<compile_context>
chip_gen: v7x
topology: tpu7x:2x2x1
jax: 0.10.0
libtpu: 0.0.40
codegen_flags: <defaults>
</compile_context>

<pallas_src>
import jax
import jax.numpy as jnp
from jax import lax
from jax.experimental import pallas as pl
from jax.experimental.pallas import tpu as pltpu


def _sigmoid1(x):
    """sigmoid(x) = 0.5*tanh(0.5*x) + 0.5 : exactly one EUP op + cheap VPU."""
    return 0.5 * jnp.tanh(0.5 * x) + 0.5


def _lstm_mlp_kernel(
    x_ref,                     # (T*B, D_in)       time-major flattened input, f32
    wih0_ref,                  # (D_in, 4*Hp)      layer-0 input->gates weights (bf16)
    wih_r_ref,                 # (L-1, Hp, 4*Hp)   layers>=1 input->gates weights (bf16)
    whh_ref,                   # (L, Hp, 4*Hp)     recurrent weights (bf16)
    b_ref,                     # (L, 1, 4*Hp)      combined bias (b_ih + b_hh), f32
    bn1_s_ref, bn1_b_ref,      # (1, Hp)           folded BatchNorm1d(hidden) scale/shift
    fc1_w_ref, fc1_b_ref,      # (Hp, 64) bf16, (1, 64) f32
    bn2_s_ref, bn2_b_ref,      # (1, 64)           folded BatchNorm1d(64) scale/shift
    fc2_w_ref, fc2_b_ref,      # (64, C) bf16, (1, C) f32
    out_ref,                   # (B, C)            softmax probabilities
    gp_a_ref,                  # scratch (T*B, 4*Hp) gate-projection buffer A
    gp_b_ref,                  # scratch (T*B, 4*Hp) gate-projection buffer B
):
    TB = x_ref.shape[0]
    B = out_ref.shape[0]
    T = TB // B
    L, Hp, _ = whh_ref.shape
    mm_dtype = whh_ref.dtype   # bf16 MXU operands, f32 accumulation

    # ---- layer 0: hoisted full-sequence input->gates projection (+ bias), one MXU tile
    gp_a_ref[...] = (
        jnp.dot(x_ref[...].astype(mm_dtype), wih0_ref[...],
                preferred_element_type=jnp.float32)
        + b_ref[0])

    gp_bufs = (gp_a_ref, gp_b_ref)
    h_last = None
    for layer in range(L):
        gp_cur = gp_bufs[layer % 2]          # gates for this layer (already includes bias)
        gp_next = gp_bufs[(layer + 1) % 2]   # written for layer+1 inside the recurrence
        last_layer = layer == L - 1

        def step(t, carry, layer=layer, gp_cur=gp_cur, gp_next=gp_next,
                 last_layer=last_layer):
            h, c = carry
            row = pl.ds(pl.multiple_of(t * B, B), B)
            # Only the recurrent h @ W_hh matmul sits on the serial critical path.
            # TODO(synk): replace with matmul_push_rhs/acc_lhs/pop to keep W_hh
            # resident in the MXU across all T steps (see header note).
            g = gp_cur[row] + jnp.dot(h.astype(mm_dtype), whh_ref[layer],
                                      preferred_element_type=jnp.float32)
            # Lane-aligned whole-vreg gate slices (width Hp, multiple of 128).
            i_g = _sigmoid1(g[:, 0 * Hp:1 * Hp])
            f_g = _sigmoid1(g[:, 1 * Hp:2 * Hp])
            g_g = jnp.tanh(g[:, 2 * Hp:3 * Hp])
            o_g = _sigmoid1(g[:, 3 * Hp:4 * Hp])
            c = f_g * c + i_g * g_g
            h = o_g * jnp.tanh(c)
            if not last_layer:
                # Next layer's input->gates projection, fused into this step.
                # Off the (h, c) dependency chain -> hidden under step slack.
                gp_next[row] = (
                    jnp.dot(h.astype(mm_dtype), wih_r_ref[layer],
                            preferred_element_type=jnp.float32)
                    + b_ref[layer + 1])
            return h, c

        h0 = jnp.zeros((B, Hp), jnp.float32)
        c0 = jnp.zeros((B, Hp), jnp.float32)
        # Cap unroll at 8 so vreg pressure / imem stay bounded for larger T.
        h_last, _ = lax.fori_loop(0, T, step, (h0, c0),
                                  unroll=True if T <= 8 else 8)
        # Inter-layer LSTM dropout (p=0.2) is identity in inference mode.

    # ---- head on the last timestep of the last layer:
    #      bn1 -> fc1 -> bn2 -> relu -> (dropout: identity) -> fc2 -> softmax
    y = h_last                                             # (B, Hp); padded lanes exactly 0
    y = y * bn1_s_ref[...] + bn1_b_ref[...]                # BatchNorm1d (eval, folded)
    y = jnp.dot(y.astype(mm_dtype), fc1_w_ref[...],
                preferred_element_type=jnp.float32) + fc1_b_ref[...]
    y = y * bn2_s_ref[...] + bn2_b_ref[...]
    y = jnp.maximum(y, 0.0)                                # ReLU
    y = jnp.dot(y.astype(mm_dtype), fc2_w_ref[...],
                preferred_element_type=jnp.float32) + fc2_b_ref[...]
    y = y - jnp.max(y, axis=1, keepdims=True)              # Softmax over dim=1
    e = jnp.exp(y)
    out_ref[...] = e / jnp.sum(e, axis=1, keepdims=True)


def _pad_gate_cols(w, H, Hp):
    """Pad each of the 4 gate blocks along the last axis from H to Hp columns.

    Invariant relied on by the kernel: padding MUST be zeros (and the initial
    (h, c) must be zeros) so padded hidden lanes stay exactly 0 every timestep.
    """
    if Hp == H:
        return w
    lead = w.shape[:-1]
    w4 = w.reshape(lead + (4, H))
    pad = [(0, 0)] * (w4.ndim - 1) + [(0, Hp - H)]
    return jnp.pad(w4, pad).reshape(lead + (4 * Hp,))


def _pad_axis(w, H, Hp, axis):
    """Zero-pad one axis from H to Hp (zeros required; see _pad_gate_cols)."""
    if Hp == H:
        return w
    pad = [(0, 0)] * w.ndim
    pad[axis] = (0, Hp - H)
    return jnp.pad(w, pad)


def lstm_model_forward(x, params, matmul_dtype=jnp.bfloat16):
    """x: (B, T, D_in) batch-first float32. Returns (B, output_size) softmax probs."""
    B, T, D = x.shape
    L, H, _ = params["whh"].shape
    C = params["fc2_w"].shape[1]
    Hp = ((H + 127) // 128) * 128      # lane-align each gate block (no-op for H=128)

    # Time-major, flattened to (T*B, D_in): the layer-0 projection for all T steps
    # becomes a single MXU matmul inside the kernel; rows for step t are
    # the sublane-aligned slice [t*B : (t+1)*B].
    x2d = jnp.transpose(x, (1, 0, 2)).reshape(T * B, D)

    # Pad gate columns (and H-sized contraction rows) to Hp; cast matmul weights
    # to the MXU operand dtype (bf16 operands, f32 accumulation).
    wih0 = _pad_gate_cols(params["wih0"], H, Hp).astype(matmul_dtype)
    wih_r = _pad_axis(_pad_gate_cols(params["wih_rest"], H, Hp), H, Hp, axis=1).astype(matmul_dtype)
    whh = _pad_axis(_pad_gate_cols(params["whh"], H, Hp), H, Hp, axis=1).astype(matmul_dtype)
    b = _pad_gate_cols(params["b"], H, Hp)
    bn1_s = _pad_axis(params["bn1_s"], H, Hp, axis=1)
    bn1_b = _pad_axis(params["bn1_b"], H, Hp, axis=1)
    fc1_w = _pad_axis(params["fc1_w"], H, Hp, axis=0).astype(matmul_dtype)
    fc2_w = params["fc2_w"].astype(matmul_dtype)

    args = (
        x2d, wih0, wih_r, whh, b,
        bn1_s, bn1_b, fc1_w, params["fc1_b"],
        params["bn2_s"], params["bn2_b"],
        fc2_w, params["fc2_b"],
    )
    vmem = pl.BlockSpec(memory_space=pltpu.MemorySpace.VMEM)
    return pl.pallas_call(
        _lstm_mlp_kernel,
        out_shape=jax.ShapeDtypeStruct((B, C), jnp.float32),
        in_specs=[vmem] * len(args),
        out_specs=vmem,
        scratch_shapes=[
            pltpu.VMEM((T * B, 4 * Hp), jnp.float32),   # gate-projection buffer A
            pltpu.VMEM((T * B, 4 * Hp), jnp.float32),   # gate-projection buffer B
        ],
        compiler_params=pltpu.CompilerParams(
            # Explicit VMEM budget (review item 4); actual footprint here ~1 MiB,
            # 32 MiB is safe on v5e/v6e/v7x alike.
            vmem_limit_bytes=32 * 1024 * 1024,
        ),
    )(*args)


def init_params(key, input_size, hidden_size, num_layers, output_size):
    """Deterministic synthetic parameters mirroring nn.LSTM / nn.Linear / BatchNorm1d."""
    H = hidden_size
    ks = list(jax.random.split(key, 13))
    u = lambda k, shape, bound: jax.random.uniform(k, shape, jnp.float32, -bound, bound)
    bf16_exact = lambda w: w.astype(jnp.bfloat16).astype(jnp.float32)
    lstm_bound = 1.0 / jnp.sqrt(H)

    # Weights stored as (in_features, 4H) so y = x @ W + b; gate order [i, f, g, o].
    # All matmul weights are pre-rounded to bf16-exact values (the kernel feeds the
    # MXU bf16 operands with f32 accumulation).
    wih0 = bf16_exact(u(ks[0], (input_size, 4 * H), lstm_bound))
    wih_rest = bf16_exact(u(ks[1], (num_layers - 1, H, 4 * H), lstm_bound))
    whh = bf16_exact(u(ks[2], (num_layers, H, 4 * H), lstm_bound))
    b_ih = u(ks[3], (num_layers, 1, 4 * H), lstm_bound)
    b_hh = u(ks[4], (num_layers, 1, 4 * H), lstm_bound)

    # BatchNorm (eval): fold (gamma, beta, running_mean, running_var, eps) into scale/shift.
    eps = 1e-5
    bn1_mean = 0.05 * jax.random.normal(ks[5], (H,), jnp.float32)
    bn1_var = jnp.ones((H,), jnp.float32) + 0.1 * jax.random.uniform(ks[6], (H,), jnp.float32)
    bn1_s = 1.0 / jnp.sqrt(bn1_var + eps)
    bn1_b = -bn1_mean * bn1_s

    bn2_mean = 0.05 * jax.random.normal(ks[7], (64,), jnp.float32)
    bn2_var = jnp.ones((64,), jnp.float32) + 0.1 * jax.random.uniform(ks[8], (64,), jnp.float32)
    bn2_s = 1.0 / jnp.sqrt(bn2_var + eps)
    bn2_b = -bn2_mean * bn2_s

    fc1_bound = 1.0 / jnp.sqrt(H)
    fc1_w = bf16_exact(u(ks[9], (H, 64), fc1_bound))
    fc1_b = u(ks[10], (1, 64), fc1_bound)
    fc2_bound = 1.0 / jnp.sqrt(64.0)
    fc2_w = bf16_exact(u(ks[11], (64, output_size), fc2_bound))
    fc2_b = u(ks[12], (1, output_size), fc2_bound)

    return dict(
        wih0=wih0, wih_rest=wih_rest, whh=whh, b=(b_ih + b_hh),
        bn1_s=bn1_s.reshape(1, H), bn1_b=bn1_b.reshape(1, H),
        fc1_w=fc1_w, fc1_b=fc1_b,
        bn2_s=bn2_s.reshape(1, 64), bn2_b=bn2_b.reshape(1, 64),
        fc2_w=fc2_w, fc2_b=fc2_b,
    )


def reference_forward(x, params):
    """Pure-JAX reference with the same inference semantics (bf16 matmul operands)."""
    B, T, _ = x.shape
    L, H, _ = params["whh"].shape
    rnd = lambda a: a.astype(jnp.bfloat16).astype(jnp.float32)  # mirror kernel's bf16 operands
    seq = x
    h = jnp.zeros((B, H), jnp.float32)
    for layer in range(L):
        wih = params["wih0"] if layer == 0 else params["wih_rest"][layer - 1]
        whh = params["whh"][layer]
        b = params["b"][layer, 0]
        h = jnp.zeros((B, H), jnp.float32)
        c = jnp.zeros((B, H), jnp.float32)
        outs = []
        for t in range(T):
            g = rnd(seq[:, t, :]) @ wih + rnd(h) @ whh + b
            i = _sigmoid1(g[:, :H])
            f = _sigmoid1(g[:, H:2 * H])
            gg = jnp.tanh(g[:, 2 * H:3 * H])
            o = _sigmoid1(g[:, 3 * H:])
            c = f * c + i * gg
            h = o * jnp.tanh(c)
            outs.append(h)
        seq = jnp.stack(outs, axis=1)
    y = h
    y = y * params["bn1_s"][0] + params["bn1_b"][0]
    y = rnd(y) @ params["fc1_w"] + params["fc1_b"][0]
    y = y * params["bn2_s"][0] + params["bn2_b"][0]
    y = jnp.maximum(y, 0.0)
    y = rnd(y) @ params["fc2_w"] + params["fc2_b"][0]
    return jax.nn.softmax(y, axis=1)


if __name__ == "__main__":
    # Module defaults: hidden_size=128, num_layers=3, output_size=2; small batch/seq/input.
    B, T, D_IN, H, L, C = 8, 8, 16, 128, 3, 2

    key = jax.random.PRNGKey(0)
    kx, kp = jax.random.split(key)
    x = jax.random.normal(kx, (B, T, D_IN), jnp.float32)
    params = init_params(kp, D_IN, H, L, C)

    fwd = jax.jit(lstm_model_forward)
    out = jax.block_until_ready(fwd(x, params))
    ref = jax.block_until_ready(reference_forward(x, params))

    assert out.shape == (B, C)
    assert bool(jnp.all(jnp.isfinite(out)))
    assert jnp.allclose(jnp.sum(out, axis=1), 1.0, atol=1e-5)
    assert jnp.allclose(out, ref, atol=2e-3, rtol=2e-3), (out, ref)
    print("KERNEL_OK")
</pallas_src>

<mosaic_0001>
module attributes {stable_mosaic.version = 11 : i64} {
  func.func @_lstm_mlp_kernel(%arg0: memref<64x16xf32, #tpu.memory_space<vmem>>, %arg1: memref<16x512xbf16, #tpu.memory_space<vmem>>, %arg2: memref<2x128x512xbf16, #tpu.memory_space<vmem>>, %arg3: memref<3x128x512xbf16, #tpu.memory_space<vmem>>, %arg4: memref<3x1x512xf32, #tpu.memory_space<vmem>>, %arg5: memref<1x128xf32, #tpu.memory_space<vmem>>, %arg6: memref<1x128xf32, #tpu.memory_space<vmem>>, %arg7: memref<128x64xbf16, #tpu.memory_space<vmem>>, %arg8: memref<1x64xf32, #tpu.memory_space<vmem>>, %arg9: memref<1x64xf32, #tpu.memory_space<vmem>>, %arg10: memref<1x64xf32, #tpu.memory_space<vmem>>, %arg11: memref<64x2xbf16, #tpu.memory_space<vmem>>, %arg12: memref<1x2xf32, #tpu.memory_space<vmem>>, %arg13: memref<8x2xf32, #tpu.memory_space<vmem>>, %arg14: memref<64x512xf32, #tpu.memory_space<vmem>>, %arg15: memref<64x512xf32, #tpu.memory_space<vmem>>) attributes {dimension_semantics = [], scalar_prefetch = 0 : i64, scratch_operands = 2 : i64, tpu.core_type = #tpu.core_type<tc>} {
    %c0 = arith.constant 0 : index
    %c0_0 = arith.constant 0 : index
    %0 = vector.load %arg0[%c0, %c0_0] : memref<64x16xf32, #tpu.memory_space<vmem>>, vector<64x16xf32>
    %1 = arith.truncf %0 : vector<64x16xf32> to vector<64x16xbf16>
    %c0_1 = arith.constant 0 : index
    %c0_2 = arith.constant 0 : index
    %2 = vector.load %arg1[%c0_1, %c0_2] : memref<16x512xbf16, #tpu.memory_space<vmem>>, vector<16x512xbf16>
    %cst = arith.constant dense<0.000000e+00> : vector<64x512xf32>
    %3 = tpu.matmul %1, %2, %cst {dimension_numbers = #tpu.dot_dimension_numbers<[1], [0], [0], [1], [0, 0, 1, 1], [], []>} : vector<64x16xbf16>, vector<16x512xbf16>, vector<64x512xf32> -> vector<64x512xf32>
    %c0_3 = arith.constant 0 : index
    %c0_4 = arith.constant 0 : index
    %c0_5 = arith.constant 0 : index
    %4 = vector.load %arg4[%c0_3, %c0_4, %c0_5] : memref<3x1x512xf32, #tpu.memory_space<vmem>>, vector<1x1x512xf32>
    %5 = vector.shape_cast %4 : vector<1x1x512xf32> to vector<1x512xf32>
    %6 = vector.broadcast %5 : vector<1x512xf32> to vector<64x512xf32>
    %7 = arith.addf %3, %6 : vector<64x512xf32>
    %c0_6 = arith.constant 0 : index
    %c0_7 = arith.constant 0 : index
    %8 = vector.load %arg14[%c0_6, %c0_7] : memref<64x512xf32, #tpu.memory_space<vmem>>, vector<64x512xf32>
    tpu.vector_store %arg14[%c0_6, %c0_7], %7 {strides = array<i32>} : memref<64x512xf32, #tpu.memory_space<vmem>>, vector<64x512xf32>,
    %cst_8 = arith.constant 0.000000e+00 : f32
    %9 = vector.broadcast %cst_8 : f32 to vector<8x128xf32>
    %cst_9 = arith.constant 0.000000e+00 : f32
    %10 = vector.broadcast %cst_9 : f32 to vector<8x128xf32>
    %c0_i32 = arith.constant 0 : i32
    %c8_i32 = arith.constant 8 : i32
    %11 = arith.muli %c0_i32, %c8_i32 : i32
    %12 = tpu.assume_multiple %11, 8 : i32
    %13 = arith.index_cast %12 : i32 to index
    %c0_10 = arith.constant 0 : index
    %14 = vector.load %arg14[%13, %c0_10] : memref<64x512xf32, #tpu.memory_space<vmem>>, vector<8x512xf32>
    %15 = arith.truncf %9 : vector<8x128xf32> to vector<8x128xbf16>
    %c0_11 = arith.constant 0 : index
    %c0_12 = arith.constant 0 : index
    %c0_13 = arith.constant 0 : index
    %16 = vector.load %arg3[%c0_11, %c0_12, %c0_13] : memref<3x128x512xbf16, #tpu.memory_space<vmem>>, vector<1x128x512xbf16>
    %17 = vector.shape_cast %16 : vector<1x128x512xbf16> to vector<128x512xbf16>
    %cst_14 = arith.constant dense<0.000000e+00> : vector<8x512xf32>
    %18 = tpu.matmul %15, %17, %cst_14 {dimension_numbers = #tpu.dot_dimension_numbers<[1], [0], [0], [1], [0, 0, 1, 1], [], []>} : vector<8x128xbf16>, vector<128x512xbf16>, vector<8x512xf32> -> vector<8x512xf32>
    %19 = arith.addf %14, %18 : vector<8x512xf32>
    %20 = vector.extract_strided_slice %19 {offsets = [0, 0], sizes = [8, 128], strides = [1, 1]} : vector<8x512xf32> to vector<8x128xf32>
    %cst_15 = arith.constant 5.000000e-01 : f32
    %21 = vector.broadcast %cst_15 : f32 to vector<8x128xf32>
    %22 = arith.mulf %21, %20 : vector<8x128xf32>
    %23 = math.tanh %22 : vector<8x128xf32>
    %cst_16 = arith.constant 5.000000e-01 : f32
    %24 = vector.broadcast %cst_16 : f32 to vector<8x128xf32>
    %25 = arith.mulf %24, %23 : vector<8x128xf32>
    %cst_17 = arith.constant 5.000000e-01 : f32
    %26 = vector.broadcast %cst_17 : f32 to vector<8x128xf32>
    %27 = arith.addf %25, %26 : vector<8x128xf32>
    %28 = vector.extract_strided_slice %19 {offsets = [0, 128], sizes = [8, 128], strides = [1, 1]} : vector<8x512xf32> to vector<8x128xf32>
    %cst_18 = arith.constant 5.000000e-01 : f32
    %29 = vector.broadcast %cst_18 : f32 to vector<8x128xf32>
    %30 = arith.mulf %29, %28 : vector<8x128xf32>
    %31 = math.tanh %30 : vector<8x128xf32>
    %cst_19 = arith.constant 5.000000e-01 : f32
    %32 = vector.broadcast %cst_19 : f32 to vector<8x128xf32>
    %33 = arith.mulf %32, %31 : vector<8x128xf32>
    %cst_20 = arith.constant 5.000000e-01 : f32
    %34 = vector.broadcast %cst_20 : f32 to vector<8x128xf32>
    %35 = arith.addf %33, %34 : vector<8x128xf32>
    %36 = vector.extract_strided_slice %19 {offsets = [0, 256], sizes = [8, 128], strides = [1, 1]} : vector<8x512xf32> to vector<8x128xf32>
    %37 = math.tanh %36 : vector<8x128xf32>
    %38 = vector.extract_strided_slice %19 {offsets = [0, 384], sizes = [8, 128], strides = [1, 1]} : vector<8x512xf32> to vector<8x128xf32>
    %cst_21 = arith.constant 5.000000e-01 : f32
    %39 = vector.broadcast %cst_21 : f32 to vector<8x128xf32>
    %40 = arith.mulf %39, %38 : vector<8x128xf32>
    %41 = math.tanh %40 : vector<8x128xf32>
    %cst_22 = arith.constant 5.000000e-01 : f32
    %42 = vector.broadcast %cst_22 : f32 to vector<8x128xf32>
    %43 = arith.mulf %42, %41 : vector<8x128xf32>
    %cst_23 = arith.constant 5.000000e-01 : f32
    %44 = vector.broadcast %cst_23 : f32 to vector<8x128xf32>
    %45 = arith.addf %43, %44 : vector<8x128xf32>
    %46 = arith.mulf %35, %10 : vector<8x128xf32>
    %47 = arith.mulf %27, %37 : vector<8x128xf32>
    %48 = arith.addf %46, %47 : vector<8x128xf32>
    %49 = math.tanh %48 : vector<8x128xf32>
    %50 = arith.mulf %45, %49 : vector<8x128xf32>
    %51 = arith.truncf %50 : vector<8x128xf32> to vector<8x128xbf16>
    %c0_24 = arith.constant 0 : index
    %c0_25 = arith.constant 0 : index
    %c0_26 = arith.constant 0 : index
    %52 = vector.load %arg2[%c0_24, %c0_25, %c0_26] : memref<2x128x512xbf16, #tpu.memory_space<vmem>>, vector<1x128x512xbf16>
    %53 = vector.shape_cast %52 : vector<1x128x512xbf16> to vector<128x512xbf16>
    %cst_27 = arith.constant dense<0.000000e+00> : vector<8x512xf32>
    %54 = tpu.matmul %51, %53, %cst_27 {dimension_numbers = #tpu.dot_dimension_numbers<[1], [0], [0], [1], [0, 0, 1, 1], [], []>} : vector<8x128xbf16>, vector<128x512xbf16>, vector<8x512xf32> -> vector<8x512xf32>
    %c1 = arith.constant 1 : index
    %c0_28 = arith.constant 0 : index
    %c0_29 = arith.constant 0 : index
    %55 = vector.load %arg4[%c1, %c0_28, %c0_29] : memref<3x1x512xf32, #tpu.memory_space<vmem>>, vector<1x1x512xf32>
    %56 = vector.shape_cast %55 : vector<1x1x512xf32> to vector<1x512xf32>
    %57 = vector.broadcast %56 : vector<1x512xf32> to vector<8x512xf32>
    %58 = arith.addf %54, %57 : vector<8x512xf32>
    %59 = arith.index_cast %12 : i32 to index
    %c0_30 = arith.constant 0 : index
    %60 = vector.load %arg15[%59, %c0_30] : memref<64x512xf32, #tpu.memory_space<vmem>>, vector<8x512xf32>
    tpu.vector_store %arg15[%59, %c0_30], %58 {strides = array<i32>} : memref<64x512xf32, #tpu.memory_space<vmem>>, vector<8x512xf32>,
    %c1_i32 = arith.constant 1 : i32
    %c8_i32_31 = arith.constant 8 : i32
    %61 = arith.muli %c1_i32, %c8_i32_31 : i32
    %62 = tpu.assume_multiple %61, 8 : i32
    %63 = arith.index_cast %62 : i32 to index
    %c0_32 = arith.constant 0 : index
    %64 = vector.load %arg14[%63, %c0_32] : memref<64x512xf32, #tpu.memory_space<vmem>>, vector<8x512xf32>
    %65 = arith.truncf %50 : vector<8x128xf32> to vector<8x128xbf16>
    %c0_33 = arith.constant 0 : index
    %c0_34 = arith.constant 0 : index
    %c0_35 = arith.constant 0 : index
    %66 = vector.load %arg3[%c0_33, %c0_34, %c0_35] : memref<3x128x512xbf16, #tpu.memory_space<vmem>>, vector<1x128x512xbf16>
    %67 = vector.shape_cast %66 : vector<1x128x512xbf16> to vector<128x512xbf16>
    %cst_36 = arith.constant dense<0.000000e+00> : vector<8x512xf32>
    %68 = tpu.matmul %65, %67, %cst_36 {dimension_numbers = #tpu.dot_dimension_numbers<[1], [0], [0], [1], [0, 0, 1, 1], [], []>} : vector<8x128xbf16>, vector<128x512xbf16>, vector<8x512xf32> -> vector<8x512xf32>
    %69 = arith.addf %64, %68 : vector<8x512xf32>
    %70 = vector.extract_strided_slice %69 {offsets = [0, 0], sizes = [8, 128], strides = [1, 1]} : vector<8x512xf32> to vector<8x128xf32>
    %cst_37 = arith.constant 5.000000e-01 : f32
    %71 = vector.broadcast %cst_37 : f32 to vector<8x128xf32>
    %72 = arith.mulf %71, %70 : vector<8x128xf32>
    %73 = math.tanh %72 : vector<8x128xf32>
    %cst_38 = arith.constant 5.000000e-01 : f32
    %74 = vector.broadcast %cst_38 : f32 to vector<8x128xf32>
    %75 = arith.mulf %74, %73 : vector<8x128xf32>
    %cst_39 = arith.constant 5.000000e-01 : f32
    %76 = vector.broadcast %cst_39 : f32 to vector<8x128xf32>
    %77 = arith.addf %75, %76 : vector<8x128xf32>
    %78 = vector.extract_strided_slice %69 {offsets = [0, 128], sizes = [8, 128], strides = [1, 1]} : vector<8x512xf32> to vector<8x128xf32>
    %cst_40 = arith.constant 5.000000e-01 : f32
    %79 = vector.broadcast %cst_40 : f32 to vector<8x128xf32>
    %80 = arith.mulf %79, %78 : vector<8x128xf32>
    %81 = math.tanh %80 : vector<8x128xf32>
    %cst_41 = arith.constant 5.000000e-01 : f32
    %82 = vector.broadcast %cst_41 : f32 to vector<8x128xf32>
    %83 = arith.mulf %82, %81 : vector<8x128xf32>
    %cst_42 = arith.constant 5.000000e-01 : f32
    %84 = vector.broadcast %cst_42 : f32 to vector<8x128xf32>
    %85 = arith.addf %83, %84 : vector<8x128xf32>
    %86 = vector.extract_strided_slice %69 {offsets = [0, 256], sizes = [8, 128], strides = [1, 1]} : vector<8x512xf32> to vector<8x128xf32>
    %87 = math.tanh %86 : vector<8x128xf32>
    %88 = vector.extract_strided_slice %69 {offsets = [0, 384], sizes = [8, 128], strides = [1, 1]} : vector<8x512xf32> to vector<8x128xf32>
    %cst_43 = arith.constant 5.000000e-01 : f32
    %89 = vector.broadcast %cst_43 : f32 to vector<8x128xf32>
    %90 = arith.mulf %89, %88 : vector<8x128xf32>
    %91 = math.tanh %90 : vector<8x128xf32>
    %cst_44 = arith.constant 5.000000e-01 : f32
    %92 = vector.broadcast %cst_44 : f32 to vector<8x128xf32>
    %93 = arith.mulf %92, %91 : vector<8x128xf32>
    %cst_45 = arith.constant 5.000000e-01 : f32
    %94 = vector.broadcast %cst_45 : f32 to vector<8x128xf32>
    %95 = arith.addf %93, %94 : vector<8x128xf32>
    %96 = arith.mulf %85, %48 : vector<8x128xf32>
    %97 = arith.mulf %77, %87 : vector<8x128xf32>
    %98 = arith.addf %96, %97 : vector<8x128xf32>
    %99 = math.tanh %98 : vector<8x128xf32>
    %100 = arith.mulf %95, %99 : vector<8x128xf32>
    %101 = arith.truncf %100 : vector<8x128xf32> to vector<8x128xbf16>
    %c0_46 = arith.constant 0 : index
    %c0_47 = arith.constant 0 : index
    %c0_48 = arith.constant 0 : index
    %102 = vector.load %arg2[%c0_46, %c0_47, %c0_48] : memref<2x128x512xbf16, #tpu.memory_space<vmem>>, vector<1x128x512xbf16>
    %103 = vector.shape_cast %102 : vector<1x128x512xbf16> to vector<128x512xbf16>
    %cst_49 = arith.constant dense<0.000000e+00> : vector<8x512xf32>
    %104 = tpu.matmul %101, %103, %cst_49 {dimension_numbers = #tpu.dot_dimension_numbers<[1], [0], [0], [1], [0, 0, 1, 1], [], []>} : vector<8x128xbf16>, vector<128x512xbf16>, vector<8x512xf32> -> vector<8x512xf32>
    %c1_50 = arith.constant 1 : index
    %c0_51 = arith.constant 0 : index
    %c0_52 = arith.constant 0 : index
    %105 = vector.load %arg4[%c1_50, %c0_51, %c0_52] : memref<3x1x512xf32, #tpu.memory_space<vmem>>, vector<1x1x512xf32>
    %106 = vector.shape_cast %105 : vector<1x1x512xf32> to vector<1x512xf32>
    %107 = vector.broadcast %106 : vector<1x512xf32> to vector<8x512xf32>
    %108 = arith.addf %104, %107 : vector<8x512xf32>
    %109 = arith.index_cast %62 : i32 to index
    %c0_53 = arith.constant 0 : index
    %110 = vector.load %arg15[%109, %c0_53] : memref<64x512xf32, #tpu.memory_space<vmem>>, vector<8x512xf32>
    tpu.vector_store %arg15[%109, %c0_53], %108 {strides = array<i32>} : memref<64x512xf32, #tpu.memory_space<vmem>>, vector<8x512xf32>,
    %c2_i32 = arith.constant 2 : i32
    %c8_i32_54 = arith.constant 8 : i32
    %111 = arith.muli %c2_i32, %c8_i32_54 : i32
    %112 = tpu.assume_multiple %111, 8 : i32
    %113 = arith.index_cast %112 : i32 to index
    %c0_55 = arith.constant 0 : index
    %114 = vector.load %arg14[%113, %c0_55] : memref<64x512xf32, #tpu.memory_space<vmem>>, vector<8x512xf32>
    %115 = arith.truncf %100 : vector<8x128xf32> to vector<8x128xbf16>
    %c0_56 = arith.constant 0 : index
    %c0_57 = arith.constant 0 : index
    %c0_58 = arith.constant 0 : index
    %116 = vector.load %arg3[%c0_56, %c0_57, %c0_58] : memref<3x128x512xbf16, #tpu.memory_space<vmem>>, vector<1x128x512xbf16>
    %117 = vector.shape_cast %116 : vector<1x128x512xbf16> to vector<128x512xbf16>
    %cst_59 = arith.constant dense<0.000000e+00> : vector<8x512xf32>
    %118 = tpu.matmul %115, %117, %cst_59 {dimension_numbers = #tpu.dot_dimension_numbers<[1], [0], [0], [1], [0, 0, 1, 1], [], []>} : vector<8x128xbf16>, vector<128x512xbf16>, vector<8x512xf32> -> vector<8x512xf32>
    %119 = arith.addf %114, %118 : vector<8x512xf32>
    %120 = vector.extract_strided_slice %119 {offsets = [0, 0], sizes = [8, 128], strides = [1, 1]} : vector<8x512xf32> to vector<8x128xf32>
    %cst_60 = arith.constant 5.000000e-01 : f32
    %121 = vector.broadcast %cst_60 : f32 to vector<8x128xf32>
    %122 = arith.mulf %121, %120 : vector<8x128xf32>
    %123 = math.tanh %122 : vector<8x128xf32>
    %cst_61 = arith.constant 5.000000e-01 : f32
    %124 = vector.broadcast %cst_61 : f32 to vector<8x128xf32>
    %125 = arith.mulf %124, %123 : vector<8x128xf32>
    %cst_62 = arith.constant 5.000000e-01 : f32
    %126 = vector.broadcast %cst_62 : f32 to vector<8x128xf32>
    %127 = arith.addf %125, %126 : vector<8x128xf32>
    %128 = vector.extract_strided_slice %119 {offsets = [0, 128], sizes = [8, 128], strides = [1, 1]} : vector<8x512xf32> to vector<8x128xf32>
    %cst_63 = arith.constant 5.000000e-01 : f32
    %129 = vector.broadcast %cst_63 : f32 to vector<8x128xf32>
    %130 = arith.mulf %129, %128 : vector<8x128xf32>
    %131 = math.tanh %130 : vector<8x128xf32>
    %cst_64 = arith.constant 5.000000e-01 : f32
    %132 = vector.broadcast %cst_64 : f32 to vector<8x128xf32>
    %133 = arith.mulf %132, %131 : vector<8x128xf32>
    %cst_65 = arith.constant 5.000000e-01 : f32
    %134 = vector.broadcast %cst_65 : f32 to vector<8x128xf32>
    %135 = arith.addf %133, %134 : vector<8x128xf32>
    %136 = vector.extract_strided_slice %119 {offsets = [0, 256], sizes = [8, 128], strides = [1, 1]} : vector<8x512xf32> to vector<8x128xf32>
    %137 = math.tanh %136 : vector<8x128xf32>
    %138 = vector.extract_strided_slice %119 {offsets = [0, 384], sizes = [8, 128], strides = [1, 1]} : vector<8x512xf32> to vector<8x128xf32>
    %cst_66 = arith.constant 5.000000e-01 : f32
    %139 = vector.broadcast %cst_66 : f32 to vector<8x128xf32>
    %140 = arith.mulf %139, %138 : vector<8x128xf32>
    %141 = math.tanh %140 : vector<8x128xf32>
    %cst_67 = arith.constant 5.000000e-01 : f32
    %142 = vector.broadcast %cst_67 : f32 to vector<8x128xf32>
    %143 = arith.mulf %142, %141 : vector<8x128xf32>
    %cst_68 = arith.constant 5.000000e-01 : f32
    %144 = vector.broadcast %cst_68 : f32 to vector<8x128xf32>
    %145 = arith.addf %143, %144 : vector<8x128xf32>
    %146 = arith.mulf %135, %98 : vector<8x128xf32>
    %147 = arith.mulf %127, %137 : vector<8x128xf32>
    %148 = arith.addf %146, %147 : vector<8x128xf32>
    %149 = math.tanh %148 : vector<8x128xf32>
    %150 = arith.mulf %145, %149 : vector<8x128xf32>
    %151 = arith.truncf %150 : vector<8x128xf32> to vector<8x128xbf16>
    %c0_69 = arith.constant 0 : index
    %c0_70 = arith.constant 0 : index
    %c0_71 = arith.constant 0 : index
    %152 = vector.load %arg2[%c0_69, %c0_70, %c0_71] : memref<2x128x512xbf16, #tpu.memory_space<vmem>>, vector<1x128x512xbf16>
    %153 = vector.shape_cast %152 : vector<1x128x512xbf16> to vector<128x512xbf16>
    %cst_72 = arith.constant dense<0.000000e+00> : vector<8x512xf32>
    %154 = tpu.matmul %151, %153, %cst_72 {dimension_numbers = #tpu.dot_dimension_numbers<[1], [0], [0], [1], [0, 0, 1, 1], [], []>} : vector<8x128xbf16>, vector<128x512xbf16>, vector<8x512xf32> -> vector<8x512xf32>
    %c1_73 = arith.constant 1 : index
    %c0_74 = arith.constant 0 : index
    %c0_75 = arith.constant 0 : index
    %155 = vector.load %arg4[%c1_73, %c0_74, %c0_75] : memref<3x1x512xf32, #tpu.memory_space<vmem>>, vector<1x1x512xf32>
    %156 = vector.shape_cast %155 : vector<1x1x512xf32> to vector<1x512xf32>
    %157 = vector.broadcast %156 : vector<1x512xf32> to vector<8x512xf32>
    %158 = arith.addf %154, %157 : vector<8x512xf32>
    %159 = arith.index_cast %112 : i32 to index
    %c0_76 = arith.constant 0 : index
    %160 = vector.load %arg15[%159, %c0_76] : memref<64x512xf32, #tpu.memory_space<vmem>>, vector<8x512xf32>
    tpu.vector_store %arg15[%159, %c0_76], %158 {strides = array<i32>} : memref<64x512xf32, #tpu.memory_space<vmem>>, vector<8x512xf32>,
    %c3_i32 = arith.constant 3 : i32
    %c8_i32_77 = arith.constant 8 : i32
    %161 = arith.muli %c3_i32, %c8_i32_77 : i32
    %162 = tpu.assume_multiple %161, 8 : i32
    %163 = arith.index_cast %162 : i32 to index
    %c0_78 = arith.constant 0 : index
    %164 = vector.load %arg14[%163, %c0_78] : memref<64x512xf32, #tpu.memory_space<vmem>>, vector<8x512xf32>
    %165 = arith.truncf %150 : vector<8x128xf32> to vector<8x128xbf16>
    %c0_79 = arith.constant 0 : index
    %c0_80 = arith.constant 0 : index
    %c0_81 = arith.constant 0 : index
    %166 = vector.load %arg3[%c0_79, %c0_80, %c0_81] : memref<3x128x512xbf16, #tpu.memory_space<vmem>>, vector<1x128x512xbf16>
    %167 = vector.shape_cast %166 : vector<1x128x512xbf16> to vector<128x512xbf16>
    %cst_82 = arith.constant dense<0.000000e+00> : vector<8x512xf32>
    %168 = tpu.matmul %165, %167, %cst_82 {dimension_numbers = #tpu.dot_dimension_numbers<[1], [0], [0], [1], [0, 0, 1, 1], [], []>} : vector<8x128xbf16>, vector<128x512xbf16>, vector<8x512xf32> -> vector<8x512xf32>
    %169 = arith.addf %164, %168 : vector<8x512xf32>
    %170 = vector.extract_strided_slice %169 {offsets = [0, 0], sizes = [8, 128], strides = [1, 1]} : vector<8x512xf32> to vector<8x128xf32>
    %cst_83 = arith.constant 5.000000e-01 : f32
    %171 = vector.broadcast %cst_83 : f32 to vector<8x128xf32>
    %172 = arith.mulf %171, %170 : vector<8x128xf32>
    %173 = math.tanh %172 : vector<8x128xf32>
    %cst_84 = arith.constant 5.000000e-01 : f32
    %174 = vector.broadcast %cst_84 : f32 to vector<8x128xf32>
    %175 = arith.mulf %174, %173 : vector<8x128xf32>
    %cst_85 = arith.constant 5.000000e-01 : f32
    %176 = vector.broadcast %cst_85 : f32 to vector<8x128xf32>
    %177 = arith.addf %175, %176 : vector<8x128xf32>
    %178 = vector.extract_strided_slice %169 {offsets = [0, 128], sizes = [8, 128], strides = [1, 1]} : vector<8x512xf32> to vector<8x128xf32>
    %cst_86 = arith.constant 5.000000e-01 : f32
    %179 = vector.broadcast %cst_86 : f32 to vector<8x128xf32>
    %180 = arith.mulf %179, %178 : vector<8x128xf32>
    %181 = math.tanh %180 : vector<8x128xf32>
    %cst_87 = arith.constant 5.000000e-01 : f32
    %182 = vector.broadcast %cst_87 : f32 to vector<8x128xf32>
    %183 = arith.mulf %182, %181 : vector<8x128xf32>
    %cst_88 = arith.constant 5.000000e-01 : f32
    %184 = vector.broadcast %cst_88 : f32 to vector<8x128xf32>
    %185 = arith.addf %183, %184 : vector<8x128xf32>
    %186 = vector.extract_strided_slice %169 {offsets = [0, 256], sizes = [8, 128], strides = [1, 1]} : vector<8x512xf32> to vector<8x128xf32>
    %187 = math.tanh %186 : vector<8x128xf32>
    %188 = vector.extract_strided_slice %169 {offsets = [0, 384], sizes = [8, 128], strides = [1, 1]} : vector<8x512xf32> to vector<8x128xf32>
    %cst_89 = arith.constant 5.000000e-01 : f32
    %189 = vector.broadcast %cst_89 : f32 to vector<8x128xf32>
    %190 = arith.mulf %189, %188 : vector<8x128xf32>
    %191 = math.tanh %190 : vector<8x128xf32>
    %cst_90 = arith.constant 5.000000e-01 : f32
    %192 = vector.broadcast %cst_90 : f32 to vector<8x128xf32>
    %193 = arith.mulf %192, %191 : vector<8x128xf32>
    %cst_91 = arith.constant 5.000000e-01 : f32
    %194 = vector.broadcast %cst_91 : f32 to vector<8x128xf32>
    %195 = arith.addf %193, %194 : vector<8x128xf32>
    %196 = arith.mulf %185, %148 : vector<8x128xf32>
    %197 = arith.mulf %177, %187 : vector<8x128xf32>
    %198 = arith.addf %196, %197 : vector<8x128xf32>
    %199 = math.tanh %198 : vector<8x128xf32>
    %200 = arith.mulf %195, %199 : vector<8x128xf32>
    %201 = arith.truncf %200 : vector<8x128xf32> to vector<8x128xbf16>
    %c0_92 = arith.constant 0 : index
    %c0_93 = arith.constant 0 : index
    %c0_94 = arith.constant 0 : index
    %202 = vector.load %arg2[%c0_92, %c0_93, %c0_94] : memref<2x128x512xbf16, #tpu.memory_space<vmem>>, vector<1x128x512xbf16>
    %203 = vector.shape_cast %202 : vector<1x128x512xbf16> to vector<128x512xbf16>
    %cst_95 = arith.constant dense<0.000000e+00> : vector<8x512xf32>
    %204 = tpu.matmul %201, %203, %cst_95 {dimension_numbers = #tpu.dot_dimension_numbers<[1], [0], [0], [1], [0, 0, 1, 1], [], []>} : vector<8x128xbf16>, vector<128x512xbf16>, vector<8x512xf32> -> vector<8x512xf32>
    %c1_96 = arith.constant 1 : index
    %c0_97 = arith.constant 0 : index
    %c0_98 = arith.constant 0 : index
    %205 = vector.load %arg4[%c1_96, %c0_97, %c0_98] : memref<3x1x512xf32, #tpu.memory_space<vmem>>, vector<1x1x512xf32>
    %206 = vector.shape_cast %205 : vector<1x1x512xf32> to vector<1x512xf32>
    %207 = vector.broadcast %206 : vector<1x512xf32> to vector<8x512xf32>
    %208 = arith.addf %204, %207 : vector<8x512xf32>
    %209 = arith.index_cast %162 : i32 to index
    %c0_99 = arith.constant 0 : index
    %210 = vector.load %arg15[%209, %c0_99] : memref<64x512xf32, #tpu.memory_space<vmem>>, vector<8x512xf32>
    tpu.vector_store %arg15[%209, %c0_99], %208 {strides = array<i32>} : memref<64x512xf32, #tpu.memory_space<vmem>>, vector<8x512xf32>,
    %c4_i32 = arith.constant 4 : i32
    %c8_i32_100 = arith.constant 8 : i32
    %211 = arith.muli %c4_i32, %c8_i32_100 : i32
    %212 = tpu.assume_multiple %211, 8 : i32
    %213 = arith.index_cast %212 : i32 to index
    %c0_101 = arith.constant 0 : index
    %214 = vector.load %arg14[%213, %c0_101] : memref<64x512xf32, #tpu.memory_space<vmem>>, vector<8x512xf32>
    %215 = arith.truncf %200 : vector<8x128xf32> to vector<8x128xbf16>
    %c0_102 = arith.constant 0 : index
    %c0_103 = arith.constant 0 : index
    %c0_104 = arith.constant 0 : index
    %216 = vector.load %arg3[%c0_102, %c0_103, %c0_104] : memref<3x128x512xbf16, #tpu.memory_space<vmem>>, vector<1x128x512xbf16>
    %217 = vector.shape_cast %216 : vector<1x128x512xbf16> to vector<128x512xbf16>
    %cst_105 = arith.constant dense<0.000000e+00> : vector<8x512xf32>
    %218 = tpu.matmul %215, %217, %cst_105 {dimension_numbers = #tpu.dot_dimension_numbers<[1], [0], [0], [1], [0, 0, 1, 1], [], []>} : vector<8x128xbf16>, vector<128x512xbf16>, vector<8x512xf32> -> vector<8x512xf32>
    %219 = arith.addf %214, %218 : vector<8x512xf32>
    %220 = vector.extract_strided_slice %219 {offsets = [0, 0], sizes = [8, 128], strides = [1, 1]} : vector<8x512xf32> to vector<8x128xf32>
    %cst_106 = arith.constant 5.000000e-01 : f32
    %221 = vector.broadcast %cst_106 : f32 to vector<8x128xf32>
    %222 = arith.mulf %221, %220 : vector<8x128xf32>
    %223 = math.tanh %222 : vector<8x128xf32>
    %cst_107 = arith.constant 5.000000e-01 : f32
    %224 = vector.broadcast %cst_107 : f32 to vector<8x128xf32>
    %225 = arith.mulf %224, %223 : vector<8x128xf32>
    %cst_108 = arith.constant 5.000000e-01 : f32
    %226 = vector.broadcast %cst_108 : f32 to vector<8x128xf32>
    %227 = arith.addf %225, %226 : vector<8x128xf32>
    %228 = vector.extract_strided_slice %219 {offsets = [0, 128], sizes = [8, 128], strides = [1, 1]} : vector<8x512xf32> to vector<8x128xf32>
    %cst_109 = arith.constant 5.000000e-01 : f32
    %229 = vector.broadcast %cst_109 : f32 to vector<8x128xf32>
    %230 = arith.mulf %229, %228 : vector<8x128xf32>
    %231 = math.tanh %230 : vector<8x128xf32>
    %cst_110 = arith.constant 5.000000e-01 : f32
    %232 = vector.broadcast %cst_110 : f32 to vector<8x128xf32>
    %233 = arith.mulf %232, %231 : vector<8x128xf32>
    %cst_111 = arith.constant 5.000000e-01 : f32
    %234 = vector.broadcast %cst_111 : f32 to vector<8x128xf32>
    %235 = arith.addf %233, %234 : vector<8x128xf32>
    %236 = vector.extract_strided_slice %219 {offsets = [0, 256], sizes = [8, 128], strides = [1, 1]} : vector<8x512xf32> to vector<8x128xf32>
    %237 = math.tanh %236 : vector<8x128xf32>
    %238 = vector.extract_strided_slice %219 {offsets = [0, 384], sizes = [8, 128], strides = [1, 1]} : vector<8x512xf32> to vector<8x128xf32>
    %cst_112 = arith.constant 5.000000e-01 : f32
    %239 = vector.broadcast %cst_112 : f32 to vector<8x128xf32>
    %240 = arith.mulf %239, %238 : vector<8x128xf32>
    %241 = math.tanh %240 : vector<8x128xf32>
    %cst_113 = arith.constant 5.000000e-01 : f32
    %242 = vector.broadcast %cst_113 : f32 to vector<8x128xf32>
    %243 = arith.mulf %242, %241 : vector<8x128xf32>
    %cst_114 = arith.constant 5.000000e-01 : f32
    %244 = vector.broadcast %cst_114 : f32 to vector<8x128xf32>
    %245 = arith.addf %243, %244 : vector<8x128xf32>
    %246 = arith.mulf %235, %198 : vector<8x128xf32>
    %247 = arith.mulf %227, %237 : vector<8x128xf32>
    %248 = arith.addf %246, %247 : vector<8x128xf32>
    %249 = math.tanh %248 : vector<8x128xf32>
    %250 = arith.mulf %245, %249 : vector<8x128xf32>
    %251 = arith.truncf %250 : vector<8x128xf32> to vector<8x128xbf16>
    %c0_115 = arith.constant 0 : index
    %c0_116 = arith.constant 0 : index
    %c0_117 = arith.constant 0 : index
    %252 = vector.load %arg2[%c0_115, %c0_116, %c0_117] : memref<2x128x512xbf16, #tpu.memory_space<vmem>>, vector<1x128x512xbf16>
    %253 = vector.shape_cast %252 : vector<1x128x512xbf16> to vector<128x512xbf16>
    %cst_118 = arith.constant dense<0.000000e+00> : vector<8x512xf32>
    %254 = tpu.matmul %251, %253, %cst_118 {dimension_numbers = #tpu.dot_dimension_numbers<[1], [0], [0], [1], [0, 0, 1, 1], [], []>} : vector<8x128xbf16>, vector<128x512xbf16>, vector<8x512xf32> -> vector<8x512xf32>
    %c1_119 = arith.constant 1 : index
    %c0_120 = arith.constant 0 : index
    %c0_121 = arith.constant 0 : index
    %255 = vector.load %arg4[%c1_119, %c0_120, %c0_121] : memref<3x1x512xf32, #tpu.memory_space<vmem>>, vector<1x1x512xf32>
    %256 = vector.shape_cast %255 : vector<1x1x512xf32> to vector<1x512xf32>
    %257 = vector.broadcast %256 : vector<1x512xf32> to vector<8x512xf32>
    %258 = arith.addf %254, %257 : vector<8x512xf32>
    %259 = arith.index_cast %212 : i32 to index
    %c0_122 = arith.constant 0 : index
    %260 = vector.load %arg15[%259, %c0_122] : memref<64x512xf32, #tpu.memory_space<vmem>>, vector<8x512xf32>
    tpu.vector_store %arg15[%259, %c0_122], %258 {strides = array<i32>} : memref<64x512xf32, #tpu.memory_space<vmem>>, vector<8x512xf32>,
    %c5_i32 = arith.constant 5 : i32
    %c8_i32_123 = arith.constant 8 : i32
    %261 = arith.muli %c5_i32, %c8_i32_123 : i32
    %262 = tpu.assume_multiple %261, 8 : i32
    %263 = arith.index_cast %262 : i32 to index
    %c0_124 = arith.constant 0 : index
    %264 = vector.load %arg14[%263, %c0_124] : memref<64x512xf32, #tpu.memory_space<vmem>>, vector<8x512xf32>
    %265 = arith.truncf %250 : vector<8x128xf32> to vector<8x128xbf16>
    %c0_125 = arith.constant 0 : index
    %c0_126 = arith.constant 0 : index
    %c0_127 = arith.constant 0 : index
    %266 = vector.load %arg3[%c0_125, %c0_126, %c0_127] : memref<3x128x512xbf16, #tpu.memory_space<vmem>>, vector<1x128x512xbf16>
    %267 = vector.shape_cast %266 : vector<1x128x512xbf16> to vector<128x512xbf16>
    %cst_128 = arith.constant dense<0.000000e+00> : vector<8x512xf32>
    %268 = tpu.matmul %265, %267, %cst_128 {dimension_numbers = #tpu.dot_dimension_numbers<[1], [0], [0], [1], [0, 0, 1, 1], [], []>} : vector<8x128xbf16>, vector<128x512xbf16>, vector<8x512xf32> -> vector<8x512xf32>
    %269 = arith.addf %264, %268 : vector<8x512xf32>
    %270 = vector.extract_strided_slice %269 {offsets = [0, 0], sizes = [8, 128], strides = [1, 1]} : vector<8x512xf32> to vector<8x128xf32>
    %cst_129 = arith.constant 5.000000e-01 : f32
    %271 = vector.broadcast %cst_129 : f32 to vector<8x128xf32>
    %272 = arith.mulf %271, %270 : vector<8x128xf32>
    %273 = math.tanh %272 : vector<8x128xf32>
    %cst_130 = arith.constant 5.000000e-01 : f32
    %274 = vector.broadcast %cst_130 : f32 to vector<8x128xf32>
    %275 = arith.mulf %274, %273 : vector<8x128xf32>
    %cst_131 = arith.constant 5.000000e-01 : f32
    %276 = vector.broadcast %cst_131 : f32 to vector<8x128xf32>
    %277 = arith.addf %275, %276 : vector<8x128xf32>
    %278 = vector.extract_strided_slice %269 {offsets = [0, 128], sizes = [8, 128], strides = [1, 1]} : vector<8x512xf32> to vector<8x128xf32>
    %cst_132 = arith.constant 5.000000e-01 : f32
    %279 = vector.broadcast %cst_132 : f32 to vector<8x128xf32>
    %280 = arith.mulf %279, %278 : vector<8x128xf32>
    %281 = math.tanh %280 : vector<8x128xf32>
    %cst_133 = arith.constant 5.000000e-01 : f32
    %282 = vector.broadcast %cst_133 : f32 to vector<8x128xf32>
    %283 = arith.mulf %282, %281 : vector<8x128xf32>
    %cst_134 = arith.constant 5.000000e-01 : f32
    %284 = vector.broadcast %cst_134 : f32 to vector<8x128xf32>
    %285 = arith.addf %283, %284 : vector<8x128xf32>
    %286 = vector.extract_strided_slice %269 {offsets = [0, 256], sizes = [8, 128], strides = [1, 1]} : vector<8x512xf32> to vector<8x128xf32>
    %287 = math.tanh %286 : vector<8x128xf32>
    %288 = vector.extract_strided_slice %269 {offsets = [0, 384], sizes = [8, 128], strides = [1, 1]} : vector<8x512xf32> to vector<8x128xf32>
    %cst_135 = arith.constant 5.000000e-01 : f32
    %289 = vector.broadcast %cst_135 : f32 to vector<8x128xf32>
    %290 = arith.mulf %289, %288 : vector<8x128xf32>
    %291 = math.tanh %290 : vector<8x128xf32>
    %cst_136 = arith.constant 5.000000e-01 : f32
    %292 = vector.broadcast %cst_136 : f32 to vector<8x128xf32>
    %293 = arith.mulf %292, %291 : vector<8x128xf32>
    %cst_137 = arith.constant 5.000000e-01 : f32
    %294 = vector.broadcast %cst_137 : f32 to vector<8x128xf32>
    %295 = arith.addf %293, %294 : vector<8x128xf32>
    %296 = arith.mulf %285, %248 : vector<8x128xf32>
    %297 = arith.mulf %277, %287 : vector<8x128xf32>
    %298 = arith.addf %296, %297 : vector<8x128xf32>
    %299 = math.tanh %298 : vector<8x128xf32>
    %300 = arith.mulf %295, %299 : vector<8x128xf32>
    %301 = arith.truncf %300 : vector<8x128xf32> to vector<8x128xbf16>
    %c0_138 = arith.constant 0 : index
    %c0_139 = arith.constant 0 : index
    %c0_140 = arith.constant 0 : index
    %302 = vector.load %arg2[%c0_138, %c0_139, %c0_140] : memref<2x128x512xbf16, #tpu.memory_space<vmem>>, vector<1x128x512xbf16>
    %303 = vector.shape_cast %302 : vector<1x128x512xbf16> to vector<128x512xbf16>
    %cst_141 = arith.constant dense<0.000000e+00> : vector<8x512xf32>
    %304 = tpu.matmul %301, %303, %cst_141 {dimension_numbers = #tpu.dot_dimension_numbers<[1], [0], [0], [1], [0, 0, 1, 1], [], []>} : vector<8x128xbf16>, vector<128x512xbf16>, vector<8x512xf32> -> vector<8x512xf32>
    %c1_142 = arith.constant 1 : index
    %c0_143 = arith.constant 0 : index
    %c0_144 = arith.constant 0 : index
    %305 = vector.load %arg4[%c1_142, %c0_143, %c0_144] : memref<3x1x512xf32, #tpu.memory_space<vmem>>, vector<1x1x512xf32>
    %306 = vector.shape_cast %305 : vector<1x1x512xf32> to vector<1x512xf32>
    %307 = vector.broadcast %306 : vector<1x512xf32> to vector<8x512xf32>
    %308 = arith.addf %304, %307 : vector<8x512xf32>
    %309 = arith.index_cast %262 : i32 to index
    %c0_145 = arith.constant 0 : index
    %310 = vector.load %arg15[%309, %c0_145] : memref<64x512xf32, #tpu.memory_space<vmem>>, vector<8x512xf32>
    tpu.vector_store %arg15[%309, %c0_145], %308 {strides = array<i32>} : memref<64x512xf32, #tpu.memory_space<vmem>>, vector<8x512xf32>,
    %c6_i32 = arith.constant 6 : i32
    %c8_i32_146 = arith.constant 8 : i32
    %311 = arith.muli %c6_i32, %c8_i32_146 : i32
    %312 = tpu.assume_multiple %311, 8 : i32
    %313 = arith.index_cast %312 : i32 to index
    %c0_147 = arith.constant 0 : index
    %314 = vector.load %arg14[%313, %c0_147] : memref<64x512xf32, #tpu.memory_space<vmem>>, vector<8x512xf32>
    %315 = arith.truncf %300 : vector<8x128xf32> to vector<8x128xbf16>
    %c0_148 = arith.constant 0 : index
    %c0_149 = arith.constant 0 : index
    %c0_150 = arith.constant 0 : index
    %316 = vector.load %arg3[%c0_148, %c0_149, %c0_150] : memref<3x128x512xbf16, #tpu.memory_space<vmem>>, vector<1x128x512xbf16>
    %317 = vector.shape_cast %316 : vector<1x128x512xbf16> to vector<128x512xbf16>
    %cst_151 = arith.constant dense<0.000000e+00> : vector<8x512xf32>
    %318 = tpu.matmul %315, %317, %cst_151 {dimension_numbers = #tpu.dot_dimension_numbers<[1], [0], [0], [1], [0, 0, 1, 1], [], []>} : vector<8x128xbf16>, vector<128x512xbf16>, vector<8x512xf32> -> vector<8x512xf32>
    %319 = arith.addf %314, %318 : vector<8x512xf32>
    %320 = vector.extract_strided_slice %319 {offsets = [0, 0], sizes = [8, 128], strides = [1, 1]} : vector<8x512xf32> to vector<8x128xf32>
    %cst_152 = arith.constant 5.000000e-01 : f32
    %321 = vector.broadcast %cst_152 : f32 to vector<8x128xf32>
    %322 = arith.mulf %321, %320 : vector<8x128xf32>
    %323 = math.tanh %322 : vector<8x128xf32>
    %cst_153 = arith.constant 5.000000e-01 : f32
    %324 = vector.broadcast %cst_153 : f32 to vector<8x128xf32>
    %325 = arith.mulf %324, %323 : vector<8x128xf32>
    %cst_154 = arith.constant 5.000000e-01 : f32
    %326 = vector.broadcast %cst_154 : f32 to vector<8x128xf32>
    %327 = arith.addf %325, %326 : vector<8x128xf32>
    %328 = vector.extract_strided_slice %319 {offsets = [0, 128], sizes = [8, 128], strides = [1, 1]} : vector<8x512xf32> to vector<8x128xf32>
    %cst_155 = arith.constant 5.000000e-01 : f32
    %329 = vector.broadcast %cst_155 : f32 to vector<8x128xf32>
    %330 = arith.mulf %329, %328 : vector<8x128xf32>
    %331 = math.tanh %330 : vector<8x128xf32>
    %cst_156 = arith.constant 5.000000e-01 : f32
    %332 = vector.broadcast %cst_156 : f32 to vector<8x128xf32>
    %333 = arith.mulf %332, %331 : vector<8x128xf32>
    %cst_157 = arith.constant 5.000000e-01 : f32
    %334 = vector.broadcast %cst_157 : f32 to vector<8x128xf32>
    %335 = arith.addf %333, %334 : vector<8x128xf32>
    %336 = vector.extract_strided_slice %319 {offsets = [0, 256], sizes = [8, 128], strides = [1, 1]} : vector<8x512xf32> to vector<8x128xf32>
    %337 = math.tanh %336 : vector<8x128xf32>
    %338 = vector.extract_strided_slice %319 {offsets = [0, 384], sizes = [8, 128], strides = [1, 1]} : vector<8x512xf32> to vector<8x128xf32>
    %cst_158 = arith.constant 5.000000e-01 : f32
    %339 = vector.broadcast %cst_158 : f32 to vector<8x128xf32>
    %340 = arith.mulf %339, %338 : vector<8x128xf32>
    %341 = math.tanh %340 : vector<8x128xf32>
    %cst_159 = arith.constant 5.000000e-01 : f32
    %342 = vector.broadcast %cst_159 : f32 to vector<8x128xf32>
    %343 = arith.mulf %342, %341 : vector<8x128xf32>
    %cst_160 = arith.constant 5.000000e-01 : f32
    %344 = vector.broadcast %cst_160 : f32 to vector<8x128xf32>
    %345 = arith.addf %343, %344 : vector<8x128xf32>
    %346 = arith.mulf %335, %298 : vector<8x128xf32>
    %347 = arith.mulf %327, %337 : vector<8x128xf32>
    %348 = arith.addf %346, %347 : vector<8x128xf32>
    %349 = math.tanh %348 : vector<8x128xf32>
    %350 = arith.mulf %345, %349 : vector<8x128xf32>
    %351 = arith.truncf %350 : vector<8x128xf32> to vector<8x128xbf16>
    %c0_161 = arith.constant 0 : index
    %c0_162 = arith.constant 0 : index
    %c0_163 = arith.constant 0 : index
    %352 = vector.load %arg2[%c0_161, %c0_162, %c0_163] : memref<2x128x512xbf16, #tpu.memory_space<vmem>>, vector<1x128x512xbf16>
    %353 = vector.shape_cast %352 : vector<1x128x512xbf16> to vector<128x512xbf16>
    %cst_164 = arith.constant dense<0.000000e+00> : vector<8x512xf32>
    %354 = tpu.matmul %351, %353, %cst_164 {dimension_numbers = #tpu.dot_dimension_numbers<[1], [0], [0], [1], [0, 0, 1, 1], [], []>} : vector<8x128xbf16>, vector<128x512xbf16>, vector<8x512xf32> -> vector<8x512xf32>
    %c1_165 = arith.constant 1 : index
    %c0_166 = arith.constant 0 : index
    %c0_167 = arith.constant 0 : index
    %355 = vector.load %arg4[%c1_165, %c0_166, %c0_167] : memref<3x1x512xf32, #tpu.memory_space<vmem>>, vector<1x1x512xf32>
    %356 = vector.shape_cast %355 : vector<1x1x512xf32> to vector<1x512xf32>
    %357 = vector.broadcast %356 : vector<1x512xf32> to vector<8x512xf32>
    %358 = arith.addf %354, %357 : vector<8x512xf32>
    %359 = arith.index_cast %312 : i32 to index
    %c0_168 = arith.constant 0 : index
    %360 = vector.load %arg15[%359, %c0_168] : memref<64x512xf32, #tpu.memory_space<vmem>>, vector<8x512xf32>
    tpu.vector_store %arg15[%359, %c0_168], %358 {strides = array<i32>} : memref<64x512xf32, #tpu.memory_space<vmem>>, vector<8x512xf32>,
    %c7_i32 = arith.constant 7 : i32
    %c8_i32_169 = arith.constant 8 : i32
    %361 = arith.muli %c7_i32, %c8_i32_169 : i32
    %362 = tpu.assume_multiple %361, 8 : i32
    %363 = arith.index_cast %362 : i32 to index
    %c0_170 = arith.constant 0 : index
    %364 = vector.load %arg14[%363, %c0_170] : memref<64x512xf32, #tpu.memory_space<vmem>>, vector<8x512xf32>
    %365 = arith.truncf %350 : vector<8x128xf32> to vector<8x128xbf16>
    %c0_171 = arith.constant 0 : index
    %c0_172 = arith.constant 0 : index
    %c0_173 = arith.constant 0 : index
    %366 = vector.load %arg3[%c0_171, %c0_172, %c0_173] : memref<3x128x512xbf16, #tpu.memory_space<vmem>>, vector<1x128x512xbf16>
    %367 = vector.shape_cast %366 : vector<1x128x512xbf16> to vector<128x512xbf16>
    %cst_174 = arith.constant dense<0.000000e+00> : vector<8x512xf32>
    %368 = tpu.matmul %365, %367, %cst_174 {dimension_numbers = #tpu.dot_dimension_numbers<[1], [0], [0], [1], [0, 0, 1, 1], [], []>} : vector<8x128xbf16>, vector<128x512xbf16>, vector<8x512xf32> -> vector<8x512xf32>
    %369 = arith.addf %364, %368 : vector<8x512xf32>
    %370 = vector.extract_strided_slice %369 {offsets = [0, 0], sizes = [8, 128], strides = [1, 1]} : vector<8x512xf32> to vector<8x128xf32>
    %cst_175 = arith.constant 5.000000e-01 : f32
    %371 = vector.broadcast %cst_175 : f32 to vector<8x128xf32>
    %372 = arith.mulf %371, %370 : vector<8x128xf32>
    %373 = math.tanh %372 : vector<8x128xf32>
    %cst_176 = arith.constant 5.000000e-01 : f32
    %374 = vector.broadcast %cst_176 : f32 to vector<8x128xf32>
    %375 = arith.mulf %374, %373 : vector<8x128xf32>
    %cst_177 = arith.constant 5.000000e-01 : f32
    %376 = vector.broadcast %cst_177 : f32 to vector<8x128xf32>
    %377 = arith.addf %375, %376 : vector<8x128xf32>
    %378 = vector.extract_strided_slice %369 {offsets = [0, 128], sizes = [8, 128], strides = [1, 1]} : vector<8x512xf32> to vector<8x128xf32>
    %cst_178 = arith.constant 5.000000e-01 : f32
    %379 = vector.broadcast %cst_178 : f32 to vector<8x128xf32>
    %380 = arith.mulf %379, %378 : vector<8x128xf32>
    %381 = math.tanh %380 : vector<8x128xf32>
    %cst_179 = arith.constant 5.000000e-01 : f32
    %382 = vector.broadcast %cst_179 : f32 to vector<8x128xf32>
    %383 = arith.mulf %382, %381 : vector<8x128xf32>
    %cst_180 = arith.constant 5.000000e-01 : f32
    %384 = vector.broadcast %cst_180 : f32 to vector<8x128xf32>
    %385 = arith.addf %383, %384 : vector<8x128xf32>
    %386 = vector.extract_strided_slice %369 {offsets = [0, 256], sizes = [8, 128], strides = [1, 1]} : vector<8x512xf32> to vector<8x128xf32>
    %387 = math.tanh %386 : vector<8x128xf32>
    %388 = vector.extract_strided_slice %369 {offsets = [0, 384], sizes = [8, 128], strides = [1, 1]} : vector<8x512xf32> to vector<8x128xf32>
    %cst_181 = arith.constant 5.000000e-01 : f32
    %389 = vector.broadcast %cst_181 : f32 to vector<8x128xf32>
    %390 = arith.mulf %389, %388 : vector<8x128xf32>
    %391 = math.tanh %390 : vector<8x128xf32>
    %cst_182 = arith.constant 5.000000e-01 : f32
    %392 = vector.broadcast %cst_182 : f32 to vector<8x128xf32>
    %393 = arith.mulf %392, %391 : vector<8x128xf32>
    %cst_183 = arith.constant 5.000000e-01 : f32
    %394 = vector.broadcast %cst_183 : f32 to vector<8x128xf32>
    %395 = arith.addf %393, %394 : vector<8x128xf32>
    %396 = arith.mulf %385, %348 : vector<8x128xf32>
    %397 = arith.mulf %377, %387 : vector<8x128xf32>
    %398 = arith.addf %396, %397 : vector<8x128xf32>
    %399 = math.tanh %398 : vector<8x128xf32>
    %400 = arith.mulf %395, %399 : vector<8x128xf32>
    %401 = arith.truncf %400 : vector<8x128xf32> to vector<8x128xbf16>
    %c0_184 = arith.constant 0 : index
    %c0_185 = arith.constant 0 : index
    %c0_186 = arith.constant 0 : index
    %402 = vector.load %arg2[%c0_184, %c0_185, %c0_186] : memref<2x128x512xbf16, #tpu.memory_space<vmem>>, vector<1x128x512xbf16>
    %403 = vector.shape_cast %402 : vector<1x128x512xbf16> to vector<128x512xbf16>
    %cst_187 = arith.constant dense<0.000000e+00> : vector<8x512xf32>
    %404 = tpu.matmul %401, %403, %cst_187 {dimension_numbers = #tpu.dot_dimension_numbers<[1], [0], [0], [1], [0, 0, 1, 1], [], []>} : vector<8x128xbf16>, vector<128x512xbf16>, vector<8x512xf32> -> vector<8x512xf32>
    %c1_188 = arith.constant 1 : index
    %c0_189 = arith.constant 0 : index
    %c0_190 = arith.constant 0 : index
    %405 = vector.load %arg4[%c1_188, %c0_189, %c0_190] : memref<3x1x512xf32, #tpu.memory_space<vmem>>, vector<1x1x512xf32>
    %406 = vector.shape_cast %405 : vector<1x1x512xf32> to vector<1x512xf32>
    %407 = vector.broadcast %406 : vector<1x512xf32> to vector<8x512xf32>
    %408 = arith.addf %404, %407 : vector<8x512xf32>
    %409 = arith.index_cast %362 : i32 to index
    %c0_191 = arith.constant 0 : index
    %410 = vector.load %arg15[%409, %c0_191] : memref<64x512xf32, #tpu.memory_space<vmem>>, vector<8x512xf32>
    tpu.vector_store %arg15[%409, %c0_191], %408 {strides = array<i32>} : memref<64x512xf32, #tpu.memory_space<vmem>>, vector<8x512xf32>,
    %c8_i32_192 = arith.constant 8 : i32
    %cst_193 = arith.constant 0.000000e+00 : f32
    %411 = vector.broadcast %cst_193 : f32 to vector<8x128xf32>
    %cst_194 = arith.constant 0.000000e+00 : f32
    %412 = vector.broadcast %cst_194 : f32 to vector<8x128xf32>
    %c0_i32_195 = arith.constant 0 : i32
    %c8_i32_196 = arith.constant 8 : i32
    %413 = arith.muli %c0_i32_195, %c8_i32_196 : i32
    %414 = tpu.assume_multiple %413, 8 : i32
    %415 = arith.index_cast %414 : i32 to index
    %c0_197 = arith.constant 0 : index
    %416 = vector.load %arg15[%415, %c0_197] : memref<64x512xf32, #tpu.memory_space<vmem>>, vector<8x512xf32>
    %417 = arith.truncf %411 : vector<8x128xf32> to vector<8x128xbf16>
    %c1_198 = arith.constant 1 : index
    %c0_199 = arith.constant 0 : index
    %c0_200 = arith.constant 0 : index
    %418 = vector.load %arg3[%c1_198, %c0_199, %c0_200] : memref<3x128x512xbf16, #tpu.memory_space<vmem>>, vector<1x128x512xbf16>
    %419 = vector.shape_cast %418 : vector<1x128x512xbf16> to vector<128x512xbf16>
    %cst_201 = arith.constant dense<0.000000e+00> : vector<8x512xf32>
    %420 = tpu.matmul %417, %419, %cst_201 {dimension_numbers = #tpu.dot_dimension_numbers<[1], [0], [0], [1], [0, 0, 1, 1], [], []>} : vector<8x128xbf16>, vector<128x512xbf16>, vector<8x512xf32> -> vector<8x512xf32>
    %421 = arith.addf %416, %420 : vector<8x512xf32>
    %422 = vector.extract_strided_slice %421 {offsets = [0, 0], sizes = [8, 128], strides = [1, 1]} : vector<8x512xf32> to vector<8x128xf32>
    %cst_202 = arith.constant 5.000000e-01 : f32
    %423 = vector.broadcast %cst_202 : f32 to vector<8x128xf32>
    %424 = arith.mulf %423, %422 : vector<8x128xf32>
    %425 = math.tanh %424 : vector<8x128xf32>
    %cst_203 = arith.constant 5.000000e-01 : f32
    %426 = vector.broadcast %cst_203 : f32 to vector<8x128xf32>
    %427 = arith.mulf %426, %425 : vector<8x128xf32>
    %cst_204 = arith.constant 5.000000e-01 : f32
    %428 = vector.broadcast %cst_204 : f32 to vector<8x128xf32>
    %429 = arith.addf %427, %428 : vector<8x128xf32>
    %430 = vector.extract_strided_slice %421 {offsets = [0, 128], sizes = [8, 128], strides = [1, 1]} : vector<8x512xf32> to vector<8x128xf32>
    %cst_205 = arith.constant 5.000000e-01 : f32
    %431 = vector.broadcast %cst_205 : f32 to vector<8x128xf32>
    %432 = arith.mulf %431, %430 : vector<8x128xf32>
    %433 = math.tanh %432 : vector<8x128xf32>
    %cst_206 = arith.constant 5.000000e-01 : f32
    %434 = vector.broadcast %cst_206 : f32 to vector<8x128xf32>
    %435 = arith.mulf %434, %433 : vector<8x128xf32>
    %cst_207 = arith.constant 5.000000e-01 : f32
    %436 = vector.broadcast %cst_207 : f32 to vector<8x128xf32>
    %437 = arith.addf %435, %436 : vector<8x128xf32>
    %438 = vector.extract_strided_slice %421 {offsets = [0, 256], sizes = [8, 128], strides = [1, 1]} : vector<8x512xf32> to vector<8x128xf32>
    %439 = math.tanh %438 : vector<8x128xf32>
    %440 = vector.extract_strided_slice %421 {offsets = [0, 384], sizes = [8, 128], strides = [1, 1]} : vector<8x512xf32> to vector<8x128xf32>
    %cst_208 = arith.constant 5.000000e-01 : f32
    %441 = vector.broadcast %cst_208 : f32 to vector<8x128xf32>
    %442 = arith.mulf %441, %440 : vector<8x128xf32>
    %443 = math.tanh %442 : vector<8x128xf32>
    %cst_209 = arith.constant 5.000000e-01 : f32
    %444 = vector.broadcast %cst_209 : f32 to vector<8x128xf32>
    %445 = arith.mulf %444, %443 : vector<8x128xf32>
    %cst_210 = arith.constant 5.000000e-01 : f32
    %446 = vector.broadcast %cst_210 : f32 to vector<8x128xf32>
    %447 = arith.addf %445, %446 : vector<8x128xf32>
    %448 = arith.mulf %437, %412 : vector<8x128xf32>
    %449 = arith.mulf %429, %439 : vector<8x128xf32>
    %450 = arith.addf %448, %449 : vector<8x128xf32>
    %451 = math.tanh %450 : vector<8x128xf32>
    %452 = arith.mulf %447, %451 : vector<8x128xf32>
    %453 = arith.truncf %452 : vector<8x128xf32> to vector<8x128xbf16>
    %c1_211 = arith.constant 1 : index
    %c0_212 = arith.constant 0 : index
    %c0_213 = arith.constant 0 : index
    %454 = vector.load %arg2[%c1_211, %c0_212, %c0_213] : memref<2x128x512xbf16, #tpu.memory_space<vmem>>, vector<1x128x512xbf16>
    %455 = vector.shape_cast %454 : vector<1x128x512xbf16> to vector<128x512xbf16>
    %cst_214 = arith.constant dense<0.000000e+00> : vector<8x512xf32>
    %456 = tpu.matmul %453, %455, %cst_214 {dimension_numbers = #tpu.dot_dimension_numbers<[1], [0], [0], [1], [0, 0, 1, 1], [], []>} : vector<8x128xbf16>, vector<128x512xbf16>, vector<8x512xf32> -> vector<8x512xf32>
    %c2 = arith.constant 2 : index
    %c0_215 = arith.constant 0 : index
    %c0_216 = arith.constant 0 : index
    %457 = vector.load %arg4[%c2, %c0_215, %c0_216] : memref<3x1x512xf32, #tpu.memory_space<vmem>>, vector<1x1x512xf32>
    %458 = vector.shape_cast %457 : vector<1x1x512xf32> to vector<1x512xf32>
    %459 = vector.broadcast %458 : vector<1x512xf32> to vector<8x512xf32>
    %460 = arith.addf %456, %459 : vector<8x512xf32>
    %461 = arith.index_cast %414 : i32 to index
    %c0_217 = arith.constant 0 : index
    %462 = vector.load %arg14[%461, %c0_217] : memref<64x512xf32, #tpu.memory_space<vmem>>, vector<8x512xf32>
    tpu.vector_store %arg14[%461, %c0_217], %460 {strides = array<i32>} : memref<64x512xf32, #tpu.memory_space<vmem>>, vector<8x512xf32>,
    %c1_i32_218 = arith.constant 1 : i32
    %c8_i32_219 = arith.constant 8 : i32
    %463 = arith.muli %c1_i32_218, %c8_i32_219 : i32
    %464 = tpu.assume_multiple %463, 8 : i32
    %465 = arith.index_cast %464 : i32 to index
    %c0_220 = arith.constant 0 : index
    %466 = vector.load %arg15[%465, %c0_220] : memref<64x512xf32, #tpu.memory_space<vmem>>, vector<8x512xf32>
    %467 = arith.truncf %452 : vector<8x128xf32> to vector<8x128xbf16>
    %c1_221 = arith.constant 1 : index
    %c0_222 = arith.constant 0 : index
    %c0_223 = arith.constant 0 : index
    %468 = vector.load %arg3[%c1_221, %c0_222, %c0_223] : memref<3x128x512xbf16, #tpu.memory_space<vmem>>, vector<1x128x512xbf16>
    %469 = vector.shape_cast %468 : vector<1x128x512xbf16> to vector<128x512xbf16>
    %cst_224 = arith.constant dense<0.000000e+00> : vector<8x512xf32>
    %470 = tpu.matmul %467, %469, %cst_224 {dimension_numbers = #tpu.dot_dimension_numbers<[1], [0], [0], [1], [0, 0, 1, 1], [], []>} : vector<8x128xbf16>, vector<128x512xbf16>, vector<8x512xf32> -> vector<8x512xf32>
    %471 = arith.addf %466, %470 : vector<8x512xf32>
    %472 = vector.extract_strided_slice %471 {offsets = [0, 0], sizes = [8, 128], strides = [1, 1]} : vector<8x512xf32> to vector<8x128xf32>
    %cst_225 = arith.constant 5.000000e-01 : f32
    %473 = vector.broadcast %cst_225 : f32 to vector<8x128xf32>
    %474 = arith.mulf %473, %472 : vector<8x128xf32>
    %475 = math.tanh %474 : vector<8x128xf32>
    %cst_226 = arith.constant 5.000000e-01 : f32
    %476 = vector.broadcast %cst_226 : f32 to vector<8x128xf32>
    %477 = arith.mulf %476, %475 : vector<8x128xf32>
    %cst_227 = arith.constant 5.000000e-01 : f32
    %478 = vector.broadcast %cst_227 : f32 to vector<8x128xf32>
    %479 = arith.addf %477, %478 : vector<8x128xf32>
    %480 = vector.extract_strided_slice %471 {offsets = [0, 128], sizes = [8, 128], strides = [1, 1]} : vector<8x512xf32> to vector<8x128xf32>
    %cst_228 = arith.constant 5.000000e-01 : f32
    %481 = vector.broadcast %cst_228 : f32 to vector<8x128xf32>
    %482 = arith.mulf %481, %480 : vector<8x128xf32>
    %483 = math.tanh %482 : vector<8x128xf32>
    %cst_229 = arith.constant 5.000000e-01 : f32
    %484 = vector.broadcast %cst_229 : f32 to vector<8x128xf32>
    %485 = arith.mulf %484, %483 : vector<8x128xf32>
    %cst_230 = arith.constant 5.000000e-01 : f32
    %486 = vector.broadcast %cst_230 : f32 to vector<8x128xf32>
    %487 = arith.addf %485, %486 : vector<8x128xf32>
    %488 = vector.extract_strided_slice %471 {offsets = [0, 256], sizes = [8, 128], strides = [1, 1]} : vector<8x512xf32> to vector<8x128xf32>
    %489 = math.tanh %488 : vector<8x128xf32>
    %490 = vector.extract_strided_slice %471 {offsets = [0, 384], sizes = [8, 128], strides = [1, 1]} : vector<8x512xf32> to vector<8x128xf32>
    %cst_231 = arith.constant 5.000000e-01 : f32
    %491 = vector.broadcast %cst_231 : f32 to vector<8x128xf32>
    %492 = arith.mulf %491, %490 : vector<8x128xf32>
    %493 = math.tanh %492 : vector<8x128xf32>
    %cst_232 = arith.constant 5.000000e-01 : f32
    %494 = vector.broadcast %cst_232 : f32 to vector<8x128xf32>
    %495 = arith.mulf %494, %493 : vector<8x128xf32>
    %cst_233 = arith.constant 5.000000e-01 : f32
    %496 = vector.broadcast %cst_233 : f32 to vector<8x128xf32>
    %497 = arith.addf %495, %496 : vector<8x128xf32>
    %498 = arith.mulf %487, %450 : vector<8x128xf32>
    %499 = arith.mulf %479, %489 : vector<8x128xf32>
    %500 = arith.addf %498, %499 : vector<8x128xf32>
    %501 = math.tanh %500 : vector<8x128xf32>
    %502 = arith.mulf %497, %501 : vector<8x128xf32>
    %503 = arith.truncf %502 : vector<8x128xf32> to vector<8x128xbf16>
    %c1_234 = arith.constant 1 : index
    %c0_235 = arith.constant 0 : index
    %c0_236 = arith.constant 0 : index
    %504 = vector.load %arg2[%c1_234, %c0_235, %c0_236] : memref<2x128x512xbf16, #tpu.memory_space<vmem>>, vector<1x128x512xbf16>
    %505 = vector.shape_cast %504 : vector<1x128x512xbf16> to vector<128x512xbf16>
    %cst_237 = arith.constant dense<0.000000e+00> : vector<8x512xf32>
    %506 = tpu.matmul %503, %505, %cst_237 {dimension_numbers = #tpu.dot_dimension_numbers<[1], [0], [0], [1], [0, 0, 1, 1], [], []>} : vector<8x128xbf16>, vector<128x512xbf16>, vector<8x512xf32> -> vector<8x512xf32>
    %c2_238 = arith.constant 2 : index
    %c0_239 = arith.constant 0 : index
    %c0_240 = arith.constant 0 : index
    %507 = vector.load %arg4[%c2_238, %c0_239, %c0_240] : memref<3x1x512xf32, #tpu.memory_space<vmem>>, vector<1x1x512xf32>
    %508 = vector.shape_cast %507 : vector<1x1x512xf32> to vector<1x512xf32>
    %509 = vector.broadcast %508 : vector<1x512xf32> to vector<8x512xf32>
    %510 = arith.addf %506, %509 : vector<8x512xf32>
    %511 = arith.index_cast %464 : i32 to index
    %c0_241 = arith.constant 0 : index
    %512 = vector.load %arg14[%511, %c0_241] : memref<64x512xf32, #tpu.memory_space<vmem>>, vector<8x512xf32>
    tpu.vector_store %arg14[%511, %c0_241], %510 {strides = array<i32>} : memref<64x512xf32, #tpu.memory_space<vmem>>, vector<8x512xf32>,
    %c2_i32_242 = arith.constant 2 : i32
    %c8_i32_243 = arith.constant 8 : i32
    %513 = arith.muli %c2_i32_242, %c8_i32_243 : i32
    %514 = tpu.assume_multiple %513, 8 : i32
    %515 = arith.index_cast %514 : i32 to index
    %c0_244 = arith.constant 0 : index
    %516 = vector.load %arg15[%515, %c0_244] : memref<64x512xf32, #tpu.memory_space<vmem>>, vector<8x512xf32>
    %517 = arith.truncf %502 : vector<8x128xf32> to vector<8x128xbf16>
    %c1_245 = arith.constant 1 : index
    %c0_246 = arith.constant 0 : index
    %c0_247 = arith.constant 0 : index
    %518 = vector.load %arg3[%c1_245, %c0_246, %c0_247] : memref<3x128x512xbf16, #tpu.memory_space<vmem>>, vector<1x128x512xbf16>
    %519 = vector.shape_cast %518 : vector<1x128x512xbf16> to vector<128x512xbf16>
    %cst_248 = arith.constant dense<0.000000e+00> : vector<8x512xf32>
    %520 = tpu.matmul %517, %519, %cst_248 {dimension_numbers = #tpu.dot_dimension_numbers<[1], [0], [0], [1], [0, 0, 1, 1], [], []>} : vector<8x128xbf16>, vector<128x512xbf16>, vector<8x512xf32> -> vector<8x512xf32>
    %521 = arith.addf %516, %520 : vector<8x512xf32>
    %522 = vector.extract_strided_slice %521 {offsets = [0, 0], sizes = [8, 128], strides = [1, 1]} : vector<8x512xf32> to vector<8x128xf32>
    %cst_249 = arith.constant 5.000000e-01 : f32
    %523 = vector.broadcast %cst_249 : f32 to vector<8x128xf32>
    %524 = arith.mulf %523, %522 : vector<8x128xf32>
    %525 = math.tanh %524 : vector<8x128xf32>
    %cst_250 = arith.constant 5.000000e-01 : f32
    %526 = vector.broadcast %cst_250 : f32 to vector<8x128xf32>
    %527 = arith.mulf %526, %525 : vector<8x128xf32>
    %cst_251 = arith.constant 5.000000e-01 : f32
    %528 = vector.broadcast %cst_251 : f32 to vector<8x128xf32>
    %529 = arith.addf %527, %528 : vector<8x128xf32>
    %530 = vector.extract_strided_slice %521 {offsets = [0, 128], sizes = [8, 128], strides = [1, 1]} : vector<8x512xf32> to vector<8x128xf32>
    %cst_252 = arith.constant 5.000000e-01 : f32
    %531 = vector.broadcast %cst_252 : f32 to vector<8x128xf32>
    %532 = arith.mulf %531, %530 : vector<8x128xf32>
    %533 = math.tanh %532 : vector<8x128xf32>
    %cst_253 = arith.constant 5.000000e-01 : f32
    %534 = vector.broadcast %cst_253 : f32 to vector<8x128xf32>
    %535 = arith.mulf %534, %533 : vector<8x128xf32>
    %cst_254 = arith.constant 5.000000e-01 : f32
    %536 = vector.broadcast %cst_254 : f32 to vector<8x128xf32>
    %537 = arith.addf %535, %536 : vector<8x128xf32>
    %538 = vector.extract_strided_slice %521 {offsets = [0, 256], sizes = [8, 128], strides = [1, 1]} : vector<8x512xf32> to vector<8x128xf32>
    %539 = math.tanh %538 : vector<8x128xf32>
    %540 = vector.extract_strided_slice %521 {offsets = [0, 384], sizes = [8, 128], strides = [1, 1]} : vector<8x512xf32> to vector<8x128xf32>
    %cst_255 = arith.constant 5.000000e-01 : f32
    %541 = vector.broadcast %cst_255 : f32 to vector<8x128xf32>
    %542 = arith.mulf %541, %540 : vector<8x128xf32>
    %543 = math.tanh %542 : vector<8x128xf32>
    %cst_256 = arith.constant 5.000000e-01 : f32
    %544 = vector.broadcast %cst_256 : f32 to vector<8x128xf32>
    %545 = arith.mulf %544, %543 : vector<8x128xf32>
    %cst_257 = arith.constant 5.000000e-01 : f32
    %546 = vector.broadcast %cst_257 : f32 to vector<8x128xf32>
    %547 = arith.addf %545, %546 : vector<8x128xf32>
    %548 = arith.mulf %537, %500 : vector<8x128xf32>
    %549 = arith.mulf %529, %539 : vector<8x128xf32>
    %550 = arith.addf %548, %549 : vector<8x128xf32>
    %551 = math.tanh %550 : vector<8x128xf32>
    %552 = arith.mulf %547, %551 : vector<8x128xf32>
    %553 = arith.truncf %552 : vector<8x128xf32> to vector<8x128xbf16>
    %c1_258 = arith.constant 1 : index
    %c0_259 = arith.constant 0 : index
    %c0_260 = arith.constant 0 : index
    %554 = vector.load %arg2[%c1_258, %c0_259, %c0_260] : memref<2x128x512xbf16, #tpu.memory_space<vmem>>, vector<1x128x512xbf16>
    %555 = vector.shape_cast %554 : vector<1x128x512xbf16> to vector<128x512xbf16>
    %cst_261 = arith.constant dense<0.000000e+00> : vector<8x512xf32>
    %556 = tpu.matmul %553, %555, %cst_261 {dimension_numbers = #tpu.dot_dimension_numbers<[1], [0], [0], [1], [0, 0, 1, 1], [], []>} : vector<8x128xbf16>, vector<128x512xbf16>, vector<8x512xf32> -> vector<8x512xf32>
    %c2_262 = arith.constant 2 : index
    %c0_263 = arith.constant 0 : index
    %c0_264 = arith.constant 0 : index
    %557 = vector.load %arg4[%c2_262, %c0_263, %c0_264] : memref<3x1x512xf32, #tpu.memory_space<vmem>>, vector<1x1x512xf32>
    %558 = vector.shape_cast %557 : vector<1x1x512xf32> to vector<1x512xf32>
    %559 = vector.broadcast %558 : vector<1x512xf32> to vector<8x512xf32>
    %560 = arith.addf %556, %559 : vector<8x512xf32>
    %561 = arith.index_cast %514 : i32 to index
    %c0_265 = arith.constant 0 : index
    %562 = vector.load %arg14[%561, %c0_265] : memref<64x512xf32, #tpu.memory_space<vmem>>, vector<8x512xf32>
    tpu.vector_store %arg14[%561, %c0_265], %560 {strides = array<i32>} : memref<64x512xf32, #tpu.memory_space<vmem>>, vector<8x512xf32>,
    %c3_i32_266 = arith.constant 3 : i32
    %c8_i32_267 = arith.constant 8 : i32
    %563 = arith.muli %c3_i32_266, %c8_i32_267 : i32
    %564 = tpu.assume_multiple %563, 8 : i32
    %565 = arith.index_cast %564 : i32 to index
    %c0_268 = arith.constant 0 : index
    %566 = vector.load %arg15[%565, %c0_268] : memref<64x512xf32, #tpu.memory_space<vmem>>, vector<8x512xf32>
    %567 = arith.truncf %552 : vector<8x128xf32> to vector<8x128xbf16>
    %c1_269 = arith.constant 1 : index
    %c0_270 = arith.constant 0 : index
    %c0_271 = arith.constant 0 : index
    %568 = vector.load %arg3[%c1_269, %c0_270, %c0_271] : memref<3x128x512xbf16, #tpu.memory_space<vmem>>, vector<1x128x512xbf16>
    %569 = vector.shape_cast %568 : vector<1x128x512xbf16> to vector<128x512xbf16>
    %cst_272 = arith.constant dense<0.000000e+00> : vector<8x512xf32>
    %570 = tpu.matmul %567, %569, %cst_272 {dimension_numbers = #tpu.dot_dimension_numbers<[1], [0], [0], [1], [0, 0, 1, 1], [], []>} : vector<8x128xbf16>, vector<128x512xbf16>, vector<8x512xf32> -> vector<8x512xf32>
    %571 = arith.addf %566, %570 : vector<8x512xf32>
    %572 = vector.extract_strided_slice %571 {offsets = [0, 0], sizes = [8, 128], strides = [1, 1]} : vector<8x512xf32> to vector<8x128xf32>
    %cst_273 = arith.constant 5.000000e-01 : f32
    %573 = vector.broadcast %cst_273 : f32 to vector<8x128xf32>
    %574 = arith.mulf %573, %572 : vector<8x128xf32>
    %575 = math.tanh %574 : vector<8x128xf32>
    %cst_274 = arith.constant 5.000000e-01 : f32
    %576 = vector.broadcast %cst_274 : f32 to vector<8x128xf32>
    %577 = arith.mulf %576, %575 : vector<8x128xf32>
    %cst_275 = arith.constant 5.000000e-01 : f32
    %578 = vector.broadcast %cst_275 : f32 to vector<8x128xf32>
    %579 = arith.addf %577, %578 : vector<8x128xf32>
    %580 = vector.extract_strided_slice %571 {offsets = [0, 128], sizes = [8, 128], strides = [1, 1]} : vector<8x512xf32> to vector<8x128xf32>
    %cst_276 = arith.constant 5.000000e-01 : f32
    %581 = vector.broadcast %cst_276 : f32 to vector<8x128xf32>
    %582 = arith.mulf %581, %580 : vector<8x128xf32>
    %583 = math.tanh %582 : vector<8x128xf32>
    %cst_277 = arith.constant 5.000000e-01 : f32
    %584 = vector.broadcast %cst_277 : f32 to vector<8x128xf32>
    %585 = arith.mulf %584, %583 : vector<8x128xf32>
    %cst_278 = arith.constant 5.000000e-01 : f32
    %586 = vector.broadcast %cst_278 : f32 to vector<8x128xf32>
    %587 = arith.addf %585, %586 : vector<8x128xf32>
    %588 = vector.extract_strided_slice %571 {offsets = [0, 256], sizes = [8, 128], strides = [1, 1]} : vector<8x512xf32> to vector<8x128xf32>
    %589 = math.tanh %588 : vector<8x128xf32>
    %590 = vector.extract_strided_slice %571 {offsets = [0, 384], sizes = [8, 128], strides = [1, 1]} : vector<8x512xf32> to vector<8x128xf32>
    %cst_279 = arith.constant 5.000000e-01 : f32
    %591 = vector.broadcast %cst_279 : f32 to vector<8x128xf32>
    %592 = arith.mulf %591, %590 : vector<8x128xf32>
    %593 = math.tanh %592 : vector<8x128xf32>
    %cst_280 = arith.constant 5.000000e-01 : f32
    %594 = vector.broadcast %cst_280 : f32 to vector<8x128xf32>
    %595 = arith.mulf %594, %593 : vector<8x128xf32>
    %cst_281 = arith.constant 5.000000e-01 : f32
    %596 = vector.broadcast %cst_281 : f32 to vector<8x128xf32>
    %597 = arith.addf %595, %596 : vector<8x128xf32>
    %598 = arith.mulf %587, %550 : vector<8x128xf32>
    %599 = arith.mulf %579, %589 : vector<8x128xf32>
    %600 = arith.addf %598, %599 : vector<8x128xf32>
    %601 = math.tanh %600 : vector<8x128xf32>
    %602 = arith.mulf %597, %601 : vector<8x128xf32>
    %603 = arith.truncf %602 : vector<8x128xf32> to vector<8x128xbf16>
    %c1_282 = arith.constant 1 : index
    %c0_283 = arith.constant 0 : index
    %c0_284 = arith.constant 0 : index
    %604 = vector.load %arg2[%c1_282, %c0_283, %c0_284] : memref<2x128x512xbf16, #tpu.memory_space<vmem>>, vector<1x128x512xbf16>
    %605 = vector.shape_cast %604 : vector<1x128x512xbf16> to vector<128x512xbf16>
    %cst_285 = arith.constant dense<0.000000e+00> : vector<8x512xf32>
    %606 = tpu.matmul %603, %605, %cst_285 {dimension_numbers = #tpu.dot_dimension_numbers<[1], [0], [0], [1], [0, 0, 1, 1], [], []>} : vector<8x128xbf16>, vector<128x512xbf16>, vector<8x512xf32> -> vector<8x512xf32>
    %c2_286 = arith.constant 2 : index
    %c0_287 = arith.constant 0 : index
    %c0_288 = arith.constant 0 : index
    %607 = vector.load %arg4[%c2_286, %c0_287, %c0_288] : memref<3x1x512xf32, #tpu.memory_space<vmem>>, vector<1x1x512xf32>
    %608 = vector.shape_cast %607 : vector<1x1x512xf32> to vector<1x512xf32>
    %609 = vector.broadcast %608 : vector<1x512xf32> to vector<8x512xf32>
    %610 = arith.addf %606, %609 : vector<8x512xf32>
    %611 = arith.index_cast %564 : i32 to index
    %c0_289 = arith.constant 0 : index
    %612 = vector.load %arg14[%611, %c0_289] : memref<64x512xf32, #tpu.memory_space<vmem>>, vector<8x512xf32>
    tpu.vector_store %arg14[%611, %c0_289], %610 {strides = array<i32>} : memref<64x512xf32, #tpu.memory_space<vmem>>, vector<8x512xf32>,
    %c4_i32_290 = arith.constant 4 : i32
    %c8_i32_291 = arith.constant 8 : i32
    %613 = arith.muli %c4_i32_290, %c8_i32_291 : i32
    %614 = tpu.assume_multiple %613, 8 : i32
    %615 = arith.index_cast %614 : i32 to index
    %c0_292 = arith.constant 0 : index
    %616 = vector.load %arg15[%615, %c0_292] : memref<64x512xf32, #tpu.memory_space<vmem>>, vector<8x512xf32>
    %617 = arith.truncf %602 : vector<8x128xf32> to vector<8x128xbf16>
    %c1_293 = arith.constant 1 : index
    %c0_294 = arith.constant 0 : index
    %c0_295 = arith.constant 0 : index
    %618 = vector.load %arg3[%c1_293, %c0_294, %c0_295] : memref<3x128x512xbf16, #tpu.memory_space<vmem>>, vector<1x128x512xbf16>
    %619 = vector.shape_cast %618 : vector<1x128x512xbf16> to vector<128x512xbf16>
    %cst_296 = arith.constant dense<0.000000e+00> : vector<8x512xf32>
    %620 = tpu.matmul %617, %619, %cst_296 {dimension_numbers = #tpu.dot_dimension_numbers<[1], [0], [0], [1], [0, 0, 1, 1], [], []>} : vector<8x128xbf16>, vector<128x512xbf16>, vector<8x512xf32> -> vector<8x512xf32>
    %621 = arith.addf %616, %620 : vector<8x512xf32>
    %622 = vector.extract_strided_slice %621 {offsets = [0, 0], sizes = [8, 128], strides = [1, 1]} : vector<8x512xf32> to vector<8x128xf32>
    %cst_297 = arith.constant 5.000000e-01 : f32
    %623 = vector.broadcast %cst_297 : f32 to vector<8x128xf32>
    %624 = arith.mulf %623, %622 : vector<8x128xf32>
    %625 = math.tanh %624 : vector<8x128xf32>
    %cst_298 = arith.constant 5.000000e-01 : f32
    %626 = vector.broadcast %cst_298 : f32 to vector<8x128xf32>
    %627 = arith.mulf %626, %625 : vector<8x128xf32>
    %cst_299 = arith.constant 5.000000e-01 : f32
    %628 = vector.broadcast %cst_299 : f32 to vector<8x128xf32>
    %629 = arith.addf %627, %628 : vector<8x128xf32>
    %630 = vector.extract_strided_slice %621 {offsets = [0, 128], sizes = [8, 128], strides = [1, 1]} : vector<8x512xf32> to vector<8x128xf32>
    %cst_300 = arith.constant 5.000000e-01 : f32
    %631 = vector.broadcast %cst_300 : f32 to vector<8x128xf32>
    %632 = arith.mulf %631, %630 : vector<8x128xf32>
    %633 = math.tanh %632 : vector<8x128xf32>
    %cst_301 = arith.constant 5.000000e-01 : f32
    %634 = vector.broadcast %cst_301 : f32 to vector<8x128xf32>
    %635 = arith.mulf %634, %633 : vector<8x128xf32>
    %cst_302 = arith.constant 5.000000e-01 : f32
    %636 = vector.broadcast %cst_302 : f32 to vector<8x128xf32>
    %637 = arith.addf %635, %636 : vector<8x128xf32>
    %638 = vector.extract_strided_slice %621 {offsets = [0, 256], sizes = [8, 128], strides = [1, 1]} : vector<8x512xf32> to vector<8x128xf32>
    %639 = math.tanh %638 : vector<8x128xf32>
    %640 = vector.extract_strided_slice %621 {offsets = [0, 384], sizes = [8, 128], strides = [1, 1]} : vector<8x512xf32> to vector<8x128xf32>
    %cst_303 = arith.constant 5.000000e-01 : f32
    %641 = vector.broadcast %cst_303 : f32 to vector<8x128xf32>
    %642 = arith.mulf %641, %640 : vector<8x128xf32>
    %643 = math.tanh %642 : vector<8x128xf32>
    %cst_304 = arith.constant 5.000000e-01 : f32
    %644 = vector.broadcast %cst_304 : f32 to vector<8x128xf32>
    %645 = arith.mulf %644, %643 : vector<8x128xf32>
    %cst_305 = arith.constant 5.000000e-01 : f32
    %646 = vector.broadcast %cst_305 : f32 to vector<8x128xf32>
    %647 = arith.addf %645, %646 : vector<8x128xf32>
    %648 = arith.mulf %637, %600 : vector<8x128xf32>
    %649 = arith.mulf %629, %639 : vector<8x128xf32>
    %650 = arith.addf %648, %649 : vector<8x128xf32>
    %651 = math.tanh %650 : vector<8x128xf32>
    %652 = arith.mulf %647, %651 : vector<8x128xf32>
    %653 = arith.truncf %652 : vector<8x128xf32> to vector<8x128xbf16>
    %c1_306 = arith.constant 1 : index
    %c0_307 = arith.constant 0 : index
    %c0_308 = arith.constant 0 : index
    %654 = vector.load %arg2[%c1_306, %c0_307, %c0_308] : memref<2x128x512xbf16, #tpu.memory_space<vmem>>, vector<1x128x512xbf16>
    %655 = vector.shape_cast %654 : vector<1x128x512xbf16> to vector<128x512xbf16>
    %cst_309 = arith.constant dense<0.000000e+00> : vector<8x512xf32>
    %656 = tpu.matmul %653, %655, %cst_309 {dimension_numbers = #tpu.dot_dimension_numbers<[1], [0], [0], [1], [0, 0, 1, 1], [], []>} : vector<8x128xbf16>, vector<128x512xbf16>, vector<8x512xf32> -> vector<8x512xf32>
    %c2_310 = arith.constant 2 : index
    %c0_311 = arith.constant 0 : index
    %c0_312 = arith.constant 0 : index
    %657 = vector.load %arg4[%c2_310, %c0_311, %c0_312] : memref<3x1x512xf32, #tpu.memory_space<vmem>>, vector<1x1x512xf32>
    %658 = vector.shape_cast %657 : vector<1x1x512xf32> to vector<1x512xf32>
    %659 = vector.broadcast %658 : vector<1x512xf32> to vector<8x512xf32>
    %660 = arith.addf %656, %659 : vector<8x512xf32>
    %661 = arith.index_cast %614 : i32 to index
    %c0_313 = arith.constant 0 : index
    %662 = vector.load %arg14[%661, %c0_313] : memref<64x512xf32, #tpu.memory_space<vmem>>, vector<8x512xf32>
    tpu.vector_store %arg14[%661, %c0_313], %660 {strides = array<i32>} : memref<64x512xf32, #tpu.memory_space<vmem>>, vector<8x512xf32>,
    %c5_i32_314 = arith.constant 5 : i32
    %c8_i32_315 = arith.constant 8 : i32
    %663 = arith.muli %c5_i32_314, %c8_i32_315 : i32
    %664 = tpu.assume_multiple %663, 8 : i32
    %665 = arith.index_cast %664 : i32 to index
    %c0_316 = arith.constant 0 : index
    %666 = vector.load %arg15[%665, %c0_316] : memref<64x512xf32, #tpu.memory_space<vmem>>, vector<8x512xf32>
    %667 = arith.truncf %652 : vector<8x128xf32> to vector<8x128xbf16>
    %c1_317 = arith.constant 1 : index
    %c0_318 = arith.constant 0 : index
    %c0_319 = arith.constant 0 : index
    %668 = vector.load %arg3[%c1_317, %c0_318, %c0_319] : memref<3x128x512xbf16, #tpu.memory_space<vmem>>, vector<1x128x512xbf16>
    %669 = vector.shape_cast %668 : vector<1x128x512xbf16> to vector<128x512xbf16>
    %cst_320 = arith.constant dense<0.000000e+00> : vector<8x512xf32>
    %670 = tpu.matmul %667, %669, %cst_320 {dimension_numbers = #tpu.dot_dimension_numbers<[1], [0], [0], [1], [0, 0, 1, 1], [], []>} : vector<8x128xbf16>, vector<128x512xbf16>, vector<8x512xf32> -> vector<8x512xf32>
    %671 = arith.addf %666, %670 : vector<8x512xf32>
    %672 = vector.extract_strided_slice %671 {offsets = [0, 0], sizes = [8, 128], strides = [1, 1]} : vector<8x512xf32> to vector<8x128xf32>
    %cst_321 = arith.constant 5.000000e-01 : f32
    %673 = vector.broadcast %cst_321 : f32 to vector<8x128xf32>
    %674 = arith.mulf %673, %672 : vector<8x128xf32>
    %675 = math.tanh %674 : vector<8x128xf32>
    %cst_322 = arith.constant 5.000000e-01 : f32
    %676 = vector.broadcast %cst_322 : f32 to vector<8x128xf32>
    %677 = arith.mulf %676, %675 : vector<8x128xf32>
    %cst_323 = arith.constant 5.000000e-01 : f32
    %678 = vector.broadcast %cst_323 : f32 to vector<8x128xf32>
    %679 = arith.addf %677, %678 : vector<8x128xf32>
    %680 = vector.extract_strided_slice %671 {offsets = [0, 128], sizes = [8, 128], strides = [1, 1]} : vector<8x512xf32> to vector<8x128xf32>
    %cst_324 = arith.constant 5.000000e-01 : f32
    %681 = vector.broadcast %cst_324 : f32 to vector<8x128xf32>
    %682 = arith.mulf %681, %680 : vector<8x128xf32>
    %683 = math.tanh %682 : vector<8x128xf32>
    %cst_325 = arith.constant 5.000000e-01 : f32
    %684 = vector.broadcast %cst_325 : f32 to vector<8x128xf32>
    %685 = arith.mulf %684, %683 : vector<8x128xf32>
    %cst_326 = arith.constant 5.000000e-01 : f32
    %686 = vector.broadcast %cst_326 : f32 to vector<8x128xf32>
    %687 = arith.addf %685, %686 : vector<8x128xf32>
    %688 = vector.extract_strided_slice %671 {offsets = [0, 256], sizes = [8, 128], strides = [1, 1]} : vector<8x512xf32> to vector<8x128xf32>
    %689 = math.tanh %688 : vector<8x128xf32>
    %690 = vector.extract_strided_slice %671 {offsets = [0, 384], sizes = [8, 128], strides = [1, 1]} : vector<8x512xf32> to vector<8x128xf32>
    %cst_327 = arith.constant 5.000000e-01 : f32
    %691 = vector.broadcast %cst_327 : f32 to vector<8x128xf32>
    %692 = arith.mulf %691, %690 : vector<8x128xf32>
    %693 = math.tanh %692 : vector<8x128xf32>
    %cst_328 = arith.constant 5.000000e-01 : f32
    %694 = vector.broadcast %cst_328 : f32 to vector<8x128xf32>
    %695 = arith.mulf %694, %693 : vector<8x128xf32>
    %cst_329 = arith.constant 5.000000e-01 : f32
    %696 = vector.broadcast %cst_329 : f32 to vector<8x128xf32>
    %697 = arith.addf %695, %696 : vector<8x128xf32>
    %698 = arith.mulf %687, %650 : vector<8x128xf32>
    %699 = arith.mulf %679, %689 : vector<8x128xf32>
    %700 = arith.addf %698, %699 : vector<8x128xf32>
    %701 = math.tanh %700 : vector<8x128xf32>
    %702 = arith.mulf %697, %701 : vector<8x128xf32>
    %703 = arith.truncf %702 : vector<8x128xf32> to vector<8x128xbf16>
    %c1_330 = arith.constant 1 : index
    %c0_331 = arith.constant 0 : index
    %c0_332 = arith.constant 0 : index
    %704 = vector.load %arg2[%c1_330, %c0_331, %c0_332] : memref<2x128x512xbf16, #tpu.memory_space<vmem>>, vector<1x128x512xbf16>
    %705 = vector.shape_cast %704 : vector<1x128x512xbf16> to vector<128x512xbf16>
    %cst_333 = arith.constant dense<0.000000e+00> : vector<8x512xf32>
    %706 = tpu.matmul %703, %705, %cst_333 {dimension_numbers = #tpu.dot_dimension_numbers<[1], [0], [0], [1], [0, 0, 1, 1], [], []>} : vector<8x128xbf16>, vector<128x512xbf16>, vector<8x512xf32> -> vector<8x512xf32>
    %c2_334 = arith.constant 2 : index
    %c0_335 = arith.constant 0 : index
    %c0_336 = arith.constant 0 : index
    %707 = vector.load %arg4[%c2_334, %c0_335, %c0_336] : memref<3x1x512xf32, #tpu.memory_space<vmem>>, vector<1x1x512xf32>
    %708 = vector.shape_cast %707 : vector<1x1x512xf32> to vector<1x512xf32>
    %709 = vector.broadcast %708 : vector<1x512xf32> to vector<8x512xf32>
    %710 = arith.addf %706, %709 : vector<8x512xf32>
    %711 = arith.index_cast %664 : i32 to index
    %c0_337 = arith.constant 0 : index
    %712 = vector.load %arg14[%711, %c0_337] : memref<64x512xf32, #tpu.memory_space<vmem>>, vector<8x512xf32>
    tpu.vector_store %arg14[%711, %c0_337], %710 {strides = array<i32>} : memref<64x512xf32, #tpu.memory_space<vmem>>, vector<8x512xf32>,
    %c6_i32_338 = arith.constant 6 : i32
    %c8_i32_339 = arith.constant 8 : i32
    %713 = arith.muli %c6_i32_338, %c8_i32_339 : i32
    %714 = tpu.assume_multiple %713, 8 : i32
    %715 = arith.index_cast %714 : i32 to index
    %c0_340 = arith.constant 0 : index
    %716 = vector.load %arg15[%715, %c0_340] : memref<64x512xf32, #tpu.memory_space<vmem>>, vector<8x512xf32>
    %717 = arith.truncf %702 : vector<8x128xf32> to vector<8x128xbf16>
    %c1_341 = arith.constant 1 : index
    %c0_342 = arith.constant 0 : index
    %c0_343 = arith.constant 0 : index
    %718 = vector.load %arg3[%c1_341, %c0_342, %c0_343] : memref<3x128x512xbf16, #tpu.memory_space<vmem>>, vector<1x128x512xbf16>
    %719 = vector.shape_cast %718 : vector<1x128x512xbf16> to vector<128x512xbf16>
    %cst_344 = arith.constant dense<0.000000e+00> : vector<8x512xf32>
    %720 = tpu.matmul %717, %719, %cst_344 {dimension_numbers = #tpu.dot_dimension_numbers<[1], [0], [0], [1], [0, 0, 1, 1], [], []>} : vector<8x128xbf16>, vector<128x512xbf16>, vector<8x512xf32> -> vector<8x512xf32>
    %721 = arith.addf %716, %720 : vector<8x512xf32>
    %722 = vector.extract_strided_slice %721 {offsets = [0, 0], sizes = [8, 128], strides = [1, 1]} : vector<8x512xf32> to vector<8x128xf32>
    %cst_345 = arith.constant 5.000000e-01 : f32
    %723 = vector.broadcast %cst_345 : f32 to vector<8x128xf32>
    %724 = arith.mulf %723, %722 : vector<8x128xf32>
    %725 = math.tanh %724 : vector<8x128xf32>
    %cst_346 = arith.constant 5.000000e-01 : f32
    %726 = vector.broadcast %cst_346 : f32 to vector<8x128xf32>
    %727 = arith.mulf %726, %725 : vector<8x128xf32>
    %cst_347 = arith.constant 5.000000e-01 : f32
    %728 = vector.broadcast %cst_347 : f32 to vector<8x128xf32>
    %729 = arith.addf %727, %728 : vector<8x128xf32>
    %730 = vector.extract_strided_slice %721 {offsets = [0, 128], sizes = [8, 128], strides = [1, 1]} : vector<8x512xf32> to vector<8x128xf32>
    %cst_348 = arith.constant 5.000000e-01 : f32
    %731 = vector.broadcast %cst_348 : f32 to vector<8x128xf32>
    %732 = arith.mulf %731, %730 : vector<8x128xf32>
    %733 = math.tanh %732 : vector<8x128xf32>
    %cst_349 = arith.constant 5.000000e-01 : f32
    %734 = vector.broadcast %cst_349 : f32 to vector<8x128xf32>
    %735 = arith.mulf %734, %733 : vector<8x128xf32>
    %cst_350 = arith.constant 5.000000e-01 : f32
    %736 = vector.broadcast %cst_350 : f32 to vector<8x128xf32>
    %737 = arith.addf %735, %736 : vector<8x128xf32>
    %738 = vector.extract_strided_slice %721 {offsets = [0, 256], sizes = [8, 128], strides = [1, 1]} : vector<8x512xf32> to vector<8x128xf32>
    %739 = math.tanh %738 : vector<8x128xf32>
    %740 = vector.extract_strided_slice %721 {offsets = [0, 384], sizes = [8, 128], strides = [1, 1]} : vector<8x512xf32> to vector<8x128xf32>
    %cst_351 = arith.constant 5.000000e-01 : f32
    %741 = vector.broadcast %cst_351 : f32 to vector<8x128xf32>
    %742 = arith.mulf %741, %740 : vector<8x128xf32>
    %743 = math.tanh %742 : vector<8x128xf32>
    %cst_352 = arith.constant 5.000000e-01 : f32
    %744 = vector.broadcast %cst_352 : f32 to vector<8x128xf32>
    %745 = arith.mulf %744, %743 : vector<8x128xf32>
    %cst_353 = arith.constant 5.000000e-01 : f32
    %746 = vector.broadcast %cst_353 : f32 to vector<8x128xf32>
    %747 = arith.addf %745, %746 : vector<8x128xf32>
    %748 = arith.mulf %737, %700 : vector<8x128xf32>
    %749 = arith.mulf %729, %739 : vector<8x128xf32>
    %750 = arith.addf %748, %749 : vector<8x128xf32>
    %751 = math.tanh %750 : vector<8x128xf32>
    %752 = arith.mulf %747, %751 : vector<8x128xf32>
    %753 = arith.truncf %752 : vector<8x128xf32> to vector<8x128xbf16>
    %c1_354 = arith.constant 1 : index
    %c0_355 = arith.constant 0 : index
    %c0_356 = arith.constant 0 : index
    %754 = vector.load %arg2[%c1_354, %c0_355, %c0_356] : memref<2x128x512xbf16, #tpu.memory_space<vmem>>, vector<1x128x512xbf16>
    %755 = vector.shape_cast %754 : vector<1x128x512xbf16> to vector<128x512xbf16>
    %cst_357 = arith.constant dense<0.000000e+00> : vector<8x512xf32>
    %756 = tpu.matmul %753, %755, %cst_357 {dimension_numbers = #tpu.dot_dimension_numbers<[1], [0], [0], [1], [0, 0, 1, 1], [], []>} : vector<8x128xbf16>, vector<128x512xbf16>, vector<8x512xf32> -> vector<8x512xf32>
    %c2_358 = arith.constant 2 : index
    %c0_359 = arith.constant 0 : index
    %c0_360 = arith.constant 0 : index
    %757 = vector.load %arg4[%c2_358, %c0_359, %c0_360] : memref<3x1x512xf32, #tpu.memory_space<vmem>>, vector<1x1x512xf32>
    %758 = vector.shape_cast %757 : vector<1x1x512xf32> to vector<1x512xf32>
    %759 = vector.broadcast %758 : vector<1x512xf32> to vector<8x512xf32>
    %760 = arith.addf %756, %759 : vector<8x512xf32>
    %761 = arith.index_cast %714 : i32 to index
    %c0_361 = arith.constant 0 : index
    %762 = vector.load %arg14[%761, %c0_361] : memref<64x512xf32, #tpu.memory_space<vmem>>, vector<8x512xf32>
    tpu.vector_store %arg14[%761, %c0_361], %760 {strides = array<i32>} : memref<64x512xf32, #tpu.memory_space<vmem>>, vector<8x512xf32>,
    %c7_i32_362 = arith.constant 7 : i32
    %c8_i32_363 = arith.constant 8 : i32
    %763 = arith.muli %c7_i32_362, %c8_i32_363 : i32
    %764 = tpu.assume_multiple %763, 8 : i32
    %765 = arith.index_cast %764 : i32 to index
    %c0_364 = arith.constant 0 : index
    %766 = vector.load %arg15[%765, %c0_364] : memref<64x512xf32, #tpu.memory_space<vmem>>, vector<8x512xf32>
    %767 = arith.truncf %752 : vector<8x128xf32> to vector<8x128xbf16>
    %c1_365 = arith.constant 1 : index
    %c0_366 = arith.constant 0 : index
    %c0_367 = arith.constant 0 : index
    %768 = vector.load %arg3[%c1_365, %c0_366, %c0_367] : memref<3x128x512xbf16, #tpu.memory_space<vmem>>, vector<1x128x512xbf16>
    %769 = vector.shape_cast %768 : vector<1x128x512xbf16> to vector<128x512xbf16>
    %cst_368 = arith.constant dense<0.000000e+00> : vector<8x512xf32>
    %770 = tpu.matmul %767, %769, %cst_368 {dimension_numbers = #tpu.dot_dimension_numbers<[1], [0], [0], [1], [0, 0, 1, 1], [], []>} : vector<8x128xbf16>, vector<128x512xbf16>, vector<8x512xf32> -> vector<8x512xf32>
    %771 = arith.addf %766, %770 : vector<8x512xf32>
    %772 = vector.extract_strided_slice %771 {offsets = [0, 0], sizes = [8, 128], strides = [1, 1]} : vector<8x512xf32> to vector<8x128xf32>
    %cst_369 = arith.constant 5.000000e-01 : f32
    %773 = vector.broadcast %cst_369 : f32 to vector<8x128xf32>
    %774 = arith.mulf %773, %772 : vector<8x128xf32>
    %775 = math.tanh %774 : vector<8x128xf32>
    %cst_370 = arith.constant 5.000000e-01 : f32
    %776 = vector.broadcast %cst_370 : f32 to vector<8x128xf32>
    %777 = arith.mulf %776, %775 : vector<8x128xf32>
    %cst_371 = arith.constant 5.000000e-01 : f32
    %778 = vector.broadcast %cst_371 : f32 to vector<8x128xf32>
    %779 = arith.addf %777, %778 : vector<8x128xf32>
    %780 = vector.extract_strided_slice %771 {offsets = [0, 128], sizes = [8, 128], strides = [1, 1]} : vector<8x512xf32> to vector<8x128xf32>
    %cst_372 = arith.constant 5.000000e-01 : f32
    %781 = vector.broadcast %cst_372 : f32 to vector<8x128xf32>
    %782 = arith.mulf %781, %780 : vector<8x128xf32>
    %783 = math.tanh %782 : vector<8x128xf32>
    %cst_373 = arith.constant 5.000000e-01 : f32
    %784 = vector.broadcast %cst_373 : f32 to vector<8x128xf32>
    %785 = arith.mulf %784, %783 : vector<8x128xf32>
    %cst_374 = arith.constant 5.000000e-01 : f32
    %786 = vector.broadcast %cst_374 : f32 to vector<8x128xf32>
    %787 = arith.addf %785, %786 : vector<8x128xf32>
    %788 = vector.extract_strided_slice %771 {offsets = [0, 256], sizes = [8, 128], strides = [1, 1]} : vector<8x512xf32> to vector<8x128xf32>
    %789 = math.tanh %788 : vector<8x128xf32>
    %790 = vector.extract_strided_slice %771 {offsets = [0, 384], sizes = [8, 128], strides = [1, 1]} : vector<8x512xf32> to vector<8x128xf32>
    %cst_375 = arith.constant 5.000000e-01 : f32
    %791 = vector.broadcast %cst_375 : f32 to vector<8x128xf32>
    %792 = arith.mulf %791, %790 : vector<8x128xf32>
    %793 = math.tanh %792 : vector<8x128xf32>
    %cst_376 = arith.constant 5.000000e-01 : f32
    %794 = vector.broadcast %cst_376 : f32 to vector<8x128xf32>
    %795 = arith.mulf %794, %793 : vector<8x128xf32>
    %cst_377 = arith.constant 5.000000e-01 : f32
    %796 = vector.broadcast %cst_377 : f32 to vector<8x128xf32>
    %797 = arith.addf %795, %796 : vector<8x128xf32>
    %798 = arith.mulf %787, %750 : vector<8x128xf32>
    %799 = arith.mulf %779, %789 : vector<8x128xf32>
    %800 = arith.addf %798, %799 : vector<8x128xf32>
    %801 = math.tanh %800 : vector<8x128xf32>
    %802 = arith.mulf %797, %801 : vector<8x128xf32>
    %803 = arith.truncf %802 : vector<8x128xf32> to vector<8x128xbf16>
    %c1_378 = arith.constant 1 : index
    %c0_379 = arith.constant 0 : index
    %c0_380 = arith.constant 0 : index
    %804 = vector.load %arg2[%c1_378, %c0_379, %c0_380] : memref<2x128x512xbf16, #tpu.memory_space<vmem>>, vector<1x128x512xbf16>
    %805 = vector.shape_cast %804 : vector<1x128x512xbf16> to vector<128x512xbf16>
    %cst_381 = arith.constant dense<0.000000e+00> : vector<8x512xf32>
    %806 = tpu.matmul %803, %805, %cst_381 {dimension_numbers = #tpu.dot_dimension_numbers<[1], [0], [0], [1], [0, 0, 1, 1], [], []>} : vector<8x128xbf16>, vector<128x512xbf16>, vector<8x512xf32> -> vector<8x512xf32>
    %c2_382 = arith.constant 2 : index
    %c0_383 = arith.constant 0 : index
    %c0_384 = arith.constant 0 : index
    %807 = vector.load %arg4[%c2_382, %c0_383, %c0_384] : memref<3x1x512xf32, #tpu.memory_space<vmem>>, vector<1x1x512xf32>
    %808 = vector.shape_cast %807 : vector<1x1x512xf32> to vector<1x512xf32>
    %809 = vector.broadcast %808 : vector<1x512xf32> to vector<8x512xf32>
    %810 = arith.addf %806, %809 : vector<8x512xf32>
    %811 = arith.index_cast %764 : i32 to index
    %c0_385 = arith.constant 0 : index
    %812 = vector.load %arg14[%811, %c0_385] : memref<64x512xf32, #tpu.memory_space<vmem>>, vector<8x512xf32>
    tpu.vector_store %arg14[%811, %c0_385], %810 {strides = array<i32>} : memref<64x512xf32, #tpu.memory_space<vmem>>, vector<8x512xf32>,
    %c8_i32_386 = arith.constant 8 : i32
    %cst_387 = arith.constant 0.000000e+00 : f32
    %813 = vector.broadcast %cst_387 : f32 to vector<8x128xf32>
    %cst_388 = arith.constant 0.000000e+00 : f32
    %814 = vector.broadcast %cst_388 : f32 to vector<8x128xf32>
    %c0_i32_389 = arith.constant 0 : i32
    %c8_i32_390 = arith.constant 8 : i32
    %815 = arith.muli %c0_i32_389, %c8_i32_390 : i32
    %816 = tpu.assume_multiple %815, 8 : i32
    %817 = arith.index_cast %816 : i32 to index
    %c0_391 = arith.constant 0 : index
    %818 = vector.load %arg14[%817, %c0_391] : memref<64x512xf32, #tpu.memory_space<vmem>>, vector<8x512xf32>
    %819 = arith.truncf %813 : vector<8x128xf32> to vector<8x128xbf16>
    %c2_392 = arith.constant 2 : index
    %c0_393 = arith.constant 0 : index
    %c0_394 = arith.constant 0 : index
    %820 = vector.load %arg3[%c2_392, %c0_393, %c0_394] : memref<3x128x512xbf16, #tpu.memory_space<vmem>>, vector<1x128x512xbf16>
    %821 = vector.shape_cast %820 : vector<1x128x512xbf16> to vector<128x512xbf16>
    %cst_395 = arith.constant dense<0.000000e+00> : vector<8x512xf32>
    %822 = tpu.matmul %819, %821, %cst_395 {dimension_numbers = #tpu.dot_dimension_numbers<[1], [0], [0], [1], [0, 0, 1, 1], [], []>} : vector<8x128xbf16>, vector<128x512xbf16>, vector<8x512xf32> -> vector<8x512xf32>
    %823 = arith.addf %818, %822 : vector<8x512xf32>
    %824 = vector.extract_strided_slice %823 {offsets = [0, 0], sizes = [8, 128], strides = [1, 1]} : vector<8x512xf32> to vector<8x128xf32>
    %cst_396 = arith.constant 5.000000e-01 : f32
    %825 = vector.broadcast %cst_396 : f32 to vector<8x128xf32>
    %826 = arith.mulf %825, %824 : vector<8x128xf32>
    %827 = math.tanh %826 : vector<8x128xf32>
    %cst_397 = arith.constant 5.000000e-01 : f32
    %828 = vector.broadcast %cst_397 : f32 to vector<8x128xf32>
    %829 = arith.mulf %828, %827 : vector<8x128xf32>
    %cst_398 = arith.constant 5.000000e-01 : f32
    %830 = vector.broadcast %cst_398 : f32 to vector<8x128xf32>
    %831 = arith.addf %829, %830 : vector<8x128xf32>
    %832 = vector.extract_strided_slice %823 {offsets = [0, 128], sizes = [8, 128], strides = [1, 1]} : vector<8x512xf32> to vector<8x128xf32>
    %cst_399 = arith.constant 5.000000e-01 : f32
    %833 = vector.broadcast %cst_399 : f32 to vector<8x128xf32>
    %834 = arith.mulf %833, %832 : vector<8x128xf32>
    %835 = math.tanh %834 : vector<8x128xf32>
    %cst_400 = arith.constant 5.000000e-01 : f32
    %836 = vector.broadcast %cst_400 : f32 to vector<8x128xf32>
    %837 = arith.mulf %836, %835 : vector<8x128xf32>
    %cst_401 = arith.constant 5.000000e-01 : f32
    %838 = vector.broadcast %cst_401 : f32 to vector<8x128xf32>
    %839 = arith.addf %837, %838 : vector<8x128xf32>
    %840 = vector.extract_strided_slice %823 {offsets = [0, 256], sizes = [8, 128], strides = [1, 1]} : vector<8x512xf32> to vector<8x128xf32>
    %841 = math.tanh %840 : vector<8x128xf32>
    %842 = vector.extract_strided_slice %823 {offsets = [0, 384], sizes = [8, 128], strides = [1, 1]} : vector<8x512xf32> to vector<8x128xf32>
    %cst_402 = arith.constant 5.000000e-01 : f32
    %843 = vector.broadcast %cst_402 : f32 to vector<8x128xf32>
    %844 = arith.mulf %843, %842 : vector<8x128xf32>
    %845 = math.tanh %844 : vector<8x128xf32>
    %cst_403 = arith.constant 5.000000e-01 : f32
    %846 = vector.broadcast %cst_403 : f32 to vector<8x128xf32>
    %847 = arith.mulf %846, %845 : vector<8x128xf32>
    %cst_404 = arith.constant 5.000000e-01 : f32
    %848 = vector.broadcast %cst_404 : f32 to vector<8x128xf32>
    %849 = arith.addf %847, %848 : vector<8x128xf32>
    %850 = arith.mulf %839, %814 : vector<8x128xf32>
    %851 = arith.mulf %831, %841 : vector<8x128xf32>
    %852 = arith.addf %850, %851 : vector<8x128xf32>
    %853 = math.tanh %852 : vector<8x128xf32>
    %854 = arith.mulf %849, %853 : vector<8x128xf32>
    %c1_i32_405 = arith.constant 1 : i32
    %c8_i32_406 = arith.constant 8 : i32
    %855 = arith.muli %c1_i32_405, %c8_i32_406 : i32
    %856 = tpu.assume_multiple %855, 8 : i32
    %857 = arith.index_cast %856 : i32 to index
    %c0_407 = arith.constant 0 : index
    %858 = vector.load %arg14[%857, %c0_407] : memref<64x512xf32, #tpu.memory_space<vmem>>, vector<8x512xf32>
    %859 = arith.truncf %854 : vector<8x128xf32> to vector<8x128xbf16>
    %c2_408 = arith.constant 2 : index
    %c0_409 = arith.constant 0 : index
    %c0_410 = arith.constant 0 : index
    %860 = vector.load %arg3[%c2_408, %c0_409, %c0_410] : memref<3x128x512xbf16, #tpu.memory_space<vmem>>, vector<1x128x512xbf16>
    %861 = vector.shape_cast %860 : vector<1x128x512xbf16> to vector<128x512xbf16>
    %cst_411 = arith.constant dense<0.000000e+00> : vector<8x512xf32>
    %862 = tpu.matmul %859, %861, %cst_411 {dimension_numbers = #tpu.dot_dimension_numbers<[1], [0], [0], [1], [0, 0, 1, 1], [], []>} : vector<8x128xbf16>, vector<128x512xbf16>, vector<8x512xf32> -> vector<8x512xf32>
    %863 = arith.addf %858, %862 : vector<8x512xf32>
    %864 = vector.extract_strided_slice %863 {offsets = [0, 0], sizes = [8, 128], strides = [1, 1]} : vector<8x512xf32> to vector<8x128xf32>
    %cst_412 = arith.constant 5.000000e-01 : f32
    %865 = vector.broadcast %cst_412 : f32 to vector<8x128xf32>
    %866 = arith.mulf %865, %864 : vector<8x128xf32>
    %867 = math.tanh %866 : vector<8x128xf32>
    %cst_413 = arith.constant 5.000000e-01 : f32
    %868 = vector.broadcast %cst_413 : f32 to vector<8x128xf32>
    %869 = arith.mulf %868, %867 : vector<8x128xf32>
    %cst_414 = arith.constant 5.000000e-01 : f32
    %870 = vector.broadcast %cst_414 : f32 to vector<8x128xf32>
    %871 = arith.addf %869, %870 : vector<8x128xf32>
    %872 = vector.extract_strided_slice %863 {offsets = [0, 128], sizes = [8, 128], strides = [1, 1]} : vector<8x512xf32> to vector<8x128xf32>
    %cst_415 = arith.constant 5.000000e-01 : f32
    %873 = vector.broadcast %cst_415 : f32 to vector<8x128xf32>
    %874 = arith.mulf %873, %872 : vector<8x128xf32>
    %875 = math.tanh %874 : vector<8x128xf32>
    %cst_416 = arith.constant 5.000000e-01 : f32
    %876 = vector.broadcast %cst_416 : f32 to vector<8x128xf32>
    %877 = arith.mulf %876, %875 : vector<8x128xf32>
    %cst_417 = arith.constant 5.000000e-01 : f32
    %878 = vector.broadcast %cst_417 : f32 to vector<8x128xf32>
    %879 = arith.addf %877, %878 : vector<8x128xf32>
    %880 = vector.extract_strided_slice %863 {offsets = [0, 256], sizes = [8, 128], strides = [1, 1]} : vector<8x512xf32> to vector<8x128xf32>
    %881 = math.tanh %880 : vector<8x128xf32>
    %882 = vector.extract_strided_slice %863 {offsets = [0, 384], sizes = [8, 128], strides = [1, 1]} : vector<8x512xf32> to vector<8x128xf32>
    %cst_418 = arith.constant 5.000000e-01 : f32
    %883 = vector.broadcast %cst_418 : f32 to vector<8x128xf32>
    %884 = arith.mulf %883, %882 : vector<8x128xf32>
    %885 = math.tanh %884 : vector<8x128xf32>
    %cst_419 = arith.constant 5.000000e-01 : f32
    %886 = vector.broadcast %cst_419 : f32 to vector<8x128xf32>
    %887 = arith.mulf %886, %885 : vector<8x128xf32>
    %cst_420 = arith.constant 5.000000e-01 : f32
    %888 = vector.broadcast %cst_420 : f32 to vector<8x128xf32>
    %889 = arith.addf %887, %888 : vector<8x128xf32>
    %890 = arith.mulf %879, %852 : vector<8x128xf32>
    %891 = arith.mulf %871, %881 : vector<8x128xf32>
    %892 = arith.addf %890, %891 : vector<8x128xf32>
    %893 = math.tanh %892 : vector<8x128xf32>
    %894 = arith.mulf %889, %893 : vector<8x128xf32>
    %c2_i32_421 = arith.constant 2 : i32
    %c8_i32_422 = arith.constant 8 : i32
    %895 = arith.muli %c2_i32_421, %c8_i32_422 : i32
    %896 = tpu.assume_multiple %895, 8 : i32
    %897 = arith.index_cast %896 : i32 to index
    %c0_423 = arith.constant 0 : index
    %898 = vector.load %arg14[%897, %c0_423] : memref<64x512xf32, #tpu.memory_space<vmem>>, vector<8x512xf32>
    %899 = arith.truncf %894 : vector<8x128xf32> to vector<8x128xbf16>
    %c2_424 = arith.constant 2 : index
    %c0_425 = arith.constant 0 : index
    %c0_426 = arith.constant 0 : index
    %900 = vector.load %arg3[%c2_424, %c0_425, %c0_426] : memref<3x128x512xbf16, #tpu.memory_space<vmem>>, vector<1x128x512xbf16>
    %901 = vector.shape_cast %900 : vector<1x128x512xbf16> to vector<128x512xbf16>
    %cst_427 = arith.constant dense<0.000000e+00> : vector<8x512xf32>
    %902 = tpu.matmul %899, %901, %cst_427 {dimension_numbers = #tpu.dot_dimension_numbers<[1], [0], [0], [1], [0, 0, 1, 1], [], []>} : vector<8x128xbf16>, vector<128x512xbf16>, vector<8x512xf32> -> vector<8x512xf32>
    %903 = arith.addf %898, %902 : vector<8x512xf32>
    %904 = vector.extract_strided_slice %903 {offsets = [0, 0], sizes = [8, 128], strides = [1, 1]} : vector<8x512xf32> to vector<8x128xf32>
    %cst_428 = arith.constant 5.000000e-01 : f32
    %905 = vector.broadcast %cst_428 : f32 to vector<8x128xf32>
    %906 = arith.mulf %905, %904 : vector<8x128xf32>
    %907 = math.tanh %906 : vector<8x128xf32>
    %cst_429 = arith.constant 5.000000e-01 : f32
    %908 = vector.broadcast %cst_429 : f32 to vector<8x128xf32>
    %909 = arith.mulf %908, %907 : vector<8x128xf32>
    %cst_430 = arith.constant 5.000000e-01 : f32
    %910 = vector.broadcast %cst_430 : f32 to vector<8x128xf32>
    %911 = arith.addf %909, %910 : vector<8x128xf32>
    %912 = vector.extract_strided_slice %903 {offsets = [0, 128], sizes = [8, 128], strides = [1, 1]} : vector<8x512xf32> to vector<8x128xf32>
    %cst_431 = arith.constant 5.000000e-01 : f32
    %913 = vector.broadcast %cst_431 : f32 to vector<8x128xf32>
    %914 = arith.mulf %913, %912 : vector<8x128xf32>
    %915 = math.tanh %914 : vector<8x128xf32>
    %cst_432 = arith.constant 5.000000e-01 : f32
    %916 = vector.broadcast %cst_432 : f32 to vector<8x128xf32>
    %917 = arith.mulf %916, %915 : vector<8x128xf32>
    %cst_433 = arith.constant 5.000000e-01 : f32
    %918 = vector.broadcast %cst_433 : f32 to vector<8x128xf32>
    %919 = arith.addf %917, %918 : vector<8x128xf32>
    %920 = vector.extract_strided_slice %903 {offsets = [0, 256], sizes = [8, 128], strides = [1, 1]} : vector<8x512xf32> to vector<8x128xf32>
    %921 = math.tanh %920 : vector<8x128xf32>
    %922 = vector.extract_strided_slice %903 {offsets = [0, 384], sizes = [8, 128], strides = [1, 1]} : vector<8x512xf32> to vector<8x128xf32>
    %cst_434 = arith.constant 5.000000e-01 : f32
    %923 = vector.broadcast %cst_434 : f32 to vector<8x128xf32>
    %924 = arith.mulf %923, %922 : vector<8x128xf32>
    %925 = math.tanh %924 : vector<8x128xf32>
    %cst_435 = arith.constant 5.000000e-01 : f32
    %926 = vector.broadcast %cst_435 : f32 to vector<8x128xf32>
    %927 = arith.mulf %926, %925 : vector<8x128xf32>
    %cst_436 = arith.constant 5.000000e-01 : f32
    %928 = vector.broadcast %cst_436 : f32 to vector<8x128xf32>
    %929 = arith.addf %927, %928 : vector<8x128xf32>
    %930 = arith.mulf %919, %892 : vector<8x128xf32>
    %931 = arith.mulf %911, %921 : vector<8x128xf32>
    %932 = arith.addf %930, %931 : vector<8x128xf32>
    %933 = math.tanh %932 : vector<8x128xf32>
    %934 = arith.mulf %929, %933 : vector<8x128xf32>
    %c3_i32_437 = arith.constant 3 : i32
    %c8_i32_438 = arith.constant 8 : i32
    %935 = arith.muli %c3_i32_437, %c8_i32_438 : i32
    %936 = tpu.assume_multiple %935, 8 : i32
    %937 = arith.index_cast %936 : i32 to index
    %c0_439 = arith.constant 0 : index
    %938 = vector.load %arg14[%937, %c0_439] : memref<64x512xf32, #tpu.memory_space<vmem>>, vector<8x512xf32>
    %939 = arith.truncf %934 : vector<8x128xf32> to vector<8x128xbf16>
    %c2_440 = arith.constant 2 : index
    %c0_441 = arith.constant 0 : index
    %c0_442 = arith.constant 0 : index
    %940 = vector.load %arg3[%c2_440, %c0_441, %c0_442] : memref<3x128x512xbf16, #tpu.memory_space<vmem>>, vector<1x128x512xbf16>
    %941 = vector.shape_cast %940 : vector<1x128x512xbf16> to vector<128x512xbf16>
    %cst_443 = arith.constant dense<0.000000e+00> : vector<8x512xf32>
    %942 = tpu.matmul %939, %941, %cst_443 {dimension_numbers = #tpu.dot_dimension_numbers<[1], [0], [0], [1], [0, 0, 1, 1], [], []>} : vector<8x128xbf16>, vector<128x512xbf16>, vector<8x512xf32> -> vector<8x512xf32>
    %943 = arith.addf %938, %942 : vector<8x512xf32>
    %944 = vector.extract_strided_slice %943 {offsets = [0, 0], sizes = [8, 128], strides = [1, 1]} : vector<8x512xf32> to vector<8x128xf32>
    %cst_444 = arith.constant 5.000000e-01 : f32
    %945 = vector.broadcast %cst_444 : f32 to vector<8x128xf32>
    %946 = arith.mulf %945, %944 : vector<8x128xf32>
    %947 = math.tanh %946 : vector<8x128xf32>
    %cst_445 = arith.constant 5.000000e-01 : f32
    %948 = vector.broadcast %cst_445 : f32 to vector<8x128xf32>
    %949 = arith.mulf %948, %947 : vector<8x128xf32>
    %cst_446 = arith.constant 5.000000e-01 : f32
    %950 = vector.broadcast %cst_446 : f32 to vector<8x128xf32>
    %951 = arith.addf %949, %950 : vector<8x128xf32>
    %952 = vector.extract_strided_slice %943 {offsets = [0, 128], sizes = [8, 128], strides = [1, 1]} : vector<8x512xf32> to vector<8x128xf32>
    %cst_447 = arith.constant 5.000000e-01 : f32
    %953 = vector.broadcast %cst_447 : f32 to vector<8x128xf32>
    %954 = arith.mulf %953, %952 : vector<8x128xf32>
    %955 = math.tanh %954 : vector<8x128xf32>
    %cst_448 = arith.constant 5.000000e-01 : f32
    %956 = vector.broadcast %cst_448 : f32 to vector<8x128xf32>
    %957 = arith.mulf %956, %955 : vector<8x128xf32>
    %cst_449 = arith.constant 5.000000e-01 : f32
    %958 = vector.broadcast %cst_449 : f32 to vector<8x128xf32>
    %959 = arith.addf %957, %958 : vector<8x128xf32>
    %960 = vector.extract_strided_slice %943 {offsets = [0, 256], sizes = [8, 128], strides = [1, 1]} : vector<8x512xf32> to vector<8x128xf32>
    %961 = math.tanh %960 : vector<8x128xf32>
    %962 = vector.extract_strided_slice %943 {offsets = [0, 384], sizes = [8, 128], strides = [1, 1]} : vector<8x512xf32> to vector<8x128xf32>
    %cst_450 = arith.constant 5.000000e-01 : f32
    %963 = vector.broadcast %cst_450 : f32 to vector<8x128xf32>
    %964 = arith.mulf %963, %962 : vector<8x128xf32>
    %965 = math.tanh %964 : vector<8x128xf32>
    %cst_451 = arith.constant 5.000000e-01 : f32
    %966 = vector.broadcast %cst_451 : f32 to vector<8x128xf32>
    %967 = arith.mulf %966, %965 : vector<8x128xf32>
    %cst_452 = arith.constant 5.000000e-01 : f32
    %968 = vector.broadcast %cst_452 : f32 to vector<8x128xf32>
    %969 = arith.addf %967, %968 : vector<8x128xf32>
    %970 = arith.mulf %959, %932 : vector<8x128xf32>
    %971 = arith.mulf %951, %961 : vector<8x128xf32>
    %972 = arith.addf %970, %971 : vector<8x128xf32>
    %973 = math.tanh %972 : vector<8x128xf32>
    %974 = arith.mulf %969, %973 : vector<8x128xf32>
    %c4_i32_453 = arith.constant 4 : i32
    %c8_i32_454 = arith.constant 8 : i32
    %975 = arith.muli %c4_i32_453, %c8_i32_454 : i32
    %976 = tpu.assume_multiple %975, 8 : i32
    %977 = arith.index_cast %976 : i32 to index
    %c0_455 = arith.constant 0 : index
    %978 = vector.load %arg14[%977, %c0_455] : memref<64x512xf32, #tpu.memory_space<vmem>>, vector<8x512xf32>
    %979 = arith.truncf %974 : vector<8x128xf32> to vector<8x128xbf16>
    %c2_456 = arith.constant 2 : index
    %c0_457 = arith.constant 0 : index
    %c0_458 = arith.constant 0 : index
    %980 = vector.load %arg3[%c2_456, %c0_457, %c0_458] : memref<3x128x512xbf16, #tpu.memory_space<vmem>>, vector<1x128x512xbf16>
    %981 = vector.shape_cast %980 : vector<1x128x512xbf16> to vector<128x512xbf16>
    %cst_459 = arith.constant dense<0.000000e+00> : vector<8x512xf32>
    %982 = tpu.matmul %979, %981, %cst_459 {dimension_numbers = #tpu.dot_dimension_numbers<[1], [0], [0], [1], [0, 0, 1, 1], [], []>} : vector<8x128xbf16>, vector<128x512xbf16>, vector<8x512xf32> -> vector<8x512xf32>
    %983 = arith.addf %978, %982 : vector<8x512xf32>
    %984 = vector.extract_strided_slice %983 {offsets = [0, 0], sizes = [8, 128], strides = [1, 1]} : vector<8x512xf32> to vector<8x128xf32>
    %cst_460 = arith.constant 5.000000e-01 : f32
    %985 = vector.broadcast %cst_460 : f32 to vector<8x128xf32>
    %986 = arith.mulf %985, %984 : vector<8x128xf32>
    %987 = math.tanh %986 : vector<8x128xf32>
    %cst_461 = arith.constant 5.000000e-01 : f32
    %988 = vector.broadcast %cst_461 : f32 to vector<8x128xf32>
    %989 = arith.mulf %988, %987 : vector<8x128xf32>
    %cst_462 = arith.constant 5.000000e-01 : f32
    %990 = vector.broadcast %cst_462 : f32 to vector<8x128xf32>
    %991 = arith.addf %989, %990 : vector<8x128xf32>
    %992 = vector.extract_strided_slice %983 {offsets = [0, 128], sizes = [8, 128], strides = [1, 1]} : vector<8x512xf32> to vector<8x128xf32>
    %cst_463 = arith.constant 5.000000e-01 : f32
    %993 = vector.broadcast %cst_463 : f32 to vector<8x128xf32>
    %994 = arith.mulf %993, %992 : vector<8x128xf32>
    %995 = math.tanh %994 : vector<8x128xf32>
    %cst_464 = arith.constant 5.000000e-01 : f32
    %996 = vector.broadcast %cst_464 : f32 to vector<8x128xf32>
    %997 = arith.mulf %996, %995 : vector<8x128xf32>
    %cst_465 = arith.constant 5.000000e-01 : f32
    %998 = vector.broadcast %cst_465 : f32 to vector<8x128xf32>
    %999 = arith.addf %997, %998 : vector<8x128xf32>
    %1000 = vector.extract_strided_slice %983 {offsets = [0, 256], sizes = [8, 128], strides = [1, 1]} : vector<8x512xf32> to vector<8x128xf32>
    %1001 = math.tanh %1000 : vector<8x128xf32>
    %1002 = vector.extract_strided_slice %983 {offsets = [0, 384], sizes = [8, 128], strides = [1, 1]} : vector<8x512xf32> to vector<8x128xf32>
    %cst_466 = arith.constant 5.000000e-01 : f32
    %1003 = vector.broadcast %cst_466 : f32 to vector<8x128xf32>
    %1004 = arith.mulf %1003, %1002 : vector<8x128xf32>
    %1005 = math.tanh %1004 : vector<8x128xf32>
    %cst_467 = arith.constant 5.000000e-01 : f32
    %1006 = vector.broadcast %cst_467 : f32 to vector<8x128xf32>
    %1007 = arith.mulf %1006, %1005 : vector<8x128xf32>
    %cst_468 = arith.constant 5.000000e-01 : f32
    %1008 = vector.broadcast %cst_468 : f32 to vector<8x128xf32>
    %1009 = arith.addf %1007, %1008 : vector<8x128xf32>
    %1010 = arith.mulf %999, %972 : vector<8x128xf32>
    %1011 = arith.mulf %991, %1001 : vector<8x128xf32>
    %1012 = arith.addf %1010, %1011 : vector<8x128xf32>
    %1013 = math.tanh %1012 : vector<8x128xf32>
    %1014 = arith.mulf %1009, %1013 : vector<8x128xf32>
    %c5_i32_469 = arith.constant 5 : i32
    %c8_i32_470 = arith.constant 8 : i32
    %1015 = arith.muli %c5_i32_469, %c8_i32_470 : i32
    %1016 = tpu.assume_multiple %1015, 8 : i32
    %1017 = arith.index_cast %1016 : i32 to index
    %c0_471 = arith.constant 0 : index
    %1018 = vector.load %arg14[%1017, %c0_471] : memref<64x512xf32, #tpu.memory_space<vmem>>, vector<8x512xf32>
    %1019 = arith.truncf %1014 : vector<8x128xf32> to vector<8x128xbf16>
    %c2_472 = arith.constant 2 : index
    %c0_473 = arith.constant 0 : index
    %c0_474 = arith.constant 0 : index
    %1020 = vector.load %arg3[%c2_472, %c0_473, %c0_474] : memref<3x128x512xbf16, #tpu.memory_space<vmem>>, vector<1x128x512xbf16>
    %1021 = vector.shape_cast %1020 : vector<1x128x512xbf16> to vector<128x512xbf16>
    %cst_475 = arith.constant dense<0.000000e+00> : vector<8x512xf32>
    %1022 = tpu.matmul %1019, %1021, %cst_475 {dimension_numbers = #tpu.dot_dimension_numbers<[1], [0], [0], [1], [0, 0, 1, 1], [], []>} : vector<8x128xbf16>, vector<128x512xbf16>, vector<8x512xf32> -> vector<8x512xf32>
    %1023 = arith.addf %1018, %1022 : vector<8x512xf32>
    %1024 = vector.extract_strided_slice %1023 {offsets = [0, 0], sizes = [8, 128], strides = [1, 1]} : vector<8x512xf32> to vector<8x128xf32>
    %cst_476 = arith.constant 5.000000e-01 : f32
    %1025 = vector.broadcast %cst_476 : f32 to vector<8x128xf32>
    %1026 = arith.mulf %1025, %1024 : vector<8x128xf32>
    %1027 = math.tanh %1026 : vector<8x128xf32>
    %cst_477 = arith.constant 5.000000e-01 : f32
    %1028 = vector.broadcast %cst_477 : f32 to vector<8x128xf32>
    %1029 = arith.mulf %1028, %1027 : vector<8x128xf32>
    %cst_478 = arith.constant 5.000000e-01 : f32
    %1030 = vector.broadcast %cst_478 : f32 to vector<8x128xf32>
    %1031 = arith.addf %1029, %1030 : vector<8x128xf32>
    %1032 = vector.extract_strided_slice %1023 {offsets = [0, 128], sizes = [8, 128], strides = [1, 1]} : vector<8x512xf32> to vector<8x128xf32>
    %cst_479 = arith.constant 5.000000e-01 : f32
    %1033 = vector.broadcast %cst_479 : f32 to vector<8x128xf32>
    %1034 = arith.mulf %1033, %1032 : vector<8x128xf32>
    %1035 = math.tanh %1034 : vector<8x128xf32>
    %cst_480 = arith.constant 5.000000e-01 : f32
    %1036 = vector.broadcast %cst_480 : f32 to vector<8x128xf32>
    %1037 = arith.mulf %1036, %1035 : vector<8x128xf32>
    %cst_481 = arith.constant 5.000000e-01 : f32
    %1038 = vector.broadcast %cst_481 : f32 to vector<8x128xf32>
    %1039 = arith.addf %1037, %1038 : vector<8x128xf32>
    %1040 = vector.extract_strided_slice %1023 {offsets = [0, 256], sizes = [8, 128], strides = [1, 1]} : vector<8x512xf32> to vector<8x128xf32>
    %1041 = math.tanh %1040 : vector<8x128xf32>
    %1042 = vector.extract_strided_slice %1023 {offsets = [0, 384], sizes = [8, 128], strides = [1, 1]} : vector<8x512xf32> to vector<8x128xf32>
    %cst_482 = arith.constant 5.000000e-01 : f32
    %1043 = vector.broadcast %cst_482 : f32 to vector<8x128xf32>
    %1044 = arith.mulf %1043, %1042 : vector<8x128xf32>
    %1045 = math.tanh %1044 : vector<8x128xf32>
    %cst_483 = arith.constant 5.000000e-01 : f32
    %1046 = vector.broadcast %cst_483 : f32 to vector<8x128xf32>
    %1047 = arith.mulf %1046, %1045 : vector<8x128xf32>
    %cst_484 = arith.constant 5.000000e-01 : f32
    %1048 = vector.broadcast %cst_484 : f32 to vector<8x128xf32>
    %1049 = arith.addf %1047, %1048 : vector<8x128xf32>
    %1050 = arith.mulf %1039, %1012 : vector<8x128xf32>
    %1051 = arith.mulf %1031, %1041 : vector<8x128xf32>
    %1052 = arith.addf %1050, %1051 : vector<8x128xf32>
    %1053 = math.tanh %1052 : vector<8x128xf32>
    %1054 = arith.mulf %1049, %1053 : vector<8x128xf32>
    %c6_i32_485 = arith.constant 6 : i32
    %c8_i32_486 = arith.constant 8 : i32
    %1055 = arith.muli %c6_i32_485, %c8_i32_486 : i32
    %1056 = tpu.assume_multiple %1055, 8 : i32
    %1057 = arith.index_cast %1056 : i32 to index
    %c0_487 = arith.constant 0 : index
    %1058 = vector.load %arg14[%1057, %c0_487] : memref<64x512xf32, #tpu.memory_space<vmem>>, vector<8x512xf32>
    %1059 = arith.truncf %1054 : vector<8x128xf32> to vector<8x128xbf16>
    %c2_488 = arith.constant 2 : index
    %c0_489 = arith.constant 0 : index
    %c0_490 = arith.constant 0 : index
    %1060 = vector.load %arg3[%c2_488, %c0_489, %c0_490] : memref<3x128x512xbf16, #tpu.memory_space<vmem>>, vector<1x128x512xbf16>
    %1061 = vector.shape_cast %1060 : vector<1x128x512xbf16> to vector<128x512xbf16>
    %cst_491 = arith.constant dense<0.000000e+00> : vector<8x512xf32>
    %1062 = tpu.matmul %1059, %1061, %cst_491 {dimension_numbers = #tpu.dot_dimension_numbers<[1], [0], [0], [1], [0, 0, 1, 1], [], []>} : vector<8x128xbf16>, vector<128x512xbf16>, vector<8x512xf32> -> vector<8x512xf32>
    %1063 = arith.addf %1058, %1062 : vector<8x512xf32>
    %1064 = vector.extract_strided_slice %1063 {offsets = [0, 0], sizes = [8, 128], strides = [1, 1]} : vector<8x512xf32> to vector<8x128xf32>
    %cst_492 = arith.constant 5.000000e-01 : f32
    %1065 = vector.broadcast %cst_492 : f32 to vector<8x128xf32>
    %1066 = arith.mulf %1065, %1064 : vector<8x128xf32>
    %1067 = math.tanh %1066 : vector<8x128xf32>
    %cst_493 = arith.constant 5.000000e-01 : f32
    %1068 = vector.broadcast %cst_493 : f32 to vector<8x128xf32>
    %1069 = arith.mulf %1068, %1067 : vector<8x128xf32>
    %cst_494 = arith.constant 5.000000e-01 : f32
    %1070 = vector.broadcast %cst_494 : f32 to vector<8x128xf32>
    %1071 = arith.addf %1069, %1070 : vector<8x128xf32>
    %1072 = vector.extract_strided_slice %1063 {offsets = [0, 128], sizes = [8, 128], strides = [1, 1]} : vector<8x512xf32> to vector<8x128xf32>
    %cst_495 = arith.constant 5.000000e-01 : f32
    %1073 = vector.broadcast %cst_495 : f32 to vector<8x128xf32>
    %1074 = arith.mulf %1073, %1072 : vector<8x128xf32>
    %1075 = math.tanh %1074 : vector<8x128xf32>
    %cst_496 = arith.constant 5.000000e-01 : f32
    %1076 = vector.broadcast %cst_496 : f32 to vector<8x128xf32>
    %1077 = arith.mulf %1076, %1075 : vector<8x128xf32>
    %cst_497 = arith.constant 5.000000e-01 : f32
    %1078 = vector.broadcast %cst_497 : f32 to vector<8x128xf32>
    %1079 = arith.addf %1077, %1078 : vector<8x128xf32>
    %1080 = vector.extract_strided_slice %1063 {offsets = [0, 256], sizes = [8, 128], strides = [1, 1]} : vector<8x512xf32> to vector<8x128xf32>
    %1081 = math.tanh %1080 : vector<8x128xf32>
    %1082 = vector.extract_strided_slice %1063 {offsets = [0, 384], sizes = [8, 128], strides = [1, 1]} : vector<8x512xf32> to vector<8x128xf32>
    %cst_498 = arith.constant 5.000000e-01 : f32
    %1083 = vector.broadcast %cst_498 : f32 to vector<8x128xf32>
    %1084 = arith.mulf %1083, %1082 : vector<8x128xf32>
    %1085 = math.tanh %1084 : vector<8x128xf32>
    %cst_499 = arith.constant 5.000000e-01 : f32
    %1086 = vector.broadcast %cst_499 : f32 to vector<8x128xf32>
    %1087 = arith.mulf %1086, %1085 : vector<8x128xf32>
    %cst_500 = arith.constant 5.000000e-01 : f32
    %1088 = vector.broadcast %cst_500 : f32 to vector<8x128xf32>
    %1089 = arith.addf %1087, %1088 : vector<8x128xf32>
    %1090 = arith.mulf %1079, %1052 : vector<8x128xf32>
    %1091 = arith.mulf %1071, %1081 : vector<8x128xf32>
    %1092 = arith.addf %1090, %1091 : vector<8x128xf32>
    %1093 = math.tanh %1092 : vector<8x128xf32>
    %1094 = arith.mulf %1089, %1093 : vector<8x128xf32>
    %c7_i32_501 = arith.constant 7 : i32
    %c8_i32_502 = arith.constant 8 : i32
    %1095 = arith.muli %c7_i32_501, %c8_i32_502 : i32
    %1096 = tpu.assume_multiple %1095, 8 : i32
    %1097 = arith.index_cast %1096 : i32 to index
    %c0_503 = arith.constant 0 : index
    %1098 = vector.load %arg14[%1097, %c0_503] : memref<64x512xf32, #tpu.memory_space<vmem>>, vector<8x512xf32>
    %1099 = arith.truncf %1094 : vector<8x128xf32> to vector<8x128xbf16>
    %c2_504 = arith.constant 2 : index
    %c0_505 = arith.constant 0 : index
    %c0_506 = arith.constant 0 : index
    %1100 = vector.load %arg3[%c2_504, %c0_505, %c0_506] : memref<3x128x512xbf16, #tpu.memory_space<vmem>>, vector<1x128x512xbf16>
    %1101 = vector.shape_cast %1100 : vector<1x128x512xbf16> to vector<128x512xbf16>
    %cst_507 = arith.constant dense<0.000000e+00> : vector<8x512xf32>
    %1102 = tpu.matmul %1099, %1101, %cst_507 {dimension_numbers = #tpu.dot_dimension_numbers<[1], [0], [0], [1], [0, 0, 1, 1], [], []>} : vector<8x128xbf16>, vector<128x512xbf16>, vector<8x512xf32> -> vector<8x512xf32>
    %1103 = arith.addf %1098, %1102 : vector<8x512xf32>
    %1104 = vector.extract_strided_slice %1103 {offsets = [0, 0], sizes = [8, 128], strides = [1, 1]} : vector<8x512xf32> to vector<8x128xf32>
    %cst_508 = arith.constant 5.000000e-01 : f32
    %1105 = vector.broadcast %cst_508 : f32 to vector<8x128xf32>
    %1106 = arith.mulf %1105, %1104 : vector<8x128xf32>
    %1107 = math.tanh %1106 : vector<8x128xf32>
    %cst_509 = arith.constant 5.000000e-01 : f32
    %1108 = vector.broadcast %cst_509 : f32 to vector<8x128xf32>
    %1109 = arith.mulf %1108, %1107 : vector<8x128xf32>
    %cst_510 = arith.constant 5.000000e-01 : f32
    %1110 = vector.broadcast %cst_510 : f32 to vector<8x128xf32>
    %1111 = arith.addf %1109, %1110 : vector<8x128xf32>
    %1112 = vector.extract_strided_slice %1103 {offsets = [0, 128], sizes = [8, 128], strides = [1, 1]} : vector<8x512xf32> to vector<8x128xf32>
    %cst_511 = arith.constant 5.000000e-01 : f32
    %1113 = vector.broadcast %cst_511 : f32 to vector<8x128xf32>
    %1114 = arith.mulf %1113, %1112 : vector<8x128xf32>
    %1115 = math.tanh %1114 : vector<8x128xf32>
    %cst_512 = arith.constant 5.000000e-01 : f32
    %1116 = vector.broadcast %cst_512 : f32 to vector<8x128xf32>
    %1117 = arith.mulf %1116, %1115 : vector<8x128xf32>
    %cst_513 = arith.constant 5.000000e-01 : f32
    %1118 = vector.broadcast %cst_513 : f32 to vector<8x128xf32>
    %1119 = arith.addf %1117, %1118 : vector<8x128xf32>
    %1120 = vector.extract_strided_slice %1103 {offsets = [0, 256], sizes = [8, 128], strides = [1, 1]} : vector<8x512xf32> to vector<8x128xf32>
    %1121 = math.tanh %1120 : vector<8x128xf32>
    %1122 = vector.extract_strided_slice %1103 {offsets = [0, 384], sizes = [8, 128], strides = [1, 1]} : vector<8x512xf32> to vector<8x128xf32>
    %cst_514 = arith.constant 5.000000e-01 : f32
    %1123 = vector.broadcast %cst_514 : f32 to vector<8x128xf32>
    %1124 = arith.mulf %1123, %1122 : vector<8x128xf32>
    %1125 = math.tanh %1124 : vector<8x128xf32>
    %cst_515 = arith.constant 5.000000e-01 : f32
    %1126 = vector.broadcast %cst_515 : f32 to vector<8x128xf32>
    %1127 = arith.mulf %1126, %1125 : vector<8x128xf32>
    %cst_516 = arith.constant 5.000000e-01 : f32
    %1128 = vector.broadcast %cst_516 : f32 to vector<8x128xf32>
    %1129 = arith.addf %1127, %1128 : vector<8x128xf32>
    %1130 = arith.mulf %1119, %1092 : vector<8x128xf32>
    %1131 = arith.mulf %1111, %1121 : vector<8x128xf32>
    %1132 = arith.addf %1130, %1131 : vector<8x128xf32>
    %1133 = math.tanh %1132 : vector<8x128xf32>
    %1134 = arith.mulf %1129, %1133 : vector<8x128xf32>
    %c8_i32_517 = arith.constant 8 : i32
    %c0_518 = arith.constant 0 : index
    %c0_519 = arith.constant 0 : index
    %1135 = vector.load %arg5[%c0_518, %c0_519] : memref<1x128xf32, #tpu.memory_space<vmem>>, vector<1x128xf32>
    %1136 = vector.broadcast %1135 : vector<1x128xf32> to vector<8x128xf32>
    %1137 = arith.mulf %1134, %1136 : vector<8x128xf32>
    %c0_520 = arith.constant 0 : index
    %c0_521 = arith.constant 0 : index
    %1138 = vector.load %arg6[%c0_520, %c0_521] : memref<1x128xf32, #tpu.memory_space<vmem>>, vector<1x128xf32>
    %1139 = vector.broadcast %1138 : vector<1x128xf32> to vector<8x128xf32>
    %1140 = arith.addf %1137, %1139 : vector<8x128xf32>
    %1141 = arith.truncf %1140 : vector<8x128xf32> to vector<8x128xbf16>
    %c0_522 = arith.constant 0 : index
    %c0_523 = arith.constant 0 : index
    %1142 = vector.load %arg7[%c0_522, %c0_523] : memref<128x64xbf16, #tpu.memory_space<vmem>>, vector<128x64xbf16>
    %cst_524 = arith.constant dense<0.000000e+00> : vector<8x64xf32>
    %1143 = tpu.matmul %1141, %1142, %cst_524 {dimension_numbers = #tpu.dot_dimension_numbers<[1], [0], [0], [1], [0, 0, 1, 1], [], []>} : vector<8x128xbf16>, vector<128x64xbf16>, vector<8x64xf32> -> vector<8x64xf32>
    %c0_525 = arith.constant 0 : index
    %c0_526 = arith.constant 0 : index
    %1144 = vector.load %arg8[%c0_525, %c0_526] : memref<1x64xf32, #tpu.memory_space<vmem>>, vector<1x64xf32>
    %1145 = vector.broadcast %1144 : vector<1x64xf32> to vector<8x64xf32>
    %1146 = arith.addf %1143, %1145 : vector<8x64xf32>
    %c0_527 = arith.constant 0 : index
    %c0_528 = arith.constant 0 : index
    %1147 = vector.load %arg9[%c0_527, %c0_528] : memref<1x64xf32, #tpu.memory_space<vmem>>, vector<1x64xf32>
    %1148 = vector.broadcast %1147 : vector<1x64xf32> to vector<8x64xf32>
    %1149 = arith.mulf %1146, %1148 : vector<8x64xf32>
    %c0_529 = arith.constant 0 : index
    %c0_530 = arith.constant 0 : index
    %1150 = vector.load %arg10[%c0_529, %c0_530] : memref<1x64xf32, #tpu.memory_space<vmem>>, vector<1x64xf32>
    %1151 = vector.broadcast %1150 : vector<1x64xf32> to vector<8x64xf32>
    %1152 = arith.addf %1149, %1151 : vector<8x64xf32>
    %cst_531 = arith.constant 0.000000e+00 : f32
    %1153 = vector.broadcast %cst_531 : f32 to vector<8x64xf32>
    %1154 = arith.maximumf %1152, %1153 : vector<8x64xf32>
    %1155 = arith.truncf %1154 : vector<8x64xf32> to vector<8x64xbf16>
    %c0_532 = arith.constant 0 : index
    %c0_533 = arith.constant 0 : index
    %1156 = vector.load %arg11[%c0_532, %c0_533] : memref<64x2xbf16, #tpu.memory_space<vmem>>, vector<64x2xbf16>
    %cst_534 = arith.constant dense<0.000000e+00> : vector<8x2xf32>
    %1157 = tpu.matmul %1155, %1156, %cst_534 {dimension_numbers = #tpu.dot_dimension_numbers<[1], [0], [0], [1], [0, 0, 1, 1], [], []>} : vector<8x64xbf16>, vector<64x2xbf16>, vector<8x2xf32> -> vector<8x2xf32>
    %c0_535 = arith.constant 0 : index
    %c0_536 = arith.constant 0 : index
    %1158 = vector.load %arg12[%c0_535, %c0_536] : memref<1x2xf32, #tpu.memory_space<vmem>>, vector<1x2xf32>
    %1159 = vector.broadcast %1158 : vector<1x2xf32> to vector<8x2xf32>
    %1160 = arith.addf %1157, %1159 : vector<8x2xf32>
    %cst_537 = arith.constant dense<0xFF800000> : vector<8xf32>
    %1161 = vector.multi_reduction <maximumf>, %1160, %cst_537 [1] : vector<8x2xf32> to vector<8xf32>
    %1162 = vector.shape_cast %1161 : vector<8xf32> to vector<8x1xf32>
    %1163 = vector.broadcast %1162 : vector<8x1xf32> to vector<8x2xf32>
    %1164 = arith.subf %1160, %1163 : vector<8x2xf32>
    %1165 = math.exp %1164 : vector<8x2xf32>
    %cst_538 = arith.constant dense<0.000000e+00> : vector<8xf32>
    %1166 = vector.multi_reduction <add>, %1165, %cst_538 [1] : vector<8x2xf32> to vector<8xf32>
    %1167 = vector.shape_cast %1166 : vector<8xf32> to vector<8x1xf32>
    %1168 = vector.broadcast %1167 : vector<8x1xf32> to vector<8x2xf32>
    %1169 = arith.divf %1165, %1168 : vector<8x2xf32>
    %c0_539 = arith.constant 0 : index
    %c0_540 = arith.constant 0 : index
    %1170 = vector.load %arg13[%c0_539, %c0_540] : memref<8x2xf32, #tpu.memory_space<vmem>>, vector<8x2xf32>
    tpu.vector_store %arg13[%c0_539, %c0_540], %1169 {strides = array<i32>} : memref<8x2xf32, #tpu.memory_space<vmem>>, vector<8x2xf32>,
    return
  }
}

</mosaic_0001>

<bundles_post_ra>
// kernel: lstm_model_forward.1
= control target key start
LH: loop header
LB: loop body
LE: loop exit
PB: predicated region body
PF: predicated region fallthrough
CT: control target
= control target key end

     0   :  { %v18170_v1 = vmov 0   ;;  %vm103_vm0 = vcmask 130048   ;;  %vm14120_vm1 = vmmov 0   ;;  %vm11203_vm2 = vcmask 523264   ;;  %s18156_s1 = inlined_call_operand.vmem [shape: bf16[16,512], index: 1, kind: input, shape index: {}]   ;;  %s18157_s0 = inlined_call_operand.vmem [shape: f32[64,16], index: 0, kind: input, shape index: {}]   ;;  %s18158_s3 = inlined_call_operand.vmem [shape: bf16[3,128,512], index: 3, kind: input, shape index: {}]   ;;  %s18159_s2 = inlined_call_operand.vmem [shape: bf16[2,128,512], index: 2, kind: input, shape index: {}]   ;;  %s18160_s4 = inlined_call_operand.vmem [shape: f32[3,1,512], index: 4, kind: input, shape index: {}]   ;;  %s18161_s7 = inlined_call_operand.vmem [shape: bf16[128,64], index: 7, kind: input, shape index: {}]   ;;  %s18162_s11 = inlined_call_operand.vmem [shape: bf16[64,2], index: 11, kind: input, shape index: {}]   ;;  %s18163_s5 = inlined_call_operand.vmem [shape: f32[1,128], index: 5, kind: input, shape index: {}]   ;;  %s18164_s6 = inlined_call_operand.vmem [shape: f32[1,128], index: 6, kind: input, shape index: {}]   ;;  %s18165_s8 = inlined_call_operand.vmem [shape: f32[1,64], index: 8, kind: input, shape index: {}]   ;;  %s18166_s9 = inlined_call_operand.vmem [shape: f32[1,64], index: 9, kind: input, shape index: {}]   ;;  %s18167_s10 = inlined_call_operand.vmem [shape: f32[1,64], index: 10, kind: input, shape index: {}]   ;;  %s18168_s12 = inlined_call_operand.vmem [shape: f32[1,2], index: 12, kind: input, shape index: {}]   ;;  %s18169_s13 = inlined_call_operand.vmem [shape: f32[8,2], index: 13, kind: output, shape index: {}]  }
   0x1   :  { %v13166_v0 = vld [vmem:[%s18156_s1 + $0x4] ss:$16 sps:$4 sm:$0xff]   ;;  %148 = vmatprep.mubr.bf16.mxu0 %v18170_v1  ;;  %221 = vmatprep.mubr.bf16.mxu1 %v18170_v1  ;;  %v13168_v2 = vld [vmem:[%s18156_s1 + $0xc] ss:$16 sps:$4 sm:$0xff]   ;;  %v13170_v3 = vld [vmem:[%s18156_s1] ss:$16 sps:$4 sm:$0xff]  }
   0x2   :  { %116 = vmatprep.subr.bf16.mxu0 %v13166_v0  ;;  %v13171_v4 = vld [vmem:[%s18156_s1 + $0x8] ss:$16 sps:$4 sm:$0xff]   ;;  %v45_v5 = vld [vmem:[%s18157_s0] sm:$0xff]  ;;  %189 = vmatprep.subr.bf16.mxu1 %v13168_v2  ;;  %v14225_v11 = vld [vmem:[%s18158_s3 + $0xc] ss:$16 sps:$4 sm:$0xff]   ;;  %vm11247_vm3 = vcmask 15360  }
   0x3   :  { %v46_v6 = vld [vmem:[%s18157_s0 + $0x8] sm:$0xff]  ;;  %117 = vmatpush1.bf16.msra.mxu0 %v13170_v3  ;;  %190 = vmatpush1.bf16.msra.mxu1 %v13171_v4  ;;  %v13172_v8 = vld [vmem:[%s18158_s3] ss:$16 sps:$4 sm:$0xff]   ;;  %v14217_v9 = vld [vmem:[%s18158_s3 + $0x4] ss:$16 sps:$4 sm:$0xff]  }
   0x4   :  { %v53_v7 = vpack.c.bf16 %v46_v6, %v45_v5  ;;  %v13175_v10 = vld [vmem:[%s18158_s3 + $0x8] ss:$16 sps:$4 sm:$0xff]   ;;  %493 = vmatprep.subr.bf16.mxu0 %v14217_v9  ;;  %v13178_v12 = vld [vmem:[%s18158_s3 + $0x20] ss:$16 sps:$4 sm:$0xff]   ;;  %v13180_v13 = vld [vmem:[%s18158_s3 + $0x24] ss:$16 sps:$4 sm:$0xff]   ;;  %534 = vmatprep.subr.bf16.mxu1 %v14225_v11 }
   0x5   :  { %v13181_v14 = vld [vmem:[%s18158_s3 + $0x28] ss:$16 sps:$4 sm:$0xff]   ;;  %v13183_v15 = vld [vmem:[%s18158_s3 + $0x2c] ss:$16 sps:$4 sm:$0xff]   ;;  %v47_v16 = vld [vmem:[%s18157_s0 + $0x10] sm:$0xff] }
   0x6   :  { %11282 = vmatmul.mubr.msk.bf16.vlgmr.msra.gmra.mrb[0].mxu0 %vm103_vm0, %v53_v7  ;;  %11286 = vmatmul.mubr.msk.bf16.vlgmr.msra.gmra.mrb[0].mxu1 %vm103_vm0, %v53_v7  ;;  %v48_v17 = vld [vmem:[%s18157_s0 + $0x18] sm:$0xff]  ;;  %v13186_v18 = vld [vmem:[%s18158_s3 + $0x44] ss:$16 sps:$4 sm:$0xff]   ;;  %v13184_v20 = vld [vmem:[%s18158_s3 + $0x40] ss:$16 sps:$4 sm:$0xff]  }
   0x7   :  { %494 = vmatpush1.bf16.msra.mxu0 %v13172_v8  ;;  %535 = vmatpush1.bf16.msra.mxu1 %v13175_v10  ;;  %v54_v19 = vpack.c.bf16 %v48_v17, %v47_v16  ;;  %v13189_v21 = vld [vmem:[%s18158_s3 + $0x4c] ss:$16 sps:$4 sm:$0xff]   ;;  %v13187_v22 = vld [vmem:[%s18158_s3 + $0x48] ss:$16 sps:$4 sm:$0xff]   ;;  %v13192_v23 = vld [vmem:[%s18158_s3 + $0x64] ss:$16 sps:$4 sm:$0xff]  }
   0x8   :  { %495 = vmatprep.subr.bf16.mxu0 %v13180_v13  ;;  %536 = vmatprep.subr.bf16.mxu1 %v13183_v15  ;;  %v13195_v24 = vld [vmem:[%s18158_s3 + $0x6c] ss:$16 sps:$4 sm:$0xff]   ;;  %v13190_v25 = vld [vmem:[%s18158_s3 + $0x60] ss:$16 sps:$4 sm:$0xff]   ;;  %v13193_v28 = vld [vmem:[%s18158_s3 + $0x68] ss:$16 sps:$4 sm:$0xff]  }
   0x9   :  { %158 = vmatprep.mubr.bf16.mxu0 %v18170_v1  ;;  %231 = vmatprep.mubr.bf16.mxu1 %v18170_v1  ;;  %v49_v26 = vld [vmem:[%s18157_s0 + $0x20] sm:$0xff]  ;;  %v50_v27 = vld [vmem:[%s18157_s0 + $0x28] sm:$0xff]  ;;  %v51_v38 = vld [vmem:[%s18157_s0 + $0x30] sm:$0xff] }
   0xa   :  { %v13198_v29 = vld [vmem:[%s18158_s3 + $0x84] ss:$16 sps:$4 sm:$0xff]   ;;  %v13201_v30 = vld [vmem:[%s18158_s3 + $0x8c] ss:$16 sps:$4 sm:$0xff]   ;;  %v55_v31 = vpack.c.bf16 %v50_v27, %v49_v26  ;;  %v13196_v32 = vld [vmem:[%s18158_s3 + $0x80] ss:$16 sps:$4 sm:$0xff]  }
   0xb   :  { %496 = vmatpush1.bf16.msra.mxu0 %v13178_v12  ;;  %537 = vmatpush1.bf16.msra.mxu1 %v13181_v14  ;;  %v13199_v33 = vld [vmem:[%s18158_s3 + $0x88] ss:$16 sps:$4 sm:$0xff]   ;;  %v13204_v34 = vld [vmem:[%s18158_s3 + $0xa4] ss:$16 sps:$4 sm:$0xff]   ;;  %v13202_v35 = vld [vmem:[%s18158_s3 + $0xa0] ss:$16 sps:$4 sm:$0xff]  }
   0xc   :  { %497 = vmatprep.subr.bf16.mxu0 %v13186_v18  ;;  %538 = vmatprep.subr.bf16.mxu1 %v13189_v21  ;;  %v13207_v36 = vld [vmem:[%s18158_s3 + $0xac] ss:$16 sps:$4 sm:$0xff]   ;;  %v13205_v37 = vld [vmem:[%s18158_s3 + $0xa8] ss:$16 sps:$4 sm:$0xff]   ;;  %v13210_v40 = vld [vmem:[%s18158_s3 + $0xc4] ss:$16 sps:$4 sm:$0xff]  }
   0xd   :  { %v52_v39 = vld [vmem:[%s18157_s0 + $0x38] sm:$0xff]  ;;  %v13208_v41 = vld [vmem:[%s18158_s3 + $0xc0] ss:$16 sps:$4 sm:$0xff]   ;;  %v13216_v45 = vld [vmem:[%s18158_s3 + $0xe4] ss:$16 sps:$4 sm:$0xff]  }
   0xe   :  { %11283 = vmatmul.mubr.msk.bf16.gmra.mrb[4].mxu0 %vm103_vm0, %v54_v19  ;;  %11287 = vmatmul.mubr.msk.bf16.gmra.mrb[4].mxu1 %vm103_vm0, %v54_v19  ;;  %v13213_v42 = vld [vmem:[%s18158_s3 + $0xcc] ss:$16 sps:$4 sm:$0xff]   ;;  %v56_v43 = vpack.c.bf16 %v52_v39, %v51_v38  ;;  %v13211_v44 = vld [vmem:[%s18158_s3 + $0xc8] ss:$16 sps:$4 sm:$0xff]   ;;  %v13214_v47 = vld [vmem:[%s18158_s3 + $0xe0] ss:$16 sps:$4 sm:$0xff]  }
   0xf   :  { %498 = vmatpush1.bf16.msra.mxu0 %v13184_v20  ;;  %168 = vmatprep.mubr.bf16.mxu0 %v18170_v1  ;;  %v13219_v46 = vld [vmem:[%s18158_s3 + $0xec] ss:$16 sps:$4 sm:$0xff]   ;;  %v13217_v48 = vld [vmem:[%s18158_s3 + $0xe8] ss:$16 sps:$4 sm:$0xff]   ;;  %v14354_v49 = vld [vmem:[%s18159_s2 + $0x4] ss:$16 sps:$4 sm:$0xff]   ;;  %v63_v20 = vlaneseq }
  0x10   :  { %539 = vmatpush1.bf16.msra.mxu1 %v13187_v22  ;;  %499 = vmatprep.subr.bf16.mxu0 %v13192_v23  ;;  %v14359_v50 = vld [vmem:[%s18159_s2] ss:$16 sps:$4 sm:$0xff]   ;;  %v14365_v51 = vld [vmem:[%s18159_s2 + $0x8] ss:$16 sps:$4 sm:$0xff]   ;;  %v14370_v52 = vld [vmem:[%s18159_s2 + $0xc] ss:$16 sps:$4 sm:$0xff]  }
  0x11   :  { %540 = vmatprep.subr.bf16.mxu1 %v13195_v24  ;;  %241 = vmatprep.mubr.bf16.mxu1 %v18170_v1  ;;  %v14377_v53 = vld [vmem:[%s18159_s2 + $0x24] ss:$16 sps:$4 sm:$0xff]   ;;  %v14382_v54 = vld [vmem:[%s18159_s2 + $0x2c] ss:$16 sps:$4 sm:$0xff]   ;;  %v14388_v55 = vld [vmem:[%s18159_s2 + $0x20] ss:$16 sps:$4 sm:$0xff]  }
  0x12   :  { %v14393_v56 = vld [vmem:[%s18159_s2 + $0x28] ss:$16 sps:$4 sm:$0xff]   ;;  %v14401_v57 = vld [vmem:[%s18159_s2 + $0x44] ss:$16 sps:$4 sm:$0xff]   ;;  %v14406_v58 = vld [vmem:[%s18159_s2 + $0x4c] ss:$16 sps:$4 sm:$0xff]  }
  0x13   :  { %500 = vmatpush1.bf16.msra.mxu0 %v13190_v25  ;;  %v14412_v59 = vld [vmem:[%s18159_s2 + $0x40] ss:$16 sps:$4 sm:$0xff]   ;;  %v14417_v60 = vld [vmem:[%s18159_s2 + $0x48] ss:$16 sps:$4 sm:$0xff]   ;;  %v14425_v61 = vld [vmem:[%s18159_s2 + $0x64] ss:$16 sps:$4 sm:$0xff]  }
  0x14   :  { %541 = vmatpush1.bf16.msra.mxu1 %v13193_v28  ;;  %501 = vmatprep.subr.bf16.mxu0 %v13198_v29  ;;  %v14430_v62 = vld [vmem:[%s18159_s2 + $0x6c] ss:$16 sps:$4 sm:$0xff]   ;;  %v14436_v63 = vld [vmem:[%s18159_s2 + $0x60] ss:$16 sps:$4 sm:$0xff]   ;;  %v14441_v0 = vld [vmem:[%s18159_s2 + $0x68] ss:$16 sps:$4 sm:$0xff]  }
  0x15   :  { %542 = vmatprep.subr.bf16.mxu1 %v13201_v30  ;;  %v14449_v2 = vld [vmem:[%s18159_s2 + $0x84] ss:$16 sps:$4 sm:$0xff]   ;;  %v14454_v3 = vld [vmem:[%s18159_s2 + $0x8c] ss:$16 sps:$4 sm:$0xff]   ;;  %v14460_v4 = vld [vmem:[%s18159_s2 + $0x80] ss:$16 sps:$4 sm:$0xff]  }
  0x16   :  { %11284 = vmatmul.mubr.msk.bf16.gmra.mrb[8].mxu0 %vm103_vm0, %v55_v31  ;;  %11288 = vmatmul.mubr.msk.bf16.gmra.mrb[8].mxu1 %vm103_vm0, %v55_v31  ;;  %v14465_v5 = vld [vmem:[%s18159_s2 + $0x88] ss:$16 sps:$4 sm:$0xff]   ;;  %v14473_v6 = vld [vmem:[%s18159_s2 + $0xa4] ss:$16 sps:$4 sm:$0xff]   ;;  %v14478_v7 = vld [vmem:[%s18159_s2 + $0xac] ss:$16 sps:$4 sm:$0xff]  }
  0x17   :  { %502 = vmatpush1.bf16.msra.mxu0 %v13196_v32  ;;  %178 = vmatprep.mubr.bf16.mxu0 %v18170_v1  ;;  %v14484_v8 = vld [vmem:[%s18159_s2 + $0xa0] ss:$16 sps:$4 sm:$0xff]   ;;  %v14489_v10 = vld [vmem:[%s18159_s2 + $0xa8] ss:$16 sps:$4 sm:$0xff]   ;;  %v14497_v12 = vld [vmem:[%s18159_s2 + $0xc4] ss:$16 sps:$4 sm:$0xff]  }
  0x18   :  { %543 = vmatpush1.bf16.msra.mxu1 %v13199_v33  ;;  %503 = vmatprep.subr.bf16.mxu0 %v13204_v34  ;;  %v14502_v13 = vld [vmem:[%s18159_s2 + $0xcc] ss:$16 sps:$4 sm:$0xff]   ;;  %v14508_v14 = vld [vmem:[%s18159_s2 + $0xc0] ss:$16 sps:$4 sm:$0xff]   ;;  %v14513_v15 = vld [vmem:[%s18159_s2 + $0xc8] ss:$16 sps:$4 sm:$0xff]  }
  0x19   :  { %544 = vmatprep.subr.bf16.mxu1 %v13207_v36  ;;  %251 = vmatprep.mubr.bf16.mxu1 %v18170_v1  ;;  %v14521_v16 = vld [vmem:[%s18159_s2 + $0xe4] ss:$16 sps:$4 sm:$0xff]   ;;  %v14526_v17 = vld [vmem:[%s18159_s2 + $0xec] ss:$16 sps:$4 sm:$0xff]   ;;  %v14532_v18 = vld [vmem:[%s18159_s2 + $0xe0] ss:$16 sps:$4 sm:$0xff]  }
  0x1a   :  { %v14537_v19 = vld [vmem:[%s18159_s2 + $0xe8] ss:$16 sps:$4 sm:$0xff]   ;;  %v64_v21 = vshrl.u32 %v63_v20, 7  ;;  %v61_v25 = vld [vmem:[%s18160_s4] sm:$0xf] }
  0x1b   :  { %504 = vmatpush1.bf16.msra.mxu0 %v13202_v35 }
  0x1c   :  { %545 = vmatpush1.bf16.msra.mxu1 %v13205_v37  ;;  %505 = vmatprep.subr.bf16.mxu0 %v13210_v40  ;;  %v14545_v22 = vsub.s32 2, %v64_v21  ;;  %v14547_v23 = vsub.s32 3, %v64_v21  ;;  %v14549_v24 = vsub.s32 0, %v64_v21  ;;  %v14554_v26 = vsub.s32 1, %v64_v21 }
  0x1d   :  { %546 = vmatprep.subr.bf16.mxu1 %v13213_v42 }
  0x1e   :  { %11285 = vmatmul.mubr.msk.bf16.gmra.mrb[12].mxu0 %vm103_vm0, %v56_v43  ;;  %11289 = vmatmul.mubr.msk.bf16.gmra.mrb[12].mxu1 %vm103_vm0, %v56_v43  ;;  %18373 = vst [vmem:[#allocation4_spill] sm:$0xff] %v14545_v22  ;;  %18374 = vst [vmem:[#allocation5_spill] sm:$0xff] %v14547_v23  ;;  %v14564_v28 = vrot.slane %v61_v25, %v14547_v23  ;;  %v66_v29 = vrot.slane %v61_v25, %v14549_v24 }
  0x1f   :  { %506 = vmatpush1.bf16.msra.mxu0 %v13208_v41  ;;  %525 = vmatprep.mubr.bf16.mxu0 %v18170_v1  ;;  %18375 = vst [vmem:[#allocation6_spill] sm:$0xff] %v14549_v24  ;;  %18376 = vst [vmem:[#allocation7_spill] sm:$0xff] %v14554_v26  ;;  %v70_v32 = vrot.slane %v61_v25, %v14554_v26 }
  0x20   :  { %547 = vmatpush1.bf16.msra.mxu1 %v13211_v44  ;;  %507 = vmatprep.subr.bf16.mxu0 %v13216_v45 }
  0x21   :  { %548 = vmatprep.subr.bf16.mxu1 %v13219_v46  ;;  %566 = vmatprep.mubr.bf16.mxu1 %v18170_v1 }
  0x23   :  { %508 = vmatpush1.bf16.msra.mxu0 %v13214_v47 }
  0x24   :  { %549 = vmatpush1.bf16.msra.mxu1 %v13217_v48  ;;  %813 = vmatprep.subr.bf16.mxu0 %v14354_v49 }
  0x25   :  { %854 = vmatprep.subr.bf16.mxu1 %v14370_v52 }
  0x26   :  { %526 = vmatmul.mubr.bf16.vlgmr.msra.gmra.mrb[16].mxu0 %v18170_v1 }
  0x27   :  { %567 = vmatmul.mubr.bf16.vlgmr.msra.gmra.mrb[16].mxu1 %v18170_v1  ;;  %845 = vmatprep.mubr.bf16.mxu0 %v18170_v1 }
  0x28   :  { %886 = vmatprep.mubr.bf16.mxu1 %v18170_v1  ;;  %814 = vmatpush1.bf16.msra.mxu0 %v14359_v50 }
  0x29   :  { %855 = vmatpush1.bf16.msra.mxu1 %v14365_v51  ;;  %815 = vmatprep.subr.bf16.mxu0 %v14377_v53 }
  0x2a   :  { %856 = vmatprep.subr.bf16.mxu1 %v14382_v54 }
  0x2c   :  { %816 = vmatpush1.bf16.msra.mxu0 %v14388_v55 }
  0x2d   :  { %857 = vmatpush1.bf16.msra.mxu1 %v14393_v56  ;;  %817 = vmatprep.subr.bf16.mxu0 %v14401_v57 }
  0x2e   :  { %858 = vmatprep.subr.bf16.mxu1 %v14406_v58 }
  0x30   :  { %818 = vmatpush1.bf16.msra.mxu0 %v14412_v59 }
  0x31   :  { %859 = vmatpush1.bf16.msra.mxu1 %v14417_v60  ;;  %819 = vmatprep.subr.bf16.mxu0 %v14425_v61 }
  0x32   :  { %860 = vmatprep.subr.bf16.mxu1 %v14430_v62 }
  0x34   :  { %820 = vmatpush1.bf16.msra.mxu0 %v14436_v63 }
  0x35   :  { %861 = vmatpush1.bf16.msra.mxu1 %v14441_v0  ;;  %821 = vmatprep.subr.bf16.mxu0 %v14449_v2 }
  0x36   :  { %862 = vmatprep.subr.bf16.mxu1 %v14454_v3 }
  0x38   :  { %822 = vmatpush1.bf16.msra.mxu0 %v14460_v4 }
  0x39   :  { %863 = vmatpush1.bf16.msra.mxu1 %v14465_v5  ;;  %823 = vmatprep.subr.bf16.mxu0 %v14473_v6 }
  0x3a   :  { %864 = vmatprep.subr.bf16.mxu1 %v14478_v7 }
  0x3c   :  { %824 = vmatpush1.bf16.msra.mxu0 %v14484_v8 }
  0x3d   :  { %865 = vmatpush1.bf16.msra.mxu1 %v14489_v10  ;;  %825 = vmatprep.subr.bf16.mxu0 %v14497_v12 }
  0x3e   :  { %866 = vmatprep.subr.bf16.mxu1 %v14502_v13 }
  0x40   :  { %826 = vmatpush1.bf16.msra.mxu0 %v14508_v14 }
  0x41   :  { %867 = vmatpush1.bf16.msra.mxu1 %v14513_v15  ;;  %827 = vmatprep.subr.bf16.mxu0 %v14521_v16 }
  0x42   :  { %868 = vmatprep.subr.bf16.mxu1 %v14526_v17 }
  0x44   :  { %828 = vmatpush1.bf16.msra.mxu0 %v14532_v18 }
  0x45   :  { %1100 = vmatprep.subr.bf16.mxu0 %v14217_v9  ;;  %869 = vmatpush1.bf16.msra.mxu1 %v14537_v19  ;;  %v14557_v9 = vrot.slane %v61_v25, %v14545_v22 }
  0x46   :  { %1141 = vmatprep.subr.bf16.mxu1 %v14225_v11 }
  0xd9   :  { %v14559_v27 = vpop.f32.mrb[0].mxu0  ;;  %v14561_v11 = vpop.f32.mrb[0].mxu1 }
  0xda   :  { %v152_v30 = vpop.f32.mrb[1].mxu0  ;;  %v225_v31 = vpop.f32.mrb[1].mxu1 }
  0xdb   :  { %v154_v33 = vpop.f32.mrb[2].mxu0  ;;  %v227_v34 = vpop.f32.mrb[2].mxu1 }
  0xdc   :  { %v14568_v35 = vadd.f32 %v154_v33, %v66_v29  ;;  %v156_v36 = vpop.f32.mrb[3].mxu0  ;;  %v14571_v37 = vadd.f32 %v227_v34, %v14557_v9  ;;  %v229_v38 = vpop.f32.mrb[3].mxu1 }
  0xdd   :  { %v14573_v39 = vadd.f32 %v156_v36, %v70_v32  ;;  %v14576_v40 = vadd.f32 %v229_v38, %v14564_v28 }
  0xe1   :  { %v160_v41 = vpop.f32.mrb[4].mxu0  ;;  %v233_v42 = vpop.f32.mrb[4].mxu1 }
  0xe2   :  { %v14578_v43 = vadd.f32 %v160_v41, %v66_v29  ;;  %v162_v44 = vpop.f32.mrb[5].mxu0  ;;  %v14581_v45 = vadd.f32 %v233_v42, %v14557_v9  ;;  %v235_v46 = vpop.f32.mrb[5].mxu1 }
  0xe3   :  { %v14583_v47 = vadd.f32 %v162_v44, %v70_v32  ;;  %v164_v48 = vpop.f32.mrb[6].mxu0  ;;  %v14586_v20 = vadd.f32 %v235_v46, %v14564_v28  ;;  %v237_v21 = vpop.f32.mrb[6].mxu1 }
  0xe4   :  { %v14588_v25 = vadd.f32 %v164_v48, %v66_v29  ;;  %v166_v33 = vpop.f32.mrb[7].mxu0  ;;  %v14591_v34 = vadd.f32 %v237_v21, %v14557_v9  ;;  %v239_v36 = vpop.f32.mrb[7].mxu1 }
  0xe5   :  { %18377 = vst [vmem:[#allocation8_spill] sm:$0xff] %v14586_v20  ;;  %v14593_v38 = vadd.f32 %v166_v33, %v70_v32  ;;  %v14596_v41 = vadd.f32 %v239_v36, %v14564_v28 }
  0xe6   :  { %18378 = vst [vmem:[#allocation9_spill] sm:$0xff] %v14588_v25  ;;  %18379 = vst [vmem:[#allocation10_spill] sm:$0xff] %v14591_v34 }
  0xe7   :  { %18380 = vst [vmem:[#allocation11_spill] sm:$0xff] %v14593_v38  ;;  %18381 = vst [vmem:[#allocation12_spill] sm:$0xff] %v14596_v41 }
  0xe9   :  { %v170_v42 = vpop.f32.mrb[8].mxu0  ;;  %v243_v44 = vpop.f32.mrb[8].mxu1 }
  0xea   :  { %v14598_v1 = vadd.f32 %v170_v42, %v66_v29  ;;  %v172_v23 = vpop.f32.mrb[9].mxu0  ;;  %v14601_v46 = vadd.f32 %v243_v44, %v14557_v9  ;;  %v245_v48 = vpop.f32.mrb[9].mxu1 }
  0xeb   :  { %v14603_v22 = vadd.f32 %v172_v23, %v70_v32  ;;  %v174_v26 = vpop.f32.mrb[10].mxu0  ;;  %v14606_v21 = vadd.f32 %v245_v48, %v14564_v28  ;;  %v247_v33 = vpop.f32.mrb[10].mxu1 }
  0xec   :  { %18382 = vst [vmem:[#allocation13_spill] sm:$0xff] %v14598_v1  ;;  %18383 = vst [vmem:[#allocation14_spill] sm:$0xff] %v14601_v46  ;;  %v14608_v24 = vadd.f32 %v174_v26, %v66_v29  ;;  %v176_v36 = vpop.f32.mrb[11].mxu0  ;;  %v14611_v41 = vadd.f32 %v247_v33, %v14557_v9  ;;  %v249_v42 = vpop.f32.mrb[11].mxu1 }
  0xed   :  { %18384 = vst [vmem:[#allocation15_spill] sm:$0xff] %v14603_v22  ;;  %18385 = vst [vmem:[#allocation16_spill] sm:$0xff] %v14606_v21  ;;  %v14613_v1 = vadd.f32 %v176_v36, %v70_v32  ;;  %v14616_v44 = vadd.f32 %v249_v42, %v14564_v28 }
  0xee   :  { %18386 = vst [vmem:[#allocation17_spill] sm:$0xff] %v14608_v24  ;;  %18387 = vst [vmem:[#allocation18_spill] sm:$0xff] %v14611_v41 }
  0xef   :  { %18388 = vst [vmem:[#allocation19_spill] sm:$0xff] %v14613_v1  ;;  %18389 = vst [vmem:[#allocation20_spill] sm:$0xff] %v14616_v44 }
  0xf1   :  { %v180_v46 = vpop.f32.mrb[12].mxu0  ;;  %v253_v23 = vpop.f32.mrb[12].mxu1 }
  0xf2   :  { %v14618_v22 = vadd.f32 %v180_v46, %v66_v29  ;;  %v182_v38 = vpop.f32.mrb[13].mxu0  ;;  %v14621_v48 = vadd.f32 %v253_v23, %v14557_v9  ;;  %v255_v26 = vpop.f32.mrb[13].mxu1 }
  0xf3   :  { %v14623_v24 = vadd.f32 %v182_v38, %v70_v32  ;;  %v184_v21 = vpop.f32.mrb[14].mxu0  ;;  %v14626_v33 = vadd.f32 %v255_v26, %v14564_v28  ;;  %v257_v36 = vpop.f32.mrb[14].mxu1  ;;  %v151_v38 = vadd.f32 %v14559_v27, %v66_v29  ;;  %v224_v26 = vadd.f32 %v14561_v11, %v14557_v9 }
  0xf4   :  { %18390 = vst [vmem:[#allocation21_spill] sm:$0xff] %v14618_v22  ;;  %18391 = vst [vmem:[#allocation22_spill] sm:$0xff] %v14621_v48  ;;  %v14628_v1 = vadd.f32 %v184_v21, %v66_v29  ;;  %v186_v42 = vpop.f32.mrb[15].mxu0  ;;  %v14631_v44 = vadd.f32 %v257_v36, %v14557_v9  ;;  %v259_v46 = vpop.f32.mrb[15].mxu1  ;;  %v226_v21 = vadd.f32 %v225_v31, %v14564_v28 }
  0xf5   :  { %18392 = vst [vmem:[#allocation23_spill] sm:$0xff] %v14623_v24  ;;  %18393 = vst [vmem:[#allocation24_spill] sm:$0xff] %v14626_v33  ;;  %v14633_v22 = vadd.f32 %v186_v42, %v70_v32  ;;  %v14636_v23 = vadd.f32 %v259_v46, %v14564_v28  ;;  %v153_v24 = vadd.f32 %v152_v30, %v70_v32 }
  0xf6   :  { %18394 = vst [vmem:[#allocation25_spill] sm:$0xff] %v14628_v1  ;;  %18395 = vst [vmem:[#allocation26_spill] sm:$0xff] %v14631_v44 }
  0xf7   :  { %18396 = vst [vmem:[#allocation27_spill] sm:$0xff] %v14633_v22  ;;  %18397 = vst [vmem:[#allocation28_spill] sm:$0xff] %v14636_v23 }
  0xf9   :  { %v527_v33 = vpop.f32.mrb[16].mxu0 }
  0xfa   :  { %v575_v1 = vadd.f32 %v527_v33, %v151_v38  ;;  %v568_v48 = vpop.f32.mrb[16].mxu1  ;;  %v529_v41 = vpop.f32.mrb[17].mxu0  ;;  %v14053_v38 = vld [vmem:[%s18158_s3 + $0x8] ss:$16 sps:$4 sm:$0xff]  }
  0xfb   :  { %v577_v36 = vadd.f32 %v568_v48, %v224_v26  ;;  %v576_v44 = vadd.f32 %v529_v41, %v153_v24  ;;  %v570_v34 = vpop.f32.mrb[17].mxu1  ;;  %v531_v42 = vpop.f32.mrb[18].mxu0  ;;  %v14054_v26 = vld [vmem:[%s18158_s3 + $0x24] ss:$16 sps:$4 sm:$0xff]  }
  0xfc   :  { %v579_v22 = vmul.f32 0.5, %v575_v1  ;;  %v578_v25 = vadd.f32 %v570_v34, %v226_v21  ;;  %v532_v46 = vpop.f32.mrb[19].mxu0  ;;  %v572_v23 = vpop.f32.mrb[18].mxu1  ;;  %v14055_v21 = vld [vmem:[%s18158_s3 + $0x2c] ss:$16 sps:$4 sm:$0xff]  }
  0xfd   :  { %v583_v20 = vmul.f32 0.5, %v576_v44  ;;  %v573_v27 = vpop.f32.mrb[19].mxu1  ;;  %v14052_v23 = vld [vmem:[%s18158_s3] ss:$16 sps:$4 sm:$0xff]   ;;  %v14057_v46 = vld [vmem:[%s18158_s3 + $0x28] ss:$16 sps:$4 sm:$0xff]  }
  0xfe   :  { %13808 = vtanh.f32 %v579_v22  ;;  %v588_v9 = vmul.f32 0.5, %v578_v25  ;;  %v14056_v42 = vld [vmem:[%s18158_s3 + $0x20] ss:$16 sps:$4 sm:$0xff]   ;;  %v14058_v27 = vld [vmem:[%s18158_s3 + $0x44] ss:$16 sps:$4 sm:$0xff]  }
  0xff   :  { %13810 = vtanh.f32 %v583_v20 }
 0x100   :  { %13812 = vtanh.f32 %v577_v36  ;;  %v18398_v36 = vmov 0  }
 0x101   :  { %13814 = vtanh.f32 %v588_v9  ;;  %v14059_v9 = vld [vmem:[%s18158_s3 + $0x4c] ss:$16 sps:$4 sm:$0xff]  }
 0x108   :  { %v13809_v11 = vpop.eup %13808 }
 0x109   :  { %v13811_v29 = vpop.eup %13810  ;;  %v581_v28 = vmul.f32 0.5, %v13809_v11  ;;  %v14060_v11 = vld [vmem:[%s18158_s3 + $0x40] ss:$16 sps:$4 sm:$0xff]  }
 0x10a   :  { %v585_v30 = vmul.f32 0.5, %v13811_v29  ;;  %v13813_v32 = vpop.eup %13812  ;;  %v14061_v29 = vld [vmem:[%s18158_s3 + $0x48] ss:$16 sps:$4 sm:$0xff]  }
 0x10b   :  { %v582_v31 = vadd.f32 0.5, %v581_v28  ;;  %v13815_v34 = vpop.eup %13814  ;;  %v14062_v28 = vld [vmem:[%s18158_s3 + $0x64] ss:$16 sps:$4 sm:$0xff]  }
 0x10c   :  { %v586_v24 = vadd.f32 0.5, %v585_v30  ;;  %v590_v44 = vmul.f32 0.5, %v13815_v34  ;;  %v14063_v30 = vld [vmem:[%s18158_s3 + $0x6c] ss:$16 sps:$4 sm:$0xff]   ;;  %v14069_v34 = vld [vmem:[%s18158_s3 + $0x88] ss:$16 sps:$4 sm:$0xff]  }
 0x10d   :  { %v593_v41 = vmul.f32 %v13813_v32, %v582_v31  ;;  %v14064_v31 = vld [vmem:[%s18158_s3 + $0x60] ss:$16 sps:$4 sm:$0xff]   ;;  %v14065_v32 = vld [vmem:[%s18158_s3 + $0x68] ss:$16 sps:$4 sm:$0xff]  }
 0x10e   :  { %v592_v48 = vmul.f32 0.0, %v586_v24  ;;  %v591_v22 = vadd.f32 0.5, %v590_v44  ;;  %v14066_v24 = vld [vmem:[%s18158_s3 + $0x84] ss:$16 sps:$4 sm:$0xff]  }
 0x10f   :  { %v14070_v44 = vld [vmem:[%s18158_s3 + $0xa4] ss:$16 sps:$4 sm:$0xff]  }
 0x110   :  { %v14642_v1 = vadd.f32 %v593_v41, %v592_v48  ;;  %v14067_v41 = vld [vmem:[%s18158_s3 + $0x8c] ss:$16 sps:$4 sm:$0xff]   ;;  %v14068_v48 = vld [vmem:[%s18158_s3 + $0x80] ss:$16 sps:$4 sm:$0xff]  }
 0x112   :  { %13816 = vtanh.f32 %v14642_v1 }
 0x11c   :  { %v13817_v20 = vpop.eup %13816 }
 0x11d   :  { %v596_v33 = vmul.f32 %v13817_v20, %v591_v22  ;;  %v14071_v22 = vld [vmem:[%s18158_s3 + $0xac] ss:$16 sps:$4 sm:$0xff]   ;;  %v14072_v20 = vld [vmem:[%s18158_s3 + $0xa0] ss:$16 sps:$4 sm:$0xff]  }
 0x11f   :  { %v14645_v25 = vpack.c.bf16 %v596_v33, %v596_v33  ;;  %v14073_v33 = vld [vmem:[%s18158_s3 + $0xa8] ss:$16 sps:$4 sm:$0xff]  }
 0x121   :  { %846 = vmatmul.mubr.bf16.vlgmr.msra.gmra.mrb[20].mxu0 %v14645_v25  ;;  %887 = vmatmul.mubr.bf16.vlgmr.msra.gmra.mrb[20].mxu1 %v14645_v25 }
 0x122   :  { %1101 = vmatpush1.bf16.msra.mxu0 %v14052_v23  ;;  %1142 = vmatpush1.bf16.msra.mxu1 %v14053_v38  ;;  %v14074_v23 = vld [vmem:[%s18158_s3 + $0xc4] ss:$16 sps:$4 sm:$0xff]   ;;  %v14075_v38 = vld [vmem:[%s18158_s3 + $0xcc] ss:$16 sps:$4 sm:$0xff]  }
 0x123   :  { %1102 = vmatprep.subr.bf16.mxu0 %v14054_v26  ;;  %1143 = vmatprep.subr.bf16.mxu1 %v14055_v21  ;;  %v14076_v26 = vld [vmem:[%s18158_s3 + $0xc0] ss:$16 sps:$4 sm:$0xff]   ;;  %v14077_v21 = vld [vmem:[%s18158_s3 + $0xc8] ss:$16 sps:$4 sm:$0xff]  }
 0x124   :  { %1132 = vmatprep.mubr.bf16.mxu0 %v18398_v36  ;;  %1173 = vmatprep.mubr.bf16.mxu1 %v18398_v36 }
 0x126   :  { %1103 = vmatpush1.bf16.msra.mxu0 %v14056_v42  ;;  %1144 = vmatpush1.bf16.msra.mxu1 %v14057_v46  ;;  %v14078_v42 = vld [vmem:[%s18158_s3 + $0xe4] ss:$16 sps:$4 sm:$0xff]   ;;  %v14079_v46 = vld [vmem:[%s18158_s3 + $0xec] ss:$16 sps:$4 sm:$0xff]  }
 0x127   :  { %1104 = vmatprep.subr.bf16.mxu0 %v14058_v27  ;;  %1145 = vmatprep.subr.bf16.mxu1 %v14059_v9  ;;  %v14080_v27 = vld [vmem:[%s18158_s3 + $0xe0] ss:$16 sps:$4 sm:$0xff]   ;;  %v14081_v9 = vld [vmem:[%s18158_s3 + $0xe8] ss:$16 sps:$4 sm:$0xff]  }
 0x12a   :  { %1105 = vmatpush1.bf16.msra.mxu0 %v14060_v11  ;;  %1146 = vmatpush1.bf16.msra.mxu1 %v14061_v29 }
 0x12b   :  { %1106 = vmatprep.subr.bf16.mxu0 %v14062_v28  ;;  %1147 = vmatprep.subr.bf16.mxu1 %v14063_v30 }
 0x12e   :  { %1107 = vmatpush1.bf16.msra.mxu0 %v14064_v31  ;;  %1148 = vmatpush1.bf16.msra.mxu1 %v14065_v32 }
 0x12f   :  { %1108 = vmatprep.subr.bf16.mxu0 %v14066_v24  ;;  %1149 = vmatprep.subr.bf16.mxu1 %v14067_v41 }
 0x132   :  { %1109 = vmatpush1.bf16.msra.mxu0 %v14068_v48  ;;  %1150 = vmatpush1.bf16.msra.mxu1 %v14069_v34 }
 0x133   :  { %1110 = vmatprep.subr.bf16.mxu0 %v14070_v44  ;;  %1151 = vmatprep.subr.bf16.mxu1 %v14071_v22 }
 0x136   :  { %1111 = vmatpush1.bf16.msra.mxu0 %v14072_v20  ;;  %1152 = vmatpush1.bf16.msra.mxu1 %v14073_v33  ;;  %v14800_v33 = vld [vmem:[%s18158_s3] ss:$16 sps:$4 sm:$0xff]  }
 0x137   :  { %1112 = vmatprep.subr.bf16.mxu0 %v14074_v23  ;;  %1153 = vmatprep.subr.bf16.mxu1 %v14075_v38  ;;  %v14805_v23 = vld [vmem:[%s18158_s3 + $0x8] ss:$16 sps:$4 sm:$0xff]   ;;  %v14812_v38 = vld [vmem:[%s18158_s3 + $0x24] ss:$16 sps:$4 sm:$0xff]  }
 0x13a   :  { %1113 = vmatpush1.bf16.msra.mxu0 %v14076_v26  ;;  %1154 = vmatpush1.bf16.msra.mxu1 %v14077_v21  ;;  %v14817_v26 = vld [vmem:[%s18158_s3 + $0x2c] ss:$16 sps:$4 sm:$0xff]   ;;  %v14826_v21 = vld [vmem:[%s18158_s3 + $0x20] ss:$16 sps:$4 sm:$0xff]  }
 0x13b   :  { %1114 = vmatprep.subr.bf16.mxu0 %v14078_v42  ;;  %1155 = vmatprep.subr.bf16.mxu1 %v14079_v46  ;;  %v14831_v42 = vld [vmem:[%s18158_s3 + $0x28] ss:$16 sps:$4 sm:$0xff]   ;;  %v14838_v46 = vld [vmem:[%s18158_s3 + $0x44] ss:$16 sps:$4 sm:$0xff]  }
 0x13e   :  { %1115 = vmatpush1.bf16.msra.mxu0 %v14080_v27  ;;  %1156 = vmatpush1.bf16.msra.mxu1 %v14081_v9  ;;  %v14843_v27 = vld [vmem:[%s18158_s3 + $0x4c] ss:$16 sps:$4 sm:$0xff]   ;;  %v14852_v9 = vld [vmem:[%s18158_s3 + $0x40] ss:$16 sps:$4 sm:$0xff]  }
 0x13f   :  { %1419 = vmatprep.subr.bf16.mxu0 %v14354_v49  ;;  %1460 = vmatprep.subr.bf16.mxu1 %v14370_v52  ;;  %v14780_v49 = vld [vmem:[%s18158_s3 + $0x4] ss:$16 sps:$4 sm:$0xff]  }
 0x141   :  { %1133 = vmatmul.mubr.bf16.vlgmr.msra.gmra.mrb[24].mxu0 %v14645_v25  ;;  %1174 = vmatmul.mubr.bf16.vlgmr.msra.gmra.mrb[24].mxu1 %v14645_v25 }
 0x142   :  { %1420 = vmatpush1.bf16.msra.mxu0 %v14359_v50  ;;  %1461 = vmatpush1.bf16.msra.mxu1 %v14365_v51  ;;  %v14785_v50 = vld [vmem:[%s18158_s3 + $0xc] ss:$16 sps:$4 sm:$0xff]  }
 0x143   :  { %1421 = vmatprep.subr.bf16.mxu0 %v14377_v53  ;;  %1462 = vmatprep.subr.bf16.mxu1 %v14382_v54 }
 0x144   :  { %1451 = vmatprep.mubr.bf16.mxu0 %v18398_v36  ;;  %1492 = vmatprep.mubr.bf16.mxu1 %v18398_v36 }
 0x146   :  { %1422 = vmatpush1.bf16.msra.mxu0 %v14388_v55  ;;  %1463 = vmatpush1.bf16.msra.mxu1 %v14393_v56 }
 0x147   :  { %1423 = vmatprep.subr.bf16.mxu0 %v14401_v57  ;;  %1464 = vmatprep.subr.bf16.mxu1 %v14406_v58 }
 0x14a   :  { %1424 = vmatpush1.bf16.msra.mxu0 %v14412_v59  ;;  %1465 = vmatpush1.bf16.msra.mxu1 %v14417_v60 }
 0x14b   :  { %1425 = vmatprep.subr.bf16.mxu0 %v14425_v61  ;;  %1466 = vmatprep.subr.bf16.mxu1 %v14430_v62 }
 0x14e   :  { %1426 = vmatpush1.bf16.msra.mxu0 %v14436_v63  ;;  %1467 = vmatpush1.bf16.msra.mxu1 %v14441_v0 }
 0x14f   :  { %1427 = vmatprep.subr.bf16.mxu0 %v14449_v2  ;;  %1468 = vmatprep.subr.bf16.mxu1 %v14454_v3 }
 0x152   :  { %1428 = vmatpush1.bf16.msra.mxu0 %v14460_v4  ;;  %1469 = vmatpush1.bf16.msra.mxu1 %v14465_v5 }
 0x153   :  { %1429 = vmatprep.subr.bf16.mxu0 %v14473_v6  ;;  %1470 = vmatprep.subr.bf16.mxu1 %v14478_v7 }
 0x156   :  { %1430 = vmatpush1.bf16.msra.mxu0 %v14484_v8  ;;  %1471 = vmatpush1.bf16.msra.mxu1 %v14489_v10 }
 0x157   :  { %1431 = vmatprep.subr.bf16.mxu0 %v14497_v12  ;;  %1472 = vmatprep.subr.bf16.mxu1 %v14502_v13 }
 0x15a   :  { %1432 = vmatpush1.bf16.msra.mxu0 %v14508_v14  ;;  %1473 = vmatpush1.bf16.msra.mxu1 %v14513_v15 }
 0x15b   :  { %1433 = vmatprep.subr.bf16.mxu0 %v14521_v16  ;;  %1474 = vmatprep.subr.bf16.mxu1 %v14526_v17 }
 0x15e   :  { %1434 = vmatpush1.bf16.msra.mxu0 %v14532_v18  ;;  %1475 = vmatpush1.bf16.msra.mxu1 %v14537_v19 }
 0x15f   :  { %1706 = vmatprep.subr.bf16.mxu0 %v14780_v49  ;;  %1747 = vmatprep.subr.bf16.mxu1 %v14785_v50 }
 0x214   :  { %v1134_v51 = vpop.f32.mrb[24].mxu0  ;;  %v1175_v52 = vpop.f32.mrb[24].mxu1 }
 0x215   :  { %v1182_v53 = vadd.f32 %v1134_v51, %v14568_v35  ;;  %v1184_v54 = vadd.f32 %v1175_v52, %v14571_v37  ;;  %v1136_v55 = vpop.f32.mrb[25].mxu0  ;;  %v1177_v56 = vpop.f32.mrb[25].mxu1  ;;  %v14857_v51 = vld [vmem:[%s18158_s3 + $0x48] ss:$16 sps:$4 sm:$0xff]   ;;  %v14864_v52 = vld [vmem:[%s18158_s3 + $0x64] ss:$16 sps:$4 sm:$0xff]  }
 0x216   :  { %v1183_v57 = vadd.f32 %v1136_v55, %v14573_v39  ;;  %v1185_v58 = vadd.f32 %v1177_v56, %v14576_v40  ;;  %v1138_v59 = vpop.f32.mrb[26].mxu0  ;;  %v1179_v60 = vpop.f32.mrb[26].mxu1  ;;  %v14881_v55 = vld [vmem:[%s18158_s3 + $0x68] ss:$16 sps:$4 sm:$0xff]   ;;  %v14888_v56 = vld [vmem:[%s18158_s3 + $0x84] ss:$16 sps:$4 sm:$0xff]  }
 0x217   :  { %v1186_v61 = vmul.f32 0.5, %v1182_v53  ;;  %v1139_v62 = vpop.f32.mrb[27].mxu0  ;;  %v1180_v25 = vpop.f32.mrb[27].mxu1  ;;  %v14869_v53 = vld [vmem:[%s18158_s3 + $0x6c] ss:$16 sps:$4 sm:$0xff]  }
 0x218   :  { %v1190_v11 = vmul.f32 0.5, %v1183_v57  ;;  %v1195_v29 = vmul.f32 0.5, %v1185_v58  ;;  %v14893_v57 = vld [vmem:[%s18158_s3 + $0x8c] ss:$16 sps:$4 sm:$0xff]   ;;  %v14900_v58 = vld [vmem:[%s18158_s3 + $0x80] ss:$16 sps:$4 sm:$0xff]  }
 0x219   :  { %13818 = vtanh.f32 %v1186_v61  ;;  %v14905_v59 = vld [vmem:[%s18158_s3 + $0x88] ss:$16 sps:$4 sm:$0xff]   ;;  %v14912_v60 = vld [vmem:[%s18158_s3 + $0xa4] ss:$16 sps:$4 sm:$0xff]   ;;  %v14917_v61 = vld [vmem:[%s18158_s3 + $0xac] ss:$16 sps:$4 sm:$0xff]  }
 0x21a   :  { %13820 = vtanh.f32 %v1190_v11  ;;  %v14924_v62 = vld [vmem:[%s18158_s3 + $0xa0] ss:$16 sps:$4 sm:$0xff]   ;;  %v14929_v25 = vld [vmem:[%s18158_s3 + $0xa8] ss:$16 sps:$4 sm:$0xff]   ;;  %v14936_v11 = vld [vmem:[%s18158_s3 + $0xc4] ss:$16 sps:$4 sm:$0xff]  }
 0x21b   :  { %13822 = vtanh.f32 %v1184_v54  ;;  %v14876_v54 = vld [vmem:[%s18158_s3 + $0x60] ss:$16 sps:$4 sm:$0xff]  }
 0x21c   :  { %13824 = vtanh.f32 %v1195_v29  ;;  %v14941_v29 = vld [vmem:[%s18158_s3 + $0xcc] ss:$16 sps:$4 sm:$0xff]  }
 0x223   :  { %v13819_v28 = vpop.eup %13818 }
 0x224   :  { %v13821_v35 = vpop.eup %13820  ;;  %v1188_v30 = vmul.f32 0.5, %v13819_v28  ;;  %v14948_v28 = vld [vmem:[%s18158_s3 + $0xc0] ss:$16 sps:$4 sm:$0xff]  }
 0x225   :  { %v1192_v37 = vmul.f32 0.5, %v13821_v35  ;;  %v13823_v32 = vpop.eup %13822  ;;  %v14953_v35 = vld [vmem:[%s18158_s3 + $0xc8] ss:$16 sps:$4 sm:$0xff]  }
 0x226   :  { %v1189_v31 = vadd.f32 0.5, %v1188_v30  ;;  %v13825_v48 = vpop.eup %13824  ;;  %v14960_v30 = vld [vmem:[%s18158_s3 + $0xe4] ss:$16 sps:$4 sm:$0xff]  }
 0x227   :  { %v1193_v39 = vadd.f32 0.5, %v1192_v37  ;;  %v1197_v34 = vmul.f32 0.5, %v13825_v48  ;;  %v14965_v37 = vld [vmem:[%s18158_s3 + $0xec] ss:$16 sps:$4 sm:$0xff]   ;;  %v14085_v48 = vld [vmem:[%s18159_s2 + $0x8] ss:$16 sps:$4 sm:$0xff]  }
 0x228   :  { %v1200_v24 = vmul.f32 %v13823_v32, %v1189_v31  ;;  %v14972_v31 = vld [vmem:[%s18158_s3 + $0xe0] ss:$16 sps:$4 sm:$0xff]   ;;  %v14977_v32 = vld [vmem:[%s18158_s3 + $0xe8] ss:$16 sps:$4 sm:$0xff]  }
 0x229   :  { %v1199_v40 = vmul.f32 %v1193_v39, %v14642_v1  ;;  %v1198_v44 = vadd.f32 0.5, %v1197_v34  ;;  %v14082_v39 = vld [vmem:[%s18159_s2 + $0x4] ss:$16 sps:$4 sm:$0xff]  }
 0x22a   :  { %v14086_v34 = vld [vmem:[%s18159_s2 + $0x24] ss:$16 sps:$4 sm:$0xff]  }
 0x22b   :  { %v14794_v41 = vadd.f32 %v1200_v24, %v1199_v40  ;;  %v14083_v24 = vld [vmem:[%s18159_s2 + $0xc] ss:$16 sps:$4 sm:$0xff]   ;;  %v14084_v40 = vld [vmem:[%s18159_s2] ss:$16 sps:$4 sm:$0xff]  }
 0x22d   :  { %13826 = vtanh.f32 %v14794_v41 }
 0x237   :  { %v13827_v22 = vpop.eup %13826 }
 0x238   :  { %v1203_v20 = vmul.f32 %v13827_v22, %v1198_v44  ;;  %v14087_v44 = vld [vmem:[%s18159_s2 + $0x2c] ss:$16 sps:$4 sm:$0xff]   ;;  %v14088_v22 = vld [vmem:[%s18159_s2 + $0x20] ss:$16 sps:$4 sm:$0xff]  }
 0x23a   :  { %v14807_v1 = vpack.c.bf16 %v1203_v20, %v1203_v20  ;;  %v14089_v20 = vld [vmem:[%s18159_s2 + $0x28] ss:$16 sps:$4 sm:$0xff]  }
 0x23c   :  { %1452 = vmatmul.mubr.bf16.vlgmr.msra.gmra.mrb[28].mxu0 %v14807_v1  ;;  %1493 = vmatmul.mubr.bf16.vlgmr.msra.gmra.mrb[28].mxu1 %v14807_v1 }
 0x23d   :  { %1707 = vmatpush1.bf16.msra.mxu0 %v14800_v33  ;;  %1748 = vmatpush1.bf16.msra.mxu1 %v14805_v23 }
 0x23e   :  { %1708 = vmatprep.subr.bf16.mxu0 %v14812_v38  ;;  %1749 = vmatprep.subr.bf16.mxu1 %v14817_v26 }
 0x23f   :  { %1738 = vmatprep.mubr.bf16.mxu0 %v18398_v36  ;;  %1779 = vmatprep.mubr.bf16.mxu1 %v18398_v36 }
 0x241   :  { %1709 = vmatpush1.bf16.msra.mxu0 %v14826_v21  ;;  %1750 = vmatpush1.bf16.msra.mxu1 %v14831_v42 }
 0x242   :  { %1710 = vmatprep.subr.bf16.mxu0 %v14838_v46  ;;  %1751 = vmatprep.subr.bf16.mxu1 %v14843_v27 }
 0x245   :  { %1711 = vmatpush1.bf16.msra.mxu0 %v14852_v9  ;;  %1752 = vmatpush1.bf16.msra.mxu1 %v14857_v51 }
 0x246   :  { %1712 = vmatprep.subr.bf16.mxu0 %v14864_v52  ;;  %1753 = vmatprep.subr.bf16.mxu1 %v14869_v53 }
 0x249   :  { %1713 = vmatpush1.bf16.msra.mxu0 %v14876_v54  ;;  %1754 = vmatpush1.bf16.msra.mxu1 %v14881_v55 }
 0x24a   :  { %1714 = vmatprep.subr.bf16.mxu0 %v14888_v56  ;;  %1755 = vmatprep.subr.bf16.mxu1 %v14893_v57 }
 0x24d   :  { %1715 = vmatpush1.bf16.msra.mxu0 %v14900_v58  ;;  %1756 = vmatpush1.bf16.msra.mxu1 %v14905_v59 }
 0x24e   :  { %1716 = vmatprep.subr.bf16.mxu0 %v14912_v60  ;;  %1757 = vmatprep.subr.bf16.mxu1 %v14917_v61 }
 0x251   :  { %1717 = vmatpush1.bf16.msra.mxu0 %v14924_v62  ;;  %1758 = vmatpush1.bf16.msra.mxu1 %v14929_v25 }
 0x252   :  { %1718 = vmatprep.subr.bf16.mxu0 %v14936_v11  ;;  %1759 = vmatprep.subr.bf16.mxu1 %v14941_v29 }
 0x255   :  { %1719 = vmatpush1.bf16.msra.mxu0 %v14948_v28  ;;  %1760 = vmatpush1.bf16.msra.mxu1 %v14953_v35 }
 0x256   :  { %1720 = vmatprep.subr.bf16.mxu0 %v14960_v30  ;;  %1761 = vmatprep.subr.bf16.mxu1 %v14965_v37 }
 0x259   :  { %1721 = vmatpush1.bf16.msra.mxu0 %v14972_v31  ;;  %1762 = vmatpush1.bf16.msra.mxu1 %v14977_v32 }
 0x25a   :  { %2025 = vmatprep.subr.bf16.mxu0 %v14082_v39  ;;  %2066 = vmatprep.subr.bf16.mxu1 %v14083_v24  ;;  %v14091_v39 = vld [vmem:[%s18159_s2 + $0x4c] ss:$16 sps:$4 sm:$0xff]   ;;  %v14092_v24 = vld [vmem:[%s18159_s2 + $0x40] ss:$16 sps:$4 sm:$0xff]  }
 0x25c   :  { %1739 = vmatmul.mubr.bf16.vlgmr.msra.gmra.mrb[32].mxu0 %v14807_v1  ;;  %1780 = vmatmul.mubr.bf16.vlgmr.msra.gmra.mrb[32].mxu1 %v14807_v1  ;;  %v14090_v1 = vld [vmem:[%s18159_s2 + $0x44] ss:$16 sps:$4 sm:$0xff]  }
 0x25d   :  { %2026 = vmatpush1.bf16.msra.mxu0 %v14084_v40  ;;  %2067 = vmatpush1.bf16.msra.mxu1 %v14085_v48  ;;  %v14093_v40 = vld [vmem:[%s18159_s2 + $0x48] ss:$16 sps:$4 sm:$0xff]   ;;  %v14094_v48 = vld [vmem:[%s18159_s2 + $0x64] ss:$16 sps:$4 sm:$0xff]  }
 0x25e   :  { %2027 = vmatprep.subr.bf16.mxu0 %v14086_v34  ;;  %2068 = vmatprep.subr.bf16.mxu1 %v14087_v44  ;;  %v14095_v34 = vld [vmem:[%s18159_s2 + $0x6c] ss:$16 sps:$4 sm:$0xff]  }
 0x25f   :  { %2057 = vmatprep.mubr.bf16.mxu0 %v18398_v36  ;;  %2098 = vmatprep.mubr.bf16.mxu1 %v18398_v36 }
 0x261   :  { %2028 = vmatpush1.bf16.msra.mxu0 %v14088_v22  ;;  %2069 = vmatpush1.bf16.msra.mxu1 %v14089_v20 }
 0x262   :  { %2029 = vmatprep.subr.bf16.mxu0 %v14090_v1  ;;  %2070 = vmatprep.subr.bf16.mxu1 %v14091_v39 }
 0x265   :  { %2030 = vmatpush1.bf16.msra.mxu0 %v14092_v24  ;;  %2071 = vmatpush1.bf16.msra.mxu1 %v14093_v40 }
 0x266   :  { %2031 = vmatprep.subr.bf16.mxu0 %v14094_v48  ;;  %2072 = vmatprep.subr.bf16.mxu1 %v14095_v34 }
 0x269   :  { %2032 = vmatpush1.bf16.msra.mxu0 %v14436_v63  ;;  %2073 = vmatpush1.bf16.msra.mxu1 %v14441_v0 }
 0x26a   :  { %2033 = vmatprep.subr.bf16.mxu0 %v14449_v2  ;;  %2074 = vmatprep.subr.bf16.mxu1 %v14454_v3 }
 0x26d   :  { %2034 = vmatpush1.bf16.msra.mxu0 %v14460_v4  ;;  %2075 = vmatpush1.bf16.msra.mxu1 %v14465_v5 }
 0x26e   :  { %2035 = vmatprep.subr.bf16.mxu0 %v14473_v6  ;;  %2076 = vmatprep.subr.bf16.mxu1 %v14478_v7  ;;  %v18399_v7 = vld [vmem:[#allocation8_spill] sm:$0xff] }
 0x271   :  { %2036 = vmatpush1.bf16.msra.mxu0 %v14484_v8  ;;  %2077 = vmatpush1.bf16.msra.mxu1 %v14489_v10 }
 0x272   :  { %2037 = vmatprep.subr.bf16.mxu0 %v14497_v12  ;;  %2078 = vmatprep.subr.bf16.mxu1 %v14502_v13 }
 0x275   :  { %2038 = vmatpush1.bf16.msra.mxu0 %v14508_v14  ;;  %2079 = vmatpush1.bf16.msra.mxu1 %v14513_v15 }
 0x276   :  { %2039 = vmatprep.subr.bf16.mxu0 %v14521_v16  ;;  %2080 = vmatprep.subr.bf16.mxu1 %v14526_v17 }
 0x279   :  { %2040 = vmatpush1.bf16.msra.mxu0 %v14532_v18  ;;  %2081 = vmatpush1.bf16.msra.mxu1 %v14537_v19 }
 0x27a   :  { %2312 = vmatprep.subr.bf16.mxu0 %v14780_v49  ;;  %2353 = vmatprep.subr.bf16.mxu1 %v14785_v50 }
 0x32f   :  { %v1740_v63 = vpop.f32.mrb[32].mxu0  ;;  %v1781_v0 = vpop.f32.mrb[32].mxu1 }
 0x330   :  { %v1788_v2 = vadd.f32 %v1740_v63, %v14578_v43  ;;  %v1790_v3 = vadd.f32 %v1781_v0, %v14581_v45  ;;  %v1742_v4 = vpop.f32.mrb[33].mxu0  ;;  %v1783_v5 = vpop.f32.mrb[33].mxu1 }
 0x331   :  { %v1789_v6 = vadd.f32 %v1742_v4, %v14583_v47  ;;  %v1791_v8 = vadd.f32 %v1783_v5, %v18399_v7  ;;  %v1744_v10 = vpop.f32.mrb[34].mxu0  ;;  %v1785_v12 = vpop.f32.mrb[34].mxu1  ;;  %v15109_v4 = vld [vmem:[%s18159_s2 + $0x8] ss:$16 sps:$4 sm:$0xff]   ;;  %v15118_v5 = vld [vmem:[%s18159_s2 + $0x24] ss:$16 sps:$4 sm:$0xff]  }
 0x332   :  { %v1792_v13 = vmul.f32 0.5, %v1788_v2  ;;  %v1745_v14 = vpop.f32.mrb[35].mxu0  ;;  %v1786_v15 = vpop.f32.mrb[35].mxu1  ;;  %v15099_v2 = vld [vmem:[%s18159_s2 + $0xc] ss:$16 sps:$4 sm:$0xff]  }
 0x333   :  { %v1796_v16 = vmul.f32 0.5, %v1789_v6  ;;  %v1801_v17 = vmul.f32 0.5, %v1791_v8  ;;  %v15123_v6 = vld [vmem:[%s18159_s2 + $0x2c] ss:$16 sps:$4 sm:$0xff]   ;;  %v15128_v7 = vld [vmem:[%s18159_s2 + $0x20] ss:$16 sps:$4 sm:$0xff]  }
 0x334   :  { %13828 = vtanh.f32 %v1792_v13  ;;  %v15133_v8 = vld [vmem:[%s18159_s2 + $0x28] ss:$16 sps:$4 sm:$0xff]   ;;  %v15142_v10 = vld [vmem:[%s18159_s2 + $0x44] ss:$16 sps:$4 sm:$0xff]   ;;  %v15147_v12 = vld [vmem:[%s18159_s2 + $0x4c] ss:$16 sps:$4 sm:$0xff]  }
 0x335   :  { %13830 = vtanh.f32 %v1796_v16  ;;  %v15152_v13 = vld [vmem:[%s18159_s2 + $0x40] ss:$16 sps:$4 sm:$0xff]   ;;  %v15157_v14 = vld [vmem:[%s18159_s2 + $0x48] ss:$16 sps:$4 sm:$0xff]   ;;  %v15166_v15 = vld [vmem:[%s18159_s2 + $0x64] ss:$16 sps:$4 sm:$0xff]  }
 0x336   :  { %13832 = vtanh.f32 %v1790_v3  ;;  %v15104_v3 = vld [vmem:[%s18159_s2] ss:$16 sps:$4 sm:$0xff]   ;;  %18400 = vst [vmem:[#allocation8_spill] sm:$0xff] %v15157_v14  ;;  %18401 = vst [vmem:[#allocation29_spill] sm:$0xff] %v15166_v15  ;;  %v15171_v16 = vld [vmem:[%s18159_s2 + $0x6c] ss:$16 sps:$4 sm:$0xff]  }
 0x337   :  { %13834 = vtanh.f32 %v1801_v17  ;;  %18402 = vst [vmem:[#allocation30_spill] sm:$0xff] %v15171_v16  ;;  %v15176_v17 = vld [vmem:[%s18159_s2 + $0x60] ss:$16 sps:$4 sm:$0xff]  }
 0x338   :  { %18403 = vst [vmem:[#allocation31_spill] sm:$0xff] %v15176_v17 }
 0x33e   :  { %v13829_v18 = vpop.eup %13828 }
 0x33f   :  { %v13831_v19 = vpop.eup %13830  ;;  %v1794_v43 = vmul.f32 0.5, %v13829_v18  ;;  %v15181_v18 = vld [vmem:[%s18159_s2 + $0x68] ss:$16 sps:$4 sm:$0xff]  }
 0x340   :  { %v1798_v45 = vmul.f32 0.5, %v13831_v19  ;;  %v13833_v22 = vpop.eup %13832  ;;  %18404 = vst [vmem:[#allocation32_spill] sm:$0xff] %v15181_v18  ;;  %v15190_v19 = vld [vmem:[%s18159_s2 + $0x84] ss:$16 sps:$4 sm:$0xff]  }
 0x341   :  { %v1795_v44 = vadd.f32 0.5, %v1794_v43  ;;  %v13835_v24 = vpop.eup %13834  ;;  %18405 = vst [vmem:[#allocation33_spill] sm:$0xff] %v15190_v19  ;;  %v15195_v43 = vld [vmem:[%s18159_s2 + $0x8c] ss:$16 sps:$4 sm:$0xff]  }
 0x342   :  { %v1799_v47 = vadd.f32 0.5, %v1798_v45  ;;  %v1803_v40 = vmul.f32 0.5, %v13835_v24  ;;  %18406 = vst [vmem:[#allocation34_spill] sm:$0xff] %v15195_v43  ;;  %v15200_v45 = vld [vmem:[%s18159_s2 + $0x80] ss:$16 sps:$4 sm:$0xff]  }
 0x343   :  { %v1806_v20 = vmul.f32 %v13833_v22, %v1795_v44  ;;  %18407 = vst [vmem:[#allocation35_spill] sm:$0xff] %v15200_v45  ;;  %v15205_v44 = vld [vmem:[%s18159_s2 + $0x88] ss:$16 sps:$4 sm:$0xff]   ;;  %v15214_v22 = vld [vmem:[%s18159_s2 + $0xa4] ss:$16 sps:$4 sm:$0xff]  }
 0x344   :  { %v1805_v1 = vmul.f32 %v1799_v47, %v14794_v41  ;;  %v1804_v48 = vadd.f32 0.5, %v1803_v40  ;;  %v15094_v41 = vld [vmem:[%s18159_s2 + $0x4] ss:$16 sps:$4 sm:$0xff]   ;;  %18408 = vst [vmem:[#allocation36_spill] sm:$0xff] %v15205_v44  ;;  %18409 = vst [vmem:[#allocation37_spill] sm:$0xff] %v15214_v22 }
 0x345   :  { %v15219_v47 = vld [vmem:[%s18159_s2 + $0xac] ss:$16 sps:$4 sm:$0xff]   ;;  %v15238_v24 = vld [vmem:[%s18159_s2 + $0xc4] ss:$16 sps:$4 sm:$0xff]  }
 0x346   :  { %v15054_v39 = vadd.f32 %v1806_v20, %v1805_v1  ;;  %18410 = vst [vmem:[#allocation38_spill] sm:$0xff] %v15219_v47  ;;  %v15224_v20 = vld [vmem:[%s18159_s2 + $0xa0] ss:$16 sps:$4 sm:$0xff]   ;;  %v15229_v1 = vld [vmem:[%s18159_s2 + $0xa8] ss:$16 sps:$4 sm:$0xff]   ;;  %18413 = vst [vmem:[#allocation41_spill] sm:$0xff] %v15238_v24 }
 0x347   :  { %18411 = vst [vmem:[#allocation39_spill] sm:$0xff] %v15224_v20  ;;  %18412 = vst [vmem:[#allocation40_spill] sm:$0xff] %v15229_v1  ;;  %v15243_v40 = vld [vmem:[%s18159_s2 + $0xcc] ss:$16 sps:$4 sm:$0xff]  }
 0x348   :  { %13836 = vtanh.f32 %v15054_v39  ;;  %18414 = vst [vmem:[#allocation42_spill] sm:$0xff] %v15243_v40 }
 0x352   :  { %v13837_v34 = vpop.eup %13836 }
 0x353   :  { %v1809_v63 = vmul.f32 %v13837_v34, %v1804_v48  ;;  %v15248_v48 = vld [vmem:[%s18159_s2 + $0xc0] ss:$16 sps:$4 sm:$0xff]   ;;  %v15253_v34 = vld [vmem:[%s18159_s2 + $0xc8] ss:$16 sps:$4 sm:$0xff]  }
 0x354   :  { %18415 = vst [vmem:[#allocation43_spill] sm:$0xff] %v15248_v48  ;;  %18416 = vst [vmem:[#allocation44_spill] sm:$0xff] %v15253_v34 }
 0x355   :  { %v1810_v0 = vpack.c.bf16 %v1809_v63, %v1809_v63  ;;  %v15262_v63 = vld [vmem:[%s18159_s2 + $0xe4] ss:$16 sps:$4 sm:$0xff]  }
 0x356   :  { %18417 = vst [vmem:[#allocation45_spill] sm:$0xff] %v15262_v63 }
 0x357   :  { %2058 = vmatmul.mubr.bf16.vlgmr.msra.gmra.mrb[36].mxu0 %v1810_v0  ;;  %2099 = vmatmul.mubr.bf16.vlgmr.msra.gmra.mrb[36].mxu1 %v1810_v0 }
 0x358   :  { %2313 = vmatpush1.bf16.msra.mxu0 %v14800_v33  ;;  %2354 = vmatpush1.bf16.msra.mxu1 %v14805_v23 }
 0x359   :  { %2314 = vmatprep.subr.bf16.mxu0 %v14812_v38  ;;  %2355 = vmatprep.subr.bf16.mxu1 %v14817_v26 }
 0x35a   :  { %2344 = vmatprep.mubr.bf16.mxu0 %v18398_v36  ;;  %2385 = vmatprep.mubr.bf16.mxu1 %v18398_v36 }
 0x35c   :  { %2315 = vmatpush1.bf16.msra.mxu0 %v14826_v21  ;;  %2356 = vmatpush1.bf16.msra.mxu1 %v14831_v42 }
 0x35d   :  { %2316 = vmatprep.subr.bf16.mxu0 %v14838_v46  ;;  %2357 = vmatprep.subr.bf16.mxu1 %v14843_v27 }
 0x360   :  { %2317 = vmatpush1.bf16.msra.mxu0 %v14852_v9  ;;  %2358 = vmatpush1.bf16.msra.mxu1 %v14857_v51 }
 0x361   :  { %2318 = vmatprep.subr.bf16.mxu0 %v14864_v52  ;;  %2359 = vmatprep.subr.bf16.mxu1 %v14869_v53 }
 0x364   :  { %2319 = vmatpush1.bf16.msra.mxu0 %v14876_v54  ;;  %2360 = vmatpush1.bf16.msra.mxu1 %v14881_v55 }
 0x365   :  { %2320 = vmatprep.subr.bf16.mxu0 %v14888_v56  ;;  %2361 = vmatprep.subr.bf16.mxu1 %v14893_v57 }
 0x368   :  { %2321 = vmatpush1.bf16.msra.mxu0 %v14900_v58  ;;  %2362 = vmatpush1.bf16.msra.mxu1 %v14905_v59 }
 0x369   :  { %2322 = vmatprep.subr.bf16.mxu0 %v14912_v60  ;;  %2363 = vmatprep.subr.bf16.mxu1 %v14917_v61 }
 0x36c   :  { %2323 = vmatpush1.bf16.msra.mxu0 %v14924_v62  ;;  %2364 = vmatpush1.bf16.msra.mxu1 %v14929_v25 }
 0x36d   :  { %2324 = vmatprep.subr.bf16.mxu0 %v14936_v11  ;;  %2365 = vmatprep.subr.bf16.mxu1 %v14941_v29 }
 0x370   :  { %2325 = vmatpush1.bf16.msra.mxu0 %v14948_v28  ;;  %2366 = vmatpush1.bf16.msra.mxu1 %v14953_v35 }
 0x371   :  { %2326 = vmatprep.subr.bf16.mxu0 %v14960_v30  ;;  %2367 = vmatprep.subr.bf16.mxu1 %v14965_v37 }
 0x374   :  { %2327 = vmatpush1.bf16.msra.mxu0 %v14972_v31  ;;  %2368 = vmatpush1.bf16.msra.mxu1 %v14977_v32 }
 0x375   :  { %2631 = vmatprep.subr.bf16.mxu0 %v15094_v41  ;;  %2672 = vmatprep.subr.bf16.mxu1 %v15099_v2 }
 0x377   :  { %2345 = vmatmul.mubr.bf16.vlgmr.msra.gmra.mrb[40].mxu0 %v1810_v0  ;;  %2386 = vmatmul.mubr.bf16.vlgmr.msra.gmra.mrb[40].mxu1 %v1810_v0  ;;  %v15267_v0 = vld [vmem:[%s18159_s2 + $0xec] ss:$16 sps:$4 sm:$0xff]  }
 0x378   :  { %2663 = vmatprep.mubr.bf16.mxu0 %v18398_v36  ;;  %2704 = vmatprep.mubr.bf16.mxu1 %v18398_v36  ;;  %18418 = vst [vmem:[#allocation46_spill] sm:$0xff] %v15267_v0 }
 0x379   :  { %2632 = vmatpush1.bf16.msra.mxu0 %v15104_v3  ;;  %2673 = vmatpush1.bf16.msra.mxu1 %v15109_v4 }
 0x37a   :  { %2633 = vmatprep.subr.bf16.mxu0 %v15118_v5  ;;  %2674 = vmatprep.subr.bf16.mxu1 %v15123_v6 }
 0x37d   :  { %2634 = vmatpush1.bf16.msra.mxu0 %v15128_v7  ;;  %2675 = vmatpush1.bf16.msra.mxu1 %v15133_v8 }
 0x37e   :  { %2635 = vmatprep.subr.bf16.mxu0 %v15142_v10  ;;  %2676 = vmatprep.subr.bf16.mxu1 %v15147_v12 }
 0x381   :  { %2636 = vmatpush1.bf16.msra.mxu0 %v15152_v13  ;;  %2677 = vmatpush1.bf16.msra.mxu1 %v15157_v14 }
 0x382   :  { %2637 = vmatprep.subr.bf16.mxu0 %v15166_v15  ;;  %2678 = vmatprep.subr.bf16.mxu1 %v15171_v16 }
 0x385   :  { %2638 = vmatpush1.bf16.msra.mxu0 %v15176_v17  ;;  %2679 = vmatpush1.bf16.msra.mxu1 %v15181_v18 }
 0x386   :  { %2639 = vmatprep.subr.bf16.mxu0 %v15190_v19  ;;  %2680 = vmatprep.subr.bf16.mxu1 %v15195_v43  ;;  %v18423_v43 = vld [vmem:[#allocation11_spill] sm:$0xff]  ;;  %v18424_v19 = vld [vmem:[#allocation12_spill] sm:$0xff] }
 0x389   :  { %2640 = vmatpush1.bf16.msra.mxu0 %v15200_v45  ;;  %2681 = vmatpush1.bf16.msra.mxu1 %v15205_v44 }
 0x38a   :  { %2641 = vmatprep.subr.bf16.mxu0 %v15214_v22  ;;  %2682 = vmatprep.subr.bf16.mxu1 %v15219_v47  ;;  %v18422_v47 = vld [vmem:[#allocation10_spill] sm:$0xff] }
 0x38d   :  { %2642 = vmatpush1.bf16.msra.mxu0 %v15224_v20  ;;  %2683 = vmatpush1.bf16.msra.mxu1 %v15229_v1  ;;  %v18421_v1 = vld [vmem:[#allocation9_spill] sm:$0xff] }
 0x38e   :  { %2643 = vmatprep.subr.bf16.mxu0 %v15238_v24  ;;  %2684 = vmatprep.subr.bf16.mxu1 %v15243_v40  ;;  %v15272_v24 = vld [vmem:[%s18159_s2 + $0xe0] ss:$16 sps:$4 sm:$0xff]  }
 0x38f   :  { %18419 = vst [vmem:[#allocation47_spill] sm:$0xff] %v15272_v24 }
 0x391   :  { %2644 = vmatpush1.bf16.msra.mxu0 %v15248_v48  ;;  %2685 = vmatpush1.bf16.msra.mxu1 %v15253_v34  ;;  %v15277_v48 = vld [vmem:[%s18159_s2 + $0xe8] ss:$16 sps:$4 sm:$0xff]  }
 0x392   :  { %18420 = vst [vmem:[#allocation48_spill] sm:$0xff] %v15277_v48  ;;  %2645 = vmatprep.subr.bf16.mxu0 %v15262_v63  ;;  %2686 = vmatprep.subr.bf16.mxu1 %v15267_v0 }
 0x395   :  { %2646 = vmatpush1.bf16.msra.mxu0 %v15272_v24  ;;  %2687 = vmatpush1.bf16.msra.mxu1 %v15277_v48 }
 0x396   :  { %2918 = vmatprep.subr.bf16.mxu0 %v14780_v49  ;;  %2959 = vmatprep.subr.bf16.mxu1 %v14785_v50 }
 0x44a   :  { %v2346_v34 = vpop.f32.mrb[40].mxu0  ;;  %v2387_v40 = vpop.f32.mrb[40].mxu1 }
 0x44b   :  { %v2394_v20 = vadd.f32 %v2346_v34, %v18421_v1  ;;  %v2396_v22 = vadd.f32 %v2387_v40, %v18422_v47  ;;  %v2348_v44 = vpop.f32.mrb[41].mxu0  ;;  %v2389_v45 = vpop.f32.mrb[41].mxu1 }
 0x44c   :  { %v2395_v63 = vadd.f32 %v2348_v44, %v18423_v43  ;;  %v2397_v0 = vadd.f32 %v2389_v45, %v18424_v19  ;;  %v2350_v18 = vpop.f32.mrb[42].mxu0  ;;  %v2391_v24 = vpop.f32.mrb[42].mxu1 }
 0x44d   :  { %v2398_v17 = vmul.f32 0.5, %v2394_v20  ;;  %v2351_v48 = vpop.f32.mrb[43].mxu0  ;;  %v2392_v16 = vpop.f32.mrb[43].mxu1 }
 0x44e   :  { %v2402_v49 = vmul.f32 0.5, %v2395_v63  ;;  %v2407_v50 = vmul.f32 0.5, %v2397_v0  ;;  %v18449_v48 = vld [vmem:[#allocation16_spill] sm:$0xff] }
 0x44f   :  { %13838 = vtanh.f32 %v2398_v17 }
 0x450   :  { %13840 = vtanh.f32 %v2402_v49 }
 0x451   :  { %13842 = vtanh.f32 %v2396_v22 }
 0x452   :  { %13844 = vtanh.f32 %v2407_v50 }
 0x459   :  { %v13839_v15 = vpop.eup %13838 }
 0x45a   :  { %v13841_v1 = vpop.eup %13840  ;;  %v2400_v34 = vmul.f32 0.5, %v13839_v15 }
 0x45b   :  { %v2404_v47 = vmul.f32 0.5, %v13841_v1  ;;  %v13843_v14 = vpop.eup %13842 }
 0x45c   :  { %v2401_v40 = vadd.f32 0.5, %v2400_v34  ;;  %v13845_v16 = vpop.eup %13844 }
 0x45d   :  { %v2405_v43 = vadd.f32 0.5, %v2404_v47  ;;  %v2409_v17 = vmul.f32 0.5, %v13845_v16 }
 0x45e   :  { %v2412_v44 = vmul.f32 %v13843_v14, %v2401_v40  ;;  %v18448_v14 = vld [vmem:[#allocation15_spill] sm:$0xff] }
 0x45f   :  { %v2411_v18 = vmul.f32 %v2405_v43, %v15054_v39  ;;  %v2410_v45 = vadd.f32 0.5, %v2409_v17 }
 0x461   :  { %v15290_v19 = vadd.f32 %v2412_v44, %v2411_v18 }
 0x463   :  { %13846 = vtanh.f32 %v15290_v19 }
 0x46d   :  { %v13847_v22 = vpop.eup %13846 }
 0x46e   :  { %v2415_v20 = vmul.f32 %v13847_v22, %v2410_v45 }
 0x470   :  { %v2416_v24 = vpack.c.bf16 %v2415_v20, %v2415_v20 }
 0x472   :  { %2664 = vmatmul.mubr.bf16.vlgmr.msra.gmra.mrb[44].mxu0 %v2416_v24  ;;  %2705 = vmatmul.mubr.bf16.vlgmr.msra.gmra.mrb[44].mxu1 %v2416_v24 }
 0x473   :  { %2919 = vmatpush1.bf16.msra.mxu0 %v14800_v33  ;;  %2960 = vmatpush1.bf16.msra.mxu1 %v14805_v23  ;;  %v18425_v33 = vld [vmem:[#allocation8_spill] sm:$0xff]  ;;  %v18426_v23 = vld [vmem:[#allocation29_spill] sm:$0xff] }
 0x474   :  { %2920 = vmatprep.subr.bf16.mxu0 %v14812_v38  ;;  %2961 = vmatprep.subr.bf16.mxu1 %v14817_v26  ;;  %v18427_v38 = vld [vmem:[#allocation30_spill] sm:$0xff]  ;;  %v18428_v26 = vld [vmem:[#allocation31_spill] sm:$0xff] }
 0x475   :  { %2950 = vmatprep.mubr.bf16.mxu0 %v18398_v36  ;;  %2991 = vmatprep.mubr.bf16.mxu1 %v18398_v36 }
 0x477   :  { %2921 = vmatpush1.bf16.msra.mxu0 %v14826_v21  ;;  %2962 = vmatpush1.bf16.msra.mxu1 %v14831_v42  ;;  %v18429_v21 = vld [vmem:[#allocation32_spill] sm:$0xff]  ;;  %v18430_v42 = vld [vmem:[#allocation33_spill] sm:$0xff] }
 0x478   :  { %2922 = vmatprep.subr.bf16.mxu0 %v14838_v46  ;;  %2963 = vmatprep.subr.bf16.mxu1 %v14843_v27  ;;  %v18431_v46 = vld [vmem:[#allocation34_spill] sm:$0xff]  ;;  %v18432_v27 = vld [vmem:[#allocation35_spill] sm:$0xff] }
 0x47b   :  { %2923 = vmatpush1.bf16.msra.mxu0 %v14852_v9  ;;  %2964 = vmatpush1.bf16.msra.mxu1 %v14857_v51  ;;  %v18433_v9 = vld [vmem:[#allocation36_spill] sm:$0xff]  ;;  %v18434_v51 = vld [vmem:[#allocation37_spill] sm:$0xff] }
 0x47c   :  { %2924 = vmatprep.subr.bf16.mxu0 %v14864_v52  ;;  %2965 = vmatprep.subr.bf16.mxu1 %v14869_v53  ;;  %v18435_v52 = vld [vmem:[#allocation38_spill] sm:$0xff]  ;;  %v18436_v53 = vld [vmem:[#allocation39_spill] sm:$0xff] }
 0x47f   :  { %2925 = vmatpush1.bf16.msra.mxu0 %v14876_v54  ;;  %2966 = vmatpush1.bf16.msra.mxu1 %v14881_v55  ;;  %v18437_v54 = vld [vmem:[#allocation40_spill] sm:$0xff]  ;;  %v18438_v55 = vld [vmem:[#allocation41_spill] sm:$0xff] }
 0x480   :  { %2926 = vmatprep.subr.bf16.mxu0 %v14888_v56  ;;  %2967 = vmatprep.subr.bf16.mxu1 %v14893_v57  ;;  %v18439_v56 = vld [vmem:[#allocation42_spill] sm:$0xff]  ;;  %v18440_v57 = vld [vmem:[#allocation43_spill] sm:$0xff] }
 0x483   :  { %2927 = vmatpush1.bf16.msra.mxu0 %v14900_v58  ;;  %2968 = vmatpush1.bf16.msra.mxu1 %v14905_v59  ;;  %v18441_v58 = vld [vmem:[#allocation44_spill] sm:$0xff]  ;;  %v18442_v59 = vld [vmem:[#allocation45_spill] sm:$0xff] }
 0x484   :  { %2928 = vmatprep.subr.bf16.mxu0 %v14912_v60  ;;  %2969 = vmatprep.subr.bf16.mxu1 %v14917_v61  ;;  %v18443_v60 = vld [vmem:[#allocation46_spill] sm:$0xff]  ;;  %v18444_v61 = vld [vmem:[#allocation47_spill] sm:$0xff] }
 0x487   :  { %2929 = vmatpush1.bf16.msra.mxu0 %v14924_v62  ;;  %2970 = vmatpush1.bf16.msra.mxu1 %v14929_v25  ;;  %v18445_v62 = vld [vmem:[#allocation48_spill] sm:$0xff] }
 0x488   :  { %2930 = vmatprep.subr.bf16.mxu0 %v14936_v11  ;;  %2971 = vmatprep.subr.bf16.mxu1 %v14941_v29  ;;  %v15362_v25 = vld [vmem:[%s18158_s3 + $0x4] ss:$16 sps:$4 sm:$0xff]   ;;  %v15367_v11 = vld [vmem:[%s18158_s3 + $0xc] ss:$16 sps:$4 sm:$0xff]  }
 0x48b   :  { %2931 = vmatpush1.bf16.msra.mxu0 %v14948_v28  ;;  %2972 = vmatpush1.bf16.msra.mxu1 %v14953_v35  ;;  %v18446_v35 = vld [vmem:[#allocation13_spill] sm:$0xff] }
 0x48c   :  { %2932 = vmatprep.subr.bf16.mxu0 %v14960_v30  ;;  %2973 = vmatprep.subr.bf16.mxu1 %v14965_v37  ;;  %v18447_v37 = vld [vmem:[#allocation14_spill] sm:$0xff] }
 0x48f   :  { %2933 = vmatpush1.bf16.msra.mxu0 %v14972_v31  ;;  %2974 = vmatpush1.bf16.msra.mxu1 %v14977_v32 }
 0x490   :  { %3237 = vmatprep.subr.bf16.mxu0 %v15094_v41  ;;  %3278 = vmatprep.subr.bf16.mxu1 %v15099_v2 }
 0x492   :  { %2951 = vmatmul.mubr.bf16.vlgmr.msra.gmra.mrb[48].mxu0 %v2416_v24  ;;  %2992 = vmatmul.mubr.bf16.vlgmr.msra.gmra.mrb[48].mxu1 %v2416_v24 }
 0x493   :  { %3238 = vmatpush1.bf16.msra.mxu0 %v15104_v3  ;;  %3279 = vmatpush1.bf16.msra.mxu1 %v15109_v4 }
 0x494   :  { %3239 = vmatprep.subr.bf16.mxu0 %v15118_v5  ;;  %3280 = vmatprep.subr.bf16.mxu1 %v15123_v6 }
 0x495   :  { %3269 = vmatprep.mubr.bf16.mxu0 %v18398_v36  ;;  %3310 = vmatprep.mubr.bf16.mxu1 %v18398_v36 }
 0x497   :  { %3240 = vmatpush1.bf16.msra.mxu0 %v15128_v7  ;;  %3281 = vmatpush1.bf16.msra.mxu1 %v15133_v8 }
 0x498   :  { %3241 = vmatprep.subr.bf16.mxu0 %v15142_v10  ;;  %3282 = vmatprep.subr.bf16.mxu1 %v15147_v12 }
 0x49b   :  { %3242 = vmatpush1.bf16.msra.mxu0 %v15152_v13  ;;  %3283 = vmatpush1.bf16.msra.mxu1 %v18425_v33 }
 0x49c   :  { %3243 = vmatprep.subr.bf16.mxu0 %v18426_v23  ;;  %3284 = vmatprep.subr.bf16.mxu1 %v18427_v38 }
 0x49f   :  { %3244 = vmatpush1.bf16.msra.mxu0 %v18428_v26  ;;  %3285 = vmatpush1.bf16.msra.mxu1 %v18429_v21 }
 0x4a0   :  { %3245 = vmatprep.subr.bf16.mxu0 %v18430_v42  ;;  %3286 = vmatprep.subr.bf16.mxu1 %v18431_v46 }
 0x4a3   :  { %3246 = vmatpush1.bf16.msra.mxu0 %v18432_v27  ;;  %3287 = vmatpush1.bf16.msra.mxu1 %v18433_v9 }
 0x4a4   :  { %3247 = vmatprep.subr.bf16.mxu0 %v18434_v51  ;;  %3288 = vmatprep.subr.bf16.mxu1 %v18435_v52 }
 0x4a7   :  { %3248 = vmatpush1.bf16.msra.mxu0 %v18436_v53  ;;  %3289 = vmatpush1.bf16.msra.mxu1 %v18437_v54 }
 0x4a8   :  { %3249 = vmatprep.subr.bf16.mxu0 %v18438_v55  ;;  %3290 = vmatprep.subr.bf16.mxu1 %v18439_v56 }
 0x4ab   :  { %3250 = vmatpush1.bf16.msra.mxu0 %v18440_v57  ;;  %3291 = vmatpush1.bf16.msra.mxu1 %v18441_v58 }
 0x4ac   :  { %3251 = vmatprep.subr.bf16.mxu0 %v18442_v59  ;;  %3292 = vmatprep.subr.bf16.mxu1 %v18443_v60 }
 0x4af   :  { %3252 = vmatpush1.bf16.msra.mxu0 %v18444_v61  ;;  %3293 = vmatpush1.bf16.msra.mxu1 %v18445_v62 }
 0x4b0   :  { %3524 = vmatprep.subr.bf16.mxu0 %v15362_v25  ;;  %3565 = vmatprep.subr.bf16.mxu1 %v15367_v11 }
 0x565   :  { %v2952_v29 = vpop.f32.mrb[48].mxu0  ;;  %v2993_v28 = vpop.f32.mrb[48].mxu1 }
 0x566   :  { %v3000_v30 = vadd.f32 %v2952_v29, %v18446_v35  ;;  %v3002_v31 = vadd.f32 %v2993_v28, %v18447_v37  ;;  %v2954_v32 = vpop.f32.mrb[49].mxu0  ;;  %v2995_v39 = vpop.f32.mrb[49].mxu1 }
 0x567   :  { %v3001_v15 = vadd.f32 %v2954_v32, %v18448_v14  ;;  %v3003_v63 = vadd.f32 %v2995_v39, %v18449_v48  ;;  %v2956_v0 = vpop.f32.mrb[50].mxu0  ;;  %v2997_v49 = vpop.f32.mrb[50].mxu1  ;;  %v15382_v32 = vld [vmem:[%s18158_s3] ss:$16 sps:$4 sm:$0xff]   ;;  %v15387_v39 = vld [vmem:[%s18158_s3 + $0x8] ss:$16 sps:$4 sm:$0xff]  }
 0x568   :  { %v3004_v50 = vmul.f32 0.5, %v3000_v30  ;;  %v2957_v1 = vpop.f32.mrb[51].mxu0  ;;  %v2998_v34 = vpop.f32.mrb[51].mxu1  ;;  %v15394_v14 = vld [vmem:[%s18158_s3 + $0x24] ss:$16 sps:$4 sm:$0xff]  }
 0x569   :  { %v3008_v47 = vmul.f32 0.5, %v3001_v15  ;;  %v3013_v40 = vmul.f32 0.5, %v3003_v63  ;;  %v15399_v15 = vld [vmem:[%s18158_s3 + $0x2c] ss:$16 sps:$4 sm:$0xff]   ;;  %v15408_v48 = vld [vmem:[%s18158_s3 + $0x20] ss:$16 sps:$4 sm:$0xff]  }
 0x56a   :  { %13848 = vtanh.f32 %v3004_v50  ;;  %v15413_v63 = vld [vmem:[%s18158_s3 + $0x28] ss:$16 sps:$4 sm:$0xff]   ;;  %v15420_v0 = vld [vmem:[%s18158_s3 + $0x44] ss:$16 sps:$4 sm:$0xff]   ;;  %v15425_v49 = vld [vmem:[%s18158_s3 + $0x4c] ss:$16 sps:$4 sm:$0xff]  }
 0x56b   :  { %13850 = vtanh.f32 %v3008_v47  ;;  %v15434_v50 = vld [vmem:[%s18158_s3 + $0x40] ss:$16 sps:$4 sm:$0xff]   ;;  %v15439_v1 = vld [vmem:[%s18158_s3 + $0x48] ss:$16 sps:$4 sm:$0xff]   ;;  %v15446_v34 = vld [vmem:[%s18158_s3 + $0x64] ss:$16 sps:$4 sm:$0xff]  }
 0x56c   :  { %13852 = vtanh.f32 %v3002_v31  ;;  %v15451_v47 = vld [vmem:[%s18158_s3 + $0x6c] ss:$16 sps:$4 sm:$0xff]  }
 0x56d   :  { %13854 = vtanh.f32 %v3013_v40  ;;  %v15458_v40 = vld [vmem:[%s18158_s3 + $0x60] ss:$16 sps:$4 sm:$0xff]  }
 0x574   :  { %v13849_v43 = vpop.eup %13848 }
 0x575   :  { %v13851_v44 = vpop.eup %13850  ;;  %v3006_v18 = vmul.f32 0.5, %v13849_v43  ;;  %v15463_v43 = vld [vmem:[%s18158_s3 + $0x68] ss:$16 sps:$4 sm:$0xff]  }
 0x576   :  { %v3010_v16 = vmul.f32 0.5, %v13851_v44  ;;  %v13853_v45 = vpop.eup %13852  ;;  %v15470_v44 = vld [vmem:[%s18158_s3 + $0x84] ss:$16 sps:$4 sm:$0xff]  }
 0x577   :  { %v3007_v17 = vadd.f32 0.5, %v3006_v18  ;;  %v13855_v28 = vpop.eup %13854  ;;  %v15475_v18 = vld [vmem:[%s18158_s3 + $0x8c] ss:$16 sps:$4 sm:$0xff]  }
 0x578   :  { %v3011_v22 = vadd.f32 0.5, %v3010_v16  ;;  %v3015_v35 = vmul.f32 0.5, %v13855_v28  ;;  %v15482_v16 = vld [vmem:[%s18158_s3 + $0x80] ss:$16 sps:$4 sm:$0xff]   ;;  %v15518_v28 = vld [vmem:[%s18158_s3 + $0xc4] ss:$16 sps:$4 sm:$0xff]  }
 0x579   :  { %v3018_v20 = vmul.f32 %v13853_v45, %v3007_v17  ;;  %v15487_v17 = vld [vmem:[%s18158_s3 + $0x88] ss:$16 sps:$4 sm:$0xff]   ;;  %v15494_v45 = vld [vmem:[%s18158_s3 + $0xa4] ss:$16 sps:$4 sm:$0xff]   ;;  %18451 = vst [vmem:[#allocation10_spill] sm:$0xff] %v15518_v28 }
 0x57a   :  { %v3017_v24 = vmul.f32 %v3011_v22, %v15290_v19  ;;  %v3016_v30 = vadd.f32 0.5, %v3015_v35  ;;  %v15499_v22 = vld [vmem:[%s18158_s3 + $0xac] ss:$16 sps:$4 sm:$0xff]  }
 0x57b   :  { %v15523_v35 = vld [vmem:[%s18158_s3 + $0xcc] ss:$16 sps:$4 sm:$0xff]  }
 0x57c   :  { %v15376_v29 = vadd.f32 %v3018_v20, %v3017_v24  ;;  %v15506_v20 = vld [vmem:[%s18158_s3 + $0xa0] ss:$16 sps:$4 sm:$0xff]   ;;  %v15511_v24 = vld [vmem:[%s18158_s3 + $0xa8] ss:$16 sps:$4 sm:$0xff]   ;;  %18452 = vst [vmem:[#allocation11_spill] sm:$0xff] %v15523_v35 }
 0x57d   :  { %18450 = vst [vmem:[#allocation9_spill] sm:$0xff] %v15511_v24 }
 0x57e   :  { %13856 = vtanh.f32 %v15376_v29 }
 0x588   :  { %v13857_v37 = vpop.eup %13856 }
 0x589   :  { %v3021_v31 = vmul.f32 %v13857_v37, %v3016_v30  ;;  %v15530_v30 = vld [vmem:[%s18158_s3 + $0xc0] ss:$16 sps:$4 sm:$0xff]   ;;  %v15535_v37 = vld [vmem:[%s18158_s3 + $0xc8] ss:$16 sps:$4 sm:$0xff]  }
 0x58b   :  { %v15389_v19 = vpack.c.bf16 %v3021_v31, %v3021_v31  ;;  %v15542_v31 = vld [vmem:[%s18158_s3 + $0xe4] ss:$16 sps:$4 sm:$0xff]  }
 0x58d   :  { %3270 = vmatmul.mubr.bf16.vlgmr.msra.gmra.mrb[52].mxu0 %v15389_v19  ;;  %3311 = vmatmul.mubr.bf16.vlgmr.msra.gmra.mrb[52].mxu1 %v15389_v19 }
 0x58e   :  { %3525 = vmatpush1.bf16.msra.mxu0 %v15382_v32  ;;  %3566 = vmatpush1.bf16.msra.mxu1 %v15387_v39 }
 0x58f   :  { %3526 = vmatprep.subr.bf16.mxu0 %v15394_v14  ;;  %3567 = vmatprep.subr.bf16.mxu1 %v15399_v15 }
 0x590   :  { %3556 = vmatprep.mubr.bf16.mxu0 %v18398_v36  ;;  %3597 = vmatprep.mubr.bf16.mxu1 %v18398_v36 }
 0x592   :  { %3527 = vmatpush1.bf16.msra.mxu0 %v15408_v48  ;;  %3568 = vmatpush1.bf16.msra.mxu1 %v15413_v63 }
 0x593   :  { %3528 = vmatprep.subr.bf16.mxu0 %v15420_v0  ;;  %3569 = vmatprep.subr.bf16.mxu1 %v15425_v49 }
 0x596   :  { %3529 = vmatpush1.bf16.msra.mxu0 %v15434_v50  ;;  %3570 = vmatpush1.bf16.msra.mxu1 %v15439_v1 }
 0x597   :  { %3530 = vmatprep.subr.bf16.mxu0 %v15446_v34  ;;  %3571 = vmatprep.subr.bf16.mxu1 %v15451_v47 }
 0x59a   :  { %3531 = vmatpush1.bf16.msra.mxu0 %v15458_v40  ;;  %3572 = vmatpush1.bf16.msra.mxu1 %v15463_v43 }
 0x59b   :  { %3532 = vmatprep.subr.bf16.mxu0 %v15470_v44  ;;  %3573 = vmatprep.subr.bf16.mxu1 %v15475_v18 }
 0x59e   :  { %3533 = vmatpush1.bf16.msra.mxu0 %v15482_v16  ;;  %3574 = vmatpush1.bf16.msra.mxu1 %v15487_v17 }
 0x59f   :  { %3534 = vmatprep.subr.bf16.mxu0 %v15494_v45  ;;  %3575 = vmatprep.subr.bf16.mxu1 %v15499_v22 }
 0x5a2   :  { %3535 = vmatpush1.bf16.msra.mxu0 %v15506_v20  ;;  %3576 = vmatpush1.bf16.msra.mxu1 %v15511_v24  ;;  %v15547_v24 = vld [vmem:[%s18158_s3 + $0xec] ss:$16 sps:$4 sm:$0xff]  }
 0x5a3   :  { %3536 = vmatprep.subr.bf16.mxu0 %v15518_v28  ;;  %3577 = vmatprep.subr.bf16.mxu1 %v15523_v35  ;;  %v15554_v28 = vld [vmem:[%s18158_s3 + $0xe0] ss:$16 sps:$4 sm:$0xff]   ;;  %v15559_v35 = vld [vmem:[%s18158_s3 + $0xe8] ss:$16 sps:$4 sm:$0xff]  }
 0x5a6   :  { %3537 = vmatpush1.bf16.msra.mxu0 %v15530_v30  ;;  %3578 = vmatpush1.bf16.msra.mxu1 %v15535_v37 }
 0x5a7   :  { %3538 = vmatprep.subr.bf16.mxu0 %v15542_v31  ;;  %3579 = vmatprep.subr.bf16.mxu1 %v15547_v24 }
 0x5aa   :  { %3539 = vmatpush1.bf16.msra.mxu0 %v15554_v28  ;;  %3580 = vmatpush1.bf16.msra.mxu1 %v15559_v35 }
 0x5ab   :  { %3843 = vmatprep.subr.bf16.mxu0 %v15094_v41  ;;  %3884 = vmatprep.subr.bf16.mxu1 %v15099_v2 }
 0x5ad   :  { %3557 = vmatmul.mubr.bf16.vlgmr.msra.gmra.mrb[56].mxu0 %v15389_v19  ;;  %3598 = vmatmul.mubr.bf16.vlgmr.msra.gmra.mrb[56].mxu1 %v15389_v19 }
 0x5ae   :  { %3844 = vmatpush1.bf16.msra.mxu0 %v15104_v3  ;;  %3885 = vmatpush1.bf16.msra.mxu1 %v15109_v4  ;;  %v18453_v3 = vld [vmem:[#allocation17_spill] sm:$0xff] }
 0x5af   :  { %3845 = vmatprep.subr.bf16.mxu0 %v15118_v5  ;;  %3886 = vmatprep.subr.bf16.mxu1 %v15123_v6  ;;  %v18454_v5 = vld [vmem:[#allocation18_spill] sm:$0xff] }
 0x5b0   :  { %3875 = vmatprep.mubr.bf16.mxu0 %v18398_v36  ;;  %3916 = vmatprep.mubr.bf16.mxu1 %v18398_v36 }
 0x5b2   :  { %3846 = vmatpush1.bf16.msra.mxu0 %v15128_v7  ;;  %3887 = vmatpush1.bf16.msra.mxu1 %v15133_v8 }
 0x5b3   :  { %3847 = vmatprep.subr.bf16.mxu0 %v15142_v10  ;;  %3888 = vmatprep.subr.bf16.mxu1 %v15147_v12  ;;  %v18455_v10 = vld [vmem:[#allocation19_spill] sm:$0xff] }
 0x5b6   :  { %3848 = vmatpush1.bf16.msra.mxu0 %v15152_v13  ;;  %3889 = vmatpush1.bf16.msra.mxu1 %v18425_v33  ;;  %v18456_v13 = vld [vmem:[#allocation20_spill] sm:$0xff] }
 0x5b7   :  { %3849 = vmatprep.subr.bf16.mxu0 %v18426_v23  ;;  %3890 = vmatprep.subr.bf16.mxu1 %v18427_v38 }
 0x5ba   :  { %3850 = vmatpush1.bf16.msra.mxu0 %v18428_v26  ;;  %3891 = vmatpush1.bf16.msra.mxu1 %v18429_v21 }
 0x5bb   :  { %3851 = vmatprep.subr.bf16.mxu0 %v18430_v42  ;;  %3892 = vmatprep.subr.bf16.mxu1 %v18431_v46 }
 0x5be   :  { %3852 = vmatpush1.bf16.msra.mxu0 %v18432_v27  ;;  %3893 = vmatpush1.bf16.msra.mxu1 %v18433_v9 }
 0x5bf   :  { %3853 = vmatprep.subr.bf16.mxu0 %v18434_v51  ;;  %3894 = vmatprep.subr.bf16.mxu1 %v18435_v52 }
 0x5c2   :  { %3854 = vmatpush1.bf16.msra.mxu0 %v18436_v53  ;;  %3895 = vmatpush1.bf16.msra.mxu1 %v18437_v54 }
 0x5c3   :  { %3855 = vmatprep.subr.bf16.mxu0 %v18438_v55  ;;  %3896 = vmatprep.subr.bf16.mxu1 %v18439_v56 }
 0x5c6   :  { %3856 = vmatpush1.bf16.msra.mxu0 %v18440_v57  ;;  %3897 = vmatpush1.bf16.msra.mxu1 %v18441_v58 }
 0x5c7   :  { %3857 = vmatprep.subr.bf16.mxu0 %v18442_v59  ;;  %3898 = vmatprep.subr.bf16.mxu1 %v18443_v60 }
 0x5ca   :  { %3858 = vmatpush1.bf16.msra.mxu0 %v18444_v61  ;;  %3899 = vmatpush1.bf16.msra.mxu1 %v18445_v62 }
 0x5cb   :  { %4130 = vmatprep.subr.bf16.mxu0 %v15362_v25  ;;  %4171 = vmatprep.subr.bf16.mxu1 %v15367_v11 }
 0x680   :  { %v3558_v41 = vpop.f32.mrb[56].mxu0  ;;  %v3599_v2 = vpop.f32.mrb[56].mxu1 }
 0x681   :  { %v3606_v4 = vadd.f32 %v3558_v41, %v18453_v3  ;;  %v3608_v6 = vadd.f32 %v3599_v2, %v18454_v5  ;;  %v3560_v7 = vpop.f32.mrb[57].mxu0  ;;  %v3601_v8 = vpop.f32.mrb[57].mxu1  ;;  %v18458_v3 = vld [vmem:[#allocation10_spill] sm:$0xff] }
 0x682   :  { %v3607_v12 = vadd.f32 %v3560_v7, %v18455_v10  ;;  %v3609_v33 = vadd.f32 %v3601_v8, %v18456_v13  ;;  %v3562_v23 = vpop.f32.mrb[58].mxu0  ;;  %v3603_v38 = vpop.f32.mrb[58].mxu1  ;;  %v15648_v5 = vld [vmem:[%s18159_s2 + $0x4] ss:$16 sps:$4 sm:$0xff]   ;;  %v15658_v7 = vld [vmem:[%s18159_s2] ss:$16 sps:$4 sm:$0xff]  }
 0x683   :  { %v3610_v26 = vmul.f32 0.5, %v3606_v4  ;;  %v3563_v21 = vpop.f32.mrb[59].mxu0  ;;  %v3604_v42 = vpop.f32.mrb[59].mxu1  ;;  %v18459_v4 = vld [vmem:[#allocation11_spill] sm:$0xff]  ;;  %v15672_v10 = vld [vmem:[%s18159_s2 + $0x24] ss:$16 sps:$4 sm:$0xff]  }
 0x684   :  { %v3614_v46 = vmul.f32 0.5, %v3607_v12  ;;  %v3619_v27 = vmul.f32 0.5, %v3609_v33  ;;  %v15663_v8 = vld [vmem:[%s18159_s2 + $0x8] ss:$16 sps:$4 sm:$0xff]   ;;  %v15677_v12 = vld [vmem:[%s18159_s2 + $0x2c] ss:$16 sps:$4 sm:$0xff]  }
 0x685   :  { %13858 = vtanh.f32 %v3610_v26  ;;  %v15682_v13 = vld [vmem:[%s18159_s2 + $0x20] ss:$16 sps:$4 sm:$0xff]   ;;  %v15687_v33 = vld [vmem:[%s18159_s2 + $0x28] ss:$16 sps:$4 sm:$0xff]   ;;  %v15696_v23 = vld [vmem:[%s18159_s2 + $0x44] ss:$16 sps:$4 sm:$0xff]  }
 0x686   :  { %13860 = vtanh.f32 %v3614_v46  ;;  %v15701_v38 = vld [vmem:[%s18159_s2 + $0x4c] ss:$16 sps:$4 sm:$0xff]   ;;  %v15706_v26 = vld [vmem:[%s18159_s2 + $0x40] ss:$16 sps:$4 sm:$0xff]   ;;  %v15711_v21 = vld [vmem:[%s18159_s2 + $0x48] ss:$16 sps:$4 sm:$0xff]  }
 0x687   :  { %13862 = vtanh.f32 %v3608_v6  ;;  %v15653_v6 = vld [vmem:[%s18159_s2 + $0xc] ss:$16 sps:$4 sm:$0xff]   ;;  %18460 = vst [vmem:[#allocation12_spill] sm:$0xff] %v15711_v21  ;;  %v15720_v42 = vld [vmem:[%s18159_s2 + $0x64] ss:$16 sps:$4 sm:$0xff]  }
 0x688   :  { %13864 = vtanh.f32 %v3619_v27  ;;  %18461 = vst [vmem:[#allocation8_spill] sm:$0xff] %v15720_v42  ;;  %v15725_v46 = vld [vmem:[%s18159_s2 + $0x6c] ss:$16 sps:$4 sm:$0xff]   ;;  %v15730_v27 = vld [vmem:[%s18159_s2 + $0x60] ss:$16 sps:$4 sm:$0xff]  }
 0x689   :  { %18462 = vst [vmem:[#allocation29_spill] sm:$0xff] %v15725_v46  ;;  %18463 = vst [vmem:[#allocation30_spill] sm:$0xff] %v15730_v27 }
 0x68f   :  { %v13859_v9 = vpop.eup %13858 }
 0x690   :  { %v13861_v51 = vpop.eup %13860  ;;  %v3612_v52 = vmul.f32 0.5, %v13859_v9  ;;  %v15735_v9 = vld [vmem:[%s18159_s2 + $0x68] ss:$16 sps:$4 sm:$0xff]  }
 0x691   :  { %v3616_v53 = vmul.f32 0.5, %v13861_v51  ;;  %v13863_v55 = vpop.eup %13862  ;;  %18464 = vst [vmem:[#allocation31_spill] sm:$0xff] %v15735_v9  ;;  %v15744_v51 = vld [vmem:[%s18159_s2 + $0x84] ss:$16 sps:$4 sm:$0xff]  }
 0x692   :  { %v3613_v54 = vadd.f32 0.5, %v3612_v52  ;;  %v13865_v60 = vpop.eup %13864  ;;  %18465 = vst [vmem:[#allocation32_spill] sm:$0xff] %v15744_v51  ;;  %v15749_v52 = vld [vmem:[%s18159_s2 + $0x8c] ss:$16 sps:$4 sm:$0xff]  }
 0x693   :  { %v3617_v56 = vadd.f32 0.5, %v3616_v53  ;;  %v3621_v61 = vmul.f32 0.5, %v13865_v60  ;;  %18466 = vst [vmem:[#allocation33_spill] sm:$0xff] %v15749_v52  ;;  %v15754_v53 = vld [vmem:[%s18159_s2 + $0x80] ss:$16 sps:$4 sm:$0xff]  }
 0x694   :  { %v3624_v57 = vmul.f32 %v13863_v55, %v3613_v54  ;;  %18467 = vst [vmem:[#allocation34_spill] sm:$0xff] %v15754_v53  ;;  %v15759_v54 = vld [vmem:[%s18159_s2 + $0x88] ss:$16 sps:$4 sm:$0xff]   ;;  %v15768_v55 = vld [vmem:[%s18159_s2 + $0xa4] ss:$16 sps:$4 sm:$0xff]  }
 0x695   :  { %v3623_v58 = vmul.f32 %v3617_v56, %v15376_v29  ;;  %v3622_v62 = vadd.f32 0.5, %v3621_v61  ;;  %v18457_v29 = vld [vmem:[#allocation9_spill] sm:$0xff]  ;;  %18468 = vst [vmem:[#allocation35_spill] sm:$0xff] %v15759_v54  ;;  %18469 = vst [vmem:[#allocation36_spill] sm:$0xff] %v15768_v55  ;;  %v15792_v60 = vld [vmem:[%s18159_s2 + $0xc4] ss:$16 sps:$4 sm:$0xff]  }
 0x696   :  { %v15773_v56 = vld [vmem:[%s18159_s2 + $0xac] ss:$16 sps:$4 sm:$0xff]   ;;  %18473 = vst [vmem:[#allocation40_spill] sm:$0xff] %v15792_v60 }
 0x697   :  { %v15608_v59 = vadd.f32 %v3624_v57, %v3623_v58  ;;  %18470 = vst [vmem:[#allocation37_spill] sm:$0xff] %v15773_v56  ;;  %v15778_v57 = vld [vmem:[%s18159_s2 + $0xa0] ss:$16 sps:$4 sm:$0xff]   ;;  %v15783_v58 = vld [vmem:[%s18159_s2 + $0xa8] ss:$16 sps:$4 sm:$0xff]  }
 0x698   :  { %18471 = vst [vmem:[#allocation38_spill] sm:$0xff] %v15778_v57  ;;  %18472 = vst [vmem:[#allocation39_spill] sm:$0xff] %v15783_v58  ;;  %v15797_v61 = vld [vmem:[%s18159_s2 + $0xcc] ss:$16 sps:$4 sm:$0xff]  }
 0x699   :  { %13866 = vtanh.f32 %v15608_v59  ;;  %18474 = vst [vmem:[#allocation41_spill] sm:$0xff] %v15797_v61 }
 0x6a3   :  { %v13867_v19 = vpop.eup %13866 }
 0x6a4   :  { %v3627_v41 = vmul.f32 %v13867_v19, %v3622_v62  ;;  %v15802_v62 = vld [vmem:[%s18159_s2 + $0xc0] ss:$16 sps:$4 sm:$0xff]   ;;  %v15807_v19 = vld [vmem:[%s18159_s2 + $0xc8] ss:$16 sps:$4 sm:$0xff]  }
 0x6a5   :  { %18475 = vst [vmem:[#allocation42_spill] sm:$0xff] %v15802_v62  ;;  %18476 = vst [vmem:[#allocation43_spill] sm:$0xff] %v15807_v19 }
 0x6a6   :  { %v3628_v2 = vpack.c.bf16 %v3627_v41, %v3627_v41  ;;  %v15816_v41 = vld [vmem:[%s18159_s2 + $0xe4] ss:$16 sps:$4 sm:$0xff]  }
 0x6a7   :  { %18477 = vst [vmem:[#allocation44_spill] sm:$0xff] %v15816_v41 }
 0x6a8   :  { %3876 = vmatmul.mubr.bf16.vlgmr.msra.gmra.mrb[60].mxu0 %v3628_v2  ;;  %3917 = vmatmul.mubr.bf16.vlgmr.msra.gmra.mrb[60].mxu1 %v3628_v2 }
 0x6a9   :  { %4131 = vmatpush1.bf16.msra.mxu0 %v15382_v32  ;;  %4172 = vmatpush1.bf16.msra.mxu1 %v15387_v39 }
 0x6aa   :  { %4132 = vmatprep.subr.bf16.mxu0 %v15394_v14  ;;  %4173 = vmatprep.subr.bf16.mxu1 %v15399_v15 }
 0x6ab   :  { %4162 = vmatprep.mubr.bf16.mxu0 %v18398_v36  ;;  %4203 = vmatprep.mubr.bf16.mxu1 %v18398_v36 }
 0x6ad   :  { %4133 = vmatpush1.bf16.msra.mxu0 %v15408_v48  ;;  %4174 = vmatpush1.bf16.msra.mxu1 %v15413_v63 }
 0x6ae   :  { %4134 = vmatprep.subr.bf16.mxu0 %v15420_v0  ;;  %4175 = vmatprep.subr.bf16.mxu1 %v15425_v49 }
 0x6b1   :  { %4135 = vmatpush1.bf16.msra.mxu0 %v15434_v50  ;;  %4176 = vmatpush1.bf16.msra.mxu1 %v15439_v1 }
 0x6b2   :  { %4136 = vmatprep.subr.bf16.mxu0 %v15446_v34  ;;  %4177 = vmatprep.subr.bf16.mxu1 %v15451_v47 }
 0x6b5   :  { %4137 = vmatpush1.bf16.msra.mxu0 %v15458_v40  ;;  %4178 = vmatpush1.bf16.msra.mxu1 %v15463_v43 }
 0x6b6   :  { %4138 = vmatprep.subr.bf16.mxu0 %v15470_v44  ;;  %4179 = vmatprep.subr.bf16.mxu1 %v15475_v18 }
 0x6b9   :  { %4139 = vmatpush1.bf16.msra.mxu0 %v15482_v16  ;;  %4180 = vmatpush1.bf16.msra.mxu1 %v15487_v17 }
 0x6ba   :  { %4140 = vmatprep.subr.bf16.mxu0 %v15494_v45  ;;  %4181 = vmatprep.subr.bf16.mxu1 %v15499_v22 }
 0x6bd   :  { %4141 = vmatpush1.bf16.msra.mxu0 %v15506_v20  ;;  %4182 = vmatpush1.bf16.msra.mxu1 %v18457_v29 }
 0x6be   :  { %4142 = vmatprep.subr.bf16.mxu0 %v18458_v3  ;;  %4183 = vmatprep.subr.bf16.mxu1 %v18459_v4 }
 0x6c1   :  { %4143 = vmatpush1.bf16.msra.mxu0 %v15530_v30  ;;  %4184 = vmatpush1.bf16.msra.mxu1 %v15535_v37 }
 0x6c2   :  { %4144 = vmatprep.subr.bf16.mxu0 %v15542_v31  ;;  %4185 = vmatprep.subr.bf16.mxu1 %v15547_v24 }
 0x6c5   :  { %4145 = vmatpush1.bf16.msra.mxu0 %v15554_v28  ;;  %4186 = vmatpush1.bf16.msra.mxu1 %v15559_v35 }
 0x6c6   :  { %4449 = vmatprep.subr.bf16.mxu0 %v15648_v5  ;;  %4490 = vmatprep.subr.bf16.mxu1 %v15653_v6 }
 0x6c8   :  { %4163 = vmatmul.mubr.bf16.vlgmr.msra.gmra.mrb[64].mxu0 %v3628_v2  ;;  %4204 = vmatmul.mubr.bf16.vlgmr.msra.gmra.mrb[64].mxu1 %v3628_v2  ;;  %v15821_v2 = vld [vmem:[%s18159_s2 + $0xec] ss:$16 sps:$4 sm:$0xff]  }
 0x6c9   :  { %4481 = vmatprep.mubr.bf16.mxu0 %v18398_v36  ;;  %4522 = vmatprep.mubr.bf16.mxu1 %v18398_v36  ;;  %18478 = vst [vmem:[#allocation45_spill] sm:$0xff] %v15821_v2 }
 0x6ca   :  { %4450 = vmatpush1.bf16.msra.mxu0 %v15658_v7  ;;  %4491 = vmatpush1.bf16.msra.mxu1 %v15663_v8 }
 0x6cb   :  { %4451 = vmatprep.subr.bf16.mxu0 %v15672_v10  ;;  %4492 = vmatprep.subr.bf16.mxu1 %v15677_v12 }
 0x6ce   :  { %4452 = vmatpush1.bf16.msra.mxu0 %v15682_v13  ;;  %4493 = vmatpush1.bf16.msra.mxu1 %v15687_v33 }
 0x6cf   :  { %4453 = vmatprep.subr.bf16.mxu0 %v15696_v23  ;;  %4494 = vmatprep.subr.bf16.mxu1 %v15701_v38 }
 0x6d2   :  { %4454 = vmatpush1.bf16.msra.mxu0 %v15706_v26  ;;  %4495 = vmatpush1.bf16.msra.mxu1 %v15711_v21 }
 0x6d3   :  { %4455 = vmatprep.subr.bf16.mxu0 %v15720_v42  ;;  %4496 = vmatprep.subr.bf16.mxu1 %v15725_v46 }
 0x6d6   :  { %4456 = vmatpush1.bf16.msra.mxu0 %v15730_v27  ;;  %4497 = vmatpush1.bf16.msra.mxu1 %v15735_v9 }
 0x6d7   :  { %4457 = vmatprep.subr.bf16.mxu0 %v15744_v51  ;;  %4498 = vmatprep.subr.bf16.mxu1 %v15749_v52  ;;  %v18483_v52 = vld [vmem:[#allocation23_spill] sm:$0xff]  ;;  %v18484_v51 = vld [vmem:[#allocation24_spill] sm:$0xff] }
 0x6da   :  { %4458 = vmatpush1.bf16.msra.mxu0 %v15754_v53  ;;  %4499 = vmatpush1.bf16.msra.mxu1 %v15759_v54 }
 0x6db   :  { %4459 = vmatprep.subr.bf16.mxu0 %v15768_v55  ;;  %4500 = vmatprep.subr.bf16.mxu1 %v15773_v56  ;;  %v18482_v56 = vld [vmem:[#allocation22_spill] sm:$0xff] }
 0x6de   :  { %4460 = vmatpush1.bf16.msra.mxu0 %v15778_v57  ;;  %4501 = vmatpush1.bf16.msra.mxu1 %v15783_v58  ;;  %v18481_v58 = vld [vmem:[#allocation21_spill] sm:$0xff] }
 0x6df   :  { %4461 = vmatprep.subr.bf16.mxu0 %v15792_v60  ;;  %4502 = vmatprep.subr.bf16.mxu1 %v15797_v61  ;;  %v15826_v60 = vld [vmem:[%s18159_s2 + $0xe0] ss:$16 sps:$4 sm:$0xff]  }
 0x6e0   :  { %18479 = vst [vmem:[#allocation46_spill] sm:$0xff] %v15826_v60 }
 0x6e2   :  { %4462 = vmatpush1.bf16.msra.mxu0 %v15802_v62  ;;  %4503 = vmatpush1.bf16.msra.mxu1 %v15807_v19  ;;  %v15831_v62 = vld [vmem:[%s18159_s2 + $0xe8] ss:$16 sps:$4 sm:$0xff]  }
 0x6e3   :  { %18480 = vst [vmem:[#allocation47_spill] sm:$0xff] %v15831_v62  ;;  %4463 = vmatprep.subr.bf16.mxu0 %v15816_v41  ;;  %4504 = vmatprep.subr.bf16.mxu1 %v15821_v2 }
 0x6e6   :  { %4464 = vmatpush1.bf16.msra.mxu0 %v15826_v60  ;;  %4505 = vmatpush1.bf16.msra.mxu1 %v15831_v62 }
 0x6e7   :  { %4736 = vmatprep.subr.bf16.mxu0 %v15362_v25  ;;  %4777 = vmatprep.subr.bf16.mxu1 %v15367_v11 }
 0x79b   :  { %v4164_v19 = vpop.f32.mrb[64].mxu0  ;;  %v4205_v61 = vpop.f32.mrb[64].mxu1 }
 0x79c   :  { %v4212_v57 = vadd.f32 %v4164_v19, %v18481_v58  ;;  %v4214_v55 = vadd.f32 %v4205_v61, %v18482_v56  ;;  %v4166_v54 = vpop.f32.mrb[65].mxu0  ;;  %v4207_v53 = vpop.f32.mrb[65].mxu1 }
 0x79d   :  { %v4213_v41 = vadd.f32 %v4166_v54, %v18483_v52  ;;  %v4215_v2 = vadd.f32 %v4207_v53, %v18484_v51  ;;  %v4168_v9 = vpop.f32.mrb[66].mxu0  ;;  %v4209_v60 = vpop.f32.mrb[66].mxu1 }
 0x79e   :  { %v4216_v27 = vmul.f32 0.5, %v4212_v57  ;;  %v4169_v62 = vpop.f32.mrb[67].mxu0  ;;  %v4210_v46 = vpop.f32.mrb[67].mxu1 }
 0x79f   :  { %v4220_v25 = vmul.f32 0.5, %v4213_v41  ;;  %v4225_v11 = vmul.f32 0.5, %v4215_v2 }
 0x7a0   :  { %13868 = vtanh.f32 %v4216_v27 }
 0x7a1   :  { %13870 = vtanh.f32 %v4220_v25 }
 0x7a2   :  { %13872 = vtanh.f32 %v4214_v55 }
 0x7a3   :  { %13874 = vtanh.f32 %v4225_v11 }
 0x7aa   :  { %v13869_v42 = vpop.eup %13868 }
 0x7ab   :  { %v13871_v58 = vpop.eup %13870  ;;  %v4218_v19 = vmul.f32 0.5, %v13869_v42 }
 0x7ac   :  { %v4222_v56 = vmul.f32 0.5, %v13871_v58  ;;  %v13873_v21 = vpop.eup %13872 }
 0x7ad   :  { %v4219_v61 = vadd.f32 0.5, %v4218_v19  ;;  %v13875_v46 = vpop.eup %13874 }
 0x7ae   :  { %v4223_v52 = vadd.f32 0.5, %v4222_v56  ;;  %v4227_v27 = vmul.f32 0.5, %v13875_v46 }
 0x7af   :  { %v4230_v54 = vmul.f32 %v13873_v21, %v4219_v61 }
 0x7b0   :  { %v4229_v9 = vmul.f32 %v4223_v52, %v15608_v59  ;;  %v4228_v53 = vadd.f32 0.5, %v4227_v27  ;;  %v18509_v59 = vld [vmem:[#allocation26_spill] sm:$0xff] }
 0x7b1   :  { %v15933_v27 = vld [vmem:[%s18158_s3 + $0x100] ss:$16 sps:$4 sm:$0xff]  }
 0x7b2   :  { %v15844_v51 = vadd.f32 %v4230_v54, %v4229_v9 }
 0x7b4   :  { %13876 = vtanh.f32 %v15844_v51 }
 0x7be   :  { %v13877_v55 = vpop.eup %13876 }
 0x7bf   :  { %v4233_v57 = vmul.f32 %v13877_v55, %v4228_v53  ;;  %v15938_v53 = vld [vmem:[%s18158_s3 + $0x108] ss:$16 sps:$4 sm:$0xff]  }
 0x7c1   :  { %v4234_v60 = vpack.c.bf16 %v4233_v57, %v4233_v57  ;;  %v15948_v57 = vld [vmem:[%s18158_s3 + $0x12c] ss:$16 sps:$4 sm:$0xff]  }
 0x7c3   :  { %4482 = vmatmul.mubr.bf16.vlgmr.msra.gmra.mrb[68].mxu0 %v4234_v60  ;;  %4523 = vmatmul.mubr.bf16.vlgmr.msra.gmra.mrb[68].mxu1 %v4234_v60 }
 0x7c4   :  { %4737 = vmatpush1.bf16.msra.mxu0 %v15382_v32  ;;  %4778 = vmatpush1.bf16.msra.mxu1 %v15387_v39  ;;  %v18485_v32 = vld [vmem:[#allocation12_spill] sm:$0xff] }
 0x7c5   :  { %4738 = vmatprep.subr.bf16.mxu0 %v15394_v14  ;;  %4779 = vmatprep.subr.bf16.mxu1 %v15399_v15  ;;  %v18486_v39 = vld [vmem:[#allocation8_spill] sm:$0xff]  ;;  %v18487_v14 = vld [vmem:[#allocation29_spill] sm:$0xff]  ;;  %v18488_v15 = vld [vmem:[#allocation30_spill] sm:$0xff] }
 0x7c6   :  { %4768 = vmatprep.mubr.bf16.mxu0 %v18398_v36  ;;  %4809 = vmatprep.mubr.bf16.mxu1 %v18398_v36 }
 0x7c8   :  { %4739 = vmatpush1.bf16.msra.mxu0 %v15408_v48  ;;  %4780 = vmatpush1.bf16.msra.mxu1 %v15413_v63  ;;  %v18489_v48 = vld [vmem:[#allocation31_spill] sm:$0xff]  ;;  %v18490_v63 = vld [vmem:[#allocation32_spill] sm:$0xff] }
 0x7c9   :  { %4740 = vmatprep.subr.bf16.mxu0 %v15420_v0  ;;  %4781 = vmatprep.subr.bf16.mxu1 %v15425_v49  ;;  %v18491_v0 = vld [vmem:[#allocation33_spill] sm:$0xff]  ;;  %v18492_v49 = vld [vmem:[#allocation34_spill] sm:$0xff] }
 0x7cc   :  { %4741 = vmatpush1.bf16.msra.mxu0 %v15434_v50  ;;  %4782 = vmatpush1.bf16.msra.mxu1 %v15439_v1  ;;  %v18493_v50 = vld [vmem:[#allocation35_spill] sm:$0xff]  ;;  %v18494_v1 = vld [vmem:[#allocation36_spill] sm:$0xff] }
 0x7cd   :  { %4742 = vmatprep.subr.bf16.mxu0 %v15446_v34  ;;  %4783 = vmatprep.subr.bf16.mxu1 %v15451_v47  ;;  %v18495_v34 = vld [vmem:[#allocation37_spill] sm:$0xff]  ;;  %v18496_v47 = vld [vmem:[#allocation38_spill] sm:$0xff] }
 0x7d0   :  { %4743 = vmatpush1.bf16.msra.mxu0 %v15458_v40  ;;  %4784 = vmatpush1.bf16.msra.mxu1 %v15463_v43  ;;  %v18497_v40 = vld [vmem:[#allocation39_spill] sm:$0xff]  ;;  %v18498_v43 = vld [vmem:[#allocation40_spill] sm:$0xff] }
 0x7d1   :  { %4744 = vmatprep.subr.bf16.mxu0 %v15470_v44  ;;  %4785 = vmatprep.subr.bf16.mxu1 %v15475_v18  ;;  %v18499_v44 = vld [vmem:[#allocation41_spill] sm:$0xff]  ;;  %v18500_v18 = vld [vmem:[#allocation42_spill] sm:$0xff] }
 0x7d4   :  { %4745 = vmatpush1.bf16.msra.mxu0 %v15482_v16  ;;  %4786 = vmatpush1.bf16.msra.mxu1 %v15487_v17  ;;  %v18501_v16 = vld [vmem:[#allocation43_spill] sm:$0xff]  ;;  %v18502_v17 = vld [vmem:[#allocation44_spill] sm:$0xff] }
 0x7d5   :  { %4746 = vmatprep.subr.bf16.mxu0 %v15494_v45  ;;  %4787 = vmatprep.subr.bf16.mxu1 %v15499_v22  ;;  %v18503_v45 = vld [vmem:[#allocation45_spill] sm:$0xff]  ;;  %v18504_v22 = vld [vmem:[#allocation46_spill] sm:$0xff] }
 0x7d8   :  { %4747 = vmatpush1.bf16.msra.mxu0 %v15506_v20  ;;  %4788 = vmatpush1.bf16.msra.mxu1 %v18457_v29  ;;  %v18505_v20 = vld [vmem:[#allocation47_spill] sm:$0xff] }
 0x7d9   :  { %4748 = vmatprep.subr.bf16.mxu0 %v18458_v3  ;;  %4789 = vmatprep.subr.bf16.mxu1 %v18459_v4 }
 0x7dc   :  { %4749 = vmatpush1.bf16.msra.mxu0 %v15530_v30  ;;  %4790 = vmatpush1.bf16.msra.mxu1 %v15535_v37  ;;  %v18508_v37 = vld [vmem:[#allocation25_spill] sm:$0xff] }
 0x7dd   :  { %4750 = vmatprep.subr.bf16.mxu0 %v15542_v31  ;;  %4791 = vmatprep.subr.bf16.mxu1 %v15547_v24  ;;  %v15916_v24 = vld [vmem:[%s18158_s3 + $0x104] ss:$16 sps:$4 sm:$0xff]  }
 0x7de   :  { %18506 = vst [vmem:[#allocation48_spill] sm:$0xff] %v15916_v24 }
 0x7e0   :  { %4751 = vmatpush1.bf16.msra.mxu0 %v15554_v28  ;;  %4792 = vmatpush1.bf16.msra.mxu1 %v15559_v35  ;;  %v15921_v28 = vld [vmem:[%s18158_s3 + $0x10c] ss:$16 sps:$4 sm:$0xff]  }
 0x7e1   :  { %5055 = vmatprep.subr.bf16.mxu0 %v15648_v5  ;;  %5096 = vmatprep.subr.bf16.mxu1 %v15653_v6  ;;  %18507 = vst [vmem:[#allocation13_spill] sm:$0xff] %v15921_v28  ;;  %v18510_v5 = vld [vmem:[#allocation27_spill] sm:$0xff] }
 0x7e3   :  { %4769 = vmatmul.mubr.bf16.vlgmr.msra.gmra.mrb[72].mxu0 %v4234_v60  ;;  %4810 = vmatmul.mubr.bf16.vlgmr.msra.gmra.mrb[72].mxu1 %v4234_v60  ;;  %v15955_v60 = vld [vmem:[%s18158_s3 + $0x120] ss:$16 sps:$4 sm:$0xff]  }
 0x7e4   :  { %5056 = vmatpush1.bf16.msra.mxu0 %v15658_v7  ;;  %5097 = vmatpush1.bf16.msra.mxu1 %v15663_v8  ;;  %v18511_v7 = vld [vmem:[#allocation28_spill] sm:$0xff] }
 0x7e5   :  { %5057 = vmatprep.subr.bf16.mxu0 %v15672_v10  ;;  %5098 = vmatprep.subr.bf16.mxu1 %v15677_v12 }
 0x7e6   :  { %5087 = vmatprep.mubr.bf16.mxu0 %v18398_v36  ;;  %5128 = vmatprep.mubr.bf16.mxu1 %v18398_v36 }
 0x7e8   :  { %5058 = vmatpush1.bf16.msra.mxu0 %v15682_v13  ;;  %5099 = vmatpush1.bf16.msra.mxu1 %v15687_v33 }
 0x7e9   :  { %5059 = vmatprep.subr.bf16.mxu0 %v15696_v23  ;;  %5100 = vmatprep.subr.bf16.mxu1 %v15701_v38 }
 0x7ec   :  { %5060 = vmatpush1.bf16.msra.mxu0 %v15706_v26  ;;  %5101 = vmatpush1.bf16.msra.mxu1 %v18485_v32  ;;  %v15960_v32 = vld [vmem:[%s18158_s3 + $0x128] ss:$16 sps:$4 sm:$0xff]  }
 0x7ed   :  { %5061 = vmatprep.subr.bf16.mxu0 %v18486_v39  ;;  %5102 = vmatprep.subr.bf16.mxu1 %v18487_v14  ;;  %v15967_v39 = vld [vmem:[%s18158_s3 + $0x144] ss:$16 sps:$4 sm:$0xff]   ;;  %v15972_v14 = vld [vmem:[%s18158_s3 + $0x14c] ss:$16 sps:$4 sm:$0xff]  }
 0x7f0   :  { %5062 = vmatpush1.bf16.msra.mxu0 %v18488_v15  ;;  %5103 = vmatpush1.bf16.msra.mxu1 %v18489_v48  ;;  %v15981_v15 = vld [vmem:[%s18158_s3 + $0x140] ss:$16 sps:$4 sm:$0xff]   ;;  %v15986_v48 = vld [vmem:[%s18158_s3 + $0x148] ss:$16 sps:$4 sm:$0xff]  }
 0x7f1   :  { %5063 = vmatprep.subr.bf16.mxu0 %v18490_v63  ;;  %5104 = vmatprep.subr.bf16.mxu1 %v18491_v0  ;;  %v15993_v63 = vld [vmem:[%s18158_s3 + $0x164] ss:$16 sps:$4 sm:$0xff]   ;;  %v15998_v0 = vld [vmem:[%s18158_s3 + $0x16c] ss:$16 sps:$4 sm:$0xff]  }
 0x7f4   :  { %5064 = vmatpush1.bf16.msra.mxu0 %v18492_v49  ;;  %5105 = vmatpush1.bf16.msra.mxu1 %v18493_v50  ;;  %v16005_v49 = vld [vmem:[%s18158_s3 + $0x160] ss:$16 sps:$4 sm:$0xff]   ;;  %v16010_v50 = vld [vmem:[%s18158_s3 + $0x168] ss:$16 sps:$4 sm:$0xff]  }
 0x7f5   :  { %5065 = vmatprep.subr.bf16.mxu0 %v18494_v1  ;;  %5106 = vmatprep.subr.bf16.mxu1 %v18495_v34  ;;  %v16017_v1 = vld [vmem:[%s18158_s3 + $0x184] ss:$16 sps:$4 sm:$0xff]   ;;  %v16022_v34 = vld [vmem:[%s18158_s3 + $0x18c] ss:$16 sps:$4 sm:$0xff]  }
 0x7f8   :  { %5066 = vmatpush1.bf16.msra.mxu0 %v18496_v47  ;;  %5107 = vmatpush1.bf16.msra.mxu1 %v18497_v40  ;;  %v16029_v47 = vld [vmem:[%s18158_s3 + $0x180] ss:$16 sps:$4 sm:$0xff]   ;;  %v16034_v40 = vld [vmem:[%s18158_s3 + $0x188] ss:$16 sps:$4 sm:$0xff]  }
 0x7f9   :  { %5067 = vmatprep.subr.bf16.mxu0 %v18498_v43  ;;  %5108 = vmatprep.subr.bf16.mxu1 %v18499_v44  ;;  %v16041_v43 = vld [vmem:[%s18158_s3 + $0x1a4] ss:$16 sps:$4 sm:$0xff]   ;;  %v16046_v44 = vld [vmem:[%s18158_s3 + $0x1ac] ss:$16 sps:$4 sm:$0xff]  }
 0x7fc   :  { %5068 = vmatpush1.bf16.msra.mxu0 %v18500_v18  ;;  %5109 = vmatpush1.bf16.msra.mxu1 %v18501_v16  ;;  %v16053_v18 = vld [vmem:[%s18158_s3 + $0x1a0] ss:$16 sps:$4 sm:$0xff]   ;;  %v16058_v16 = vld [vmem:[%s18158_s3 + $0x1a8] ss:$16 sps:$4 sm:$0xff]  }
 0x7fd   :  { %5069 = vmatprep.subr.bf16.mxu0 %v18502_v17  ;;  %5110 = vmatprep.subr.bf16.mxu1 %v18503_v45  ;;  %v16065_v17 = vld [vmem:[%s18158_s3 + $0x1c4] ss:$16 sps:$4 sm:$0xff]   ;;  %v16070_v45 = vld [vmem:[%s18158_s3 + $0x1cc] ss:$16 sps:$4 sm:$0xff]  }
 0x800   :  { %5070 = vmatpush1.bf16.msra.mxu0 %v18504_v22  ;;  %5111 = vmatpush1.bf16.msra.mxu1 %v18505_v20  ;;  %v16077_v22 = vld [vmem:[%s18158_s3 + $0x1c0] ss:$16 sps:$4 sm:$0xff]   ;;  %v16082_v20 = vld [vmem:[%s18158_s3 + $0x1c8] ss:$16 sps:$4 sm:$0xff]  }
 0x801   :  { %5340 = vmatprep.subr.bf16.mxu0 %v15916_v24  ;;  %5381 = vmatprep.subr.bf16.mxu1 %v15921_v28 }
 0x8b6   :  { %v4770_v35 = vpop.f32.mrb[72].mxu0  ;;  %v4811_v30 = vpop.f32.mrb[72].mxu1 }
 0x8b7   :  { %v4818_v31 = vadd.f32 %v4770_v35, %v18508_v37  ;;  %v4820_v29 = vadd.f32 %v4811_v30, %v18509_v59  ;;  %v4772_v3 = vpop.f32.mrb[73].mxu0  ;;  %v4813_v4 = vpop.f32.mrb[73].mxu1  ;;  %v16089_v35 = vld [vmem:[%s18158_s3 + $0x1e4] ss:$16 sps:$4 sm:$0xff]   ;;  %v16094_v30 = vld [vmem:[%s18158_s3 + $0x1ec] ss:$16 sps:$4 sm:$0xff]  }
 0x8b8   :  { %v4819_v6 = vadd.f32 %v4772_v3, %v18510_v5  ;;  %v4821_v8 = vadd.f32 %v4813_v4, %v18511_v7  ;;  %v4774_v10 = vpop.f32.mrb[74].mxu0  ;;  %v4815_v12 = vpop.f32.mrb[74].mxu1  ;;  %v16101_v37 = vld [vmem:[%s18158_s3 + $0x1e0] ss:$16 sps:$4 sm:$0xff]   ;;  %v16119_v59 = vld [vmem:[%s18159_s2 + $0x104] ss:$16 sps:$4 sm:$0xff]  }
 0x8b9   :  { %v4822_v13 = vmul.f32 0.5, %v4818_v31  ;;  %v4775_v33 = vpop.f32.mrb[75].mxu0  ;;  %v4816_v23 = vpop.f32.mrb[75].mxu1  ;;  %v16106_v31 = vld [vmem:[%s18158_s3 + $0x1e8] ss:$16 sps:$4 sm:$0xff]  }
 0x8ba   :  { %v4826_v38 = vmul.f32 0.5, %v4819_v6  ;;  %v4831_v26 = vmul.f32 0.5, %v4821_v8  ;;  %v16129_v3 = vld [vmem:[%s18159_s2 + $0x100] ss:$16 sps:$4 sm:$0xff]   ;;  %v16134_v4 = vld [vmem:[%s18159_s2 + $0x108] ss:$16 sps:$4 sm:$0xff]  }
 0x8bb   :  { %13878 = vtanh.f32 %v4822_v13  ;;  %v16143_v5 = vld [vmem:[%s18159_s2 + $0x124] ss:$16 sps:$4 sm:$0xff]   ;;  %v16148_v6 = vld [vmem:[%s18159_s2 + $0x12c] ss:$16 sps:$4 sm:$0xff]   ;;  %v16153_v7 = vld [vmem:[%s18159_s2 + $0x120] ss:$16 sps:$4 sm:$0xff]  }
 0x8bc   :  { %13880 = vtanh.f32 %v4826_v38  ;;  %v16158_v8 = vld [vmem:[%s18159_s2 + $0x128] ss:$16 sps:$4 sm:$0xff]   ;;  %v16167_v10 = vld [vmem:[%s18159_s2 + $0x144] ss:$16 sps:$4 sm:$0xff]   ;;  %v16172_v12 = vld [vmem:[%s18159_s2 + $0x14c] ss:$16 sps:$4 sm:$0xff]  }
 0x8bd   :  { %13882 = vtanh.f32 %v4820_v29  ;;  %v16124_v29 = vld [vmem:[%s18159_s2 + $0x10c] ss:$16 sps:$4 sm:$0xff]   ;;  %18512 = vst [vmem:[#allocation14_spill] sm:$0xff] %v16172_v12  ;;  %v16177_v13 = vld [vmem:[%s18159_s2 + $0x140] ss:$16 sps:$4 sm:$0xff]  }
 0x8be   :  { %13884 = vtanh.f32 %v4831_v26  ;;  %18513 = vst [vmem:[#allocation15_spill] sm:$0xff] %v16177_v13  ;;  %v16182_v33 = vld [vmem:[%s18159_s2 + $0x148] ss:$16 sps:$4 sm:$0xff]   ;;  %v16191_v23 = vld [vmem:[%s18159_s2 + $0x164] ss:$16 sps:$4 sm:$0xff]  }
 0x8bf   :  { %18514 = vst [vmem:[#allocation16_spill] sm:$0xff] %v16182_v33  ;;  %18515 = vst [vmem:[#allocation17_spill] sm:$0xff] %v16191_v23  ;;  %v16196_v38 = vld [vmem:[%s18159_s2 + $0x16c] ss:$16 sps:$4 sm:$0xff]   ;;  %v16201_v26 = vld [vmem:[%s18159_s2 + $0x160] ss:$16 sps:$4 sm:$0xff]  }
 0x8c0   :  { %18516 = vst [vmem:[#allocation18_spill] sm:$0xff] %v16196_v38  ;;  %18517 = vst [vmem:[#allocation19_spill] sm:$0xff] %v16201_v26 }
 0x8c5   :  { %v13879_v21 = vpop.eup %13878 }
 0x8c6   :  { %v13881_v42 = vpop.eup %13880  ;;  %v4824_v62 = vmul.f32 0.5, %v13879_v21  ;;  %v16206_v21 = vld [vmem:[%s18159_s2 + $0x168] ss:$16 sps:$4 sm:$0xff]  }
 0x8c7   :  { %v4828_v41 = vmul.f32 0.5, %v13881_v42  ;;  %v13883_v25 = vpop.eup %13882  ;;  %18518 = vst [vmem:[#allocation20_spill] sm:$0xff] %v16206_v21  ;;  %v16215_v42 = vld [vmem:[%s18159_s2 + $0x184] ss:$16 sps:$4 sm:$0xff]  }
 0x8c8   :  { %v4825_v2 = vadd.f32 0.5, %v4824_v62  ;;  %v13885_v61 = vpop.eup %13884  ;;  %18519 = vst [vmem:[#allocation9_spill] sm:$0xff] %v16215_v42  ;;  %v16220_v62 = vld [vmem:[%s18159_s2 + $0x18c] ss:$16 sps:$4 sm:$0xff]  }
 0x8c9   :  { %v4829_v11 = vadd.f32 0.5, %v4828_v41  ;;  %v4833_v52 = vmul.f32 0.5, %v13885_v61  ;;  %18520 = vst [vmem:[#allocation10_spill] sm:$0xff] %v16220_v62  ;;  %v16225_v41 = vld [vmem:[%s18159_s2 + $0x180] ss:$16 sps:$4 sm:$0xff]  }
 0x8ca   :  { %v4836_v58 = vmul.f32 %v13883_v25, %v4825_v2  ;;  %18521 = vst [vmem:[#allocation11_spill] sm:$0xff] %v16225_v41  ;;  %v16230_v2 = vld [vmem:[%s18159_s2 + $0x188] ss:$16 sps:$4 sm:$0xff]   ;;  %v16239_v25 = vld [vmem:[%s18159_s2 + $0x1a4] ss:$16 sps:$4 sm:$0xff]  }
 0x8cb   :  { %v4835_v19 = vmul.f32 %v4829_v11, %v15844_v51  ;;  %v4834_v54 = vadd.f32 0.5, %v4833_v52  ;;  %v15943_v51 = vld [vmem:[%s18158_s3 + $0x124] ss:$16 sps:$4 sm:$0xff]   ;;  %18522 = vst [vmem:[#allocation21_spill] sm:$0xff] %v16230_v2  ;;  %18523 = vst [vmem:[#allocation22_spill] sm:$0xff] %v16239_v25 }
 0x8cc   :  { %v16244_v11 = vld [vmem:[%s18159_s2 + $0x1ac] ss:$16 sps:$4 sm:$0xff]   ;;  %v16273_v52 = vld [vmem:[%s18159_s2 + $0x1c0] ss:$16 sps:$4 sm:$0xff]  }
 0x8cd   :  { %v4837_v56 = vadd.f32 %v4836_v58, %v4835_v19  ;;  %18524 = vst [vmem:[#allocation23_spill] sm:$0xff] %v16244_v11  ;;  %v16249_v58 = vld [vmem:[%s18159_s2 + $0x1a0] ss:$16 sps:$4 sm:$0xff]   ;;  %v16254_v19 = vld [vmem:[%s18159_s2 + $0x1a8] ss:$16 sps:$4 sm:$0xff]   ;;  %18529 = vst [vmem:[#allocation30_spill] sm:$0xff] %v16273_v52 }
 0x8ce   :  { %18525 = vst [vmem:[#allocation24_spill] sm:$0xff] %v16249_v58  ;;  %18526 = vst [vmem:[#allocation12_spill] sm:$0xff] %v16254_v19  ;;  %v16268_v61 = vld [vmem:[%s18159_s2 + $0x1cc] ss:$16 sps:$4 sm:$0xff]  }
 0x8cf   :  { %13886 = vtanh.f32 %v4837_v56  ;;  %v16263_v56 = vld [vmem:[%s18159_s2 + $0x1c4] ss:$16 sps:$4 sm:$0xff]   ;;  %18528 = vst [vmem:[#allocation29_spill] sm:$0xff] %v16268_v61 }
 0x8d0   :  { %18527 = vst [vmem:[#allocation8_spill] sm:$0xff] %v16263_v56 }
 0x8d9   :  { %v13887_v9 = vpop.eup %13886 }
 0x8da   :  { %v4839_v46 = vmul.f32 %v13887_v9, %v4834_v54  ;;  %v16278_v54 = vld [vmem:[%s18159_s2 + $0x1c8] ss:$16 sps:$4 sm:$0xff]   ;;  %v16287_v9 = vld [vmem:[%s18159_s2 + $0x1e4] ss:$16 sps:$4 sm:$0xff]  }
 0x8db   :  { %18530 = vst [vmem:[#allocation31_spill] sm:$0xff] %v16278_v54  ;;  %18531 = vst [vmem:[#allocation32_spill] sm:$0xff] %v16287_v9 }
 0x8dc   :  { %v4840_v55 = vpack.c.bf16 %v4839_v46, %v4839_v46  ;;  %v16292_v46 = vld [vmem:[%s18159_s2 + $0x1ec] ss:$16 sps:$4 sm:$0xff]  }
 0x8dd   :  { %18532 = vst [vmem:[#allocation33_spill] sm:$0xff] %v16292_v46 }
 0x8de   :  { %5088 = vmatmul.mubr.bf16.vlgmr.msra.gmra.mrb[76].mxu0 %v4840_v55  ;;  %5129 = vmatmul.mubr.bf16.vlgmr.msra.gmra.mrb[76].mxu1 %v4840_v55  ;;  %v16297_v55 = vld [vmem:[%s18159_s2 + $0x1e0] ss:$16 sps:$4 sm:$0xff]  }
 0x8df   :  { %5341 = vmatpush1.bf16.msra.mxu0 %v15933_v27  ;;  %5382 = vmatpush1.bf16.msra.mxu1 %v15938_v53  ;;  %18533 = vst [vmem:[#allocation34_spill] sm:$0xff] %v16297_v55 }
 0x8e0   :  { %5342 = vmatprep.subr.bf16.mxu0 %v15943_v51  ;;  %5383 = vmatprep.subr.bf16.mxu1 %v15948_v57 }
 0x8e1   :  { %5372 = vmatprep.mubr.bf16.mxu0 %v18398_v36  ;;  %5413 = vmatprep.mubr.bf16.mxu1 %v18398_v36 }
 0x8e3   :  { %5343 = vmatpush1.bf16.msra.mxu0 %v15955_v60  ;;  %5384 = vmatpush1.bf16.msra.mxu1 %v15960_v32 }
 0x8e4   :  { %5344 = vmatprep.subr.bf16.mxu0 %v15967_v39  ;;  %5385 = vmatprep.subr.bf16.mxu1 %v15972_v14 }
 0x8e7   :  { %5345 = vmatpush1.bf16.msra.mxu0 %v15981_v15  ;;  %5386 = vmatpush1.bf16.msra.mxu1 %v15986_v48 }
 0x8e8   :  { %5346 = vmatprep.subr.bf16.mxu0 %v15993_v63  ;;  %5387 = vmatprep.subr.bf16.mxu1 %v15998_v0 }
 0x8eb   :  { %5347 = vmatpush1.bf16.msra.mxu0 %v16005_v49  ;;  %5388 = vmatpush1.bf16.msra.mxu1 %v16010_v50 }
 0x8ec   :  { %5348 = vmatprep.subr.bf16.mxu0 %v16017_v1  ;;  %5389 = vmatprep.subr.bf16.mxu1 %v16022_v34 }
 0x8ef   :  { %5349 = vmatpush1.bf16.msra.mxu0 %v16029_v47  ;;  %5390 = vmatpush1.bf16.msra.mxu1 %v16034_v40 }
 0x8f0   :  { %5350 = vmatprep.subr.bf16.mxu0 %v16041_v43  ;;  %5391 = vmatprep.subr.bf16.mxu1 %v16046_v44 }
 0x8f3   :  { %5351 = vmatpush1.bf16.msra.mxu0 %v16053_v18  ;;  %5392 = vmatpush1.bf16.msra.mxu1 %v16058_v16 }
 0x8f4   :  { %5352 = vmatprep.subr.bf16.mxu0 %v16065_v17  ;;  %5393 = vmatprep.subr.bf16.mxu1 %v16070_v45 }
 0x8f7   :  { %5353 = vmatpush1.bf16.msra.mxu0 %v16077_v22  ;;  %5394 = vmatpush1.bf16.msra.mxu1 %v16082_v20 }
 0x8f8   :  { %5354 = vmatprep.subr.bf16.mxu0 %v16089_v35  ;;  %5395 = vmatprep.subr.bf16.mxu1 %v16094_v30 }
 0x8fb   :  { %5355 = vmatpush1.bf16.msra.mxu0 %v16101_v37  ;;  %5396 = vmatpush1.bf16.msra.mxu1 %v16106_v31 }
 0x8fc   :  { %5661 = vmatprep.subr.bf16.mxu0 %v16119_v59  ;;  %5702 = vmatprep.subr.bf16.mxu1 %v16124_v29 }
 0x8fe   :  { %5373 = vmatmul.mubr.bf16.vlgmr.msra.gmra.mrb[20].mxu0 %v18398_v36  ;;  %5414 = vmatmul.mubr.bf16.vlgmr.msra.gmra.mrb[20].mxu1 %v18398_v36 }
 0x8ff   :  { %5693 = vmatprep.mubr.bf16.mxu0 %v18398_v36  ;;  %5734 = vmatprep.mubr.bf16.mxu1 %v18398_v36 }
 0x900   :  { %5662 = vmatpush1.bf16.msra.mxu0 %v16129_v3  ;;  %5703 = vmatpush1.bf16.msra.mxu1 %v16134_v4 }
 0x901   :  { %5663 = vmatprep.subr.bf16.mxu0 %v16143_v5  ;;  %5704 = vmatprep.subr.bf16.mxu1 %v16148_v6 }
 0x904   :  { %5664 = vmatpush1.bf16.msra.mxu0 %v16153_v7  ;;  %5705 = vmatpush1.bf16.msra.mxu1 %v16158_v8 }
 0x905   :  { %5665 = vmatprep.subr.bf16.mxu0 %v16167_v10  ;;  %5706 = vmatprep.subr.bf16.mxu1 %v16172_v12 }
 0x908   :  { %5666 = vmatpush1.bf16.msra.mxu0 %v16177_v13  ;;  %5707 = vmatpush1.bf16.msra.mxu1 %v16182_v33 }
 0x909   :  { %5667 = vmatprep.subr.bf16.mxu0 %v16191_v23  ;;  %5708 = vmatprep.subr.bf16.mxu1 %v16196_v38  ;;  %v18538_v23 = vld [vmem:[#allocation5_spill] sm:$0xff] }
 0x90c   :  { %5668 = vmatpush1.bf16.msra.mxu0 %v16201_v26  ;;  %5709 = vmatpush1.bf16.msra.mxu1 %v16206_v21 }
 0x90d   :  { %5669 = vmatprep.subr.bf16.mxu0 %v16215_v42  ;;  %5710 = vmatprep.subr.bf16.mxu1 %v16220_v62 }
 0x910   :  { %5670 = vmatpush1.bf16.msra.mxu0 %v16225_v41  ;;  %5711 = vmatpush1.bf16.msra.mxu1 %v16230_v2 }
 0x911   :  { %5671 = vmatprep.subr.bf16.mxu0 %v16239_v25  ;;  %5712 = vmatprep.subr.bf16.mxu1 %v16244_v11 }
 0x914   :  { %5672 = vmatpush1.bf16.msra.mxu0 %v16249_v58  ;;  %5713 = vmatpush1.bf16.msra.mxu1 %v16254_v19  ;;  %v18536_v19 = vld [vmem:[#allocation7_spill] sm:$0xff] }
 0x915   :  { %5673 = vmatprep.subr.bf16.mxu0 %v16263_v56  ;;  %5714 = vmatprep.subr.bf16.mxu1 %v16268_v61  ;;  %v18535_v61 = vld [vmem:[#allocation6_spill] sm:$0xff] }
 0x918   :  { %5674 = vmatpush1.bf16.msra.mxu0 %v16273_v52  ;;  %5715 = vmatpush1.bf16.msra.mxu1 %v16278_v54  ;;  %v16302_v52 = vld [vmem:[%s18159_s2 + $0x1e8] ss:$16 sps:$4 sm:$0xff]   ;;  %v11322_v54 = vld [vmem:[%s18160_s4 + $0x4] sm:$0xf] }
 0x919   :  { %18534 = vst [vmem:[#allocation35_spill] sm:$0xff] %v16302_v52  ;;  %5675 = vmatprep.subr.bf16.mxu0 %v16287_v9  ;;  %5716 = vmatprep.subr.bf16.mxu1 %v16292_v46  ;;  %v636_v56 = vrot.slane %v11322_v54, %v18535_v61  ;;  %v640_v58 = vrot.slane %v11322_v54, %v18536_v19  ;;  %v18537_v46 = vld [vmem:[#allocation4_spill] sm:$0xff] }
 0x91a   :  { %v644_v2 = vrot.slane %v11322_v54, %v18537_v46  ;;  %v648_v61 = vrot.slane %v11322_v54, %v18538_v23  ;;  %v18543_v54 = vld [vmem:[#allocation19_spill] sm:$0xff] }
 0x91c   :  { %5676 = vmatpush1.bf16.msra.mxu0 %v16297_v55  ;;  %5717 = vmatpush1.bf16.msra.mxu1 %v16302_v52 }
 0x91d   :  { %5943 = vmatprep.subr.bf16.mxu0 %v15916_v24  ;;  %5984 = vmatprep.subr.bf16.mxu1 %v15921_v28 }
 0x9d1   :  { %v5374_v11 = vpop.f32.mrb[20].mxu0  ;;  %v5415_v9 = vpop.f32.mrb[20].mxu1 }
 0x9d2   :  { %v12971_v25 = vadd.f32 %v5374_v11, %v636_v56  ;;  %v5376_v55 = vpop.f32.mrb[21].mxu0  ;;  %v5417_v41 = vpop.f32.mrb[21].mxu1  ;;  %v12973_v38 = vadd.f32 %v5415_v9, %v644_v2  ;;  %v18544_v9 = vld [vmem:[#allocation20_spill] sm:$0xff] }
 0x9d3   :  { %v12972_v52 = vadd.f32 %v5376_v55, %v640_v58  ;;  %v5378_v62 = vpop.f32.mrb[22].mxu0  ;;  %v5419_v24 = vpop.f32.mrb[22].mxu1  ;;  %v12974_v19 = vadd.f32 %v5417_v41, %v648_v61  ;;  %v18541_v61 = vld [vmem:[#allocation17_spill] sm:$0xff]  ;;  %v18546_v55 = vld [vmem:[#allocation10_spill] sm:$0xff] }
 0x9d4   :  { %v5426_v42 = vmul.f32 0.5, %v12971_v25  ;;  %v5379_v28 = vpop.f32.mrb[23].mxu0  ;;  %v5420_v21 = vpop.f32.mrb[23].mxu1 }
 0x9d5   :  { %v5430_v26 = vmul.f32 0.5, %v12972_v52  ;;  %v5435_v33 = vmul.f32 0.5, %v12974_v19  ;;  %v18542_v52 = vld [vmem:[#allocation18_spill] sm:$0xff] }
 0x9d6   :  { %13888 = vtanh.f32 %v5426_v42 }
 0x9d7   :  { %13890 = vtanh.f32 %v5430_v26 }
 0x9d8   :  { %13892 = vtanh.f32 %v12973_v38 }
 0x9d9   :  { %13894 = vtanh.f32 %v5435_v33  ;;  %v18540_v33 = vld [vmem:[#allocation16_spill] sm:$0xff] }
 0x9e0   :  { %v13889_v11 = vpop.eup %13888 }
 0x9e1   :  { %v13891_v56 = vpop.eup %13890  ;;  %v5428_v46 = vmul.f32 0.5, %v13889_v11  ;;  %v18547_v11 = vld [vmem:[#allocation11_spill] sm:$0xff] }
 0x9e2   :  { %v5432_v13 = vmul.f32 0.5, %v13891_v56  ;;  %v13893_v62 = vpop.eup %13892  ;;  %v18548_v56 = vld [vmem:[#allocation21_spill] sm:$0xff] }
 0x9e3   :  { %v5429_v58 = vadd.f32 0.5, %v5428_v46  ;;  %v13895_v42 = vpop.eup %13894  ;;  %v18545_v46 = vld [vmem:[#allocation9_spill] sm:$0xff] }
 0x9e4   :  { %v5433_v24 = vadd.f32 0.5, %v5432_v13  ;;  %v5437_v2 = vmul.f32 0.5, %v13895_v42  ;;  %v18539_v13 = vld [vmem:[#allocation15_spill] sm:$0xff]  ;;  %v18554_v42 = vld [vmem:[#allocation29_spill] sm:$0xff] }
 0x9e5   :  { %v5440_v25 = vmul.f32 %v13893_v62, %v5429_v58  ;;  %v18549_v58 = vld [vmem:[#allocation22_spill] sm:$0xff]  ;;  %v18550_v62 = vld [vmem:[#allocation23_spill] sm:$0xff] }
 0x9e6   :  { %v5439_v28 = vmul.f32 0.0, %v5433_v24  ;;  %v5438_v26 = vadd.f32 0.5, %v5437_v2  ;;  %v18551_v24 = vld [vmem:[#allocation24_spill] sm:$0xff]  ;;  %v18555_v2 = vld [vmem:[#allocation30_spill] sm:$0xff] }
 0x9e8   :  { %v16317_v21 = vadd.f32 %v5440_v25, %v5439_v28  ;;  %v18552_v25 = vld [vmem:[#allocation12_spill] sm:$0xff] }
 0x9e9   :  { %v18553_v28 = vld [vmem:[#allocation8_spill] sm:$0xff] }
 0x9ea   :  { %13896 = vtanh.f32 %v16317_v21 }
 0x9f4   :  { %v13897_v38 = vpop.eup %13896 }
 0x9f5   :  { %v5443_v41 = vmul.f32 %v13897_v38, %v5438_v26  ;;  %v18556_v26 = vld [vmem:[#allocation31_spill] sm:$0xff]  ;;  %v18557_v38 = vld [vmem:[#allocation32_spill] sm:$0xff] }
 0x9f7   :  { %v5444_v19 = vpack.c.bf16 %v5443_v41, %v5443_v41  ;;  %v18558_v41 = vld [vmem:[#allocation33_spill] sm:$0xff] }
 0x9f9   :  { %5694 = vmatmul.mubr.bf16.vlgmr.msra.gmra.mrb[80].mxu0 %v5444_v19  ;;  %5735 = vmatmul.mubr.bf16.vlgmr.msra.gmra.mrb[80].mxu1 %v5444_v19 }
 0x9fa   :  { %5944 = vmatpush1.bf16.msra.mxu0 %v15933_v27  ;;  %5985 = vmatpush1.bf16.msra.mxu1 %v15938_v53 }
 0x9fb   :  { %5945 = vmatprep.subr.bf16.mxu0 %v15943_v51  ;;  %5986 = vmatprep.subr.bf16.mxu1 %v15948_v57 }
 0x9fc   :  { %5975 = vmatprep.mubr.bf16.mxu0 %v18398_v36  ;;  %6016 = vmatprep.mubr.bf16.mxu1 %v18398_v36 }
 0x9fe   :  { %5946 = vmatpush1.bf16.msra.mxu0 %v15955_v60  ;;  %5987 = vmatpush1.bf16.msra.mxu1 %v15960_v32 }
 0x9ff   :  { %5947 = vmatprep.subr.bf16.mxu0 %v15967_v39  ;;  %5988 = vmatprep.subr.bf16.mxu1 %v15972_v14 }
 0xa02   :  { %5948 = vmatpush1.bf16.msra.mxu0 %v15981_v15  ;;  %5989 = vmatpush1.bf16.msra.mxu1 %v15986_v48 }
 0xa03   :  { %5949 = vmatprep.subr.bf16.mxu0 %v15993_v63  ;;  %5990 = vmatprep.subr.bf16.mxu1 %v15998_v0 }
 0xa06   :  { %5950 = vmatpush1.bf16.msra.mxu0 %v16005_v49  ;;  %5991 = vmatpush1.bf16.msra.mxu1 %v16010_v50 }
 0xa07   :  { %5951 = vmatprep.subr.bf16.mxu0 %v16017_v1  ;;  %5992 = vmatprep.subr.bf16.mxu1 %v16022_v34 }
 0xa0a   :  { %5952 = vmatpush1.bf16.msra.mxu0 %v16029_v47  ;;  %5993 = vmatpush1.bf16.msra.mxu1 %v16034_v40 }
 0xa0b   :  { %5953 = vmatprep.subr.bf16.mxu0 %v16041_v43  ;;  %5994 = vmatprep.subr.bf16.mxu1 %v16046_v44 }
 0xa0e   :  { %5954 = vmatpush1.bf16.msra.mxu0 %v16053_v18  ;;  %5995 = vmatpush1.bf16.msra.mxu1 %v16058_v16 }
 0xa0f   :  { %5955 = vmatprep.subr.bf16.mxu0 %v16065_v17  ;;  %5996 = vmatprep.subr.bf16.mxu1 %v16070_v45 }
 0xa12   :  { %5956 = vmatpush1.bf16.msra.mxu0 %v16077_v22  ;;  %5997 = vmatpush1.bf16.msra.mxu1 %v16082_v20 }
 0xa13   :  { %5957 = vmatprep.subr.bf16.mxu0 %v16089_v35  ;;  %5998 = vmatprep.subr.bf16.mxu1 %v16094_v30 }
 0xa16   :  { %5958 = vmatpush1.bf16.msra.mxu0 %v16101_v37  ;;  %5999 = vmatpush1.bf16.msra.mxu1 %v16106_v31 }
 0xa17   :  { %6262 = vmatprep.subr.bf16.mxu0 %v16119_v59  ;;  %6303 = vmatprep.subr.bf16.mxu1 %v16124_v29 }
 0xa19   :  { %5976 = vmatmul.mubr.bf16.vlgmr.msra.gmra.mrb[28].mxu0 %v5444_v19  ;;  %6017 = vmatmul.mubr.bf16.vlgmr.msra.gmra.mrb[28].mxu1 %v5444_v19  ;;  %v18559_v19 = vld [vmem:[#allocation34_spill] sm:$0xff] }
 0xa1a   :  { %6263 = vmatpush1.bf16.msra.mxu0 %v16129_v3  ;;  %6304 = vmatpush1.bf16.msra.mxu1 %v16134_v4 }
 0xa1b   :  { %6264 = vmatprep.subr.bf16.mxu0 %v16143_v5  ;;  %6305 = vmatprep.subr.bf16.mxu1 %v16148_v6 }
 0xa1c   :  { %6294 = vmatprep.mubr.bf16.mxu0 %v18398_v36  ;;  %6335 = vmatprep.mubr.bf16.mxu1 %v18398_v36 }
 0xa1e   :  { %6265 = vmatpush1.bf16.msra.mxu0 %v16153_v7  ;;  %6306 = vmatpush1.bf16.msra.mxu1 %v16158_v8 }
 0xa1f   :  { %6266 = vmatprep.subr.bf16.mxu0 %v16167_v10  ;;  %6307 = vmatprep.subr.bf16.mxu1 %v16172_v12 }
 0xa22   :  { %6267 = vmatpush1.bf16.msra.mxu0 %v18539_v13  ;;  %6308 = vmatpush1.bf16.msra.mxu1 %v18540_v33 }
 0xa23   :  { %6268 = vmatprep.subr.bf16.mxu0 %v18541_v61  ;;  %6309 = vmatprep.subr.bf16.mxu1 %v18542_v52 }
 0xa26   :  { %6269 = vmatpush1.bf16.msra.mxu0 %v18543_v54  ;;  %6310 = vmatpush1.bf16.msra.mxu1 %v18544_v9 }
 0xa27   :  { %6270 = vmatprep.subr.bf16.mxu0 %v18545_v46  ;;  %6311 = vmatprep.subr.bf16.mxu1 %v18546_v55 }
 0xa2a   :  { %6271 = vmatpush1.bf16.msra.mxu0 %v18547_v11  ;;  %6312 = vmatpush1.bf16.msra.mxu1 %v18548_v56 }
 0xa2b   :  { %6272 = vmatprep.subr.bf16.mxu0 %v18549_v58  ;;  %6313 = vmatprep.subr.bf16.mxu1 %v18550_v62  ;;  %v18560_v58 = vld [vmem:[#allocation35_spill] sm:$0xff]  ;;  %v18561_v62 = vld [vmem:[#allocation48_spill] sm:$0xff] }
 0xa2e   :  { %6273 = vmatpush1.bf16.msra.mxu0 %v18551_v24  ;;  %6314 = vmatpush1.bf16.msra.mxu1 %v18552_v25  ;;  %v18562_v24 = vld [vmem:[#allocation13_spill] sm:$0xff]  ;;  %v18564_v25 = vld [vmem:[#allocation7_spill] sm:$0xff] }
 0xa2f   :  { %6274 = vmatprep.subr.bf16.mxu0 %v18553_v28  ;;  %6315 = vmatprep.subr.bf16.mxu1 %v18554_v42  ;;  %v11387_v42 = vld [vmem:[%s18160_s4 + $0x4] sm:$0xf]  ;;  %v18563_v28 = vld [vmem:[#allocation6_spill] sm:$0xff] }
 0xa32   :  { %6275 = vmatpush1.bf16.msra.mxu0 %v18555_v2  ;;  %6316 = vmatpush1.bf16.msra.mxu1 %v18556_v26  ;;  %v1242_v2 = vrot.slane %v11387_v42, %v18563_v28  ;;  %v1246_v26 = vrot.slane %v11387_v42, %v18564_v25  ;;  %v1254_v28 = vrot.slane %v11387_v42, %v18538_v23 }
 0xa33   :  { %6276 = vmatprep.subr.bf16.mxu0 %v18557_v38  ;;  %6317 = vmatprep.subr.bf16.mxu1 %v18558_v41  ;;  %v18565_v41 = vld [vmem:[#allocation4_spill] sm:$0xff] }
 0xa34   :  { %v1250_v55 = vrot.slane %v11387_v42, %v18565_v41 }
 0xa36   :  { %6277 = vmatpush1.bf16.msra.mxu0 %v18559_v19  ;;  %6318 = vmatpush1.bf16.msra.mxu1 %v18560_v58 }
 0xa37   :  { %6544 = vmatprep.subr.bf16.mxu0 %v18561_v62  ;;  %6585 = vmatprep.subr.bf16.mxu1 %v18562_v24 }
 0xaec   :  { %v5977_v56 = vpop.f32.mrb[28].mxu0  ;;  %v6018_v38 = vpop.f32.mrb[28].mxu1 }
 0xaed   :  { %v12975_v11 = vadd.f32 %v5977_v56, %v1242_v2  ;;  %v5979_v19 = vpop.f32.mrb[29].mxu0  ;;  %v6020_v46 = vpop.f32.mrb[29].mxu1  ;;  %v12977_v33 = vadd.f32 %v6018_v38, %v1250_v55 }
 0xaee   :  { %v12976_v58 = vadd.f32 %v5979_v19, %v1246_v26  ;;  %v5981_v9 = vpop.f32.mrb[30].mxu0  ;;  %v6022_v62 = vpop.f32.mrb[30].mxu1  ;;  %v12978_v25 = vadd.f32 %v6020_v46, %v1254_v28 }
 0xaef   :  { %v6029_v54 = vmul.f32 0.5, %v12975_v11  ;;  %v5982_v24 = vpop.f32.mrb[31].mxu0  ;;  %v6023_v52 = vpop.f32.mrb[31].mxu1 }
 0xaf0   :  { %v6033_v61 = vmul.f32 0.5, %v12976_v58  ;;  %v6038_v13 = vmul.f32 0.5, %v12978_v25 }
 0xaf1   :  { %13898 = vtanh.f32 %v6029_v54 }
 0xaf2   :  { %13900 = vtanh.f32 %v6033_v61 }
 0xaf3   :  { %13902 = vtanh.f32 %v12977_v33 }
 0xaf4   :  { %13904 = vtanh.f32 %v6038_v13 }
 0xafb   :  { %v13899_v56 = vpop.eup %13898 }
 0xafc   :  { %v13901_v2 = vpop.eup %13900  ;;  %v6031_v41 = vmul.f32 0.5, %v13899_v56 }
 0xafd   :  { %v6035_v12 = vmul.f32 0.5, %v13901_v2  ;;  %v13903_v9 = vpop.eup %13902 }
 0xafe   :  { %v6032_v26 = vadd.f32 0.5, %v6031_v41  ;;  %v13905_v54 = vpop.eup %13904 }
 0xaff   :  { %v6036_v19 = vadd.f32 0.5, %v6035_v12  ;;  %v6040_v61 = vmul.f32 0.5, %v13905_v54 }
 0xb00   :  { %v6043_v11 = vmul.f32 %v13903_v9, %v6032_v26 }
 0xb01   :  { %v6042_v52 = vmul.f32 %v6036_v19, %v16317_v21  ;;  %v6041_v33 = vadd.f32 0.5, %v6040_v61 }
 0xb03   :  { %v16396_v58 = vadd.f32 %v6043_v11, %v6042_v52 }
 0xb05   :  { %13906 = vtanh.f32 %v16396_v58 }
 0xb0f   :  { %v13907_v46 = vpop.eup %13906 }
 0xb10   :  { %v6046_v55 = vmul.f32 %v13907_v46, %v6041_v33 }
 0xb12   :  { %v6047_v25 = vpack.c.bf16 %v6046_v55, %v6046_v55 }
 0xb14   :  { %6295 = vmatmul.mubr.bf16.vlgmr.msra.gmra.mrb[84].mxu0 %v6047_v25  ;;  %6336 = vmatmul.mubr.bf16.vlgmr.msra.gmra.mrb[84].mxu1 %v6047_v25 }
 0xb15   :  { %6545 = vmatpush1.bf16.msra.mxu0 %v15933_v27  ;;  %6586 = vmatpush1.bf16.msra.mxu1 %v15938_v53  ;;  %v18566_v27 = vld [vmem:[#allocation14_spill] sm:$0xff]  ;;  %v18567_v53 = vld [vmem:[#allocation15_spill] sm:$0xff] }
 0xb16   :  { %6546 = vmatprep.subr.bf16.mxu0 %v15943_v51  ;;  %6587 = vmatprep.subr.bf16.mxu1 %v15948_v57  ;;  %v18568_v51 = vld [vmem:[#allocation16_spill] sm:$0xff]  ;;  %v18569_v57 = vld [vmem:[#allocation17_spill] sm:$0xff] }
 0xb17   :  { %6576 = vmatprep.mubr.bf16.mxu0 %v18398_v36  ;;  %6617 = vmatprep.mubr.bf16.mxu1 %v18398_v36 }
 0xb19   :  { %6547 = vmatpush1.bf16.msra.mxu0 %v15955_v60  ;;  %6588 = vmatpush1.bf16.msra.mxu1 %v15960_v32  ;;  %v18570_v60 = vld [vmem:[#allocation18_spill] sm:$0xff]  ;;  %v18571_v32 = vld [vmem:[#allocation19_spill] sm:$0xff] }
 0xb1a   :  { %6548 = vmatprep.subr.bf16.mxu0 %v15967_v39  ;;  %6589 = vmatprep.subr.bf16.mxu1 %v15972_v14  ;;  %v18572_v39 = vld [vmem:[#allocation20_spill] sm:$0xff]  ;;  %v18573_v14 = vld [vmem:[#allocation9_spill] sm:$0xff] }
 0xb1d   :  { %6549 = vmatpush1.bf16.msra.mxu0 %v15981_v15  ;;  %6590 = vmatpush1.bf16.msra.mxu1 %v15986_v48  ;;  %v18574_v15 = vld [vmem:[#allocation10_spill] sm:$0xff]  ;;  %v18575_v48 = vld [vmem:[#allocation11_spill] sm:$0xff] }
 0xb1e   :  { %6550 = vmatprep.subr.bf16.mxu0 %v15993_v63  ;;  %6591 = vmatprep.subr.bf16.mxu1 %v15998_v0  ;;  %v18576_v63 = vld [vmem:[#allocation21_spill] sm:$0xff]  ;;  %v18577_v0 = vld [vmem:[#allocation22_spill] sm:$0xff] }
 0xb21   :  { %6551 = vmatpush1.bf16.msra.mxu0 %v16005_v49  ;;  %6592 = vmatpush1.bf16.msra.mxu1 %v16010_v50  ;;  %v18578_v49 = vld [vmem:[#allocation23_spill] sm:$0xff]  ;;  %v18579_v50 = vld [vmem:[#allocation24_spill] sm:$0xff] }
 0xb22   :  { %6552 = vmatprep.subr.bf16.mxu0 %v16017_v1  ;;  %6593 = vmatprep.subr.bf16.mxu1 %v16022_v34  ;;  %v18580_v1 = vld [vmem:[#allocation12_spill] sm:$0xff] }
 0xb23   :  { %v18581_v34 = vld [vmem:[#allocation8_spill] sm:$0xff] }
 0xb25   :  { %6553 = vmatpush1.bf16.msra.mxu0 %v16029_v47  ;;  %6594 = vmatpush1.bf16.msra.mxu1 %v16034_v40  ;;  %v18582_v47 = vld [vmem:[#allocation29_spill] sm:$0xff]  ;;  %v18583_v40 = vld [vmem:[#allocation30_spill] sm:$0xff] }
 0xb26   :  { %6554 = vmatprep.subr.bf16.mxu0 %v16041_v43  ;;  %6595 = vmatprep.subr.bf16.mxu1 %v16046_v44  ;;  %v18584_v43 = vld [vmem:[#allocation31_spill] sm:$0xff]  ;;  %v18585_v44 = vld [vmem:[#allocation32_spill] sm:$0xff] }
 0xb29   :  { %6555 = vmatpush1.bf16.msra.mxu0 %v16053_v18  ;;  %6596 = vmatpush1.bf16.msra.mxu1 %v16058_v16  ;;  %v18586_v18 = vld [vmem:[#allocation33_spill] sm:$0xff]  ;;  %v18587_v16 = vld [vmem:[#allocation34_spill] sm:$0xff] }
 0xb2a   :  { %6556 = vmatprep.subr.bf16.mxu0 %v16065_v17  ;;  %6597 = vmatprep.subr.bf16.mxu1 %v16070_v45  ;;  %v18588_v17 = vld [vmem:[#allocation35_spill] sm:$0xff]  ;;  %v16468_v45 = vld [vmem:[%s18158_s3 + $0x104] ss:$16 sps:$4 sm:$0xff]  }
 0xb2b   :  { %18589 = vst [vmem:[#allocation36_spill] sm:$0xff] %v16468_v45 }
 0xb2d   :  { %6557 = vmatpush1.bf16.msra.mxu0 %v16077_v22  ;;  %6598 = vmatpush1.bf16.msra.mxu1 %v16082_v20  ;;  %v16473_v22 = vld [vmem:[%s18158_s3 + $0x10c] ss:$16 sps:$4 sm:$0xff]   ;;  %v11452_v20 = vld [vmem:[%s18160_s4 + $0x4] sm:$0xf] }
 0xb2e   :  { %6558 = vmatprep.subr.bf16.mxu0 %v16089_v35  ;;  %6599 = vmatprep.subr.bf16.mxu1 %v16094_v30  ;;  %18590 = vst [vmem:[#allocation37_spill] sm:$0xff] %v16473_v22  ;;  %v18591_v35 = vld [vmem:[#allocation6_spill] sm:$0xff]  ;;  %v1860_v41 = vrot.slane %v11452_v20, %v18538_v23 }
 0xb2f   :  { %v1848_v30 = vrot.slane %v11452_v20, %v18591_v35 }
 0xb31   :  { %6559 = vmatpush1.bf16.msra.mxu0 %v16101_v37  ;;  %6600 = vmatpush1.bf16.msra.mxu1 %v16106_v31  ;;  %v18592_v37 = vld [vmem:[#allocation7_spill] sm:$0xff] }
 0xb32   :  { %6863 = vmatprep.subr.bf16.mxu0 %v16119_v59  ;;  %6904 = vmatprep.subr.bf16.mxu1 %v16124_v29  ;;  %v1852_v31 = vrot.slane %v11452_v20, %v18592_v37 }
 0xb34   :  { %6577 = vmatmul.mubr.bf16.vlgmr.msra.gmra.mrb[36].mxu0 %v6047_v25  ;;  %6618 = vmatmul.mubr.bf16.vlgmr.msra.gmra.mrb[36].mxu1 %v6047_v25 }
 0xb35   :  { %6864 = vmatpush1.bf16.msra.mxu0 %v16129_v3  ;;  %6905 = vmatpush1.bf16.msra.mxu1 %v16134_v4  ;;  %v18593_v4 = vld [vmem:[#allocation4_spill] sm:$0xff] }
 0xb36   :  { %6865 = vmatprep.subr.bf16.mxu0 %v16143_v5  ;;  %6906 = vmatprep.subr.bf16.mxu1 %v16148_v6  ;;  %v1856_v5 = vrot.slane %v11452_v20, %v18593_v4  ;;  %v16620_v20 = vld [vmem:[%s18158_s3 + $0x1a8] ss:$16 sps:$4 sm:$0xff]  }
 0xb37   :  { %6895 = vmatprep.mubr.bf16.mxu0 %v18398_v36  ;;  %6936 = vmatprep.mubr.bf16.mxu1 %v18398_v36 }
 0xb39   :  { %6866 = vmatpush1.bf16.msra.mxu0 %v16153_v7  ;;  %6907 = vmatpush1.bf16.msra.mxu1 %v16158_v8 }
 0xb3a   :  { %6867 = vmatprep.subr.bf16.mxu0 %v16167_v10  ;;  %6908 = vmatprep.subr.bf16.mxu1 %v18566_v27 }
 0xb3d   :  { %6868 = vmatpush1.bf16.msra.mxu0 %v18567_v53  ;;  %6909 = vmatpush1.bf16.msra.mxu1 %v18568_v51  ;;  %v16491_v51 = vld [vmem:[%s18158_s3 + $0x100] ss:$16 sps:$4 sm:$0xff]  }
 0xb3e   :  { %6869 = vmatprep.subr.bf16.mxu0 %v18569_v57  ;;  %6910 = vmatprep.subr.bf16.mxu1 %v18570_v60  ;;  %v16496_v57 = vld [vmem:[%s18158_s3 + $0x108] ss:$16 sps:$4 sm:$0xff]   ;;  %v16503_v60 = vld [vmem:[%s18158_s3 + $0x124] ss:$16 sps:$4 sm:$0xff]  }
 0xb41   :  { %6870 = vmatpush1.bf16.msra.mxu0 %v18571_v32  ;;  %6911 = vmatpush1.bf16.msra.mxu1 %v18572_v39  ;;  %v16508_v32 = vld [vmem:[%s18158_s3 + $0x12c] ss:$16 sps:$4 sm:$0xff]   ;;  %v16517_v39 = vld [vmem:[%s18158_s3 + $0x120] ss:$16 sps:$4 sm:$0xff]  }
 0xb42   :  { %6871 = vmatprep.subr.bf16.mxu0 %v18573_v14  ;;  %6912 = vmatprep.subr.bf16.mxu1 %v18574_v15  ;;  %v16522_v14 = vld [vmem:[%s18158_s3 + $0x128] ss:$16 sps:$4 sm:$0xff]   ;;  %v16529_v15 = vld [vmem:[%s18158_s3 + $0x144] ss:$16 sps:$4 sm:$0xff]  }
 0xb45   :  { %6872 = vmatpush1.bf16.msra.mxu0 %v18575_v48  ;;  %6913 = vmatpush1.bf16.msra.mxu1 %v18576_v63  ;;  %v16534_v48 = vld [vmem:[%s18158_s3 + $0x14c] ss:$16 sps:$4 sm:$0xff]   ;;  %v16543_v63 = vld [vmem:[%s18158_s3 + $0x140] ss:$16 sps:$4 sm:$0xff]  }
 0xb46   :  { %6873 = vmatprep.subr.bf16.mxu0 %v18577_v0  ;;  %6914 = vmatprep.subr.bf16.mxu1 %v18578_v49  ;;  %v16548_v0 = vld [vmem:[%s18158_s3 + $0x148] ss:$16 sps:$4 sm:$0xff]   ;;  %v16555_v49 = vld [vmem:[%s18158_s3 + $0x164] ss:$16 sps:$4 sm:$0xff]  }
 0xb49   :  { %6874 = vmatpush1.bf16.msra.mxu0 %v18579_v50  ;;  %6915 = vmatpush1.bf16.msra.mxu1 %v18580_v1  ;;  %v16560_v50 = vld [vmem:[%s18158_s3 + $0x16c] ss:$16 sps:$4 sm:$0xff]   ;;  %v16567_v1 = vld [vmem:[%s18158_s3 + $0x160] ss:$16 sps:$4 sm:$0xff]  }
 0xb4a   :  { %6875 = vmatprep.subr.bf16.mxu0 %v18581_v34  ;;  %6916 = vmatprep.subr.bf16.mxu1 %v18582_v47  ;;  %v16572_v34 = vld [vmem:[%s18158_s3 + $0x168] ss:$16 sps:$4 sm:$0xff]   ;;  %v16579_v47 = vld [vmem:[%s18158_s3 + $0x184] ss:$16 sps:$4 sm:$0xff]  }
 0xb4d   :  { %6876 = vmatpush1.bf16.msra.mxu0 %v18583_v40  ;;  %6917 = vmatpush1.bf16.msra.mxu1 %v18584_v43  ;;  %v16584_v40 = vld [vmem:[%s18158_s3 + $0x18c] ss:$16 sps:$4 sm:$0xff]   ;;  %v16591_v43 = vld [vmem:[%s18158_s3 + $0x180] ss:$16 sps:$4 sm:$0xff]  }
 0xb4e   :  { %6877 = vmatprep.subr.bf16.mxu0 %v18585_v44  ;;  %6918 = vmatprep.subr.bf16.mxu1 %v18586_v18  ;;  %v16596_v44 = vld [vmem:[%s18158_s3 + $0x188] ss:$16 sps:$4 sm:$0xff]   ;;  %v16603_v18 = vld [vmem:[%s18158_s3 + $0x1a4] ss:$16 sps:$4 sm:$0xff]  }
 0xb51   :  { %6878 = vmatpush1.bf16.msra.mxu0 %v18587_v16  ;;  %6919 = vmatpush1.bf16.msra.mxu1 %v18588_v17  ;;  %v16608_v16 = vld [vmem:[%s18158_s3 + $0x1ac] ss:$16 sps:$4 sm:$0xff]   ;;  %v16615_v17 = vld [vmem:[%s18158_s3 + $0x1a0] ss:$16 sps:$4 sm:$0xff]  }
 0xb52   :  { %7145 = vmatprep.subr.bf16.mxu0 %v16468_v45  ;;  %7186 = vmatprep.subr.bf16.mxu1 %v16473_v22 }
 0xc07   :  { %v6578_v59 = vpop.f32.mrb[36].mxu0  ;;  %v6619_v29 = vpop.f32.mrb[36].mxu1 }
 0xc08   :  { %v12979_v3 = vadd.f32 %v6578_v59, %v1848_v30  ;;  %v6580_v6 = vpop.f32.mrb[37].mxu0  ;;  %v6621_v7 = vpop.f32.mrb[37].mxu1  ;;  %v12981_v38 = vadd.f32 %v6619_v29, %v1856_v5  ;;  %v16627_v30 = vld [vmem:[%s18158_s3 + $0x1c4] ss:$16 sps:$4 sm:$0xff]   ;;  %v16639_v59 = vld [vmem:[%s18158_s3 + $0x1c0] ss:$16 sps:$4 sm:$0xff]  }
 0xc09   :  { %v12980_v8 = vadd.f32 %v6580_v6, %v1852_v31  ;;  %v6582_v10 = vpop.f32.mrb[38].mxu0  ;;  %v6623_v12 = vpop.f32.mrb[38].mxu1  ;;  %v12982_v62 = vadd.f32 %v6621_v7, %v1860_v41  ;;  %v16632_v31 = vld [vmem:[%s18158_s3 + $0x1cc] ss:$16 sps:$4 sm:$0xff]   ;;  %v16644_v29 = vld [vmem:[%s18158_s3 + $0x1c8] ss:$16 sps:$4 sm:$0xff]  }
 0xc0a   :  { %v6630_v21 = vmul.f32 0.5, %v12979_v3  ;;  %v6583_v13 = vpop.f32.mrb[39].mxu0  ;;  %v6624_v28 = vpop.f32.mrb[39].mxu1  ;;  %v16651_v3 = vld [vmem:[%s18158_s3 + $0x1e4] ss:$16 sps:$4 sm:$0xff]  }
 0xc0b   :  { %v6634_v42 = vmul.f32 0.5, %v12980_v8  ;;  %v6639_v24 = vmul.f32 0.5, %v12982_v62  ;;  %v16656_v5 = vld [vmem:[%s18158_s3 + $0x1ec] ss:$16 sps:$4 sm:$0xff]   ;;  %v16663_v6 = vld [vmem:[%s18158_s3 + $0x1e0] ss:$16 sps:$4 sm:$0xff]  }
 0xc0c   :  { %13908 = vtanh.f32 %v6630_v21  ;;  %v16668_v7 = vld [vmem:[%s18158_s3 + $0x1e8] ss:$16 sps:$4 sm:$0xff]   ;;  %v16681_v8 = vld [vmem:[%s18159_s2 + $0x104] ss:$16 sps:$4 sm:$0xff]   ;;  %v16686_v10 = vld [vmem:[%s18159_s2 + $0x10c] ss:$16 sps:$4 sm:$0xff]  }
 0xc0d   :  { %13910 = vtanh.f32 %v6634_v42  ;;  %v16691_v12 = vld [vmem:[%s18159_s2 + $0x100] ss:$16 sps:$4 sm:$0xff]   ;;  %v16696_v21 = vld [vmem:[%s18159_s2 + $0x108] ss:$16 sps:$4 sm:$0xff]   ;;  %v16705_v13 = vld [vmem:[%s18159_s2 + $0x124] ss:$16 sps:$4 sm:$0xff]  }
 0xc0e   :  { %13912 = vtanh.f32 %v12981_v38  ;;  %v16710_v28 = vld [vmem:[%s18159_s2 + $0x12c] ss:$16 sps:$4 sm:$0xff]   ;;  %v16715_v42 = vld [vmem:[%s18159_s2 + $0x120] ss:$16 sps:$4 sm:$0xff]   ;;  %v16720_v38 = vld [vmem:[%s18159_s2 + $0x128] ss:$16 sps:$4 sm:$0xff]  }
 0xc0f   :  { %13914 = vtanh.f32 %v6639_v24  ;;  %v16729_v41 = vld [vmem:[%s18159_s2 + $0x144] ss:$16 sps:$4 sm:$0xff]   ;;  %v16734_v62 = vld [vmem:[%s18159_s2 + $0x14c] ss:$16 sps:$4 sm:$0xff]   ;;  %v16739_v24 = vld [vmem:[%s18159_s2 + $0x140] ss:$16 sps:$4 sm:$0xff]  }
 0xc10   :  { %18594 = vst [vmem:[#allocation38_spill] sm:$0xff] %v16734_v62  ;;  %18595 = vst [vmem:[#allocation39_spill] sm:$0xff] %v16739_v24 }
 0xc16   :  { %v13909_v56 = vpop.eup %13908 }
 0xc17   :  { %v13911_v2 = vpop.eup %13910  ;;  %v6632_v26 = vmul.f32 0.5, %v13909_v56  ;;  %v16744_v56 = vld [vmem:[%s18159_s2 + $0x148] ss:$16 sps:$4 sm:$0xff]  }
 0xc18   :  { %v6636_v9 = vmul.f32 0.5, %v13911_v2  ;;  %v13913_v11 = vpop.eup %13912  ;;  %18596 = vst [vmem:[#allocation40_spill] sm:$0xff] %v16744_v56  ;;  %v16753_v2 = vld [vmem:[%s18159_s2 + $0x164] ss:$16 sps:$4 sm:$0xff]  }
 0xc19   :  { %v6633_v19 = vadd.f32 0.5, %v6632_v26  ;;  %v13915_v46 = vpop.eup %13914  ;;  %18597 = vst [vmem:[#allocation41_spill] sm:$0xff] %v16753_v2  ;;  %v16758_v26 = vld [vmem:[%s18159_s2 + $0x16c] ss:$16 sps:$4 sm:$0xff]  }
 0xc1a   :  { %v6637_v52 = vadd.f32 0.5, %v6636_v9  ;;  %v6641_v55 = vmul.f32 0.5, %v13915_v46  ;;  %18598 = vst [vmem:[#allocation42_spill] sm:$0xff] %v16758_v26  ;;  %v16763_v9 = vld [vmem:[%s18159_s2 + $0x160] ss:$16 sps:$4 sm:$0xff]  }
 0xc1b   :  { %v6644_v54 = vmul.f32 %v13913_v11, %v6633_v19  ;;  %18599 = vst [vmem:[#allocation43_spill] sm:$0xff] %v16763_v9  ;;  %v16768_v19 = vld [vmem:[%s18159_s2 + $0x168] ss:$16 sps:$4 sm:$0xff]   ;;  %v16777_v11 = vld [vmem:[%s18159_s2 + $0x184] ss:$16 sps:$4 sm:$0xff]  }
 0xc1c   :  { %v6643_v61 = vmul.f32 %v6637_v52, %v16396_v58  ;;  %v6642_v25 = vadd.f32 0.5, %v6641_v55  ;;  %18600 = vst [vmem:[#allocation44_spill] sm:$0xff] %v16768_v19  ;;  %18601 = vst [vmem:[#allocation45_spill] sm:$0xff] %v16777_v11  ;;  %v16782_v52 = vld [vmem:[%s18159_s2 + $0x18c] ss:$16 sps:$4 sm:$0xff]  }
 0xc1d   :  { %18602 = vst [vmem:[#allocation46_spill] sm:$0xff] %v16782_v52  ;;  %v16801_v46 = vld [vmem:[%s18159_s2 + $0x1a4] ss:$16 sps:$4 sm:$0xff]   ;;  %v16806_v55 = vld [vmem:[%s18159_s2 + $0x1ac] ss:$16 sps:$4 sm:$0xff]  }
 0xc1e   :  { %v16485_v33 = vadd.f32 %v6644_v54, %v6643_v61  ;;  %v16787_v54 = vld [vmem:[%s18159_s2 + $0x180] ss:$16 sps:$4 sm:$0xff]   ;;  %v16792_v61 = vld [vmem:[%s18159_s2 + $0x188] ss:$16 sps:$4 sm:$0xff]   ;;  %18605 = vst [vmem:[#allocation26_spill] sm:$0xff] %v16801_v46  ;;  %18606 = vst [vmem:[#allocation27_spill] sm:$0xff] %v16806_v55 }
 0xc1f   :  { %18603 = vst [vmem:[#allocation47_spill] sm:$0xff] %v16787_v54  ;;  %18604 = vst [vmem:[#allocation25_spill] sm:$0xff] %v16792_v61 }
 0xc20   :  { %13916 = vtanh.f32 %v16485_v33 }
 0xc2a   :  { %v13917_v27 = vpop.eup %13916 }
 0xc2b   :  { %v6647_v53 = vmul.f32 %v13917_v27, %v6642_v25  ;;  %v16811_v25 = vld [vmem:[%s18159_s2 + $0x1a0] ss:$16 sps:$4 sm:$0xff]   ;;  %v16816_v27 = vld [vmem:[%s18159_s2 + $0x1a8] ss:$16 sps:$4 sm:$0xff]  }
 0xc2c   :  { %18607 = vst [vmem:[#allocation28_spill] sm:$0xff] %v16811_v25  ;;  %18608 = vst [vmem:[#allocation5_spill] sm:$0xff] %v16816_v27 }
 0xc2d   :  { %v16498_v58 = vpack.c.bf16 %v6647_v53, %v6647_v53  ;;  %v16825_v53 = vld [vmem:[%s18159_s2 + $0x1c4] ss:$16 sps:$4 sm:$0xff]  }
 0xc2e   :  { %18609 = vst [vmem:[#allocation48_spill] sm:$0xff] %v16825_v53 }
 0xc2f   :  { %6896 = vmatmul.mubr.bf16.vlgmr.msra.gmra.mrb[88].mxu0 %v16498_v58  ;;  %6937 = vmatmul.mubr.bf16.vlgmr.msra.gmra.mrb[88].mxu1 %v16498_v58 }
 0xc30   :  { %7146 = vmatpush1.bf16.msra.mxu0 %v16491_v51  ;;  %7187 = vmatpush1.bf16.msra.mxu1 %v16496_v57 }
 0xc31   :  { %7147 = vmatprep.subr.bf16.mxu0 %v16503_v60  ;;  %7188 = vmatprep.subr.bf16.mxu1 %v16508_v32 }
 0xc32   :  { %7177 = vmatprep.mubr.bf16.mxu0 %v18398_v36  ;;  %7218 = vmatprep.mubr.bf16.mxu1 %v18398_v36 }
 0xc34   :  { %7148 = vmatpush1.bf16.msra.mxu0 %v16517_v39  ;;  %7189 = vmatpush1.bf16.msra.mxu1 %v16522_v14 }
 0xc35   :  { %7149 = vmatprep.subr.bf16.mxu0 %v16529_v15  ;;  %7190 = vmatprep.subr.bf16.mxu1 %v16534_v48 }
 0xc38   :  { %7150 = vmatpush1.bf16.msra.mxu0 %v16543_v63  ;;  %7191 = vmatpush1.bf16.msra.mxu1 %v16548_v0 }
 0xc39   :  { %7151 = vmatprep.subr.bf16.mxu0 %v16555_v49  ;;  %7192 = vmatprep.subr.bf16.mxu1 %v16560_v50 }
 0xc3c   :  { %7152 = vmatpush1.bf16.msra.mxu0 %v16567_v1  ;;  %7193 = vmatpush1.bf16.msra.mxu1 %v16572_v34 }
 0xc3d   :  { %7153 = vmatprep.subr.bf16.mxu0 %v16579_v47  ;;  %7194 = vmatprep.subr.bf16.mxu1 %v16584_v40 }
 0xc40   :  { %7154 = vmatpush1.bf16.msra.mxu0 %v16591_v43  ;;  %7195 = vmatpush1.bf16.msra.mxu1 %v16596_v44 }
 0xc41   :  { %7155 = vmatprep.subr.bf16.mxu0 %v16603_v18  ;;  %7196 = vmatprep.subr.bf16.mxu1 %v16608_v16 }
 0xc44   :  { %7156 = vmatpush1.bf16.msra.mxu0 %v16615_v17  ;;  %7197 = vmatpush1.bf16.msra.mxu1 %v16620_v20 }
 0xc45   :  { %7157 = vmatprep.subr.bf16.mxu0 %v16627_v30  ;;  %7198 = vmatprep.subr.bf16.mxu1 %v16632_v31 }
 0xc48   :  { %7158 = vmatpush1.bf16.msra.mxu0 %v16639_v59  ;;  %7199 = vmatpush1.bf16.msra.mxu1 %v16644_v29 }
 0xc49   :  { %7159 = vmatprep.subr.bf16.mxu0 %v16651_v3  ;;  %7200 = vmatprep.subr.bf16.mxu1 %v16656_v5 }
 0xc4c   :  { %7160 = vmatpush1.bf16.msra.mxu0 %v16663_v6  ;;  %7201 = vmatpush1.bf16.msra.mxu1 %v16668_v7 }
 0xc4d   :  { %7464 = vmatprep.subr.bf16.mxu0 %v16681_v8  ;;  %7505 = vmatprep.subr.bf16.mxu1 %v16686_v10 }
 0xc4f   :  { %7178 = vmatmul.mubr.bf16.vlgmr.msra.gmra.mrb[44].mxu0 %v16498_v58  ;;  %7219 = vmatmul.mubr.bf16.vlgmr.msra.gmra.mrb[44].mxu1 %v16498_v58  ;;  %v16830_v58 = vld [vmem:[%s18159_s2 + $0x1cc] ss:$16 sps:$4 sm:$0xff]  }
 0xc50   :  { %7496 = vmatprep.mubr.bf16.mxu0 %v18398_v36  ;;  %7537 = vmatprep.mubr.bf16.mxu1 %v18398_v36  ;;  %18610 = vst [vmem:[#allocation13_spill] sm:$0xff] %v16830_v58 }
 0xc51   :  { %7465 = vmatpush1.bf16.msra.mxu0 %v16691_v12  ;;  %7506 = vmatpush1.bf16.msra.mxu1 %v16696_v21 }
 0xc52   :  { %7466 = vmatprep.subr.bf16.mxu0 %v16705_v13  ;;  %7507 = vmatprep.subr.bf16.mxu1 %v16710_v28 }
 0xc55   :  { %7467 = vmatpush1.bf16.msra.mxu0 %v16715_v42  ;;  %7508 = vmatpush1.bf16.msra.mxu1 %v16720_v38 }
 0xc56   :  { %7468 = vmatprep.subr.bf16.mxu0 %v16729_v41  ;;  %7509 = vmatprep.subr.bf16.mxu1 %v16734_v62 }
 0xc59   :  { %7469 = vmatpush1.bf16.msra.mxu0 %v16739_v24  ;;  %7510 = vmatpush1.bf16.msra.mxu1 %v16744_v56 }
 0xc5a   :  { %7470 = vmatprep.subr.bf16.mxu0 %v16753_v2  ;;  %7511 = vmatprep.subr.bf16.mxu1 %v16758_v26 }
 0xc5d   :  { %7471 = vmatpush1.bf16.msra.mxu0 %v16763_v9  ;;  %7512 = vmatpush1.bf16.msra.mxu1 %v16768_v19 }
 0xc5e   :  { %7472 = vmatprep.subr.bf16.mxu0 %v16777_v11  ;;  %7513 = vmatprep.subr.bf16.mxu1 %v16782_v52 }
 0xc61   :  { %7473 = vmatpush1.bf16.msra.mxu0 %v16787_v54  ;;  %7514 = vmatpush1.bf16.msra.mxu1 %v16792_v61 }
 0xc62   :  { %7474 = vmatprep.subr.bf16.mxu0 %v16801_v46  ;;  %7515 = vmatprep.subr.bf16.mxu1 %v16806_v55  ;;  %v16835_v46 = vld [vmem:[%s18159_s2 + $0x1c0] ss:$16 sps:$4 sm:$0xff]   ;;  %v16854_v55 = vld [vmem:[%s18159_s2 + $0x1ec] ss:$16 sps:$4 sm:$0xff]  }
 0xc63   :  { %18611 = vst [vmem:[#allocation14_spill] sm:$0xff] %v16835_v46  ;;  %18614 = vst [vmem:[#allocation17_spill] sm:$0xff] %v16854_v55 }
 0xc65   :  { %7475 = vmatpush1.bf16.msra.mxu0 %v16811_v25  ;;  %7516 = vmatpush1.bf16.msra.mxu1 %v16816_v27  ;;  %v16840_v25 = vld [vmem:[%s18159_s2 + $0x1c8] ss:$16 sps:$4 sm:$0xff]   ;;  %v16849_v27 = vld [vmem:[%s18159_s2 + $0x1e4] ss:$16 sps:$4 sm:$0xff]  }
 0xc66   :  { %18612 = vst [vmem:[#allocation15_spill] sm:$0xff] %v16840_v25  ;;  %7476 = vmatprep.subr.bf16.mxu0 %v16825_v53  ;;  %7517 = vmatprep.subr.bf16.mxu1 %v16830_v58  ;;  %18613 = vst [vmem:[#allocation16_spill] sm:$0xff] %v16849_v27  ;;  %v16859_v53 = vld [vmem:[%s18159_s2 + $0x1e0] ss:$16 sps:$4 sm:$0xff]  }
 0xc67   :  { %18615 = vst [vmem:[#allocation18_spill] sm:$0xff] %v16859_v53 }
 0xc69   :  { %7477 = vmatpush1.bf16.msra.mxu0 %v16835_v46  ;;  %7518 = vmatpush1.bf16.msra.mxu1 %v16840_v25  ;;  %v16864_v46 = vld [vmem:[%s18159_s2 + $0x1e8] ss:$16 sps:$4 sm:$0xff]   ;;  %v11517_v25 = vld [vmem:[%s18160_s4 + $0x4] sm:$0xf] }
 0xc6a   :  { %18616 = vst [vmem:[#allocation19_spill] sm:$0xff] %v16864_v46  ;;  %7478 = vmatprep.subr.bf16.mxu0 %v16849_v27  ;;  %7519 = vmatprep.subr.bf16.mxu1 %v16854_v55  ;;  %v2454_v58 = vrot.slane %v11517_v25, %v18591_v35  ;;  %v2458_v61 = vrot.slane %v11517_v25, %v18592_v37 }
 0xc6b   :  { %v2462_v55 = vrot.slane %v11517_v25, %v18593_v4  ;;  %v2466_v35 = vrot.slane %v11517_v25, %v18538_v23  ;;  %v18623_v25 = vld [vmem:[#allocation44_spill] sm:$0xff] }
 0xc6d   :  { %7479 = vmatpush1.bf16.msra.mxu0 %v16859_v53  ;;  %7520 = vmatpush1.bf16.msra.mxu1 %v16864_v46 }
 0xc6e   :  { %7746 = vmatprep.subr.bf16.mxu0 %v16468_v45  ;;  %7787 = vmatprep.subr.bf16.mxu1 %v16473_v22 }
 0xd22   :  { %v7179_v54 = vpop.f32.mrb[44].mxu0  ;;  %v7220_v27 = vpop.f32.mrb[44].mxu1 }
 0xd23   :  { %v12983_v52 = vadd.f32 %v7179_v54, %v2454_v58  ;;  %v7181_v53 = vpop.f32.mrb[45].mxu0  ;;  %v7222_v11 = vpop.f32.mrb[45].mxu1  ;;  %v12985_v56 = vadd.f32 %v7220_v27, %v2462_v55  ;;  %v18622_v55 = vld [vmem:[#allocation43_spill] sm:$0xff]  ;;  %v18624_v27 = vld [vmem:[#allocation45_spill] sm:$0xff] }
 0xd24   :  { %v12984_v46 = vadd.f32 %v7181_v53, %v2458_v61  ;;  %v7183_v19 = vpop.f32.mrb[46].mxu0  ;;  %v7224_v45 = vpop.f32.mrb[46].mxu1  ;;  %v12986_v37 = vadd.f32 %v7222_v11, %v2466_v35  ;;  %v18625_v53 = vld [vmem:[#allocation46_spill] sm:$0xff] }
 0xd25   :  { %v7231_v9 = vmul.f32 0.5, %v12983_v52  ;;  %v7184_v22 = vpop.f32.mrb[47].mxu0  ;;  %v7225_v26 = vpop.f32.mrb[47].mxu1 }
 0xd26   :  { %v7235_v2 = vmul.f32 0.5, %v12984_v46  ;;  %v7240_v24 = vmul.f32 0.5, %v12986_v37  ;;  %v18621_v46 = vld [vmem:[#allocation42_spill] sm:$0xff] }
 0xd27   :  { %13918 = vtanh.f32 %v7231_v9 }
 0xd28   :  { %13920 = vtanh.f32 %v7235_v2 }
 0xd29   :  { %13922 = vtanh.f32 %v12985_v56 }
 0xd2a   :  { %13924 = vtanh.f32 %v7240_v24  ;;  %v18620_v24 = vld [vmem:[#allocation41_spill] sm:$0xff] }
 0xd31   :  { %v13919_v54 = vpop.eup %13918 }
 0xd32   :  { %v13921_v58 = vpop.eup %13920  ;;  %v7233_v4 = vmul.f32 0.5, %v13919_v54  ;;  %v18626_v54 = vld [vmem:[#allocation47_spill] sm:$0xff] }
 0xd33   :  { %v7237_v62 = vmul.f32 0.5, %v13921_v58  ;;  %v13923_v19 = vpop.eup %13922  ;;  %v18627_v58 = vld [vmem:[#allocation25_spill] sm:$0xff] }
 0xd34   :  { %v7234_v61 = vadd.f32 0.5, %v7233_v4  ;;  %v13925_v9 = vpop.eup %13924  ;;  %v18617_v4 = vld [vmem:[#allocation38_spill] sm:$0xff] }
 0xd35   :  { %v7238_v45 = vadd.f32 0.5, %v7237_v62  ;;  %v7242_v2 = vmul.f32 0.5, %v13925_v9  ;;  %v18619_v62 = vld [vmem:[#allocation40_spill] sm:$0xff]  ;;  %v18633_v9 = vld [vmem:[#allocation13_spill] sm:$0xff] }
 0xd36   :  { %v7245_v52 = vmul.f32 %v13923_v19, %v7234_v61  ;;  %v18628_v61 = vld [vmem:[#allocation26_spill] sm:$0xff]  ;;  %v18629_v19 = vld [vmem:[#allocation27_spill] sm:$0xff] }
 0xd37   :  { %v7244_v22 = vmul.f32 %v7238_v45, %v16485_v33  ;;  %v7243_v56 = vadd.f32 0.5, %v7242_v2  ;;  %v18618_v33 = vld [vmem:[#allocation39_spill] sm:$0xff]  ;;  %v18630_v45 = vld [vmem:[#allocation28_spill] sm:$0xff]  ;;  %v18634_v2 = vld [vmem:[#allocation14_spill] sm:$0xff] }
 0xd39   :  { %v16880_v26 = vadd.f32 %v7245_v52, %v7244_v22  ;;  %v18631_v52 = vld [vmem:[#allocation5_spill] sm:$0xff]  ;;  %v18632_v22 = vld [vmem:[#allocation48_spill] sm:$0xff] }
 0xd3b   :  { %13926 = vtanh.f32 %v16880_v26 }
 0xd45   :  { %v13927_v35 = vpop.eup %13926 }
 0xd46   :  { %v7248_v37 = vmul.f32 %v13927_v35, %v7243_v56  ;;  %v18635_v56 = vld [vmem:[#allocation15_spill] sm:$0xff]  ;;  %v18636_v35 = vld [vmem:[#allocation16_spill] sm:$0xff] }
 0xd48   :  { %v7249_v11 = vpack.c.bf16 %v7248_v37, %v7248_v37  ;;  %v18637_v37 = vld [vmem:[#allocation17_spill] sm:$0xff] }
 0xd4a   :  { %7497 = vmatmul.mubr.bf16.vlgmr.msra.gmra.mrb[92].mxu0 %v7249_v11  ;;  %7538 = vmatmul.mubr.bf16.vlgmr.msra.gmra.mrb[92].mxu1 %v7249_v11 }
 0xd4b   :  { %7747 = vmatpush1.bf16.msra.mxu0 %v16491_v51  ;;  %7788 = vmatpush1.bf16.msra.mxu1 %v16496_v57 }
 0xd4c   :  { %7748 = vmatprep.subr.bf16.mxu0 %v16503_v60  ;;  %7789 = vmatprep.subr.bf16.mxu1 %v16508_v32 }
 0xd4d   :  { %7778 = vmatprep.mubr.bf16.mxu0 %v18398_v36  ;;  %7819 = vmatprep.mubr.bf16.mxu1 %v18398_v36 }
 0xd4f   :  { %7749 = vmatpush1.bf16.msra.mxu0 %v16517_v39  ;;  %7790 = vmatpush1.bf16.msra.mxu1 %v16522_v14 }
 0xd50   :  { %7750 = vmatprep.subr.bf16.mxu0 %v16529_v15  ;;  %7791 = vmatprep.subr.bf16.mxu1 %v16534_v48 }
 0xd53   :  { %7751 = vmatpush1.bf16.msra.mxu0 %v16543_v63  ;;  %7792 = vmatpush1.bf16.msra.mxu1 %v16548_v0 }
 0xd54   :  { %7752 = vmatprep.subr.bf16.mxu0 %v16555_v49  ;;  %7793 = vmatprep.subr.bf16.mxu1 %v16560_v50 }
 0xd57   :  { %7753 = vmatpush1.bf16.msra.mxu0 %v16567_v1  ;;  %7794 = vmatpush1.bf16.msra.mxu1 %v16572_v34 }
 0xd58   :  { %7754 = vmatprep.subr.bf16.mxu0 %v16579_v47  ;;  %7795 = vmatprep.subr.bf16.mxu1 %v16584_v40 }
 0xd5b   :  { %7755 = vmatpush1.bf16.msra.mxu0 %v16591_v43  ;;  %7796 = vmatpush1.bf16.msra.mxu1 %v16596_v44 }
 0xd5c   :  { %7756 = vmatprep.subr.bf16.mxu0 %v16603_v18  ;;  %7797 = vmatprep.subr.bf16.mxu1 %v16608_v16 }
 0xd5f   :  { %7757 = vmatpush1.bf16.msra.mxu0 %v16615_v17  ;;  %7798 = vmatpush1.bf16.msra.mxu1 %v16620_v20 }
 0xd60   :  { %7758 = vmatprep.subr.bf16.mxu0 %v16627_v30  ;;  %7799 = vmatprep.subr.bf16.mxu1 %v16632_v31 }
 0xd63   :  { %7759 = vmatpush1.bf16.msra.mxu0 %v16639_v59  ;;  %7800 = vmatpush1.bf16.msra.mxu1 %v16644_v29 }
 0xd64   :  { %7760 = vmatprep.subr.bf16.mxu0 %v16651_v3  ;;  %7801 = vmatprep.subr.bf16.mxu1 %v16656_v5 }
 0xd67   :  { %7761 = vmatpush1.bf16.msra.mxu0 %v16663_v6  ;;  %7802 = vmatpush1.bf16.msra.mxu1 %v16668_v7 }
 0xd68   :  { %8065 = vmatprep.subr.bf16.mxu0 %v16681_v8  ;;  %8106 = vmatprep.subr.bf16.mxu1 %v16686_v10 }
 0xd6a   :  { %7779 = vmatmul.mubr.bf16.vlgmr.msra.gmra.mrb[52].mxu0 %v7249_v11  ;;  %7820 = vmatmul.mubr.bf16.vlgmr.msra.gmra.mrb[52].mxu1 %v7249_v11  ;;  %v18638_v11 = vld [vmem:[#allocation18_spill] sm:$0xff] }
 0xd6b   :  { %8066 = vmatpush1.bf16.msra.mxu0 %v16691_v12  ;;  %8107 = vmatpush1.bf16.msra.mxu1 %v16696_v21 }
 0xd6c   :  { %8067 = vmatprep.subr.bf16.mxu0 %v16705_v13  ;;  %8108 = vmatprep.subr.bf16.mxu1 %v16710_v28 }
 0xd6d   :  { %8097 = vmatprep.mubr.bf16.mxu0 %v18398_v36  ;;  %8138 = vmatprep.mubr.bf16.mxu1 %v18398_v36 }
 0xd6f   :  { %8068 = vmatpush1.bf16.msra.mxu0 %v16715_v42  ;;  %8109 = vmatpush1.bf16.msra.mxu1 %v16720_v38 }
 0xd70   :  { %8069 = vmatprep.subr.bf16.mxu0 %v16729_v41  ;;  %8110 = vmatprep.subr.bf16.mxu1 %v18617_v4 }
 0xd73   :  { %8070 = vmatpush1.bf16.msra.mxu0 %v18618_v33  ;;  %8111 = vmatpush1.bf16.msra.mxu1 %v18619_v62 }
 0xd74   :  { %8071 = vmatprep.subr.bf16.mxu0 %v18620_v24  ;;  %8112 = vmatprep.subr.bf16.mxu1 %v18621_v46 }
 0xd77   :  { %8072 = vmatpush1.bf16.msra.mxu0 %v18622_v55  ;;  %8113 = vmatpush1.bf16.msra.mxu1 %v18623_v25 }
 0xd78   :  { %8073 = vmatprep.subr.bf16.mxu0 %v18624_v27  ;;  %8114 = vmatprep.subr.bf16.mxu1 %v18625_v53 }
 0xd7b   :  { %8074 = vmatpush1.bf16.msra.mxu0 %v18626_v54  ;;  %8115 = vmatpush1.bf16.msra.mxu1 %v18627_v58 }
 0xd7c   :  { %8075 = vmatprep.subr.bf16.mxu0 %v18628_v61  ;;  %8116 = vmatprep.subr.bf16.mxu1 %v18629_v19  ;;  %v18639_v61 = vld [vmem:[#allocation19_spill] sm:$0xff]  ;;  %v18640_v19 = vld [vmem:[#allocation36_spill] sm:$0xff] }
 0xd7f   :  { %8076 = vmatpush1.bf16.msra.mxu0 %v18630_v45  ;;  %8117 = vmatpush1.bf16.msra.mxu1 %v18631_v52  ;;  %v18641_v45 = vld [vmem:[#allocation37_spill] sm:$0xff]  ;;  %v18643_v52 = vld [vmem:[#allocation7_spill] sm:$0xff] }
 0xd80   :  { %8077 = vmatprep.subr.bf16.mxu0 %v18632_v22  ;;  %8118 = vmatprep.subr.bf16.mxu1 %v18633_v9  ;;  %v11582_v9 = vld [vmem:[%s18160_s4 + $0x4] sm:$0xf]  ;;  %v18642_v22 = vld [vmem:[#allocation6_spill] sm:$0xff] }
 0xd83   :  { %8078 = vmatpush1.bf16.msra.mxu0 %v18634_v2  ;;  %8119 = vmatpush1.bf16.msra.mxu1 %v18635_v56  ;;  %v3060_v2 = vrot.slane %v11582_v9, %v18642_v22  ;;  %v3064_v56 = vrot.slane %v11582_v9, %v18643_v52  ;;  %v3072_v22 = vrot.slane %v11582_v9, %v18538_v23 }
 0xd84   :  { %8079 = vmatprep.subr.bf16.mxu0 %v18636_v35  ;;  %8120 = vmatprep.subr.bf16.mxu1 %v18637_v37  ;;  %v18644_v37 = vld [vmem:[#allocation4_spill] sm:$0xff] }
 0xd85   :  { %v3068_v53 = vrot.slane %v11582_v9, %v18644_v37 }
 0xd87   :  { %8080 = vmatpush1.bf16.msra.mxu0 %v18638_v11  ;;  %8121 = vmatpush1.bf16.msra.mxu1 %v18639_v61 }
 0xd88   :  { %8347 = vmatprep.subr.bf16.mxu0 %v18640_v19  ;;  %8388 = vmatprep.subr.bf16.mxu1 %v18641_v45 }
 0xe3d   :  { %v7780_v58 = vpop.f32.mrb[52].mxu0  ;;  %v7821_v35 = vpop.f32.mrb[52].mxu1 }
 0xe3e   :  { %v12987_v54 = vadd.f32 %v7780_v58, %v3060_v2  ;;  %v7782_v11 = vpop.f32.mrb[53].mxu0  ;;  %v7823_v27 = vpop.f32.mrb[53].mxu1  ;;  %v12989_v62 = vadd.f32 %v7821_v35, %v3068_v53 }
 0xe3f   :  { %v12988_v61 = vadd.f32 %v7782_v11, %v3064_v56  ;;  %v7784_v25 = vpop.f32.mrb[54].mxu0  ;;  %v7825_v19 = vpop.f32.mrb[54].mxu1  ;;  %v12990_v52 = vadd.f32 %v7823_v27, %v3072_v22 }
 0xe40   :  { %v7832_v55 = vmul.f32 0.5, %v12987_v54  ;;  %v7785_v45 = vpop.f32.mrb[55].mxu0  ;;  %v7826_v46 = vpop.f32.mrb[55].mxu1 }
 0xe41   :  { %v7836_v24 = vmul.f32 0.5, %v12988_v61  ;;  %v7841_v33 = vmul.f32 0.5, %v12990_v52 }
 0xe42   :  { %13928 = vtanh.f32 %v7832_v55 }
 0xe43   :  { %13930 = vtanh.f32 %v7836_v24 }
 0xe44   :  { %13932 = vtanh.f32 %v12989_v62 }
 0xe45   :  { %13934 = vtanh.f32 %v7841_v33 }
 0xe4c   :  { %v13929_v58 = vpop.eup %13928 }
 0xe4d   :  { %v13931_v2 = vpop.eup %13930  ;;  %v7834_v37 = vmul.f32 0.5, %v13929_v58 }
 0xe4e   :  { %v7838_v4 = vmul.f32 0.5, %v13931_v2  ;;  %v13933_v25 = vpop.eup %13932 }
 0xe4f   :  { %v7835_v56 = vadd.f32 0.5, %v7834_v37  ;;  %v13935_v55 = vpop.eup %13934 }
 0xe50   :  { %v7839_v11 = vadd.f32 0.5, %v7838_v4  ;;  %v7843_v24 = vmul.f32 0.5, %v13935_v55 }
 0xe51   :  { %v7846_v54 = vmul.f32 %v13933_v25, %v7835_v56 }
 0xe52   :  { %v7845_v46 = vmul.f32 %v7839_v11, %v16880_v26  ;;  %v7844_v62 = vadd.f32 0.5, %v7843_v24 }
 0xe54   :  { %v16959_v61 = vadd.f32 %v7846_v54, %v7845_v46 }
 0xe56   :  { %13936 = vtanh.f32 %v16959_v61 }
 0xe60   :  { %v13937_v27 = vpop.eup %13936 }
 0xe61   :  { %v7849_v53 = vmul.f32 %v13937_v27, %v7844_v62 }
 0xe63   :  { %v7850_v52 = vpack.c.bf16 %v7849_v53, %v7849_v53 }
 0xe65   :  { %8098 = vmatmul.mubr.bf16.vlgmr.msra.gmra.mrb[96].mxu0 %v7850_v52  ;;  %8139 = vmatmul.mubr.bf16.vlgmr.msra.gmra.mrb[96].mxu1 %v7850_v52 }
 0xe66   :  { %8348 = vmatpush1.bf16.msra.mxu0 %v16491_v51  ;;  %8389 = vmatpush1.bf16.msra.mxu1 %v16496_v57  ;;  %v18645_v51 = vld [vmem:[#allocation38_spill] sm:$0xff]  ;;  %v18646_v57 = vld [vmem:[#allocation39_spill] sm:$0xff] }
 0xe67   :  { %8349 = vmatprep.subr.bf16.mxu0 %v16503_v60  ;;  %8390 = vmatprep.subr.bf16.mxu1 %v16508_v32  ;;  %v18647_v60 = vld [vmem:[#allocation40_spill] sm:$0xff]  ;;  %v18648_v32 = vld [vmem:[#allocation41_spill] sm:$0xff] }
 0xe68   :  { %8379 = vmatprep.mubr.bf16.mxu0 %v18398_v36  ;;  %8420 = vmatprep.mubr.bf16.mxu1 %v18398_v36 }
 0xe6a   :  { %8350 = vmatpush1.bf16.msra.mxu0 %v16517_v39  ;;  %8391 = vmatpush1.bf16.msra.mxu1 %v16522_v14  ;;  %v18649_v39 = vld [vmem:[#allocation42_spill] sm:$0xff]  ;;  %v18650_v14 = vld [vmem:[#allocation43_spill] sm:$0xff] }
 0xe6b   :  { %8351 = vmatprep.subr.bf16.mxu0 %v16529_v15  ;;  %8392 = vmatprep.subr.bf16.mxu1 %v16534_v48  ;;  %v18651_v15 = vld [vmem:[#allocation44_spill] sm:$0xff]  ;;  %v18652_v48 = vld [vmem:[#allocation45_spill] sm:$0xff] }
 0xe6e   :  { %8352 = vmatpush1.bf16.msra.mxu0 %v16543_v63  ;;  %8393 = vmatpush1.bf16.msra.mxu1 %v16548_v0  ;;  %v18653_v63 = vld [vmem:[#allocation46_spill] sm:$0xff]  ;;  %v18654_v0 = vld [vmem:[#allocation47_spill] sm:$0xff] }
 0xe6f   :  { %8353 = vmatprep.subr.bf16.mxu0 %v16555_v49  ;;  %8394 = vmatprep.subr.bf16.mxu1 %v16560_v50  ;;  %v18655_v49 = vld [vmem:[#allocation25_spill] sm:$0xff]  ;;  %v18656_v50 = vld [vmem:[#allocation26_spill] sm:$0xff] }
 0xe72   :  { %8354 = vmatpush1.bf16.msra.mxu0 %v16567_v1  ;;  %8395 = vmatpush1.bf16.msra.mxu1 %v16572_v34  ;;  %v18657_v1 = vld [vmem:[#allocation27_spill] sm:$0xff]  ;;  %v18658_v34 = vld [vmem:[#allocation28_spill] sm:$0xff] }
 0xe73   :  { %8355 = vmatprep.subr.bf16.mxu0 %v16579_v47  ;;  %8396 = vmatprep.subr.bf16.mxu1 %v16584_v40  ;;  %v18659_v47 = vld [vmem:[#allocation5_spill] sm:$0xff]  ;;  %v18660_v40 = vld [vmem:[#allocation48_spill] sm:$0xff] }
 0xe76   :  { %8356 = vmatpush1.bf16.msra.mxu0 %v16591_v43  ;;  %8397 = vmatpush1.bf16.msra.mxu1 %v16596_v44  ;;  %v18661_v43 = vld [vmem:[#allocation13_spill] sm:$0xff]  ;;  %v18662_v44 = vld [vmem:[#allocation14_spill] sm:$0xff] }
 0xe77   :  { %8357 = vmatprep.subr.bf16.mxu0 %v16603_v18  ;;  %8398 = vmatprep.subr.bf16.mxu1 %v16608_v16  ;;  %v18663_v18 = vld [vmem:[#allocation15_spill] sm:$0xff]  ;;  %v18664_v16 = vld [vmem:[#allocation16_spill] sm:$0xff] }
 0xe7a   :  { %8358 = vmatpush1.bf16.msra.mxu0 %v16615_v17  ;;  %8399 = vmatpush1.bf16.msra.mxu1 %v16620_v20  ;;  %v18665_v17 = vld [vmem:[#allocation17_spill] sm:$0xff]  ;;  %v18666_v20 = vld [vmem:[#allocation18_spill] sm:$0xff] }
 0xe7b   :  { %8359 = vmatprep.subr.bf16.mxu0 %v16627_v30  ;;  %8400 = vmatprep.subr.bf16.mxu1 %v16632_v31  ;;  %v18667_v30 = vld [vmem:[#allocation19_spill] sm:$0xff]  ;;  %v17031_v31 = vld [vmem:[%s18158_s3 + $0x104] ss:$16 sps:$4 sm:$0xff]  }
 0xe7e   :  { %8360 = vmatpush1.bf16.msra.mxu0 %v16639_v59  ;;  %8401 = vmatpush1.bf16.msra.mxu1 %v16644_v29  ;;  %v17036_v59 = vld [vmem:[%s18158_s3 + $0x10c] ss:$16 sps:$4 sm:$0xff]   ;;  %v11647_v29 = vld [vmem:[%s18160_s4 + $0x4] sm:$0xf] }
 0xe7f   :  { %8361 = vmatprep.subr.bf16.mxu0 %v16651_v3  ;;  %8402 = vmatprep.subr.bf16.mxu1 %v16656_v5  ;;  %v18668_v3 = vld [vmem:[#allocation6_spill] sm:$0xff]  ;;  %v3678_v37 = vrot.slane %v11647_v29, %v18538_v23 }
 0xe80   :  { %v3666_v5 = vrot.slane %v11647_v29, %v18668_v3 }
 0xe82   :  { %8362 = vmatpush1.bf16.msra.mxu0 %v16663_v6  ;;  %8403 = vmatpush1.bf16.msra.mxu1 %v16668_v7  ;;  %v18669_v6 = vld [vmem:[#allocation7_spill] sm:$0xff] }
 0xe83   :  { %8666 = vmatprep.subr.bf16.mxu0 %v16681_v8  ;;  %8707 = vmatprep.subr.bf16.mxu1 %v16686_v10  ;;  %v3670_v7 = vrot.slane %v11647_v29, %v18669_v6 }
 0xe85   :  { %8380 = vmatmul.mubr.bf16.vlgmr.msra.gmra.mrb[60].mxu0 %v7850_v52  ;;  %8421 = vmatmul.mubr.bf16.vlgmr.msra.gmra.mrb[60].mxu1 %v7850_v52 }
 0xe86   :  { %8667 = vmatpush1.bf16.msra.mxu0 %v16691_v12  ;;  %8708 = vmatpush1.bf16.msra.mxu1 %v16696_v21  ;;  %v18670_v21 = vld [vmem:[#allocation4_spill] sm:$0xff] }
 0xe87   :  { %8668 = vmatprep.subr.bf16.mxu0 %v16705_v13  ;;  %8709 = vmatprep.subr.bf16.mxu1 %v16710_v28  ;;  %v3674_v13 = vrot.slane %v11647_v29, %v18670_v21  ;;  %v17183_v29 = vld [vmem:[%s18158_s3 + $0x1a8] ss:$16 sps:$4 sm:$0xff]  }
 0xe88   :  { %8698 = vmatprep.mubr.bf16.mxu0 %v18398_v36  ;;  %8739 = vmatprep.mubr.bf16.mxu1 %v18398_v36 }
 0xe8a   :  { %8669 = vmatpush1.bf16.msra.mxu0 %v16715_v42  ;;  %8710 = vmatpush1.bf16.msra.mxu1 %v16720_v38 }
 0xe8b   :  { %8670 = vmatprep.subr.bf16.mxu0 %v16729_v41  ;;  %8711 = vmatprep.subr.bf16.mxu1 %v18645_v51 }
 0xe8e   :  { %8671 = vmatpush1.bf16.msra.mxu0 %v18646_v57  ;;  %8712 = vmatpush1.bf16.msra.mxu1 %v18647_v60  ;;  %v17054_v60 = vld [vmem:[%s18158_s3 + $0x100] ss:$16 sps:$4 sm:$0xff]  }
 0xe8f   :  { %8672 = vmatprep.subr.bf16.mxu0 %v18648_v32  ;;  %8713 = vmatprep.subr.bf16.mxu1 %v18649_v39  ;;  %v17059_v32 = vld [vmem:[%s18158_s3 + $0x108] ss:$16 sps:$4 sm:$0xff]   ;;  %v17066_v39 = vld [vmem:[%s18158_s3 + $0x124] ss:$16 sps:$4 sm:$0xff]  }
 0xe92   :  { %8673 = vmatpush1.bf16.msra.mxu0 %v18650_v14  ;;  %8714 = vmatpush1.bf16.msra.mxu1 %v18651_v15  ;;  %v17071_v14 = vld [vmem:[%s18158_s3 + $0x12c] ss:$16 sps:$4 sm:$0xff]   ;;  %v17080_v15 = vld [vmem:[%s18158_s3 + $0x120] ss:$16 sps:$4 sm:$0xff]  }
 0xe93   :  { %8674 = vmatprep.subr.bf16.mxu0 %v18652_v48  ;;  %8715 = vmatprep.subr.bf16.mxu1 %v18653_v63  ;;  %v17085_v48 = vld [vmem:[%s18158_s3 + $0x128] ss:$16 sps:$4 sm:$0xff]   ;;  %v17092_v63 = vld [vmem:[%s18158_s3 + $0x144] ss:$16 sps:$4 sm:$0xff]  }
 0xe96   :  { %8675 = vmatpush1.bf16.msra.mxu0 %v18654_v0  ;;  %8716 = vmatpush1.bf16.msra.mxu1 %v18655_v49  ;;  %v17097_v0 = vld [vmem:[%s18158_s3 + $0x14c] ss:$16 sps:$4 sm:$0xff]   ;;  %v17106_v49 = vld [vmem:[%s18158_s3 + $0x140] ss:$16 sps:$4 sm:$0xff]  }
 0xe97   :  { %8676 = vmatprep.subr.bf16.mxu0 %v18656_v50  ;;  %8717 = vmatprep.subr.bf16.mxu1 %v18657_v1  ;;  %v17111_v50 = vld [vmem:[%s18158_s3 + $0x148] ss:$16 sps:$4 sm:$0xff]   ;;  %v17118_v1 = vld [vmem:[%s18158_s3 + $0x164] ss:$16 sps:$4 sm:$0xff]  }
 0xe9a   :  { %8677 = vmatpush1.bf16.msra.mxu0 %v18658_v34  ;;  %8718 = vmatpush1.bf16.msra.mxu1 %v18659_v47  ;;  %v17123_v34 = vld [vmem:[%s18158_s3 + $0x16c] ss:$16 sps:$4 sm:$0xff]   ;;  %v17130_v47 = vld [vmem:[%s18158_s3 + $0x160] ss:$16 sps:$4 sm:$0xff]  }
 0xe9b   :  { %8678 = vmatprep.subr.bf16.mxu0 %v18660_v40  ;;  %8719 = vmatprep.subr.bf16.mxu1 %v18661_v43  ;;  %v17135_v40 = vld [vmem:[%s18158_s3 + $0x168] ss:$16 sps:$4 sm:$0xff]   ;;  %v17142_v43 = vld [vmem:[%s18158_s3 + $0x184] ss:$16 sps:$4 sm:$0xff]  }
 0xe9e   :  { %8679 = vmatpush1.bf16.msra.mxu0 %v18662_v44  ;;  %8720 = vmatpush1.bf16.msra.mxu1 %v18663_v18  ;;  %v17147_v44 = vld [vmem:[%s18158_s3 + $0x18c] ss:$16 sps:$4 sm:$0xff]   ;;  %v17154_v18 = vld [vmem:[%s18158_s3 + $0x180] ss:$16 sps:$4 sm:$0xff]  }
 0xe9f   :  { %8680 = vmatprep.subr.bf16.mxu0 %v18664_v16  ;;  %8721 = vmatprep.subr.bf16.mxu1 %v18665_v17  ;;  %v17159_v16 = vld [vmem:[%s18158_s3 + $0x188] ss:$16 sps:$4 sm:$0xff]   ;;  %v17166_v17 = vld [vmem:[%s18158_s3 + $0x1a4] ss:$16 sps:$4 sm:$0xff]  }
 0xea2   :  { %8681 = vmatpush1.bf16.msra.mxu0 %v18666_v20  ;;  %8722 = vmatpush1.bf16.msra.mxu1 %v18667_v30  ;;  %v17171_v20 = vld [vmem:[%s18158_s3 + $0x1ac] ss:$16 sps:$4 sm:$0xff]   ;;  %v17178_v30 = vld [vmem:[%s18158_s3 + $0x1a0] ss:$16 sps:$4 sm:$0xff]  }
 0xea3   :  { %8948 = vmatprep.subr.bf16.mxu0 %v17031_v31  ;;  %8989 = vmatprep.subr.bf16.mxu1 %v17036_v59 }
 0xf58   :  { %v8381_v8 = vpop.f32.mrb[60].mxu0  ;;  %v8422_v10 = vpop.f32.mrb[60].mxu1 }
 0xf59   :  { %v12991_v12 = vadd.f32 %v8381_v8, %v3666_v5  ;;  %v8383_v28 = vpop.f32.mrb[61].mxu0  ;;  %v8424_v42 = vpop.f32.mrb[61].mxu1  ;;  %v12993_v35 = vadd.f32 %v8422_v10, %v3674_v13  ;;  %v17190_v5 = vld [vmem:[%s18158_s3 + $0x1c4] ss:$16 sps:$4 sm:$0xff]   ;;  %v17202_v8 = vld [vmem:[%s18158_s3 + $0x1c0] ss:$16 sps:$4 sm:$0xff]  }
 0xf5a   :  { %v12992_v38 = vadd.f32 %v8383_v28, %v3670_v7  ;;  %v8385_v41 = vpop.f32.mrb[62].mxu0  ;;  %v8426_v26 = vpop.f32.mrb[62].mxu1  ;;  %v12994_v19 = vadd.f32 %v8424_v42, %v3678_v37  ;;  %v17195_v7 = vld [vmem:[%s18158_s3 + $0x1cc] ss:$16 sps:$4 sm:$0xff]   ;;  %v17207_v10 = vld [vmem:[%s18158_s3 + $0x1c8] ss:$16 sps:$4 sm:$0xff]  }
 0xf5b   :  { %v8433_v4 = vmul.f32 0.5, %v12991_v12  ;;  %v8386_v33 = vpop.f32.mrb[63].mxu0  ;;  %v8427_v22 = vpop.f32.mrb[63].mxu1  ;;  %v17214_v12 = vld [vmem:[%s18158_s3 + $0x1e4] ss:$16 sps:$4 sm:$0xff]  }
 0xf5c   :  { %v8437_v9 = vmul.f32 0.5, %v12992_v38  ;;  %v8442_v45 = vmul.f32 0.5, %v12994_v19  ;;  %v17219_v13 = vld [vmem:[%s18158_s3 + $0x1ec] ss:$16 sps:$4 sm:$0xff]   ;;  %v17226_v28 = vld [vmem:[%s18158_s3 + $0x1e0] ss:$16 sps:$4 sm:$0xff]  }
 0xf5d   :  { %13938 = vtanh.f32 %v8433_v4  ;;  %v17231_v42 = vld [vmem:[%s18158_s3 + $0x1e8] ss:$16 sps:$4 sm:$0xff]   ;;  %v17244_v38 = vld [vmem:[%s18159_s2 + $0x104] ss:$16 sps:$4 sm:$0xff]   ;;  %v17249_v41 = vld [vmem:[%s18159_s2 + $0x10c] ss:$16 sps:$4 sm:$0xff]  }
 0xf5e   :  { %13940 = vtanh.f32 %v8437_v9  ;;  %v17254_v26 = vld [vmem:[%s18159_s2 + $0x100] ss:$16 sps:$4 sm:$0xff]   ;;  %v17259_v4 = vld [vmem:[%s18159_s2 + $0x108] ss:$16 sps:$4 sm:$0xff]   ;;  %v17268_v33 = vld [vmem:[%s18159_s2 + $0x124] ss:$16 sps:$4 sm:$0xff]  }
 0xf5f   :  { %13942 = vtanh.f32 %v12993_v35  ;;  %v17273_v22 = vld [vmem:[%s18159_s2 + $0x12c] ss:$16 sps:$4 sm:$0xff]   ;;  %v17278_v9 = vld [vmem:[%s18159_s2 + $0x120] ss:$16 sps:$4 sm:$0xff]   ;;  %v17283_v35 = vld [vmem:[%s18159_s2 + $0x128] ss:$16 sps:$4 sm:$0xff]  }
 0xf60   :  { %13944 = vtanh.f32 %v8442_v45  ;;  %v17292_v37 = vld [vmem:[%s18159_s2 + $0x144] ss:$16 sps:$4 sm:$0xff]   ;;  %v17297_v19 = vld [vmem:[%s18159_s2 + $0x14c] ss:$16 sps:$4 sm:$0xff]   ;;  %v17302_v45 = vld [vmem:[%s18159_s2 + $0x140] ss:$16 sps:$4 sm:$0xff]  }
 0xf61   :  { %18671 = vst [vmem:[#allocation20_spill] sm:$0xff] %v17297_v19  ;;  %18672 = vst [vmem:[#allocation9_spill] sm:$0xff] %v17302_v45 }
 0xf67   :  { %v13939_v58 = vpop.eup %13938 }
 0xf68   :  { %v13941_v2 = vpop.eup %13940  ;;  %v8435_v56 = vmul.f32 0.5, %v13939_v58  ;;  %v17307_v58 = vld [vmem:[%s18159_s2 + $0x148] ss:$16 sps:$4 sm:$0xff]  }
 0xf69   :  { %v8439_v25 = vmul.f32 0.5, %v13941_v2  ;;  %v13943_v54 = vpop.eup %13942  ;;  %18673 = vst [vmem:[#allocation10_spill] sm:$0xff] %v17307_v58  ;;  %v17316_v2 = vld [vmem:[%s18159_s2 + $0x164] ss:$16 sps:$4 sm:$0xff]  }
 0xf6a   :  { %v8436_v11 = vadd.f32 0.5, %v8435_v56  ;;  %v13945_v27 = vpop.eup %13944  ;;  %18674 = vst [vmem:[#allocation11_spill] sm:$0xff] %v17316_v2  ;;  %v17321_v56 = vld [vmem:[%s18159_s2 + $0x16c] ss:$16 sps:$4 sm:$0xff]  }
 0xf6b   :  { %v8440_v46 = vadd.f32 0.5, %v8439_v25  ;;  %v8444_v53 = vmul.f32 0.5, %v13945_v27  ;;  %18675 = vst [vmem:[#allocation21_spill] sm:$0xff] %v17321_v56  ;;  %v17326_v25 = vld [vmem:[%s18159_s2 + $0x160] ss:$16 sps:$4 sm:$0xff]  }
 0xf6c   :  { %v8447_v55 = vmul.f32 %v13943_v54, %v8436_v11  ;;  %18676 = vst [vmem:[#allocation22_spill] sm:$0xff] %v17326_v25  ;;  %v17331_v11 = vld [vmem:[%s18159_s2 + $0x168] ss:$16 sps:$4 sm:$0xff]   ;;  %v17340_v54 = vld [vmem:[%s18159_s2 + $0x184] ss:$16 sps:$4 sm:$0xff]  }
 0xf6d   :  { %v8446_v24 = vmul.f32 %v8440_v46, %v16959_v61  ;;  %v8445_v52 = vadd.f32 0.5, %v8444_v53  ;;  %18677 = vst [vmem:[#allocation23_spill] sm:$0xff] %v17331_v11  ;;  %18678 = vst [vmem:[#allocation24_spill] sm:$0xff] %v17340_v54  ;;  %v17345_v46 = vld [vmem:[%s18159_s2 + $0x18c] ss:$16 sps:$4 sm:$0xff]  }
 0xf6e   :  { %18679 = vst [vmem:[#allocation12_spill] sm:$0xff] %v17345_v46  ;;  %v17364_v27 = vld [vmem:[%s18159_s2 + $0x1a4] ss:$16 sps:$4 sm:$0xff]   ;;  %v17369_v53 = vld [vmem:[%s18159_s2 + $0x1ac] ss:$16 sps:$4 sm:$0xff]  }
 0xf6f   :  { %v17048_v62 = vadd.f32 %v8447_v55, %v8446_v24  ;;  %v17350_v55 = vld [vmem:[%s18159_s2 + $0x180] ss:$16 sps:$4 sm:$0xff]   ;;  %v17355_v24 = vld [vmem:[%s18159_s2 + $0x188] ss:$16 sps:$4 sm:$0xff]   ;;  %18682 = vst [vmem:[#allocation30_spill] sm:$0xff] %v17364_v27  ;;  %18683 = vst [vmem:[#allocation31_spill] sm:$0xff] %v17369_v53 }
 0xf70   :  { %18680 = vst [vmem:[#allocation8_spill] sm:$0xff] %v17350_v55  ;;  %18681 = vst [vmem:[#allocation29_spill] sm:$0xff] %v17355_v24 }
 0xf71   :  { %13946 = vtanh.f32 %v17048_v62 }
 0xf7b   :  { %v13947_v51 = vpop.eup %13946 }
 0xf7c   :  { %v8450_v57 = vmul.f32 %v13947_v51, %v8445_v52  ;;  %v17374_v52 = vld [vmem:[%s18159_s2 + $0x1a0] ss:$16 sps:$4 sm:$0xff]   ;;  %v17379_v51 = vld [vmem:[%s18159_s2 + $0x1a8] ss:$16 sps:$4 sm:$0xff]  }
 0xf7d   :  { %18684 = vst [vmem:[#allocation32_spill] sm:$0xff] %v17374_v52  ;;  %18685 = vst [vmem:[#allocation33_spill] sm:$0xff] %v17379_v51 }
 0xf7e   :  { %v17061_v61 = vpack.c.bf16 %v8450_v57, %v8450_v57  ;;  %v17388_v57 = vld [vmem:[%s18159_s2 + $0x1c4] ss:$16 sps:$4 sm:$0xff]  }
 0xf7f   :  { %18686 = vst [vmem:[#allocation34_spill] sm:$0xff] %v17388_v57 }
 0xf80   :  { %8699 = vmatmul.mubr.bf16.vlgmr.msra.gmra.mrb[100].mxu0 %v17061_v61  ;;  %8740 = vmatmul.mubr.bf16.vlgmr.msra.gmra.mrb[100].mxu1 %v17061_v61 }
 0xf81   :  { %8949 = vmatpush1.bf16.msra.mxu0 %v17054_v60  ;;  %8990 = vmatpush1.bf16.msra.mxu1 %v17059_v32 }
 0xf82   :  { %8950 = vmatprep.subr.bf16.mxu0 %v17066_v39  ;;  %8991 = vmatprep.subr.bf16.mxu1 %v17071_v14 }
 0xf83   :  { %8980 = vmatprep.mubr.bf16.mxu0 %v18398_v36  ;;  %9021 = vmatprep.mubr.bf16.mxu1 %v18398_v36 }
 0xf85   :  { %8951 = vmatpush1.bf16.msra.mxu0 %v17080_v15  ;;  %8992 = vmatpush1.bf16.msra.mxu1 %v17085_v48 }
 0xf86   :  { %8952 = vmatprep.subr.bf16.mxu0 %v17092_v63  ;;  %8993 = vmatprep.subr.bf16.mxu1 %v17097_v0 }
 0xf89   :  { %8953 = vmatpush1.bf16.msra.mxu0 %v17106_v49  ;;  %8994 = vmatpush1.bf16.msra.mxu1 %v17111_v50 }
 0xf8a   :  { %8954 = vmatprep.subr.bf16.mxu0 %v17118_v1  ;;  %8995 = vmatprep.subr.bf16.mxu1 %v17123_v34 }
 0xf8d   :  { %8955 = vmatpush1.bf16.msra.mxu0 %v17130_v47  ;;  %8996 = vmatpush1.bf16.msra.mxu1 %v17135_v40 }
 0xf8e   :  { %8956 = vmatprep.subr.bf16.mxu0 %v17142_v43  ;;  %8997 = vmatprep.subr.bf16.mxu1 %v17147_v44 }
 0xf91   :  { %8957 = vmatpush1.bf16.msra.mxu0 %v17154_v18  ;;  %8998 = vmatpush1.bf16.msra.mxu1 %v17159_v16 }
 0xf92   :  { %8958 = vmatprep.subr.bf16.mxu0 %v17166_v17  ;;  %8999 = vmatprep.subr.bf16.mxu1 %v17171_v20 }
 0xf95   :  { %8959 = vmatpush1.bf16.msra.mxu0 %v17178_v30  ;;  %9000 = vmatpush1.bf16.msra.mxu1 %v17183_v29 }
 0xf96   :  { %8960 = vmatprep.subr.bf16.mxu0 %v17190_v5  ;;  %9001 = vmatprep.subr.bf16.mxu1 %v17195_v7 }
 0xf99   :  { %8961 = vmatpush1.bf16.msra.mxu0 %v17202_v8  ;;  %9002 = vmatpush1.bf16.msra.mxu1 %v17207_v10 }
 0xf9a   :  { %8962 = vmatprep.subr.bf16.mxu0 %v17214_v12  ;;  %9003 = vmatprep.subr.bf16.mxu1 %v17219_v13 }
 0xf9d   :  { %8963 = vmatpush1.bf16.msra.mxu0 %v17226_v28  ;;  %9004 = vmatpush1.bf16.msra.mxu1 %v17231_v42 }
 0xf9e   :  { %9267 = vmatprep.subr.bf16.mxu0 %v17244_v38  ;;  %9308 = vmatprep.subr.bf16.mxu1 %v17249_v41 }
 0xfa0   :  { %8981 = vmatmul.mubr.bf16.vlgmr.msra.gmra.mrb[68].mxu0 %v17061_v61  ;;  %9022 = vmatmul.mubr.bf16.vlgmr.msra.gmra.mrb[68].mxu1 %v17061_v61  ;;  %v17393_v61 = vld [vmem:[%s18159_s2 + $0x1cc] ss:$16 sps:$4 sm:$0xff]  }
 0xfa1   :  { %9299 = vmatprep.mubr.bf16.mxu0 %v18398_v36  ;;  %9340 = vmatprep.mubr.bf16.mxu1 %v18398_v36  ;;  %18687 = vst [vmem:[#allocation35_spill] sm:$0xff] %v17393_v61 }
 0xfa2   :  { %9268 = vmatpush1.bf16.msra.mxu0 %v17254_v26  ;;  %9309 = vmatpush1.bf16.msra.mxu1 %v17259_v4 }
 0xfa3   :  { %9269 = vmatprep.subr.bf16.mxu0 %v17268_v33  ;;  %9310 = vmatprep.subr.bf16.mxu1 %v17273_v22 }
 0xfa6   :  { %9270 = vmatpush1.bf16.msra.mxu0 %v17278_v9  ;;  %9311 = vmatpush1.bf16.msra.mxu1 %v17283_v35 }
 0xfa7   :  { %9271 = vmatprep.subr.bf16.mxu0 %v17292_v37  ;;  %9312 = vmatprep.subr.bf16.mxu1 %v17297_v19 }
 0xfaa   :  { %9272 = vmatpush1.bf16.msra.mxu0 %v17302_v45  ;;  %9313 = vmatpush1.bf16.msra.mxu1 %v17307_v58 }
 0xfab   :  { %9273 = vmatprep.subr.bf16.mxu0 %v17316_v2  ;;  %9314 = vmatprep.subr.bf16.mxu1 %v17321_v56 }
 0xfae   :  { %9274 = vmatpush1.bf16.msra.mxu0 %v17326_v25  ;;  %9315 = vmatpush1.bf16.msra.mxu1 %v17331_v11 }
 0xfaf   :  { %9275 = vmatprep.subr.bf16.mxu0 %v17340_v54  ;;  %9316 = vmatprep.subr.bf16.mxu1 %v17345_v46 }
 0xfb2   :  { %9276 = vmatpush1.bf16.msra.mxu0 %v17350_v55  ;;  %9317 = vmatpush1.bf16.msra.mxu1 %v17355_v24 }
 0xfb3   :  { %9277 = vmatprep.subr.bf16.mxu0 %v17364_v27  ;;  %9318 = vmatprep.subr.bf16.mxu1 %v17369_v53  ;;  %v17398_v27 = vld [vmem:[%s18159_s2 + $0x1c0] ss:$16 sps:$4 sm:$0xff]   ;;  %v17417_v53 = vld [vmem:[%s18159_s2 + $0x1ec] ss:$16 sps:$4 sm:$0xff]  }
 0xfb4   :  { %18688 = vst [vmem:[#allocation36_spill] sm:$0xff] %v17398_v27  ;;  %18691 = vst [vmem:[#allocation39_spill] sm:$0xff] %v17417_v53 }
 0xfb6   :  { %9278 = vmatpush1.bf16.msra.mxu0 %v17374_v52  ;;  %9319 = vmatpush1.bf16.msra.mxu1 %v17379_v51  ;;  %v17403_v52 = vld [vmem:[%s18159_s2 + $0x1c8] ss:$16 sps:$4 sm:$0xff]   ;;  %v17412_v51 = vld [vmem:[%s18159_s2 + $0x1e4] ss:$16 sps:$4 sm:$0xff]  }
 0xfb7   :  { %18689 = vst [vmem:[#allocation37_spill] sm:$0xff] %v17403_v52  ;;  %9279 = vmatprep.subr.bf16.mxu0 %v17388_v57  ;;  %9320 = vmatprep.subr.bf16.mxu1 %v17393_v61  ;;  %18690 = vst [vmem:[#allocation38_spill] sm:$0xff] %v17412_v51  ;;  %v17422_v57 = vld [vmem:[%s18159_s2 + $0x1e0] ss:$16 sps:$4 sm:$0xff]  }
 0xfb8   :  { %18692 = vst [vmem:[#allocation40_spill] sm:$0xff] %v17422_v57 }
 0xfba   :  { %9280 = vmatpush1.bf16.msra.mxu0 %v17398_v27  ;;  %9321 = vmatpush1.bf16.msra.mxu1 %v17403_v52  ;;  %v17427_v27 = vld [vmem:[%s18159_s2 + $0x1e8] ss:$16 sps:$4 sm:$0xff]   ;;  %v11712_v52 = vld [vmem:[%s18160_s4 + $0x4] sm:$0xf] }
 0xfbb   :  { %18693 = vst [vmem:[#allocation41_spill] sm:$0xff] %v17427_v27  ;;  %9281 = vmatprep.subr.bf16.mxu0 %v17412_v51  ;;  %9322 = vmatprep.subr.bf16.mxu1 %v17417_v53  ;;  %v4272_v61 = vrot.slane %v11712_v52, %v18668_v3  ;;  %v4276_v24 = vrot.slane %v11712_v52, %v18669_v6 }
 0xfbc   :  { %v4280_v53 = vrot.slane %v11712_v52, %v18670_v21  ;;  %v4284_v3 = vrot.slane %v11712_v52, %v18538_v23 }
 0xfbe   :  { %9282 = vmatpush1.bf16.msra.mxu0 %v17422_v57  ;;  %9323 = vmatpush1.bf16.msra.mxu1 %v17427_v27 }
 0xfbf   :  { %9549 = vmatprep.subr.bf16.mxu0 %v17031_v31  ;;  %9590 = vmatprep.subr.bf16.mxu1 %v17036_v59 }
0x1073   :  { %v8982_v55 = vpop.f32.mrb[68].mxu0  ;;  %v9023_v51 = vpop.f32.mrb[68].mxu1 }
0x1074   :  { %v12995_v46 = vadd.f32 %v8982_v55, %v4272_v61  ;;  %v8984_v57 = vpop.f32.mrb[69].mxu0  ;;  %v9025_v54 = vpop.f32.mrb[69].mxu1  ;;  %v12997_v58 = vadd.f32 %v9023_v51, %v4280_v53 }
0x1075   :  { %v12996_v27 = vadd.f32 %v8984_v57, %v4276_v24  ;;  %v8986_v11 = vpop.f32.mrb[70].mxu0  ;;  %v9027_v31 = vpop.f32.mrb[70].mxu1  ;;  %v12998_v6 = vadd.f32 %v9025_v54, %v4284_v3 }
0x1076   :  { %v9034_v25 = vmul.f32 0.5, %v12995_v46  ;;  %v8987_v59 = vpop.f32.mrb[71].mxu0  ;;  %v9028_v56 = vpop.f32.mrb[71].mxu1 }
0x1077   :  { %v9038_v2 = vmul.f32 0.5, %v12996_v27  ;;  %v9043_v45 = vmul.f32 0.5, %v12998_v6 }
0x1078   :  { %13948 = vtanh.f32 %v9034_v25 }
0x1079   :  { %13950 = vtanh.f32 %v9038_v2 }
0x107a   :  { %13952 = vtanh.f32 %v12997_v58 }
0x107b   :  { %13954 = vtanh.f32 %v9043_v45 }
0x1082   :  { %v13949_v55 = vpop.eup %13948 }
0x1083   :  { %v13951_v61 = vpop.eup %13950  ;;  %v9036_v21 = vmul.f32 0.5, %v13949_v55 }
0x1084   :  { %v9040_v19 = vmul.f32 0.5, %v13951_v61  ;;  %v13953_v11 = vpop.eup %13952 }
0x1085   :  { %v9037_v24 = vadd.f32 0.5, %v9036_v21  ;;  %v13955_v25 = vpop.eup %13954  ;;  %v18694_v21 = vld [vmem:[#allocation20_spill] sm:$0xff] }
0x1086   :  { %v9041_v57 = vadd.f32 0.5, %v9040_v19  ;;  %v9045_v2 = vmul.f32 0.5, %v13955_v25 }
0x1087   :  { %v9048_v46 = vmul.f32 %v13953_v11, %v9037_v24 }
0x1088   :  { %v9047_v56 = vmul.f32 %v9041_v57, %v17048_v62  ;;  %v9046_v58 = vadd.f32 0.5, %v9045_v2  ;;  %v18695_v62 = vld [vmem:[#allocation9_spill] sm:$0xff] }
0x108a   :  { %v17443_v27 = vadd.f32 %v9048_v46, %v9047_v56 }
0x108c   :  { %13956 = vtanh.f32 %v17443_v27 }
0x1096   :  { %v13957_v3 = vpop.eup %13956 }
0x1097   :  { %v9051_v6 = vmul.f32 %v13957_v3, %v9046_v58 }
0x1099   :  { %v9052_v54 = vpack.c.bf16 %v9051_v6, %v9051_v6 }
0x109b   :  { %9300 = vmatmul.mubr.bf16.vlgmr.msra.gmra.mrb[104].mxu0 %v9052_v54  ;;  %9341 = vmatmul.mubr.bf16.vlgmr.msra.gmra.mrb[104].mxu1 %v9052_v54 }
0x109c   :  { %9550 = vmatpush1.bf16.msra.mxu0 %v17054_v60  ;;  %9591 = vmatpush1.bf16.msra.mxu1 %v17059_v32  ;;  %v18696_v60 = vld [vmem:[#allocation10_spill] sm:$0xff]  ;;  %v18697_v32 = vld [vmem:[#allocation11_spill] sm:$0xff] }
0x109d   :  { %9551 = vmatprep.subr.bf16.mxu0 %v17066_v39  ;;  %9592 = vmatprep.subr.bf16.mxu1 %v17071_v14  ;;  %v18698_v39 = vld [vmem:[#allocation21_spill] sm:$0xff]  ;;  %v18699_v14 = vld [vmem:[#allocation22_spill] sm:$0xff] }
0x109e   :  { %9581 = vmatprep.mubr.bf16.mxu0 %v18398_v36  ;;  %9622 = vmatprep.mubr.bf16.mxu1 %v18398_v36 }
0x10a0   :  { %9552 = vmatpush1.bf16.msra.mxu0 %v17080_v15  ;;  %9593 = vmatpush1.bf16.msra.mxu1 %v17085_v48  ;;  %v18700_v15 = vld [vmem:[#allocation23_spill] sm:$0xff]  ;;  %v18701_v48 = vld [vmem:[#allocation24_spill] sm:$0xff] }
0x10a1   :  { %9553 = vmatprep.subr.bf16.mxu0 %v17092_v63  ;;  %9594 = vmatprep.subr.bf16.mxu1 %v17097_v0  ;;  %v18702_v63 = vld [vmem:[#allocation12_spill] sm:$0xff] }
0x10a2   :  { %v18703_v0 = vld [vmem:[#allocation8_spill] sm:$0xff] }
0x10a4   :  { %9554 = vmatpush1.bf16.msra.mxu0 %v17106_v49  ;;  %9595 = vmatpush1.bf16.msra.mxu1 %v17111_v50  ;;  %v18704_v49 = vld [vmem:[#allocation29_spill] sm:$0xff]  ;;  %v18705_v50 = vld [vmem:[#allocation30_spill] sm:$0xff] }
0x10a5   :  { %9555 = vmatprep.subr.bf16.mxu0 %v17118_v1  ;;  %9596 = vmatprep.subr.bf16.mxu1 %v17123_v34  ;;  %v18706_v1 = vld [vmem:[#allocation31_spill] sm:$0xff]  ;;  %v18707_v34 = vld [vmem:[#allocation32_spill] sm:$0xff] }
0x10a8   :  { %9556 = vmatpush1.bf16.msra.mxu0 %v17130_v47  ;;  %9597 = vmatpush1.bf16.msra.mxu1 %v17135_v40  ;;  %v18708_v47 = vld [vmem:[#allocation33_spill] sm:$0xff]  ;;  %v18709_v40 = vld [vmem:[#allocation34_spill] sm:$0xff] }
0x10a9   :  { %9557 = vmatprep.subr.bf16.mxu0 %v17142_v43  ;;  %9598 = vmatprep.subr.bf16.mxu1 %v17147_v44  ;;  %v18710_v43 = vld [vmem:[#allocation35_spill] sm:$0xff]  ;;  %v18711_v44 = vld [vmem:[#allocation36_spill] sm:$0xff] }
0x10ac   :  { %9558 = vmatpush1.bf16.msra.mxu0 %v17154_v18  ;;  %9599 = vmatpush1.bf16.msra.mxu1 %v17159_v16  ;;  %v18712_v18 = vld [vmem:[#allocation37_spill] sm:$0xff]  ;;  %v18713_v16 = vld [vmem:[#allocation38_spill] sm:$0xff] }
0x10ad   :  { %9559 = vmatprep.subr.bf16.mxu0 %v17166_v17  ;;  %9600 = vmatprep.subr.bf16.mxu1 %v17171_v20  ;;  %v18714_v17 = vld [vmem:[#allocation39_spill] sm:$0xff]  ;;  %v18715_v20 = vld [vmem:[#allocation40_spill] sm:$0xff] }
0x10b0   :  { %9560 = vmatpush1.bf16.msra.mxu0 %v17178_v30  ;;  %9601 = vmatpush1.bf16.msra.mxu1 %v17183_v29  ;;  %v18716_v30 = vld [vmem:[#allocation41_spill] sm:$0xff]  ;;  %v17515_v29 = vld [vmem:[%s18158_s3 + $0x204] ss:$16 sps:$4 sm:$0xff]  }
0x10b1   :  { %9561 = vmatprep.subr.bf16.mxu0 %v17190_v5  ;;  %9602 = vmatprep.subr.bf16.mxu1 %v17195_v7  ;;  %v17520_v5 = vld [vmem:[%s18158_s3 + $0x20c] ss:$16 sps:$4 sm:$0xff]   ;;  %v11777_v7 = vld [vmem:[%s18160_s4 + $0x4] sm:$0xf] }
0x10b2   :  { %v4890_v51 = vrot.slane %v11777_v7, %v18538_v23 }
0x10b4   :  { %9562 = vmatpush1.bf16.msra.mxu0 %v17202_v8  ;;  %9603 = vmatpush1.bf16.msra.mxu1 %v17207_v10  ;;  %v18717_v8 = vld [vmem:[#allocation6_spill] sm:$0xff] }
0x10b5   :  { %9563 = vmatprep.subr.bf16.mxu0 %v17214_v12  ;;  %9604 = vmatprep.subr.bf16.mxu1 %v17219_v13  ;;  %v4878_v10 = vrot.slane %v11777_v7, %v18717_v8  ;;  %v18718_v12 = vld [vmem:[#allocation7_spill] sm:$0xff] }
0x10b6   :  { %v4882_v13 = vrot.slane %v11777_v7, %v18718_v12 }
0x10b8   :  { %9564 = vmatpush1.bf16.msra.mxu0 %v17226_v28  ;;  %9605 = vmatpush1.bf16.msra.mxu1 %v17231_v42 }
0x10b9   :  { %9868 = vmatprep.subr.bf16.mxu0 %v17244_v38  ;;  %9909 = vmatprep.subr.bf16.mxu1 %v17249_v41  ;;  %v18719_v41 = vld [vmem:[#allocation4_spill] sm:$0xff] }
0x10bb   :  { %9582 = vmatmul.mubr.bf16.vlgmr.msra.gmra.mrb[76].mxu0 %v9052_v54  ;;  %9623 = vmatmul.mubr.bf16.vlgmr.msra.gmra.mrb[76].mxu1 %v9052_v54 }
0x10bc   :  { %9869 = vmatpush1.bf16.msra.mxu0 %v17254_v26  ;;  %9910 = vmatpush1.bf16.msra.mxu1 %v17259_v4  ;;  %v4886_v26 = vrot.slane %v11777_v7, %v18719_v41  ;;  %v17660_v7 = vld [vmem:[%s18158_s3 + $0x2a8] ss:$16 sps:$4 sm:$0xff]  }
0x10bd   :  { %9870 = vmatprep.subr.bf16.mxu0 %v17268_v33  ;;  %9911 = vmatprep.subr.bf16.mxu1 %v17273_v22 }
0x10be   :  { %9900 = vmatprep.mubr.bf16.mxu0 %v18398_v36  ;;  %9941 = vmatprep.mubr.bf16.mxu1 %v18398_v36 }
0x10c0   :  { %9871 = vmatpush1.bf16.msra.mxu0 %v17278_v9  ;;  %9912 = vmatpush1.bf16.msra.mxu1 %v17283_v35 }
0x10c1   :  { %9872 = vmatprep.subr.bf16.mxu0 %v17292_v37  ;;  %9913 = vmatprep.subr.bf16.mxu1 %v18694_v21 }
0x10c4   :  { %9873 = vmatpush1.bf16.msra.mxu0 %v18695_v62  ;;  %9914 = vmatpush1.bf16.msra.mxu1 %v18696_v60  ;;  %v17535_v60 = vld [vmem:[%s18158_s3 + $0x200] ss:$16 sps:$4 sm:$0xff]  }
0x10c5   :  { %9874 = vmatprep.subr.bf16.mxu0 %v18697_v32  ;;  %9915 = vmatprep.subr.bf16.mxu1 %v18698_v39  ;;  %v17540_v32 = vld [vmem:[%s18158_s3 + $0x208] ss:$16 sps:$4 sm:$0xff]  }
0x10c8   :  { %9875 = vmatpush1.bf16.msra.mxu0 %v18699_v14  ;;  %9916 = vmatpush1.bf16.msra.mxu1 %v18700_v15  ;;  %v17550_v14 = vld [vmem:[%s18158_s3 + $0x22c] ss:$16 sps:$4 sm:$0xff]   ;;  %v17557_v15 = vld [vmem:[%s18158_s3 + $0x220] ss:$16 sps:$4 sm:$0xff]  }
0x10c9   :  { %9876 = vmatprep.subr.bf16.mxu0 %v18701_v48  ;;  %9917 = vmatprep.subr.bf16.mxu1 %v18702_v63  ;;  %v17562_v48 = vld [vmem:[%s18158_s3 + $0x228] ss:$16 sps:$4 sm:$0xff]   ;;  %v17569_v63 = vld [vmem:[%s18158_s3 + $0x244] ss:$16 sps:$4 sm:$0xff]  }
0x10cc   :  { %9877 = vmatpush1.bf16.msra.mxu0 %v18703_v0  ;;  %9918 = vmatpush1.bf16.msra.mxu1 %v18704_v49  ;;  %v17574_v0 = vld [vmem:[%s18158_s3 + $0x24c] ss:$16 sps:$4 sm:$0xff]   ;;  %v17583_v49 = vld [vmem:[%s18158_s3 + $0x240] ss:$16 sps:$4 sm:$0xff]  }
0x10cd   :  { %9878 = vmatprep.subr.bf16.mxu0 %v18705_v50  ;;  %9919 = vmatprep.subr.bf16.mxu1 %v18706_v1  ;;  %v17588_v50 = vld [vmem:[%s18158_s3 + $0x248] ss:$16 sps:$4 sm:$0xff]   ;;  %v17595_v1 = vld [vmem:[%s18158_s3 + $0x264] ss:$16 sps:$4 sm:$0xff]  }
0x10d0   :  { %9879 = vmatpush1.bf16.msra.mxu0 %v18707_v34  ;;  %9920 = vmatpush1.bf16.msra.mxu1 %v18708_v47  ;;  %v17600_v34 = vld [vmem:[%s18158_s3 + $0x26c] ss:$16 sps:$4 sm:$0xff]   ;;  %v17607_v47 = vld [vmem:[%s18158_s3 + $0x260] ss:$16 sps:$4 sm:$0xff]  }
0x10d1   :  { %9880 = vmatprep.subr.bf16.mxu0 %v18709_v40  ;;  %9921 = vmatprep.subr.bf16.mxu1 %v18710_v43  ;;  %v17612_v40 = vld [vmem:[%s18158_s3 + $0x268] ss:$16 sps:$4 sm:$0xff]   ;;  %v17619_v43 = vld [vmem:[%s18158_s3 + $0x284] ss:$16 sps:$4 sm:$0xff]  }
0x10d4   :  { %9881 = vmatpush1.bf16.msra.mxu0 %v18711_v44  ;;  %9922 = vmatpush1.bf16.msra.mxu1 %v18712_v18  ;;  %v17624_v44 = vld [vmem:[%s18158_s3 + $0x28c] ss:$16 sps:$4 sm:$0xff]   ;;  %v17631_v18 = vld [vmem:[%s18158_s3 + $0x280] ss:$16 sps:$4 sm:$0xff]  }
0x10d5   :  { %9882 = vmatprep.subr.bf16.mxu0 %v18713_v16  ;;  %9923 = vmatprep.subr.bf16.mxu1 %v18714_v17  ;;  %v17636_v16 = vld [vmem:[%s18158_s3 + $0x288] ss:$16 sps:$4 sm:$0xff]   ;;  %v17643_v17 = vld [vmem:[%s18158_s3 + $0x2a4] ss:$16 sps:$4 sm:$0xff]  }
0x10d8   :  { %9883 = vmatpush1.bf16.msra.mxu0 %v18715_v20  ;;  %9924 = vmatpush1.bf16.msra.mxu1 %v18716_v30  ;;  %v17648_v20 = vld [vmem:[%s18158_s3 + $0x2ac] ss:$16 sps:$4 sm:$0xff]   ;;  %v17655_v30 = vld [vmem:[%s18158_s3 + $0x2a0] ss:$16 sps:$4 sm:$0xff]  }
0x10d9   :  { %10151 = vmatprep.subr.bf16.mxu0 %v17515_v29  ;;  %10192 = vmatprep.subr.bf16.mxu1 %v17520_v5 }
0x118e   :  { %v9583_v28 = vpop.f32.mrb[76].mxu0  ;;  %v9624_v42 = vpop.f32.mrb[76].mxu1 }
0x118f   :  { %v12999_v38 = vadd.f32 %v9583_v28, %v4878_v10  ;;  %v9585_v4 = vpop.f32.mrb[77].mxu0  ;;  %v9626_v33 = vpop.f32.mrb[77].mxu1  ;;  %v13001_v52 = vadd.f32 %v9624_v42, %v4886_v26  ;;  %v17667_v10 = vld [vmem:[%s18158_s3 + $0x2c4] ss:$16 sps:$4 sm:$0xff]   ;;  %v17679_v28 = vld [vmem:[%s18158_s3 + $0x2c0] ss:$16 sps:$4 sm:$0xff]  }
0x1190   :  { %v13000_v22 = vadd.f32 %v9585_v4, %v4882_v13  ;;  %v9587_v9 = vpop.f32.mrb[78].mxu0  ;;  %v9628_v35 = vpop.f32.mrb[78].mxu1  ;;  %v13002_v31 = vadd.f32 %v9626_v33, %v4890_v51  ;;  %v17672_v13 = vld [vmem:[%s18158_s3 + $0x2cc] ss:$16 sps:$4 sm:$0xff]   ;;  %v17684_v42 = vld [vmem:[%s18158_s3 + $0x2c8] ss:$16 sps:$4 sm:$0xff]  }
0x1191   :  { %v9635_v37 = vmul.f32 0.5, %v12999_v38  ;;  %v9588_v19 = vpop.f32.mrb[79].mxu0  ;;  %v9629_v45 = vpop.f32.mrb[79].mxu1  ;;  %v17691_v38 = vld [vmem:[%s18158_s3 + $0x2e4] ss:$16 sps:$4 sm:$0xff]  }
0x1192   :  { %v9639_v53 = vmul.f32 0.5, %v13000_v22  ;;  %v9644_v59 = vmul.f32 0.5, %v13002_v31  ;;  %v17696_v26 = vld [vmem:[%s18158_s3 + $0x2ec] ss:$16 sps:$4 sm:$0xff]   ;;  %v17703_v4 = vld [vmem:[%s18158_s3 + $0x2e0] ss:$16 sps:$4 sm:$0xff]  }
0x1193   :  { %13958 = vtanh.f32 %v9635_v37  ;;  %v17708_v33 = vld [vmem:[%s18158_s3 + $0x2e8] ss:$16 sps:$4 sm:$0xff]  }
0x1194   :  { %13960 = vtanh.f32 %v9639_v53  ;;  %v11906_v22 = vld [vmem:[%s18160_s4 + $0x8] sm:$0xf] }
0x1195   :  { %13962 = vtanh.f32 %v13001_v52  ;;  %v5484_v9 = vrot.slane %v11906_v22, %v18717_v8  ;;  %v5488_v35 = vrot.slane %v11906_v22, %v18718_v12  ;;  %v5492_v53 = vrot.slane %v11906_v22, %v18719_v41 }
0x1196   :  { %13964 = vtanh.f32 %v9644_v59 }
0x119d   :  { %v13959_v55 = vpop.eup %13958 }
0x119e   :  { %v13961_v61 = vpop.eup %13960  ;;  %v9637_v24 = vmul.f32 0.5, %v13959_v55 }
0x119f   :  { %v9641_v11 = vmul.f32 0.5, %v13961_v61  ;;  %v13963_v46 = vpop.eup %13962 }
0x11a0   :  { %v9638_v57 = vadd.f32 0.5, %v9637_v24  ;;  %v13965_v3 = vpop.eup %13964 }
0x11a1   :  { %v9642_v56 = vadd.f32 0.5, %v9641_v11  ;;  %v9646_v6 = vmul.f32 0.5, %v13965_v3 }
0x11a2   :  { %v9649_v25 = vmul.f32 %v13963_v46, %v9638_v57 }
0x11a3   :  { %v9648_v2 = vmul.f32 %v9642_v56, %v17443_v27  ;;  %v9647_v54 = vadd.f32 0.5, %v9646_v6  ;;  %v17545_v27 = vld [vmem:[%s18158_s3 + $0x224] ss:$16 sps:$4 sm:$0xff]   ;;  %v5496_v56 = vrot.slane %v11906_v22, %v18538_v23 }
0x11a5   :  { %v9650_v58 = vadd.f32 %v9649_v25, %v9648_v2 }
0x11a7   :  { %13966 = vtanh.f32 %v9650_v58 }
0x11b1   :  { %v13967_v21 = vpop.eup %13966 }
0x11b2   :  { %v9652_v62 = vmul.f32 %v13967_v21, %v9647_v54 }
0x11b4   :  { %v9653_v39 = vpack.c.bf16 %v9652_v62, %v9652_v62 }
0x11b6   :  { %9901 = vmatmul.mubr.bf16.vlgmr.msra.gmra.mrb[108].mxu0 %v9653_v39  ;;  %9942 = vmatmul.mubr.bf16.vlgmr.msra.gmra.mrb[108].mxu1 %v9653_v39 }
0x11b7   :  { %10152 = vmatpush1.bf16.msra.mxu0 %v17535_v60  ;;  %10193 = vmatpush1.bf16.msra.mxu1 %v17540_v32 }
0x11b8   :  { %10153 = vmatprep.subr.bf16.mxu0 %v17545_v27  ;;  %10194 = vmatprep.subr.bf16.mxu1 %v17550_v14 }
0x11b9   :  { %10183 = vmatprep.mubr.bf16.mxu0 %v18398_v36  ;;  %10224 = vmatprep.mubr.bf16.mxu1 %v18398_v36 }
0x11bb   :  { %10154 = vmatpush1.bf16.msra.mxu0 %v17557_v15  ;;  %10195 = vmatpush1.bf16.msra.mxu1 %v17562_v48 }
0x11bc   :  { %10155 = vmatprep.subr.bf16.mxu0 %v17569_v63  ;;  %10196 = vmatprep.subr.bf16.mxu1 %v17574_v0 }
0x11bf   :  { %10156 = vmatpush1.bf16.msra.mxu0 %v17583_v49  ;;  %10197 = vmatpush1.bf16.msra.mxu1 %v17588_v50 }
0x11c0   :  { %10157 = vmatprep.subr.bf16.mxu0 %v17595_v1  ;;  %10198 = vmatprep.subr.bf16.mxu1 %v17600_v34 }
0x11c3   :  { %10158 = vmatpush1.bf16.msra.mxu0 %v17607_v47  ;;  %10199 = vmatpush1.bf16.msra.mxu1 %v17612_v40 }
0x11c4   :  { %10159 = vmatprep.subr.bf16.mxu0 %v17619_v43  ;;  %10200 = vmatprep.subr.bf16.mxu1 %v17624_v44 }
0x11c7   :  { %10160 = vmatpush1.bf16.msra.mxu0 %v17631_v18  ;;  %10201 = vmatpush1.bf16.msra.mxu1 %v17636_v16 }
0x11c8   :  { %10161 = vmatprep.subr.bf16.mxu0 %v17643_v17  ;;  %10202 = vmatprep.subr.bf16.mxu1 %v17648_v20 }
0x11cb   :  { %10162 = vmatpush1.bf16.msra.mxu0 %v17655_v30  ;;  %10203 = vmatpush1.bf16.msra.mxu1 %v17660_v7 }
0x11cc   :  { %10163 = vmatprep.subr.bf16.mxu0 %v17667_v10  ;;  %10204 = vmatprep.subr.bf16.mxu1 %v17672_v13 }
0x11cf   :  { %10164 = vmatpush1.bf16.msra.mxu0 %v17679_v28  ;;  %10205 = vmatpush1.bf16.msra.mxu1 %v17684_v42 }
0x11d0   :  { %10165 = vmatprep.subr.bf16.mxu0 %v17691_v38  ;;  %10206 = vmatprep.subr.bf16.mxu1 %v17696_v26 }
0x11d3   :  { %10166 = vmatpush1.bf16.msra.mxu0 %v17703_v4  ;;  %10207 = vmatpush1.bf16.msra.mxu1 %v17708_v33 }
0x11d4   :  { %10260 = vmatprep.subr.bf16.mxu0 %v17515_v29  ;;  %10301 = vmatprep.subr.bf16.mxu1 %v17520_v5 }
0x11d6   :  { %10184 = vmatmul.mubr.bf16.vlgmr.msra.gmra.mrb[80].mxu0 %v18398_v36  ;;  %10225 = vmatmul.mubr.bf16.vlgmr.msra.gmra.mrb[80].mxu1 %v18398_v36 }
0x11d7   :  { %10261 = vmatpush1.bf16.msra.mxu0 %v17535_v60  ;;  %10302 = vmatpush1.bf16.msra.mxu1 %v17540_v32 }
0x11d8   :  { %10262 = vmatprep.subr.bf16.mxu0 %v17545_v27  ;;  %10303 = vmatprep.subr.bf16.mxu1 %v17550_v14 }
0x11d9   :  { %10292 = vmatprep.mubr.bf16.mxu0 %v18398_v36  ;;  %10333 = vmatprep.mubr.bf16.mxu1 %v18398_v36 }
0x11db   :  { %10263 = vmatpush1.bf16.msra.mxu0 %v17557_v15  ;;  %10304 = vmatpush1.bf16.msra.mxu1 %v17562_v48 }
0x11dc   :  { %10264 = vmatprep.subr.bf16.mxu0 %v17569_v63  ;;  %10305 = vmatprep.subr.bf16.mxu1 %v17574_v0 }
0x11df   :  { %10265 = vmatpush1.bf16.msra.mxu0 %v17583_v49  ;;  %10306 = vmatpush1.bf16.msra.mxu1 %v17588_v50 }
0x11e0   :  { %10266 = vmatprep.subr.bf16.mxu0 %v17595_v1  ;;  %10307 = vmatprep.subr.bf16.mxu1 %v17600_v34 }
0x11e3   :  { %10267 = vmatpush1.bf16.msra.mxu0 %v17607_v47  ;;  %10308 = vmatpush1.bf16.msra.mxu1 %v17612_v40 }
0x11e4   :  { %10268 = vmatprep.subr.bf16.mxu0 %v17619_v43  ;;  %10309 = vmatprep.subr.bf16.mxu1 %v17624_v44 }
0x11e7   :  { %10269 = vmatpush1.bf16.msra.mxu0 %v17631_v18  ;;  %10310 = vmatpush1.bf16.msra.mxu1 %v17636_v16 }
0x11e8   :  { %10270 = vmatprep.subr.bf16.mxu0 %v17643_v17  ;;  %10311 = vmatprep.subr.bf16.mxu1 %v17648_v20 }
0x11eb   :  { %10271 = vmatpush1.bf16.msra.mxu0 %v17655_v30  ;;  %10312 = vmatpush1.bf16.msra.mxu1 %v17660_v7 }
0x11ec   :  { %10272 = vmatprep.subr.bf16.mxu0 %v17667_v10  ;;  %10313 = vmatprep.subr.bf16.mxu1 %v17672_v13 }
0x11ef   :  { %10273 = vmatpush1.bf16.msra.mxu0 %v17679_v28  ;;  %10314 = vmatpush1.bf16.msra.mxu1 %v17684_v42 }
0x11f0   :  { %10274 = vmatprep.subr.bf16.mxu0 %v17691_v38  ;;  %10315 = vmatprep.subr.bf16.mxu1 %v17696_v26 }
0x11f3   :  { %10275 = vmatpush1.bf16.msra.mxu0 %v17703_v4  ;;  %10316 = vmatpush1.bf16.msra.mxu1 %v17708_v33 }
0x11f4   :  { %10369 = vmatprep.subr.bf16.mxu0 %v17515_v29  ;;  %10410 = vmatprep.subr.bf16.mxu1 %v17520_v5 }
0x12a9   :  { %v10185_v37 = vpop.f32.mrb[80].mxu0  ;;  %v10226_v19 = vpop.f32.mrb[80].mxu1 }
0x12aa   :  { %v13003_v45 = vadd.f32 %v10185_v37, %v5484_v9  ;;  %v10187_v52 = vpop.f32.mrb[81].mxu0  ;;  %v10228_v51 = vpop.f32.mrb[81].mxu1  ;;  %v13005_v46 = vadd.f32 %v10226_v19, %v5492_v53 }
0x12ab   :  { %v13004_v31 = vadd.f32 %v10187_v52, %v5488_v35  ;;  %v10189_v59 = vpop.f32.mrb[82].mxu0  ;;  %v10230_v55 = vpop.f32.mrb[82].mxu1  ;;  %v13006_v25 = vadd.f32 %v10228_v51, %v5496_v56 }
0x12ac   :  { %v10237_v61 = vmul.f32 0.5, %v13003_v45  ;;  %v10190_v24 = vpop.f32.mrb[83].mxu0  ;;  %v10231_v11 = vpop.f32.mrb[83].mxu1 }
0x12ad   :  { %v10241_v57 = vmul.f32 0.5, %v13004_v31  ;;  %v10246_v2 = vmul.f32 0.5, %v13006_v25  ;;  %v12035_v31 = vld [vmem:[%s18160_s4 + $0x8] sm:$0xf] }
0x12ae   :  { %13968 = vtanh.f32 %v10237_v61  ;;  %v6085_v59 = vrot.slane %v12035_v31, %v18717_v8  ;;  %v6089_v55 = vrot.slane %v12035_v31, %v18718_v12 }
0x12af   :  { %13970 = vtanh.f32 %v10241_v57  ;;  %v6093_v57 = vrot.slane %v12035_v31, %v18719_v41 }
0x12b0   :  { %13972 = vtanh.f32 %v13005_v46 }
0x12b1   :  { %13974 = vtanh.f32 %v10246_v2 }
0x12b8   :  { %v13969_v58 = vpop.eup %13968 }
0x12b9   :  { %v13971_v3 = vpop.eup %13970  ;;  %v10239_v6 = vmul.f32 0.5, %v13969_v58 }
0x12ba   :  { %v10243_v54 = vmul.f32 0.5, %v13971_v3  ;;  %v13973_v62 = vpop.eup %13972 }
0x12bb   :  { %v10240_v21 = vadd.f32 0.5, %v10239_v6  ;;  %v13975_v19 = vpop.eup %13974 }
0x12bc   :  { %v10244_v39 = vadd.f32 0.5, %v10243_v54  ;;  %v10248_v22 = vmul.f32 0.5, %v13975_v19 }
0x12bd   :  { %v10251_v9 = vmul.f32 %v13973_v62, %v10240_v21 }
0x12be   :  { %v10250_v35 = vmul.f32 0.0, %v10244_v39  ;;  %v10249_v45 = vadd.f32 0.5, %v10248_v22  ;;  %v6097_v39 = vrot.slane %v12035_v31, %v18538_v23 }
0x12c0   :  { %v17759_v37 = vadd.f32 %v10251_v9, %v10250_v35 }
0x12c2   :  { %13976 = vtanh.f32 %v17759_v37 }
0x12cc   :  { %v13977_v53 = vpop.eup %13976 }
0x12cd   :  { %v10254_v52 = vmul.f32 %v13977_v53, %v10249_v45 }
0x12cf   :  { %v10259_v51 = vpack.c.bf16 %v10254_v52, %v10254_v52 }
0x12d1   :  { %10293 = vmatmul.mubr.bf16.vlgmr.msra.gmra.mrb[84].mxu0 %v10259_v51  ;;  %10334 = vmatmul.mubr.bf16.vlgmr.msra.gmra.mrb[84].mxu1 %v10259_v51 }
0x12d2   :  { %10370 = vmatpush1.bf16.msra.mxu0 %v17535_v60  ;;  %10411 = vmatpush1.bf16.msra.mxu1 %v17540_v32 }
0x12d3   :  { %10371 = vmatprep.subr.bf16.mxu0 %v17545_v27  ;;  %10412 = vmatprep.subr.bf16.mxu1 %v17550_v14 }
0x12d4   :  { %10401 = vmatprep.mubr.bf16.mxu0 %v18398_v36  ;;  %10442 = vmatprep.mubr.bf16.mxu1 %v18398_v36 }
0x12d6   :  { %10372 = vmatpush1.bf16.msra.mxu0 %v17557_v15  ;;  %10413 = vmatpush1.bf16.msra.mxu1 %v17562_v48 }
0x12d7   :  { %10373 = vmatprep.subr.bf16.mxu0 %v17569_v63  ;;  %10414 = vmatprep.subr.bf16.mxu1 %v17574_v0 }
0x12da   :  { %10374 = vmatpush1.bf16.msra.mxu0 %v17583_v49  ;;  %10415 = vmatpush1.bf16.msra.mxu1 %v17588_v50 }
0x12db   :  { %10375 = vmatprep.subr.bf16.mxu0 %v17595_v1  ;;  %10416 = vmatprep.subr.bf16.mxu1 %v17600_v34 }
0x12de   :  { %10376 = vmatpush1.bf16.msra.mxu0 %v17607_v47  ;;  %10417 = vmatpush1.bf16.msra.mxu1 %v17612_v40 }
0x12df   :  { %10377 = vmatprep.subr.bf16.mxu0 %v17619_v43  ;;  %10418 = vmatprep.subr.bf16.mxu1 %v17624_v44 }
0x12e2   :  { %10378 = vmatpush1.bf16.msra.mxu0 %v17631_v18  ;;  %10419 = vmatpush1.bf16.msra.mxu1 %v17636_v16 }
0x12e3   :  { %10379 = vmatprep.subr.bf16.mxu0 %v17643_v17  ;;  %10420 = vmatprep.subr.bf16.mxu1 %v17648_v20 }
0x12e6   :  { %10380 = vmatpush1.bf16.msra.mxu0 %v17655_v30  ;;  %10421 = vmatpush1.bf16.msra.mxu1 %v17660_v7 }
0x12e7   :  { %10381 = vmatprep.subr.bf16.mxu0 %v17667_v10  ;;  %10422 = vmatprep.subr.bf16.mxu1 %v17672_v13 }
0x12ea   :  { %10382 = vmatpush1.bf16.msra.mxu0 %v17679_v28  ;;  %10423 = vmatpush1.bf16.msra.mxu1 %v17684_v42 }
0x12eb   :  { %10383 = vmatprep.subr.bf16.mxu0 %v17691_v38  ;;  %10424 = vmatprep.subr.bf16.mxu1 %v17696_v26 }
0x12ee   :  { %10384 = vmatpush1.bf16.msra.mxu0 %v17703_v4  ;;  %10425 = vmatpush1.bf16.msra.mxu1 %v17708_v33 }
0x12ef   :  { %10478 = vmatprep.subr.bf16.mxu0 %v17515_v29  ;;  %10519 = vmatprep.subr.bf16.mxu1 %v17520_v5 }
0x13a4   :  { %v10294_v61 = vpop.f32.mrb[84].mxu0  ;;  %v10335_v24 = vpop.f32.mrb[84].mxu1 }
0x13a5   :  { %v13007_v11 = vadd.f32 %v10294_v61, %v6085_v59  ;;  %v10296_v46 = vpop.f32.mrb[85].mxu0  ;;  %v10337_v56 = vpop.f32.mrb[85].mxu1  ;;  %v13009_v62 = vadd.f32 %v10335_v24, %v6093_v57 }
0x13a6   :  { %v13008_v25 = vadd.f32 %v10296_v46, %v6089_v55  ;;  %v10298_v2 = vpop.f32.mrb[86].mxu0  ;;  %v10339_v58 = vpop.f32.mrb[86].mxu1  ;;  %v13010_v9 = vadd.f32 %v10337_v56, %v6097_v39 }
0x13a7   :  { %v10346_v3 = vmul.f32 0.5, %v13007_v11  ;;  %v10299_v6 = vpop.f32.mrb[87].mxu0  ;;  %v10340_v54 = vpop.f32.mrb[87].mxu1 }
0x13a8   :  { %v10350_v21 = vmul.f32 0.5, %v13008_v25  ;;  %v10355_v35 = vmul.f32 0.5, %v13010_v9 }
0x13a9   :  { %13978 = vtanh.f32 %v10346_v3 }
0x13aa   :  { %13980 = vtanh.f32 %v10350_v21 }
0x13ab   :  { %13982 = vtanh.f32 %v13009_v62 }
0x13ac   :  { %13984 = vtanh.f32 %v10355_v35 }
0x13b3   :  { %v13979_v19 = vpop.eup %13978 }
0x13b4   :  { %v13981_v22 = vpop.eup %13980  ;;  %v10348_v45 = vmul.f32 0.5, %v13979_v19 }
0x13b5   :  { %v10352_v53 = vmul.f32 0.5, %v13981_v22  ;;  %v13983_v51 = vpop.eup %13982 }
0x13b6   :  { %v10349_v52 = vadd.f32 0.5, %v10348_v45  ;;  %v13985_v31 = vpop.eup %13984 }
0x13b7   :  { %v10353_v59 = vadd.f32 0.5, %v10352_v53  ;;  %v10357_v24 = vmul.f32 0.5, %v13985_v31 }
0x13b8   :  { %v10360_v55 = vmul.f32 %v13983_v51, %v10349_v52 }
0x13b9   :  { %v10359_v61 = vmul.f32 %v10353_v59, %v17759_v37  ;;  %v10358_v57 = vadd.f32 0.5, %v10357_v24  ;;  %v12164_v37 = vld [vmem:[%s18160_s4 + $0x8] sm:$0xf] }
0x13ba   :  { %v6686_v2 = vrot.slane %v12164_v37, %v18717_v8  ;;  %v6690_v58 = vrot.slane %v12164_v37, %v18718_v12  ;;  %v6694_v21 = vrot.slane %v12164_v37, %v18719_v41  ;;  %v6698_v59 = vrot.slane %v12164_v37, %v18538_v23 }
0x13bb   :  { %v17804_v11 = vadd.f32 %v10360_v55, %v10359_v61 }
0x13bd   :  { %13986 = vtanh.f32 %v17804_v11 }
0x13c7   :  { %v13987_v46 = vpop.eup %13986 }
0x13c8   :  { %v10363_v56 = vmul.f32 %v13987_v46, %v10358_v57 }
0x13ca   :  { %v10368_v25 = vpack.c.bf16 %v10363_v56, %v10363_v56 }
0x13cc   :  { %10402 = vmatmul.mubr.bf16.vlgmr.msra.gmra.mrb[88].mxu0 %v10368_v25  ;;  %10443 = vmatmul.mubr.bf16.vlgmr.msra.gmra.mrb[88].mxu1 %v10368_v25 }
0x13cd   :  { %10479 = vmatpush1.bf16.msra.mxu0 %v17535_v60  ;;  %10520 = vmatpush1.bf16.msra.mxu1 %v17540_v32 }
0x13ce   :  { %10480 = vmatprep.subr.bf16.mxu0 %v17545_v27  ;;  %10521 = vmatprep.subr.bf16.mxu1 %v17550_v14 }
0x13cf   :  { %10510 = vmatprep.mubr.bf16.mxu0 %v18398_v36  ;;  %10551 = vmatprep.mubr.bf16.mxu1 %v18398_v36 }
0x13d1   :  { %10481 = vmatpush1.bf16.msra.mxu0 %v17557_v15  ;;  %10522 = vmatpush1.bf16.msra.mxu1 %v17562_v48 }
0x13d2   :  { %10482 = vmatprep.subr.bf16.mxu0 %v17569_v63  ;;  %10523 = vmatprep.subr.bf16.mxu1 %v17574_v0 }
0x13d5   :  { %10483 = vmatpush1.bf16.msra.mxu0 %v17583_v49  ;;  %10524 = vmatpush1.bf16.msra.mxu1 %v17588_v50 }
0x13d6   :  { %10484 = vmatprep.subr.bf16.mxu0 %v17595_v1  ;;  %10525 = vmatprep.subr.bf16.mxu1 %v17600_v34 }
0x13d9   :  { %10485 = vmatpush1.bf16.msra.mxu0 %v17607_v47  ;;  %10526 = vmatpush1.bf16.msra.mxu1 %v17612_v40 }
0x13da   :  { %10486 = vmatprep.subr.bf16.mxu0 %v17619_v43  ;;  %10527 = vmatprep.subr.bf16.mxu1 %v17624_v44 }
0x13dd   :  { %10487 = vmatpush1.bf16.msra.mxu0 %v17631_v18  ;;  %10528 = vmatpush1.bf16.msra.mxu1 %v17636_v16 }
0x13de   :  { %10488 = vmatprep.subr.bf16.mxu0 %v17643_v17  ;;  %10529 = vmatprep.subr.bf16.mxu1 %v17648_v20 }
0x13e1   :  { %10489 = vmatpush1.bf16.msra.mxu0 %v17655_v30  ;;  %10530 = vmatpush1.bf16.msra.mxu1 %v17660_v7 }
0x13e2   :  { %10490 = vmatprep.subr.bf16.mxu0 %v17667_v10  ;;  %10531 = vmatprep.subr.bf16.mxu1 %v17672_v13 }
0x13e5   :  { %10491 = vmatpush1.bf16.msra.mxu0 %v17679_v28  ;;  %10532 = vmatpush1.bf16.msra.mxu1 %v17684_v42 }
0x13e6   :  { %10492 = vmatprep.subr.bf16.mxu0 %v17691_v38  ;;  %10533 = vmatprep.subr.bf16.mxu1 %v17696_v26 }
0x13e9   :  { %10493 = vmatpush1.bf16.msra.mxu0 %v17703_v4  ;;  %10534 = vmatpush1.bf16.msra.mxu1 %v17708_v33 }
0x13ea   :  { %10587 = vmatprep.subr.bf16.mxu0 %v17515_v29  ;;  %10628 = vmatprep.subr.bf16.mxu1 %v17520_v5 }
0x149f   :  { %v10403_v3 = vpop.f32.mrb[88].mxu0  ;;  %v10444_v6 = vpop.f32.mrb[88].mxu1 }
0x14a0   :  { %v13011_v54 = vadd.f32 %v10403_v3, %v6686_v2  ;;  %v10405_v62 = vpop.f32.mrb[89].mxu0  ;;  %v10446_v39 = vpop.f32.mrb[89].mxu1  ;;  %v13013_v51 = vadd.f32 %v10444_v6, %v6694_v21 }
0x14a1   :  { %v13012_v9 = vadd.f32 %v10405_v62, %v6690_v58  ;;  %v10407_v35 = vpop.f32.mrb[90].mxu0  ;;  %v10448_v19 = vpop.f32.mrb[90].mxu1  ;;  %v13014_v55 = vadd.f32 %v10446_v39, %v6698_v59 }
0x14a2   :  { %v10455_v22 = vmul.f32 0.5, %v13011_v54  ;;  %v10408_v45 = vpop.f32.mrb[91].mxu0  ;;  %v10449_v53 = vpop.f32.mrb[91].mxu1 }
0x14a3   :  { %v10459_v52 = vmul.f32 0.5, %v13012_v9  ;;  %v10464_v61 = vmul.f32 0.5, %v13014_v55 }
0x14a4   :  { %13988 = vtanh.f32 %v10455_v22 }
0x14a5   :  { %13990 = vtanh.f32 %v10459_v52 }
0x14a6   :  { %13992 = vtanh.f32 %v13013_v51 }
0x14a7   :  { %13994 = vtanh.f32 %v10464_v61 }
0x14ae   :  { %v13989_v31 = vpop.eup %13988 }
0x14af   :  { %v13991_v24 = vpop.eup %13990  ;;  %v10457_v57 = vmul.f32 0.5, %v13989_v31 }
0x14b0   :  { %v10461_v46 = vmul.f32 0.5, %v13991_v24  ;;  %v13993_v25 = vpop.eup %13992 }
0x14b1   :  { %v10458_v56 = vadd.f32 0.5, %v10457_v57  ;;  %v13995_v37 = vpop.eup %13994 }
0x14b2   :  { %v10462_v2 = vadd.f32 0.5, %v10461_v46  ;;  %v10466_v6 = vmul.f32 0.5, %v13995_v37 }
0x14b3   :  { %v10469_v58 = vmul.f32 %v13993_v25, %v10458_v56 }
0x14b4   :  { %v10468_v3 = vmul.f32 %v10462_v2, %v17804_v11  ;;  %v10467_v21 = vadd.f32 0.5, %v10466_v6  ;;  %v12293_v11 = vld [vmem:[%s18160_s4 + $0x8] sm:$0xf] }
0x14b5   :  { %v7287_v35 = vrot.slane %v12293_v11, %v18717_v8  ;;  %v7291_v19 = vrot.slane %v12293_v11, %v18718_v12  ;;  %v7295_v52 = vrot.slane %v12293_v11, %v18719_v41  ;;  %v7299_v2 = vrot.slane %v12293_v11, %v18538_v23 }
0x14b6   :  { %v17849_v54 = vadd.f32 %v10469_v58, %v10468_v3 }
0x14b8   :  { %13996 = vtanh.f32 %v17849_v54 }
0x14c2   :  { %v13997_v62 = vpop.eup %13996 }
0x14c3   :  { %v10472_v39 = vmul.f32 %v13997_v62, %v10467_v21 }
0x14c5   :  { %v10477_v9 = vpack.c.bf16 %v10472_v39, %v10472_v39 }
0x14c7   :  { %10511 = vmatmul.mubr.bf16.vlgmr.msra.gmra.mrb[92].mxu0 %v10477_v9  ;;  %10552 = vmatmul.mubr.bf16.vlgmr.msra.gmra.mrb[92].mxu1 %v10477_v9 }
0x14c8   :  { %10588 = vmatpush1.bf16.msra.mxu0 %v17535_v60  ;;  %10629 = vmatpush1.bf16.msra.mxu1 %v17540_v32 }
0x14c9   :  { %10589 = vmatprep.subr.bf16.mxu0 %v17545_v27  ;;  %10630 = vmatprep.subr.bf16.mxu1 %v17550_v14 }
0x14ca   :  { %10619 = vmatprep.mubr.bf16.mxu0 %v18398_v36  ;;  %10660 = vmatprep.mubr.bf16.mxu1 %v18398_v36 }
0x14cc   :  { %10590 = vmatpush1.bf16.msra.mxu0 %v17557_v15  ;;  %10631 = vmatpush1.bf16.msra.mxu1 %v17562_v48 }
0x14cd   :  { %10591 = vmatprep.subr.bf16.mxu0 %v17569_v63  ;;  %10632 = vmatprep.subr.bf16.mxu1 %v17574_v0 }
0x14d0   :  { %10592 = vmatpush1.bf16.msra.mxu0 %v17583_v49  ;;  %10633 = vmatpush1.bf16.msra.mxu1 %v17588_v50 }
0x14d1   :  { %10593 = vmatprep.subr.bf16.mxu0 %v17595_v1  ;;  %10634 = vmatprep.subr.bf16.mxu1 %v17600_v34 }
0x14d4   :  { %10594 = vmatpush1.bf16.msra.mxu0 %v17607_v47  ;;  %10635 = vmatpush1.bf16.msra.mxu1 %v17612_v40 }
0x14d5   :  { %10595 = vmatprep.subr.bf16.mxu0 %v17619_v43  ;;  %10636 = vmatprep.subr.bf16.mxu1 %v17624_v44 }
0x14d8   :  { %10596 = vmatpush1.bf16.msra.mxu0 %v17631_v18  ;;  %10637 = vmatpush1.bf16.msra.mxu1 %v17636_v16 }
0x14d9   :  { %10597 = vmatprep.subr.bf16.mxu0 %v17643_v17  ;;  %10638 = vmatprep.subr.bf16.mxu1 %v17648_v20 }
0x14dc   :  { %10598 = vmatpush1.bf16.msra.mxu0 %v17655_v30  ;;  %10639 = vmatpush1.bf16.msra.mxu1 %v17660_v7 }
0x14dd   :  { %10599 = vmatprep.subr.bf16.mxu0 %v17667_v10  ;;  %10640 = vmatprep.subr.bf16.mxu1 %v17672_v13 }
0x14e0   :  { %10600 = vmatpush1.bf16.msra.mxu0 %v17679_v28  ;;  %10641 = vmatpush1.bf16.msra.mxu1 %v17684_v42 }
0x14e1   :  { %10601 = vmatprep.subr.bf16.mxu0 %v17691_v38  ;;  %10642 = vmatprep.subr.bf16.mxu1 %v17696_v26 }
0x14e4   :  { %10602 = vmatpush1.bf16.msra.mxu0 %v17703_v4  ;;  %10643 = vmatpush1.bf16.msra.mxu1 %v17708_v33 }
0x14e5   :  { %10696 = vmatprep.subr.bf16.mxu0 %v17515_v29  ;;  %10737 = vmatprep.subr.bf16.mxu1 %v17520_v5 }
0x159a   :  { %v10512_v22 = vpop.f32.mrb[92].mxu0  ;;  %v10553_v45 = vpop.f32.mrb[92].mxu1 }
0x159b   :  { %v13015_v53 = vadd.f32 %v10512_v22, %v7287_v35  ;;  %v10514_v51 = vpop.f32.mrb[93].mxu0  ;;  %v10555_v59 = vpop.f32.mrb[93].mxu1  ;;  %v13017_v25 = vadd.f32 %v10553_v45, %v7295_v52 }
0x159c   :  { %v13016_v55 = vadd.f32 %v10514_v51, %v7291_v19  ;;  %v10516_v61 = vpop.f32.mrb[94].mxu0  ;;  %v10557_v31 = vpop.f32.mrb[94].mxu1  ;;  %v13018_v58 = vadd.f32 %v10555_v59, %v7299_v2 }
0x159d   :  { %v10564_v24 = vmul.f32 0.5, %v13015_v53  ;;  %v10517_v57 = vpop.f32.mrb[95].mxu0  ;;  %v10558_v46 = vpop.f32.mrb[95].mxu1 }
0x159e   :  { %v10568_v56 = vmul.f32 0.5, %v13016_v55  ;;  %v10573_v3 = vmul.f32 0.5, %v13018_v58 }
0x159f   :  { %13998 = vtanh.f32 %v10564_v24 }
0x15a0   :  { %14000 = vtanh.f32 %v10568_v56 }
0x15a1   :  { %14002 = vtanh.f32 %v13017_v25 }
0x15a2   :  { %14004 = vtanh.f32 %v10573_v3 }
0x15a9   :  { %v13999_v37 = vpop.eup %13998 }
0x15aa   :  { %v14001_v6 = vpop.eup %14000  ;;  %v10566_v21 = vmul.f32 0.5, %v13999_v37 }
0x15ab   :  { %v10570_v62 = vmul.f32 0.5, %v14001_v6  ;;  %v14003_v9 = vpop.eup %14002 }
0x15ac   :  { %v10567_v39 = vadd.f32 0.5, %v10566_v21  ;;  %v14005_v11 = vpop.eup %14004 }
0x15ad   :  { %v10571_v35 = vadd.f32 0.5, %v10570_v62  ;;  %v10575_v45 = vmul.f32 0.5, %v14005_v11 }
0x15ae   :  { %v10578_v19 = vmul.f32 %v14003_v9, %v10567_v39 }
0x15af   :  { %v10577_v22 = vmul.f32 %v10571_v35, %v17849_v54  ;;  %v10576_v52 = vadd.f32 0.5, %v10575_v45  ;;  %v12422_v54 = vld [vmem:[%s18160_s4 + $0x8] sm:$0xf] }
0x15b0   :  { %v7888_v61 = vrot.slane %v12422_v54, %v18717_v8  ;;  %v7892_v31 = vrot.slane %v12422_v54, %v18718_v12  ;;  %v7896_v56 = vrot.slane %v12422_v54, %v18719_v41  ;;  %v7900_v39 = vrot.slane %v12422_v54, %v18538_v23 }
0x15b1   :  { %v17894_v53 = vadd.f32 %v10578_v19, %v10577_v22 }
0x15b3   :  { %14006 = vtanh.f32 %v17894_v53 }
0x15bd   :  { %v14007_v51 = vpop.eup %14006 }
0x15be   :  { %v10581_v59 = vmul.f32 %v14007_v51, %v10576_v52 }
0x15c0   :  { %v10586_v55 = vpack.c.bf16 %v10581_v59, %v10581_v59 }
0x15c2   :  { %10620 = vmatmul.mubr.bf16.vlgmr.msra.gmra.mrb[96].mxu0 %v10586_v55  ;;  %10661 = vmatmul.mubr.bf16.vlgmr.msra.gmra.mrb[96].mxu1 %v10586_v55 }
0x15c3   :  { %10697 = vmatpush1.bf16.msra.mxu0 %v17535_v60  ;;  %10738 = vmatpush1.bf16.msra.mxu1 %v17540_v32 }
0x15c4   :  { %10698 = vmatprep.subr.bf16.mxu0 %v17545_v27  ;;  %10739 = vmatprep.subr.bf16.mxu1 %v17550_v14 }
0x15c5   :  { %10728 = vmatprep.mubr.bf16.mxu0 %v18398_v36  ;;  %10769 = vmatprep.mubr.bf16.mxu1 %v18398_v36 }
0x15c7   :  { %10699 = vmatpush1.bf16.msra.mxu0 %v17557_v15  ;;  %10740 = vmatpush1.bf16.msra.mxu1 %v17562_v48 }
0x15c8   :  { %10700 = vmatprep.subr.bf16.mxu0 %v17569_v63  ;;  %10741 = vmatprep.subr.bf16.mxu1 %v17574_v0 }
0x15cb   :  { %10701 = vmatpush1.bf16.msra.mxu0 %v17583_v49  ;;  %10742 = vmatpush1.bf16.msra.mxu1 %v17588_v50 }
0x15cc   :  { %10702 = vmatprep.subr.bf16.mxu0 %v17595_v1  ;;  %10743 = vmatprep.subr.bf16.mxu1 %v17600_v34 }
0x15cf   :  { %10703 = vmatpush1.bf16.msra.mxu0 %v17607_v47  ;;  %10744 = vmatpush1.bf16.msra.mxu1 %v17612_v40 }
0x15d0   :  { %10704 = vmatprep.subr.bf16.mxu0 %v17619_v43  ;;  %10745 = vmatprep.subr.bf16.mxu1 %v17624_v44 }
0x15d3   :  { %10705 = vmatpush1.bf16.msra.mxu0 %v17631_v18  ;;  %10746 = vmatpush1.bf16.msra.mxu1 %v17636_v16 }
0x15d4   :  { %10706 = vmatprep.subr.bf16.mxu0 %v17643_v17  ;;  %10747 = vmatprep.subr.bf16.mxu1 %v17648_v20 }
0x15d7   :  { %10707 = vmatpush1.bf16.msra.mxu0 %v17655_v30  ;;  %10748 = vmatpush1.bf16.msra.mxu1 %v17660_v7 }
0x15d8   :  { %10708 = vmatprep.subr.bf16.mxu0 %v17667_v10  ;;  %10749 = vmatprep.subr.bf16.mxu1 %v17672_v13 }
0x15db   :  { %10709 = vmatpush1.bf16.msra.mxu0 %v17679_v28  ;;  %10750 = vmatpush1.bf16.msra.mxu1 %v17684_v42 }
0x15dc   :  { %10710 = vmatprep.subr.bf16.mxu0 %v17691_v38  ;;  %10751 = vmatprep.subr.bf16.mxu1 %v17696_v26 }
0x15df   :  { %10711 = vmatpush1.bf16.msra.mxu0 %v17703_v4  ;;  %10752 = vmatpush1.bf16.msra.mxu1 %v17708_v33 }
0x15e0   :  { %10805 = vmatprep.subr.bf16.mxu0 %v17515_v29  ;;  %10846 = vmatprep.subr.bf16.mxu1 %v17520_v5 }
0x1695   :  { %v10621_v24 = vpop.f32.mrb[96].mxu0  ;;  %v10662_v57 = vpop.f32.mrb[96].mxu1 }
0x1696   :  { %v13019_v46 = vadd.f32 %v10621_v24, %v7888_v61  ;;  %v10623_v25 = vpop.f32.mrb[97].mxu0  ;;  %v10664_v2 = vpop.f32.mrb[97].mxu1  ;;  %v13021_v62 = vadd.f32 %v10662_v57, %v7896_v56 }
0x1697   :  { %v13020_v58 = vadd.f32 %v10623_v25, %v7892_v31  ;;  %v10625_v3 = vpop.f32.mrb[98].mxu0  ;;  %v10666_v29 = vpop.f32.mrb[98].mxu1  ;;  %v13022_v9 = vadd.f32 %v10664_v2, %v7900_v39 }
0x1698   :  { %v10673_v37 = vmul.f32 0.5, %v13019_v46  ;;  %v10626_v5 = vpop.f32.mrb[99].mxu0  ;;  %v10667_v6 = vpop.f32.mrb[99].mxu1 }
0x1699   :  { %v10677_v21 = vmul.f32 0.5, %v13020_v58  ;;  %v10682_v35 = vmul.f32 0.5, %v13022_v9 }
0x169a   :  { %14008 = vtanh.f32 %v10673_v37 }
0x169b   :  { %14010 = vtanh.f32 %v10677_v21 }
0x169c   :  { %14012 = vtanh.f32 %v13021_v62 }
0x169d   :  { %14014 = vtanh.f32 %v10682_v35 }
0x16a4   :  { %v14009_v19 = vpop.eup %14008 }
0x16a5   :  { %v14011_v22 = vpop.eup %14010  ;;  %v10675_v11 = vmul.f32 0.5, %v14009_v19 }
0x16a6   :  { %v10679_v45 = vmul.f32 0.5, %v14011_v22  ;;  %v14013_v51 = vpop.eup %14012 }
0x16a7   :  { %v10676_v52 = vadd.f32 0.5, %v10675_v11  ;;  %v14015_v54 = vpop.eup %14014 }
0x16a8   :  { %v10680_v59 = vadd.f32 0.5, %v10679_v45  ;;  %v10684_v24 = vmul.f32 0.5, %v14015_v54  ;;  %v14103_v54 = vld [vmem:[%s18158_s3 + $0x228] ss:$16 sps:$4 sm:$0xff]  }
0x16a9   :  { %v10687_v55 = vmul.f32 %v14013_v51, %v10676_v52  ;;  %v14098_v51 = vld [vmem:[%s18158_s3 + $0x200] ss:$16 sps:$4 sm:$0xff]  }
0x16aa   :  { %v10686_v61 = vmul.f32 %v10680_v59, %v17894_v53  ;;  %v10685_v57 = vadd.f32 0.5, %v10684_v24  ;;  %v14099_v59 = vld [vmem:[%s18158_s3 + $0x208] ss:$16 sps:$4 sm:$0xff]   ;;  %v14104_v24 = vld [vmem:[%s18158_s3 + $0x244] ss:$16 sps:$4 sm:$0xff]  }
0x16ac   :  { %v17939_v31 = vadd.f32 %v10687_v55, %v10686_v61  ;;  %v14100_v55 = vld [vmem:[%s18158_s3 + $0x224] ss:$16 sps:$4 sm:$0xff]   ;;  %v14101_v61 = vld [vmem:[%s18158_s3 + $0x22c] ss:$16 sps:$4 sm:$0xff]  }
0x16ae   :  { %14016 = vtanh.f32 %v17939_v31 }
0x16b8   :  { %v14017_v46 = vpop.eup %14016 }
0x16b9   :  { %v10690_v56 = vmul.f32 %v14017_v46, %v10685_v57  ;;  %v14105_v57 = vld [vmem:[%s18158_s3 + $0x24c] ss:$16 sps:$4 sm:$0xff]   ;;  %v14107_v46 = vld [vmem:[%s18158_s3 + $0x248] ss:$16 sps:$4 sm:$0xff]  }
0x16bb   :  { %v10695_v25 = vpack.c.bf16 %v10690_v56, %v10690_v56  ;;  %v14108_v56 = vld [vmem:[%s18158_s3 + $0x264] ss:$16 sps:$4 sm:$0xff]  }
0x16bd   :  { %10729 = vmatmul.mubr.bf16.vlgmr.msra.gmra.mrb[100].mxu0 %v10695_v25  ;;  %10770 = vmatmul.mubr.bf16.vlgmr.msra.gmra.mrb[100].mxu1 %v10695_v25  ;;  %v14109_v25 = vld [vmem:[%s18158_s3 + $0x26c] ss:$16 sps:$4 sm:$0xff]  }
0x16be   :  { %10806 = vmatpush1.bf16.msra.mxu0 %v17535_v60  ;;  %10847 = vmatpush1.bf16.msra.mxu1 %v17540_v32  ;;  %v14096_v60 = vld [vmem:[%s18158_s3 + $0x204] ss:$16 sps:$4 sm:$0xff]   ;;  %v14097_v32 = vld [vmem:[%s18158_s3 + $0x20c] ss:$16 sps:$4 sm:$0xff]  }
0x16bf   :  { %10807 = vmatprep.subr.bf16.mxu0 %v17545_v27  ;;  %10848 = vmatprep.subr.bf16.mxu1 %v17550_v14  ;;  %v12551_v27 = vld [vmem:[%s18160_s4 + $0x8] sm:$0xf] }
0x16c0   :  { %10837 = vmatprep.mubr.bf16.mxu0 %v18398_v36  ;;  %10878 = vmatprep.mubr.bf16.mxu1 %v18398_v36  ;;  %v8489_v14 = vrot.slane %v12551_v27, %v18717_v8 }
0x16c2   :  { %10808 = vmatpush1.bf16.msra.mxu0 %v17557_v15  ;;  %10849 = vmatpush1.bf16.msra.mxu1 %v17562_v48  ;;  %v8493_v15 = vrot.slane %v12551_v27, %v18718_v12 }
0x16c3   :  { %10809 = vmatprep.subr.bf16.mxu0 %v17569_v63  ;;  %10850 = vmatprep.subr.bf16.mxu1 %v17574_v0 }
0x16c6   :  { %10810 = vmatpush1.bf16.msra.mxu0 %v17583_v49  ;;  %10851 = vmatpush1.bf16.msra.mxu1 %v17588_v50  ;;  %v8497_v49 = vrot.slane %v12551_v27, %v18719_v41 }
0x16c7   :  { %10811 = vmatprep.subr.bf16.mxu0 %v17595_v1  ;;  %10852 = vmatprep.subr.bf16.mxu1 %v17600_v34 }
0x16ca   :  { %10812 = vmatpush1.bf16.msra.mxu0 %v17607_v47  ;;  %10853 = vmatpush1.bf16.msra.mxu1 %v17612_v40 }
0x16cb   :  { %10813 = vmatprep.subr.bf16.mxu0 %v17619_v43  ;;  %10854 = vmatprep.subr.bf16.mxu1 %v17624_v44 }
0x16ce   :  { %10814 = vmatpush1.bf16.msra.mxu0 %v17631_v18  ;;  %10855 = vmatpush1.bf16.msra.mxu1 %v17636_v16 }
0x16cf   :  { %10815 = vmatprep.subr.bf16.mxu0 %v17643_v17  ;;  %10856 = vmatprep.subr.bf16.mxu1 %v17648_v20  ;;  %v8501_v20 = vrot.slane %v12551_v27, %v18538_v23  ;;  %v14112_v27 = vld [vmem:[%s18158_s3 + $0x284] ss:$16 sps:$4 sm:$0xff]  }
0x16d2   :  { %10816 = vmatpush1.bf16.msra.mxu0 %v17655_v30  ;;  %10857 = vmatpush1.bf16.msra.mxu1 %v17660_v7 }
0x16d3   :  { %10817 = vmatprep.subr.bf16.mxu0 %v17667_v10  ;;  %10858 = vmatprep.subr.bf16.mxu1 %v17672_v13 }
0x16d6   :  { %10818 = vmatpush1.bf16.msra.mxu0 %v17679_v28  ;;  %10859 = vmatpush1.bf16.msra.mxu1 %v17684_v42 }
0x16d7   :  { %10819 = vmatprep.subr.bf16.mxu0 %v17691_v38  ;;  %10860 = vmatprep.subr.bf16.mxu1 %v17696_v26 }
0x16da   :  { %10820 = vmatpush1.bf16.msra.mxu0 %v17703_v4  ;;  %10861 = vmatpush1.bf16.msra.mxu1 %v17708_v33 }
0x16db   :  { %10914 = vmatprep.subr.bf16.mxu0 %v14096_v60  ;;  %10955 = vmatprep.subr.bf16.mxu1 %v14097_v32  ;;  %v14110_v60 = vld [vmem:[%s18158_s3 + $0x260] ss:$16 sps:$4 sm:$0xff]   ;;  %v14111_v32 = vld [vmem:[%s18158_s3 + $0x268] ss:$16 sps:$4 sm:$0xff]  }
0x1790   :  { %v10730_v48 = vpop.f32.mrb[100].mxu0  ;;  %v10771_v63 = vpop.f32.mrb[100].mxu1 }
0x1791   :  { %v13023_v0 = vadd.f32 %v10730_v48, %v8489_v14  ;;  %v10732_v50 = vpop.f32.mrb[101].mxu0  ;;  %v10773_v1 = vpop.f32.mrb[101].mxu1  ;;  %v13025_v17 = vadd.f32 %v10771_v63, %v8497_v49  ;;  %v14113_v14 = vld [vmem:[%s18158_s3 + $0x28c] ss:$16 sps:$4 sm:$0xff]   ;;  %v14115_v48 = vld [vmem:[%s18158_s3 + $0x288] ss:$16 sps:$4 sm:$0xff]  }
0x1792   :  { %v13024_v34 = vadd.f32 %v10732_v50, %v8493_v15  ;;  %v10734_v47 = vpop.f32.mrb[102].mxu0  ;;  %v10775_v40 = vpop.f32.mrb[102].mxu1  ;;  %v13026_v53 = vadd.f32 %v10773_v1, %v8501_v20  ;;  %v14114_v15 = vld [vmem:[%s18158_s3 + $0x280] ss:$16 sps:$4 sm:$0xff]   ;;  %v14116_v63 = vld [vmem:[%s18158_s3 + $0x2a4] ss:$16 sps:$4 sm:$0xff]  }
0x1793   :  { %v10782_v43 = vmul.f32 0.5, %v13023_v0  ;;  %v10735_v44 = vpop.f32.mrb[103].mxu0  ;;  %v10776_v18 = vpop.f32.mrb[103].mxu1  ;;  %v14117_v0 = vld [vmem:[%s18158_s3 + $0x2ac] ss:$16 sps:$4 sm:$0xff]  }
0x1794   :  { %v10786_v16 = vmul.f32 0.5, %v13024_v34  ;;  %v10791_v2 = vmul.f32 0.5, %v13026_v53 }
0x1795   :  { %14018 = vtanh.f32 %v10782_v43 }
0x1796   :  { %14020 = vtanh.f32 %v10786_v16 }
0x1797   :  { %14022 = vtanh.f32 %v13025_v17 }
0x1798   :  { %14024 = vtanh.f32 %v10791_v2 }
0x179f   :  { %v14019_v58 = vpop.eup %14018 }
0x17a0   :  { %v14021_v3 = vpop.eup %14020  ;;  %v10784_v29 = vmul.f32 0.5, %v14019_v58 }
0x17a1   :  { %v10788_v37 = vmul.f32 0.5, %v14021_v3  ;;  %v14023_v6 = vpop.eup %14022 }
0x17a2   :  { %v10785_v5 = vadd.f32 0.5, %v10784_v29  ;;  %v14025_v35 = vpop.eup %14024 }
0x17a3   :  { %v10789_v21 = vadd.f32 0.5, %v10788_v37  ;;  %v10793_v19 = vmul.f32 0.5, %v14025_v35 }
0x17a4   :  { %v10796_v62 = vmul.f32 %v14023_v6, %v10785_v5 }
0x17a5   :  { %v10795_v39 = vmul.f32 %v10789_v21, %v17939_v31  ;;  %v10794_v22 = vadd.f32 0.5, %v10793_v19  ;;  %v14102_v31 = vld [vmem:[%s18158_s3 + $0x220] ss:$16 sps:$4 sm:$0xff]  }
0x17a7   :  { %v17988_v9 = vadd.f32 %v10796_v62, %v10795_v39 }
0x17a9   :  { %14026 = vtanh.f32 %v17988_v9 }
0x17b3   :  { %v14027_v11 = vpop.eup %14026 }
0x17b4   :  { %v10799_v45 = vmul.f32 %v14027_v11, %v10794_v22  ;;  %v13796_v11 = vld [vmem:[%s18161_s7] sm:$0xff]  }
0x17b6   :  { %v10804_v52 = vpack.c.bf16 %v10799_v45, %v10799_v45  ;;  %v14119_v45 = vmov 0.0  }
0x17b8   :  { %10838 = vmatmul.mubr.bf16.vlgmr.msra.gmra.mrb[104].mxu0 %v10804_v52  ;;  %10879 = vmatmul.mubr.bf16.vlgmr.msra.gmra.mrb[104].mxu1 %v10804_v52  ;;  %v13798_v52 = vld [vmem:[%s18161_s7 + $0x10] sm:$0xff]  }
0x17b9   :  { %10915 = vmatpush1.bf16.msra.mxu0 %v14098_v51  ;;  %10956 = vmatpush1.bf16.msra.mxu1 %v14099_v59  ;;  %v13799_v51 = vld [vmem:[%s18161_s7 + $0x18] sm:$0xff]   ;;  %v13800_v59 = vld [vmem:[%s18161_s7 + $0x20] sm:$0xff]  }
0x17ba   :  { %10916 = vmatprep.subr.bf16.mxu0 %v14100_v55  ;;  %10957 = vmatprep.subr.bf16.mxu1 %v14101_v61  ;;  %v13801_v55 = vld [vmem:[%s18161_s7 + $0x28] sm:$0xff]   ;;  %v13802_v61 = vld [vmem:[%s18161_s7 + $0x30] sm:$0xff]  }
0x17bb   :  { %10946 = vmatprep.mubr.bf16.mxu0 %v18398_v36  ;;  %10987 = vmatprep.mubr.bf16.mxu1 %v18398_v36  ;;  %v14106_v36 = vld [vmem:[%s18158_s3 + $0x240] ss:$16 sps:$4 sm:$0xff]  }
0x17bd   :  { %10917 = vmatpush1.bf16.msra.mxu0 %v14102_v31  ;;  %10958 = vmatpush1.bf16.msra.mxu1 %v14103_v54  ;;  %v13803_v31 = vld [vmem:[%s18161_s7 + $0x38] sm:$0xff]   ;;  %v13804_v54 = vld [vmem:[%s18162_s11] sm:$0xff]  }
0x17be   :  { %10918 = vmatprep.subr.bf16.mxu0 %v14104_v24  ;;  %10959 = vmatprep.subr.bf16.mxu1 %v14105_v57  ;;  %v12809_v24 = vld [vmem:[%s18160_s4 + $0x8] sm:$0xf] }
0x17bf   :  { %v9691_v57 = vrot.slane %v12809_v24, %v18717_v8 }
0x17c1   :  { %10919 = vmatpush1.bf16.msra.mxu0 %v14106_v36  ;;  %10960 = vmatpush1.bf16.msra.mxu1 %v14107_v46  ;;  %v9695_v36 = vrot.slane %v12809_v24, %v18718_v12 }
0x17c2   :  { %10920 = vmatprep.subr.bf16.mxu0 %v14108_v56  ;;  %10961 = vmatprep.subr.bf16.mxu1 %v14109_v25 }
0x17c5   :  { %10921 = vmatpush1.bf16.msra.mxu0 %v14110_v60  ;;  %10962 = vmatpush1.bf16.msra.mxu1 %v14111_v32  ;;  %v9699_v60 = vrot.slane %v12809_v24, %v18719_v41 }
0x17c6   :  { %10922 = vmatprep.subr.bf16.mxu0 %v14112_v27  ;;  %10963 = vmatprep.subr.bf16.mxu1 %v14113_v14 }
0x17c9   :  { %10923 = vmatpush1.bf16.msra.mxu0 %v14114_v15  ;;  %10964 = vmatpush1.bf16.msra.mxu1 %v14115_v48 }
0x17ca   :  { %10924 = vmatprep.subr.bf16.mxu0 %v14116_v63  ;;  %10965 = vmatprep.subr.bf16.mxu1 %v14117_v0 }
0x17cd   :  { %10925 = vmatpush1.bf16.msra.mxu0 %v17655_v30  ;;  %10966 = vmatpush1.bf16.msra.mxu1 %v17660_v7  ;;  %v12680_v30 = vld [vmem:[%s18160_s4 + $0x8] sm:$0xf] }
0x17ce   :  { %10926 = vmatprep.subr.bf16.mxu0 %v17667_v10  ;;  %10967 = vmatprep.subr.bf16.mxu1 %v17672_v13  ;;  %v9090_v7 = vrot.slane %v12680_v30, %v18717_v8  ;;  %v9094_v10 = vrot.slane %v12680_v30, %v18718_v12  ;;  %v9102_v44 = vrot.slane %v12680_v30, %v18538_v23 }
0x17cf   :  { %v9703_v8 = vrot.slane %v12809_v24, %v18538_v23 }
0x17d1   :  { %10927 = vmatpush1.bf16.msra.mxu0 %v17679_v28  ;;  %10968 = vmatpush1.bf16.msra.mxu1 %v17684_v42  ;;  %v9098_v42 = vrot.slane %v12680_v30, %v18719_v41 }
0x17d2   :  { %10928 = vmatprep.subr.bf16.mxu0 %v17691_v38  ;;  %10969 = vmatprep.subr.bf16.mxu1 %v17696_v26 }
0x17d5   :  { %10929 = vmatpush1.bf16.msra.mxu0 %v17703_v4  ;;  %10970 = vmatpush1.bf16.msra.mxu1 %v17708_v33 }
0x17d6   :  { %12939 = vmatprep.subr.bf16.mxu0 %v14119_v45  ;;  %12959 = vmatprep.subr.bf16.mxu1 %v14119_v45 }
0x188b   :  { %v10839_v13 = vpop.f32.mrb[104].mxu0  ;;  %v10880_v28 = vpop.f32.mrb[104].mxu1 }
0x188c   :  { %v13027_v49 = vadd.f32 %v10839_v13, %v9090_v7  ;;  %v10841_v38 = vpop.f32.mrb[105].mxu0  ;;  %v10882_v50 = vpop.f32.mrb[105].mxu1  ;;  %v13029_v43 = vadd.f32 %v10880_v28, %v9098_v42 }
0x188d   :  { %v13028_v26 = vadd.f32 %v10841_v38, %v9094_v10  ;;  %v10843_v1 = vpop.f32.mrb[106].mxu0  ;;  %v10884_v4 = vpop.f32.mrb[106].mxu1  ;;  %v13030_v18 = vadd.f32 %v10882_v50, %v9102_v44 }
0x188e   :  { %v10891_v34 = vmul.f32 0.5, %v13027_v49  ;;  %v10844_v33 = vpop.f32.mrb[107].mxu0  ;;  %v10885_v47 = vpop.f32.mrb[107].mxu1 }
0x188f   :  { %v10895_v40 = vmul.f32 0.5, %v13028_v26  ;;  %v10900_v16 = vmul.f32 0.5, %v13030_v18  ;;  %v12907_v18 = vld [vmem:[%s18164_s6] ss:$0 sm:$0xff] }
0x1890   :  { %14028 = vtanh.f32 %v10891_v34 }
0x1891   :  { %14030 = vtanh.f32 %v10895_v40 }
0x1892   :  { %14032 = vtanh.f32 %v13029_v43  ;;  %v12906_v43 = vld [vmem:[%s18163_s5] ss:$0 sm:$0xff] }
0x1893   :  { %14034 = vtanh.f32 %v10900_v16 }
0x189a   :  { %v14029_v17 = vpop.eup %14028 }
0x189b   :  { %v14031_v20 = vpop.eup %14030  ;;  %v10893_v53 = vmul.f32 0.5, %v14029_v17 }
0x189c   :  { %v10897_v2 = vmul.f32 0.5, %v14031_v20  ;;  %v14033_v3 = vpop.eup %14032 }
0x189d   :  { %v10894_v58 = vadd.f32 0.5, %v10893_v53  ;;  %v14035_v21 = vpop.eup %14034  ;;  %v13805_v53 = vld [vmem:[%s18162_s11 + $0x8] sm:$0xff]  }
0x189e   :  { %v10898_v29 = vadd.f32 0.5, %v10897_v2  ;;  %v10902_v62 = vmul.f32 0.5, %v14035_v21  ;;  %v13806_v2 = vld [vmem:[%s18162_s11 + $0x10] sm:$0xff]   ;;  %v12918_v21 = vld [vmem:[%s18167_s10] ss:$0 sm:$0xff] }
0x189f   :  { %v10905_v37 = vmul.f32 %v14033_v3, %v10894_v58  ;;  %v13807_v58 = vld [vmem:[%s18162_s11 + $0x18] sm:$0xff]   ;;  %v12908_v3 = vld [vmem:[%s18165_s8] ss:$0 sm:$0xff] }
0x18a0   :  { %v10904_v5 = vmul.f32 %v10898_v29, %v17988_v9  ;;  %v10903_v39 = vadd.f32 0.5, %v10902_v62  ;;  %v13797_v9 = vld [vmem:[%s18161_s7 + $0x8] sm:$0xff]  }
0x18a2   :  { %v18071_v6 = vadd.f32 %v10905_v37, %v10904_v5  ;;  %v12917_v37 = vld [vmem:[%s18166_s9] ss:$0 sm:$0xff] }
0x18a4   :  { %14036 = vtanh.f32 %v18071_v6 }
0x18ae   :  { %v14037_v35 = vpop.eup %14036 }
0x18af   :  { %v10908_v19 = vmul.f32 %v14037_v35, %v10903_v39 }
0x18b1   :  { %v10913_v22 = vpack.c.bf16 %v10908_v19, %v10908_v19 }
0x18b3   :  { %10947 = vmatmul.mubr.bf16.vlgmr.msra.gmra.mrb[108].mxu0 %v10913_v22  ;;  %10988 = vmatmul.mubr.bf16.vlgmr.msra.gmra.mrb[108].mxu1 %v10913_v22 }
0x18b4   :  { %12940 = vmatpush3.bf16.msra.mxu0 %v13796_v11  ;;  %12955 = vmatprep.mubr.msk.bf16.mxu0 %vm14120_vm1, %v14119_v45 }
0x18b5   :  { %12941 = vmatprep.subr.bf16.mxu0 %v14119_v45  ;;  %12967 = vmatprep.mubr.msk.bf16.mxu1 %vm14120_vm1, %v14119_v45 }
0x18b6   :  { %12960 = vmatpush3.bf16.msra.mxu1 %v13804_v54 }
0x18b7   :  { %12961 = vmatprep.subr.bf16.mxu1 %v14119_v45 }
0x18b8   :  { %12942 = vmatpush3.bf16.msra.mxu0 %v13797_v9 }
0x18b9   :  { %12943 = vmatprep.subr.bf16.mxu0 %v14119_v45 }
0x18ba   :  { %12962 = vmatpush3.bf16.msra.mxu1 %v13805_v53 }
0x18bb   :  { %12963 = vmatprep.subr.bf16.mxu1 %v14119_v45 }
0x18bc   :  { %12944 = vmatpush3.bf16.msra.mxu0 %v13798_v52 }
0x18bd   :  { %12945 = vmatprep.subr.bf16.mxu0 %v14119_v45 }
0x18be   :  { %12964 = vmatpush3.bf16.msra.mxu1 %v13806_v2 }
0x18bf   :  { %12965 = vmatprep.subr.bf16.mxu1 %v14119_v45 }
0x18c0   :  { %12946 = vmatpush3.bf16.msra.mxu0 %v13799_v51 }
0x18c1   :  { %12947 = vmatprep.subr.bf16.mxu0 %v14119_v45 }
0x18c2   :  { %12966 = vmatpush3.bf16.msra.mxu1 %v13807_v58 }
0x18c4   :  { %12948 = vmatpush3.bf16.msra.mxu0 %v13800_v59 }
0x18c5   :  { %12949 = vmatprep.subr.bf16.mxu0 %v14119_v45 }
0x18c8   :  { %12950 = vmatpush3.bf16.msra.mxu0 %v13801_v55 }
0x18c9   :  { %12951 = vmatprep.subr.bf16.mxu0 %v14119_v45 }
0x18cc   :  { %12952 = vmatpush3.bf16.msra.mxu0 %v13802_v61 }
0x18cd   :  { %12953 = vmatprep.subr.bf16.mxu0 %v14119_v45  ;;  %v12919_v45 = vld [vmem:[%s18168_s12] ss:$0 sm:$0xff] }
0x18d0   :  { %12954 = vmatpush3.bf16.msra.mxu0 %v13803_v31 }
0x1986   :  { %v10948_v46 = vpop.f32.mrb[108].mxu0  ;;  %v10989_v56 = vpop.f32.mrb[108].mxu1 }
0x1987   :  { %v13031_v25 = vadd.f32 %v10948_v46, %v9691_v57  ;;  %v10950_v32 = vpop.f32.mrb[109].mxu0  ;;  %v10991_v27 = vpop.f32.mrb[109].mxu1  ;;  %v13033_v10 = vadd.f32 %v10989_v56, %v9699_v60 }
0x1988   :  { %v13032_v14 = vadd.f32 %v10950_v32, %v9695_v36  ;;  %v10952_v15 = vpop.f32.mrb[110].mxu0  ;;  %v10993_v48 = vpop.f32.mrb[110].mxu1  ;;  %v13034_v12 = vadd.f32 %v10991_v27, %v9703_v8 }
0x1989   :  { %v11000_v63 = vmul.f32 0.5, %v13031_v25  ;;  %v10953_v0 = vpop.f32.mrb[111].mxu0  ;;  %v10994_v30 = vpop.f32.mrb[111].mxu1 }
0x198a   :  { %v11004_v7 = vmul.f32 0.5, %v13032_v14  ;;  %v11009_v13 = vmul.f32 0.5, %v13034_v12 }
0x198b   :  { %14038 = vtanh.f32 %v11000_v63 }
0x198c   :  { %14040 = vtanh.f32 %v11004_v7 }
0x198d   :  { %14042 = vtanh.f32 %v13033_v10 }
0x198e   :  { %14044 = vtanh.f32 %v11009_v13 }
0x1995   :  { %v14039_v28 = vpop.eup %14038 }
0x1996   :  { %v14041_v49 = vpop.eup %14040  ;;  %v11002_v41 = vmul.f32 0.5, %v14039_v28 }
0x1997   :  { %v11006_v42 = vmul.f32 0.5, %v14041_v49  ;;  %v14043_v50 = vpop.eup %14042 }
0x1998   :  { %v11003_v38 = vadd.f32 0.5, %v11002_v41  ;;  %v14045_v33 = vpop.eup %14044 }
0x1999   :  { %v11007_v26 = vadd.f32 0.5, %v11006_v42  ;;  %v11011_v47 = vmul.f32 0.5, %v14045_v33 }
0x199a   :  { %v11014_v1 = vmul.f32 %v14043_v50, %v11003_v38 }
0x199b   :  { %v11013_v4 = vmul.f32 %v11007_v26, %v18071_v6  ;;  %v11012_v23 = vadd.f32 0.5, %v11011_v47 }
0x199d   :  { %v11015_v34 = vadd.f32 %v11014_v1, %v11013_v4 }
0x199f   :  { %14046 = vtanh.f32 %v11015_v34 }
0x19a9   :  { %v14047_v40 = vpop.eup %14046 }
0x19aa   :  { %v11017_v44 = vmul.f32 %v14047_v40, %v11012_v23 }
0x19ac   :  { %v11025_v16 = vmul.f32 %v12906_v43, %v11017_v44 }
0x19ae   :  { %v11033_v17 = vadd.f32 %v12907_v18, %v11025_v16 }
0x19b0   :  { %v11034_v20 = vpack.c.bf16 %v11033_v17, %v11033_v17 }
0x19b2   :  { %12956 = vmatmul.mubr.bf16.vlgmr.msra.gmra.mrb[112].mxu0 %v11034_v20 }
0x1a85   :  { %v11140_v29 = vpop.f32.mrb[112].mxu0 }
0x1a86   :  { %v11141_v5 = vadd.f32 %v12908_v3, %v11140_v29  ;;  %v12957_v6 = vpop.f32.mrb[113].mxu0 }
0x1a87   :  { %v11143_v62 = vpop.f32.mrb[114].mxu0 }
0x1a88   :  { %v11153_v39 = vmul.f32 %v12917_v37, %v11141_v5  ;;  %v12958_v35 = vpop.f32.mrb[115].mxu0 }
0x1a8a   :  { %v11161_v19 = vadd.f32 %v12918_v21, %v11153_v39 }
0x1a8c   :  { %v11162_v22 = vmax.f32 %v11161_v19, 0.0 }
0x1a8e   :  { %v11163_v11 = vpack.c.bf16 %v11162_v22, %v11162_v22 }
0x1a90   :  { %12968 = vmatmul.mubr.msk.bf16.vlgmr.msra.gmra.mrb[112].mxu1 %vm11203_vm2, %v11163_v11 }
0x1b63   :  { %v11241_v9 = vpop.f32.mrb[112].mxu1 }
0x1b64   :  { %v11242_v52 = vadd.f32 %v12919_v45, %v11241_v9  ;;  %v12969_v51 = vpop.f32.mrb[113].mxu1 }
0x1b65   :  { %v11244_v59 = vpop.f32.mrb[114].mxu1 }
0x1b66   :  { %v12970_v55 = vpop.f32.mrb[115].mxu1  ;;  %v11248_v61 = vsel %vm11247_vm3, %v11242_v52, -inf }
0x1b67   :  { %11249 = vmax.xlane.f32.xlu0 %v11248_v61 }
0x1bf4   :  { %v11250_v31 = vpop.xlane.xlu0 %11249 }
0x1bf5   :  { %v11251_v54 = vsub.f32 %v11242_v52, %v11250_v31 }
0x1bf7   :  { %v11252_v24 = vmul.f32 1.442695, %v11251_v54 }
0x1bf9   :  { %14048 = vpow2.f32 %v11252_v24 }
0x1c03   :  { %v14049_v57 = vpop.eup %14048 }
0x1c04   :  { %v11254_v36 = vsel %vm11247_vm3, %v14049_v57, 0.0 }
0x1c05   :  { %11255 = vadd.xlane.f32.xlu0 %v11254_v36 }
0x1c92   :  { %v11256_v46 = vpop.xlane.xlu0 %11255 }
0x1c93   :  { %14050 = vrcp.f32 %v11256_v46 }
0x1c9d   :  { %v14051_v56 = vpop.eup %14050 }
0x1c9e   :  { %v11258_v25 = vmul.f32 %v14051_v56, %v14049_v57 }
0x1ca0   :  { %11259 = vst.msk [vmem:[%s18169_s13] sm:$0xff] %vm11247_vm3, %v11258_v25 }

</bundles_post_ra>
